<compile_context>
chip_gen: v7x
topology: tpu7x:2x2x1
jax: 0.10.0
libtpu: 0.0.40
codegen_flags: <defaults>
</compile_context>

<pallas_src>
import math

import numpy as np
import jax
import jax.numpy as jnp
from jax.experimental import pallas as pl
from jax.experimental.pallas import tpu as pltpu

# ------------------------------------------------------------------
# Config (small, consistent with the module; d_model == num_features *
# num_instances so trend_part + seasonal_part is a valid add, as the
# reference forward requires).
# ------------------------------------------------------------------
BATCH          = 2
SEQ_LEN        = 16      # history_steps
LABEL_LEN      = 8       # label_steps
PRED_LEN       = 8       # predict_steps
NUM_FEATURES   = 4
NUM_INSTANCES  = 8
C_IN           = NUM_FEATURES * NUM_INSTANCES    # 32
D_MODEL        = 32
N_HEADS        = 4
D_FF           = 32      # hidden_dim
NUM_ENC_LAYERS = 1
NUM_DEC_LAYERS = 1
MOVING_AVG     = 25
FACTOR         = 3
MARK_DIM       = 4       # embed='timeF', freq='h' -> 4 time features
DEC_LEN        = 2 * LABEL_LEN   # forecast() concatenates label_len + label_len


# ------------------------------------------------------------------
# Constant moving-average matrix: series_decomp (replicate-pad + AvgPool1d)
# is a fixed linear map over time -> moving_mean = A @ x.
# ------------------------------------------------------------------
def _moving_avg_matrix(length, kernel_size=MOVING_AVG):
    pad = (kernel_size - 1) // 2
    a = np.zeros((length, length), np.float32)
    for t in range(length):
        for j in range(kernel_size):
            src = min(max(t + j - pad, 0), length - 1)
            a[t, src] += 1.0 / kernel_size
    return a


# ------------------------------------------------------------------
# In-kernel helpers (operate on VMEM-resident values for ONE batch element)
# ------------------------------------------------------------------
def _dot(a, b):
    return jnp.dot(a, b, preferred_element_type=jnp.float32)


def _gelu(x):
    # TODO(synk): tanh-approx GELU; torch F.gelu defaults to the exact erf form,
    # which has no guaranteed Mosaic lowering (approximation error ~1e-3).
    c = math.sqrt(2.0 / math.pi)
    return 0.5 * x * (1.0 + jnp.tanh(c * (x + 0.044715 * x * x * x)))


def _circ_conv3(x, w96):
    """Conv1d(kernel=3, padding=1, circular, bias=False) as one fused matmul.
    x: (L, Cin); w96: (3*Cin, Cout)."""
    l = x.shape[0]
    xx = jnp.concatenate([x, x], axis=0)                         # doubled for wrap
    prev = jax.lax.slice_in_dim(xx, l - 1, 2 * l - 1, axis=0)    # x[(t-1) % L]
    nxt = jax.lax.slice_in_dim(xx, 1, l + 1, axis=0)             # x[(t+1) % L]
    xs = jnp.concatenate([prev, x, nxt], axis=-1)                # (L, 3*Cin), lane-dense
    return _dot(xs, w96)


def _layernorm_seq(x, gamma, beta):
    """my_Layernorm: LayerNorm over channels then subtract the per-time mean."""
    mu = jnp.mean(x, axis=-1, keepdims=True)
    var = jnp.mean((x - mu) ** 2, axis=-1, keepdims=True)
    x_hat = (x - mu) * jax.lax.rsqrt(var + 1e-5) * gamma + beta
    return x_hat - jnp.mean(x_hat, axis=0, keepdims=True)


def _auto_correlation(q, k, v):
    """Inference-mode AutoCorrelation on one batch element.
    q/k/v: (L, CH) with heads flattened (corr is averaged over heads+channels,
    so flattening is exactly equivalent).  L == S in this config, so the
    reference zero-pad / truncate branch is a no-op."""
    assert q.shape == k.shape == v.shape
    l, ch = q.shape
    top_k = int(FACTOR * math.log(l))
    inv_ch = 1.0 / ch

    qq = jnp.concatenate([q, q], axis=0)    # doubled arrays -> circular shifts
    vv = jnp.concatenate([v, v], axis=0)    # are plain static slices

    iota_row = jax.lax.broadcasted_iota(jnp.int32, (1, l), 1)    # lane ids
    iota_col = jax.lax.broadcasted_iota(jnp.int32, (l, 1), 0)    # sublane ids

    # circular correlation corr[tau] = (1/CH) sum_{t,c} q[(t+tau)%L, c] * k[t, c]
    # (identical to irfft(rfft(q)*conj(rfft(k))) averaged over heads+channels)
    corr_row = jnp.zeros((1, l), jnp.float32)
    corr_col = jnp.zeros((l, 1), jnp.float32)
    for tau in range(l):
        q_rot = jax.lax.slice_in_dim(qq, tau, tau + l, axis=0)   # q[(t+tau)%L]
        s = jnp.sum(q_rot * k, axis=1, keepdims=True)            # (L, 1)
        s = jnp.sum(s, axis=0, keepdims=True) * inv_ch           # (1, 1)
        corr_row = corr_row + jnp.where(iota_row == tau, s, 0.0)
        corr_col = corr_col + jnp.where(iota_col == tau, s, 0.0)

    # top-k selection via rank mask (no lax.top_k / gathers; ties are measure-zero)
    greater = jnp.where(corr_col > corr_row, 1.0, 0.0)           # [a,b] = corr[a]>corr[b]
    rank = jnp.sum(greater, axis=0, keepdims=True)               # (1, L)
    mask = rank < float(top_k)

    # softmax over the selected lags only (== softmax(torch.topk(...).values))
    sel = jnp.where(mask, corr_row, -1e30)
    m = jnp.max(sel, axis=1, keepdims=True)
    e = jnp.where(mask, jnp.exp(corr_row - m), 0.0)
    w_lag = e / jnp.sum(e, axis=1, keepdims=True)                # (1, L)

    # time-delay aggregation: out[t] = sum_tau w_lag[tau] * v[(t+tau)%L]
    out = jnp.zeros_like(v)
    for tau in range(l):
        v_rot = jax.lax.slice_in_dim(vv, tau, tau + l, axis=0)
        w_tau = jnp.sum(jnp.where(iota_row == tau, w_lag, 0.0), axis=1, keepdims=True)
        out = out + w_tau * v_rot
    return out


def _attention(p, queries, keys, self_attn):
    """AutoCorrelationLayer with fused QKV (self) / fused KV (cross) projection."""
    d = D_MODEL
    if self_attn:
        qkv = _dot(queries, p['wqkv']) + p['bqkv']               # (L, 3D) lane-dense
        q = qkv[:, :d]
        k = qkv[:, d:2 * d]
        v = qkv[:, 2 * d:]
    else:
        q = _dot(queries, p['wqkv'][:, :d]) + p['bqkv'][:, :d]
        kv = _dot(keys, p['wqkv'][:, d:]) + p['bqkv'][:, d:]     # fused K|V
        k = kv[:, :d]
        v = kv[:, d:]
    out = _auto_correlation(q, k, v)
    return _dot(out, p['wo']) + p['bo']


# ------------------------------------------------------------------
# The single fused forward kernel (one grid step == one batch element)
# ------------------------------------------------------------------
def _autoformer_kernel(*refs):
    out_ref = refs[-1]
    it = iter(refs[:-1])

    def nxt2d():
        return next(it)[...]

    def nxtb():          # batched (1, T, C) block -> (T, C)
        return next(it)[0]

    a_enc = nxt2d()                       # (SEQ_LEN, SEQ_LEN) moving-avg matrix
    a_dec = nxt2d()                       # (DEC_LEN, DEC_LEN)
    x_enc = nxtb()                        # (SEQ_LEN, C_IN)
    x_mark_enc = nxtb()                   # (SEQ_LEN, MARK_DIM)
    x_mark_dec = nxtb()                   # (DEC_LEN, MARK_DIM)
    trend_w = nxt2d(); trend_b = nxt2d()
    enc_tok_w = nxt2d(); enc_time_w = nxt2d()
    dec_tok_w = nxt2d(); dec_time_w = nxt2d()

    enc_layers = []
    for _ in range(NUM_ENC_LAYERS):
        wqkv = nxt2d(); bqkv = nxt2d(); wo = nxt2d(); bo = nxt2d()
        ff1 = nxt2d(); ff2 = nxt2d()
        enc_layers.append(dict(wqkv=wqkv, bqkv=bqkv, wo=wo, bo=bo, ff1=ff1, ff2=ff2))
    enc_g = nxt2d(); enc_b = nxt2d()

    dec_layers = []
    for _ in range(NUM_DEC_LAYERS):
        s_wqkv = nxt2d(); s_bqkv = nxt2d(); s_wo = nxt2d(); s_bo = nxt2d()
        c_wqkv = nxt2d(); c_bqkv = nxt2d(); c_wo = nxt2d(); c_bo = nxt2d()
        ff1 = nxt2d(); ff2 = nxt2d(); trend_conv = nxt2d()
        dec_layers.append(dict(
            self_attn=dict(wqkv=s_wqkv, bqkv=s_bqkv, wo=s_wo, bo=s_bo),
            cross_attn=dict(wqkv=c_wqkv, bqkv=c_bqkv, wo=c_wo, bo=c_bo),
            ff1=ff1, ff2=ff2, trend_conv=trend_conv))
    dec_g = nxt2d(); dec_b = nxt2d()
    proj_w = nxt2d(); proj_b = nxt2d()

    def decomp(x, a):
        mm = _dot(a, x)                   # moving average == constant matmul
        return x - mm, mm

    # ---- forecast prologue (mean / decomposition / decoder inits) ----
    mean_enc = jnp.mean(x_enc, axis=0, keepdims=True)                      # (1, C_IN)
    seasonal_full, trend_full = decomp(x_enc, a_enc)
    trend = jnp.concatenate(
        [trend_full[SEQ_LEN - LABEL_LEN:, :],
         jnp.broadcast_to(mean_enc, (LABEL_LEN, C_IN))], axis=0)           # (DEC_LEN, C_IN)
    trend = _dot(trend, trend_w) + trend_b                                 # (DEC_LEN, D_MODEL)
    seasonal_init = jnp.concatenate(
        [seasonal_full[SEQ_LEN - LABEL_LEN:, :],
         jnp.zeros((DEC_LEN - LABEL_LEN, C_IN), jnp.float32)], axis=0)     # (DEC_LEN, C_IN)

    # ---- embeddings (TokenEmbedding conv3 circular + timeF linear) ----
    enc_x = _circ_conv3(x_enc, enc_tok_w) + _dot(x_mark_enc, enc_time_w)
    dec_x = _circ_conv3(seasonal_init, dec_tok_w) + _dot(x_mark_dec, dec_time_w)

    # ---- encoder ----
    for lp in enc_layers:
        enc_x = enc_x + _attention(lp, enc_x, enc_x, self_attn=True)
        enc_x, _ = decomp(enc_x, a_enc)
        y = _dot(_gelu(_dot(enc_x, lp['ff1'])), lp['ff2'])                 # fused FFN
        enc_x, _ = decomp(enc_x + y, a_enc)
    enc_out = _layernorm_seq(enc_x, enc_g, enc_b)

    # ---- decoder ----
    for lp in dec_layers:
        dec_x = dec_x + _attention(lp['self_attn'], dec_x, dec_x, self_attn=True)
        dec_x, trend1 = decomp(dec_x, a_dec)
        dec_x = dec_x + _attention(lp['cross_attn'], dec_x, enc_out, self_attn=False)
        dec_x, trend2 = decomp(dec_x, a_dec)
        y = _dot(_gelu(_dot(dec_x, lp['ff1'])), lp['ff2'])
        dec_x, trend3 = decomp(dec_x + y, a_dec)
        trend = trend + _circ_conv3(trend1 + trend2 + trend3, lp['trend_conv'])
    dec_x = _layernorm_seq(dec_x, dec_g, dec_b)
    seasonal_part = _dot(dec_x, proj_w) + proj_b                           # (DEC_LEN, C_IN)

    dec_out = trend + seasonal_part
    out_ref[0] = dec_out[DEC_LEN - PRED_LEN:, :]                           # final slice in-kernel


# ------------------------------------------------------------------
# Wrapper: flatten params + call the single fused kernel
# ------------------------------------------------------------------
def _flatten_inputs(params, a_enc, a_dec, x_enc, x_mark_enc, x_mark_dec):
    flat = [a_enc, a_dec, x_enc, x_mark_enc, x_mark_dec,
            params['trend_w'], params['trend_b'],
            params['enc_emb']['token_w'], params['enc_emb']['time_w'],
            params['dec_emb']['token_w'], params['dec_emb']['time_w']]
    for lp in params['encoder']['layers']:
        flat += [lp['attn']['wqkv'], lp['attn']['bqkv'], lp['attn']['wo'], lp['attn']['bo'],
                 lp['ff_w1'], lp['ff_w2']]
    flat += [params['encoder']['norm_g'], params['encoder']['norm_b']]
    for lp in params['decoder']['layers']:
        flat += [lp['self_attn']['wqkv'], lp['self_attn']['bqkv'],
                 lp['self_attn']['wo'], lp['self_attn']['bo'],
                 lp['cross_attn']['wqkv'], lp['cross_attn']['bqkv'],
                 lp['cross_attn']['wo'], lp['cross_attn']['bo'],
                 lp['ff_w1'], lp['ff_w2'], lp['trend_conv_w']]
    flat += [params['decoder']['norm_g'], params['decoder']['norm_b'],
             params['decoder']['proj_w'], params['decoder']['proj_b']]
    return flat


def autoformer_forward(params, x_enc, x_dec, x_mark_enc, x_mark_dec,
                       adj_in=None, adj_out=None, instances_index_vm=None, mask=None):
    # adj_in / adj_out / instances_index_vm / mask are unused by the forecast path.
    b = x_enc.shape[0]
    x_enc2 = x_enc.reshape(b, x_enc.shape[1], -1)
    x_dec2 = x_dec.reshape(b, x_dec.shape[1], -1)

    a_enc = jnp.asarray(_moving_avg_matrix(SEQ_LEN))
    a_dec = jnp.asarray(_moving_avg_matrix(DEC_LEN))

    flat = _flatten_inputs(params, a_enc, a_dec, x_enc2, x_mark_enc, x_mark_dec)

    # indices 2,3,4 are the batched activations; everything else is a shared 2-D weight
    batched_blocks = {2: (1, SEQ_LEN, C_IN),
                      3: (1, SEQ_LEN, MARK_DIM),
                      4: (1, DEC_LEN, MARK_DIM)}
    in_specs = []
    for idx, arr in enumerate(flat):
        if idx in batched_blocks:
            in_specs.append(pl.BlockSpec(batched_blocks[idx], lambda i: (i, 0, 0)))
        else:
            assert arr.ndim == 2
            in_specs.append(pl.BlockSpec(arr.shape, lambda i: (0, 0)))

    out = pl.pallas_call(
        _autoformer_kernel,
        out_shape=jax.ShapeDtypeStruct((b, PRED_LEN, C_IN), jnp.float32),
        grid=(b,),
        in_specs=in_specs,
        out_specs=pl.BlockSpec((1, PRED_LEN, C_IN), lambda i: (i, 0, 0)),
        compiler_params=pltpu.CompilerParams(dimension_semantics=("parallel",)),
    )(*flat)

    return out.reshape(b, x_dec2.shape[1], -1, NUM_FEATURES)


# ------------------------------------------------------------------
# Deterministic parameter init (kernel-ready layout: fused QKV, (1,N) biases,
# conv3 weights flattened to (3*Cin, Cout)).
# ------------------------------------------------------------------
def init_params(key):
    keys = iter(jax.random.split(key, 64))

    def nxt():
        return next(keys)

    def dense(fan_in, fan_out):
        return jax.random.normal(nxt(), (fan_in, fan_out), jnp.float32) / math.sqrt(fan_in)

    def vec(n):
        return 0.02 * jax.random.normal(nxt(), (1, n), jnp.float32)

    def conv3(cin, cout):
        return jax.random.normal(nxt(), (3 * cin, cout), jnp.float32) / math.sqrt(3 * cin)

    def attn():
        return dict(wqkv=dense(D_MODEL, 3 * D_MODEL), bqkv=vec(3 * D_MODEL),
                    wo=dense(D_MODEL, D_MODEL), bo=vec(D_MODEL))

    return dict(
        trend_w=dense(C_IN, D_MODEL), trend_b=vec(D_MODEL),
        enc_emb=dict(token_w=conv3(C_IN, D_MODEL), time_w=dense(MARK_DIM, D_MODEL)),
        dec_emb=dict(token_w=conv3(C_IN, D_MODEL), time_w=dense(MARK_DIM, D_MODEL)),
        encoder=dict(
            layers=[dict(attn=attn(),
                         ff_w1=dense(D_MODEL, D_FF),
                         ff_w2=dense(D_FF, D_MODEL))
                    for _ in range(NUM_ENC_LAYERS)],
            norm_g=jnp.ones((1, D_MODEL), jnp.float32),
            norm_b=jnp.zeros((1, D_MODEL), jnp.float32)),
        decoder=dict(
            layers=[dict(self_attn=attn(), cross_attn=attn(),
                         ff_w1=dense(D_MODEL, D_FF),
                         ff_w2=dense(D_FF, D_MODEL),
                         trend_conv_w=conv3(D_MODEL, D_MODEL))
                    for _ in range(NUM_DEC_LAYERS)],
            norm_g=jnp.ones((1, D_MODEL), jnp.float32),
            norm_b=jnp.zeros((1, D_MODEL), jnp.float32),
            proj_w=dense(D_MODEL, C_IN), proj_b=vec(C_IN)),
    )


if __name__ == "__main__":
    key = jax.random.PRNGKey(0)
    kp, k1, k2, k3, k4 = jax.random.split(key, 5)
    params = init_params(kp)

    x_enc = jax.random.normal(k1, (BATCH, SEQ_LEN, NUM_INSTANCES, NUM_FEATURES), jnp.float32)
    x_dec = jax.random.normal(k2, (BATCH, PRED_LEN, NUM_INSTANCES, NUM_FEATURES), jnp.float32)
    x_mark_enc = jax.random.normal(k3, (BATCH, SEQ_LEN, MARK_DIM), jnp.float32)
    x_mark_dec = jax.random.normal(k4, (BATCH, DEC_LEN, MARK_DIM), jnp.float32)

    out = jax.jit(autoformer_forward)(params, x_enc, x_dec, x_mark_enc, x_mark_dec)
    out = jax.block_until_ready(out)
    assert out.shape == (BATCH, PRED_LEN, NUM_INSTANCES, NUM_FEATURES), out.shape
    assert bool(jnp.all(jnp.isfinite(out)))
    print("KERNEL_OK")
</pallas_src>

<mosaic_0001>
module attributes {stable_mosaic.version = 11 : i64} {
  func.func @_autoformer_kernel(%arg0: i32, %arg1: memref<16x16xf32, #tpu.memory_space<vmem>>, %arg2: memref<16x16xf32, #tpu.memory_space<vmem>>, %arg3: memref<1x16x32xf32, #tpu.memory_space<vmem>>, %arg4: memref<1x16x4xf32, #tpu.memory_space<vmem>>, %arg5: memref<1x16x4xf32, #tpu.memory_space<vmem>>, %arg6: memref<32x32xf32, #tpu.memory_space<vmem>>, %arg7: memref<1x32xf32, #tpu.memory_space<vmem>>, %arg8: memref<96x32xf32, #tpu.memory_space<vmem>>, %arg9: memref<4x32xf32, #tpu.memory_space<vmem>>, %arg10: memref<96x32xf32, #tpu.memory_space<vmem>>, %arg11: memref<4x32xf32, #tpu.memory_space<vmem>>, %arg12: memref<32x96xf32, #tpu.memory_space<vmem>>, %arg13: memref<1x96xf32, #tpu.memory_space<vmem>>, %arg14: memref<32x32xf32, #tpu.memory_space<vmem>>, %arg15: memref<1x32xf32, #tpu.memory_space<vmem>>, %arg16: memref<32x32xf32, #tpu.memory_space<vmem>>, %arg17: memref<32x32xf32, #tpu.memory_space<vmem>>, %arg18: memref<1x32xf32, #tpu.memory_space<vmem>>, %arg19: memref<1x32xf32, #tpu.memory_space<vmem>>, %arg20: memref<32x96xf32, #tpu.memory_space<vmem>>, %arg21: memref<1x96xf32, #tpu.memory_space<vmem>>, %arg22: memref<32x32xf32, #tpu.memory_space<vmem>>, %arg23: memref<1x32xf32, #tpu.memory_space<vmem>>, %arg24: memref<32x96xf32, #tpu.memory_space<vmem>>, %arg25: memref<1x96xf32, #tpu.memory_space<vmem>>, %arg26: memref<32x32xf32, #tpu.memory_space<vmem>>, %arg27: memref<1x32xf32, #tpu.memory_space<vmem>>, %arg28: memref<32x32xf32, #tpu.memory_space<vmem>>, %arg29: memref<32x32xf32, #tpu.memory_space<vmem>>, %arg30: memref<96x32xf32, #tpu.memory_space<vmem>>, %arg31: memref<1x32xf32, #tpu.memory_space<vmem>>, %arg32: memref<1x32xf32, #tpu.memory_space<vmem>>, %arg33: memref<32x32xf32, #tpu.memory_space<vmem>>, %arg34: memref<1x32xf32, #tpu.memory_space<vmem>>, %arg35: memref<1x8x32xf32, #tpu.memory_space<vmem>>) attributes {dimension_semantics = [#tpu.dimension_semantics<parallel>], iteration_bounds = array<i64: 2>, scalar_prefetch = 0 : i64, scratch_operands = 0 : i64, tpu.core_type = #tpu.core_type<tc>, window_params = [{pipeline_mode = #tpu.pipeline_mode<synchronous>, transform_indices = @transform_0, window_bounds = array<i64: 16, 16>}, {pipeline_mode = #tpu.pipeline_mode<synchronous>, transform_indices = @transform_1, window_bounds = array<i64: 16, 16>}, {transform_indices = @transform_2, window_bounds = array<i64: 1, 16, 32>}, {transform_indices = @transform_3, window_bounds = array<i64: 1, 16, 4>}, {transform_indices = @transform_4, window_bounds = array<i64: 1, 16, 4>}, {pipeline_mode = #tpu.pipeline_mode<synchronous>, transform_indices = @transform_5, window_bounds = array<i64: 32, 32>}, {pipeline_mode = #tpu.pipeline_mode<synchronous>, transform_indices = @transform_6, window_bounds = array<i64: 1, 32>}, {pipeline_mode = #tpu.pipeline_mode<synchronous>, transform_indices = @transform_7, window_bounds = array<i64: 96, 32>}, {pipeline_mode = #tpu.pipeline_mode<synchronous>, transform_indices = @transform_8, window_bounds = array<i64: 4, 32>}, {pipeline_mode = #tpu.pipeline_mode<synchronous>, transform_indices = @transform_9, window_bounds = array<i64: 96, 32>}, {pipeline_mode = #tpu.pipeline_mode<synchronous>, transform_indices = @transform_10, window_bounds = array<i64: 4, 32>}, {pipeline_mode = #tpu.pipeline_mode<synchronous>, transform_indices = @transform_11, window_bounds = array<i64: 32, 96>}, {pipeline_mode = #tpu.pipeline_mode<synchronous>, transform_indices = @transform_12, window_bounds = array<i64: 1, 96>}, {pipeline_mode = #tpu.pipeline_mode<synchronous>, transform_indices = @transform_13, window_bounds = array<i64: 32, 32>}, {pipeline_mode = #tpu.pipeline_mode<synchronous>, transform_indices = @transform_14, window_bounds = array<i64: 1, 32>}, {pipeline_mode = #tpu.pipeline_mode<synchronous>, transform_indices = @transform_15, window_bounds = array<i64: 32, 32>}, {pipeline_mode = #tpu.pipeline_mode<synchronous>, transform_indices = @transform_16, window_bounds = array<i64: 32, 32>}, {pipeline_mode = #tpu.pipeline_mode<synchronous>, transform_indices = @transform_17, window_bounds = array<i64: 1, 32>}, {pipeline_mode = #tpu.pipeline_mode<synchronous>, transform_indices = @transform_18, window_bounds = array<i64: 1, 32>}, {pipeline_mode = #tpu.pipeline_mode<synchronous>, transform_indices = @transform_19, window_bounds = array<i64: 32, 96>}, {pipeline_mode = #tpu.pipeline_mode<synchronous>, transform_indices = @transform_20, window_bounds = array<i64: 1, 96>}, {pipeline_mode = #tpu.pipeline_mode<synchronous>, transform_indices = @transform_21, window_bounds = array<i64: 32, 32>}, {pipeline_mode = #tpu.pipeline_mode<synchronous>, transform_indices = @transform_22, window_bounds = array<i64: 1, 32>}, {pipeline_mode = #tpu.pipeline_mode<synchronous>, transform_indices = @transform_23, window_bounds = array<i64: 32, 96>}, {pipeline_mode = #tpu.pipeline_mode<synchronous>, transform_indices = @transform_24, window_bounds = array<i64: 1, 96>}, {pipeline_mode = #tpu.pipeline_mode<synchronous>, transform_indices = @transform_25, window_bounds = array<i64: 32, 32>}, {pipeline_mode = #tpu.pipeline_mode<synchronous>, transform_indices = @transform_26, window_bounds = array<i64: 1, 32>}, {pipeline_mode = #tpu.pipeline_mode<synchronous>, transform_indices = @transform_27, window_bounds = array<i64: 32, 32>}, {pipeline_mode = #tpu.pipeline_mode<synchronous>, transform_indices = @transform_28, window_bounds = array<i64: 32, 32>}, {pipeline_mode = #tpu.pipeline_mode<synchronous>, transform_indices = @transform_29, window_bounds = array<i64: 96, 32>}, {pipeline_mode = #tpu.pipeline_mode<synchronous>, transform_indices = @transform_30, window_bounds = array<i64: 1, 32>}, {pipeline_mode = #tpu.pipeline_mode<synchronous>, transform_indices = @transform_31, window_bounds = array<i64: 1, 32>}, {pipeline_mode = #tpu.pipeline_mode<synchronous>, transform_indices = @transform_32, window_bounds = array<i64: 32, 32>}, {pipeline_mode = #tpu.pipeline_mode<synchronous>, transform_indices = @transform_33, window_bounds = array<i64: 1, 32>}, {transform_indices = @transform_34, window_bounds = array<i64: 1, 8, 32>}]} {
    %c0 = arith.constant 0 : index
    %c0_0 = arith.constant 0 : index
    %0 = vector.load %arg1[%c0, %c0_0] : memref<16x16xf32, #tpu.memory_space<vmem>>, vector<16x16xf32>
    %c0_1 = arith.constant 0 : index
    %c0_2 = arith.constant 0 : index
    %1 = vector.load %arg2[%c0_1, %c0_2] : memref<16x16xf32, #tpu.memory_space<vmem>>, vector<16x16xf32>
    %c0_3 = arith.constant 0 : index
    %c0_4 = arith.constant 0 : index
    %c0_5 = arith.constant 0 : index
    %2 = vector.load %arg3[%c0_3, %c0_4, %c0_5] : memref<1x16x32xf32, #tpu.memory_space<vmem>>, vector<1x16x32xf32>
    %3 = vector.shape_cast %2 : vector<1x16x32xf32> to vector<16x32xf32>
    %c0_6 = arith.constant 0 : index
    %c0_7 = arith.constant 0 : index
    %c0_8 = arith.constant 0 : index
    %4 = vector.load %arg4[%c0_6, %c0_7, %c0_8] : memref<1x16x4xf32, #tpu.memory_space<vmem>>, vector<1x16x4xf32>
    %5 = vector.shape_cast %4 : vector<1x16x4xf32> to vector<16x4xf32>
    %c0_9 = arith.constant 0 : index
    %c0_10 = arith.constant 0 : index
    %c0_11 = arith.constant 0 : index
    %6 = vector.load %arg5[%c0_9, %c0_10, %c0_11] : memref<1x16x4xf32, #tpu.memory_space<vmem>>, vector<1x16x4xf32>
    %7 = vector.shape_cast %6 : vector<1x16x4xf32> to vector<16x4xf32>
    %c0_12 = arith.constant 0 : index
    %c0_13 = arith.constant 0 : index
    %8 = vector.load %arg6[%c0_12, %c0_13] : memref<32x32xf32, #tpu.memory_space<vmem>>, vector<32x32xf32>
    %c0_14 = arith.constant 0 : index
    %c0_15 = arith.constant 0 : index
    %9 = vector.load %arg7[%c0_14, %c0_15] : memref<1x32xf32, #tpu.memory_space<vmem>>, vector<1x32xf32>
    %c0_16 = arith.constant 0 : index
    %c0_17 = arith.constant 0 : index
    %10 = vector.load %arg8[%c0_16, %c0_17] : memref<96x32xf32, #tpu.memory_space<vmem>>, vector<96x32xf32>
    %c0_18 = arith.constant 0 : index
    %c0_19 = arith.constant 0 : index
    %11 = vector.load %arg9[%c0_18, %c0_19] : memref<4x32xf32, #tpu.memory_space<vmem>>, vector<4x32xf32>
    %c0_20 = arith.constant 0 : index
    %c0_21 = arith.constant 0 : index
    %12 = vector.load %arg10[%c0_20, %c0_21] : memref<96x32xf32, #tpu.memory_space<vmem>>, vector<96x32xf32>
    %c0_22 = arith.constant 0 : index
    %c0_23 = arith.constant 0 : index
    %13 = vector.load %arg11[%c0_22, %c0_23] : memref<4x32xf32, #tpu.memory_space<vmem>>, vector<4x32xf32>
    %c0_24 = arith.constant 0 : index
    %c0_25 = arith.constant 0 : index
    %14 = vector.load %arg12[%c0_24, %c0_25] : memref<32x96xf32, #tpu.memory_space<vmem>>, vector<32x96xf32>
    %c0_26 = arith.constant 0 : index
    %c0_27 = arith.constant 0 : index
    %15 = vector.load %arg13[%c0_26, %c0_27] : memref<1x96xf32, #tpu.memory_space<vmem>>, vector<1x96xf32>
    %c0_28 = arith.constant 0 : index
    %c0_29 = arith.constant 0 : index
    %16 = vector.load %arg14[%c0_28, %c0_29] : memref<32x32xf32, #tpu.memory_space<vmem>>, vector<32x32xf32>
    %c0_30 = arith.constant 0 : index
    %c0_31 = arith.constant 0 : index
    %17 = vector.load %arg15[%c0_30, %c0_31] : memref<1x32xf32, #tpu.memory_space<vmem>>, vector<1x32xf32>
    %c0_32 = arith.constant 0 : index
    %c0_33 = arith.constant 0 : index
    %18 = vector.load %arg16[%c0_32, %c0_33] : memref<32x32xf32, #tpu.memory_space<vmem>>, vector<32x32xf32>
    %c0_34 = arith.constant 0 : index
    %c0_35 = arith.constant 0 : index
    %19 = vector.load %arg17[%c0_34, %c0_35] : memref<32x32xf32, #tpu.memory_space<vmem>>, vector<32x32xf32>
    %c0_36 = arith.constant 0 : index
    %c0_37 = arith.constant 0 : index
    %20 = vector.load %arg18[%c0_36, %c0_37] : memref<1x32xf32, #tpu.memory_space<vmem>>, vector<1x32xf32>
    %c0_38 = arith.constant 0 : index
    %c0_39 = arith.constant 0 : index
    %21 = vector.load %arg19[%c0_38, %c0_39] : memref<1x32xf32, #tpu.memory_space<vmem>>, vector<1x32xf32>
    %c0_40 = arith.constant 0 : index
    %c0_41 = arith.constant 0 : index
    %22 = vector.load %arg20[%c0_40, %c0_41] : memref<32x96xf32, #tpu.memory_space<vmem>>, vector<32x96xf32>
    %c0_42 = arith.constant 0 : index
    %c0_43 = arith.constant 0 : index
    %23 = vector.load %arg21[%c0_42, %c0_43] : memref<1x96xf32, #tpu.memory_space<vmem>>, vector<1x96xf32>
    %c0_44 = arith.constant 0 : index
    %c0_45 = arith.constant 0 : index
    %24 = vector.load %arg22[%c0_44, %c0_45] : memref<32x32xf32, #tpu.memory_space<vmem>>, vector<32x32xf32>
    %c0_46 = arith.constant 0 : index
    %c0_47 = arith.constant 0 : index
    %25 = vector.load %arg23[%c0_46, %c0_47] : memref<1x32xf32, #tpu.memory_space<vmem>>, vector<1x32xf32>
    %c0_48 = arith.constant 0 : index
    %c0_49 = arith.constant 0 : index
    %26 = vector.load %arg24[%c0_48, %c0_49] : memref<32x96xf32, #tpu.memory_space<vmem>>, vector<32x96xf32>
    %c0_50 = arith.constant 0 : index
    %c0_51 = arith.constant 0 : index
    %27 = vector.load %arg25[%c0_50, %c0_51] : memref<1x96xf32, #tpu.memory_space<vmem>>, vector<1x96xf32>
    %c0_52 = arith.constant 0 : index
    %c0_53 = arith.constant 0 : index
    %28 = vector.load %arg26[%c0_52, %c0_53] : memref<32x32xf32, #tpu.memory_space<vmem>>, vector<32x32xf32>
    %c0_54 = arith.constant 0 : index
    %c0_55 = arith.constant 0 : index
    %29 = vector.load %arg27[%c0_54, %c0_55] : memref<1x32xf32, #tpu.memory_space<vmem>>, vector<1x32xf32>
    %c0_56 = arith.constant 0 : index
    %c0_57 = arith.constant 0 : index
    %30 = vector.load %arg28[%c0_56, %c0_57] : memref<32x32xf32, #tpu.memory_space<vmem>>, vector<32x32xf32>
    %c0_58 = arith.constant 0 : index
    %c0_59 = arith.constant 0 : index
    %31 = vector.load %arg29[%c0_58, %c0_59] : memref<32x32xf32, #tpu.memory_space<vmem>>, vector<32x32xf32>
    %c0_60 = arith.constant 0 : index
    %c0_61 = arith.constant 0 : index
    %32 = vector.load %arg30[%c0_60, %c0_61] : memref<96x32xf32, #tpu.memory_space<vmem>>, vector<96x32xf32>
    %c0_62 = arith.constant 0 : index
    %c0_63 = arith.constant 0 : index
    %33 = vector.load %arg31[%c0_62, %c0_63] : memref<1x32xf32, #tpu.memory_space<vmem>>, vector<1x32xf32>
    %c0_64 = arith.constant 0 : index
    %c0_65 = arith.constant 0 : index
    %34 = vector.load %arg32[%c0_64, %c0_65] : memref<1x32xf32, #tpu.memory_space<vmem>>, vector<1x32xf32>
    %c0_66 = arith.constant 0 : index
    %c0_67 = arith.constant 0 : index
    %35 = vector.load %arg33[%c0_66, %c0_67] : memref<32x32xf32, #tpu.memory_space<vmem>>, vector<32x32xf32>
    %c0_68 = arith.constant 0 : index
    %c0_69 = arith.constant 0 : index
    %36 = vector.load %arg34[%c0_68, %c0_69] : memref<1x32xf32, #tpu.memory_space<vmem>>, vector<1x32xf32>
    %cst = arith.constant dense<0.000000e+00> : vector<32xf32>
    %37 = vector.multi_reduction <add>, %3, %cst [0] : vector<16x32xf32> to vector<32xf32>
    %38 = vector.shape_cast %37 : vector<32xf32> to vector<1x32xf32>
    %cst_70 = arith.constant 1.600000e+01 : f32
    %39 = vector.broadcast %cst_70 : f32 to vector<1x32xf32>
    %40 = arith.divf %38, %39 : vector<1x32xf32>
    %cst_71 = arith.constant dense<0.000000e+00> : vector<16x32xf32>
    %41 = tpu.matmul %0, %3, %cst_71 {dimension_numbers = #tpu.dot_dimension_numbers<[1], [0], [0], [1], [0, 0, 1, 1], [], []>} : vector<16x16xf32>, vector<16x32xf32>, vector<16x32xf32> -> vector<16x32xf32>
    %42 = arith.subf %3, %41 : vector<16x32xf32>
    %43 = vector.extract_strided_slice %41 {offsets = [8, 0], sizes = [8, 32], strides = [1, 1]} : vector<16x32xf32> to vector<8x32xf32>
    %44 = vector.shape_cast %40 : vector<1x32xf32> to vector<1x32xf32>
    %45 = vector.broadcast %44 : vector<1x32xf32> to vector<8x32xf32>
    %46 = tpu.concatenate %43, %45 in 0 : vector<8x32xf32>, vector<8x32xf32> -> vector<16x32xf32>
    %cst_72 = arith.constant dense<0.000000e+00> : vector<16x32xf32>
    %47 = tpu.matmul %46, %8, %cst_72 {dimension_numbers = #tpu.dot_dimension_numbers<[1], [0], [0], [1], [0, 0, 1, 1], [], []>} : vector<16x32xf32>, vector<32x32xf32>, vector<16x32xf32> -> vector<16x32xf32>
    %48 = vector.broadcast %9 : vector<1x32xf32> to vector<16x32xf32>
    %49 = arith.addf %47, %48 : vector<16x32xf32>
    %50 = vector.extract_strided_slice %42 {offsets = [8, 0], sizes = [8, 32], strides = [1, 1]} : vector<16x32xf32> to vector<8x32xf32>
    %cst_73 = arith.constant 0.000000e+00 : f32
    %51 = vector.broadcast %cst_73 : f32 to vector<8x32xf32>
    %52 = tpu.concatenate %50, %51 in 0 : vector<8x32xf32>, vector<8x32xf32> -> vector<16x32xf32>
    %53 = tpu.concatenate %3, %3 in 0 : vector<16x32xf32>, vector<16x32xf32> -> vector<32x32xf32>
    %54 = vector.extract_strided_slice %53 {offsets = [15, 0], sizes = [16, 32], strides = [1, 1]} : vector<32x32xf32> to vector<16x32xf32>
    %55 = vector.extract_strided_slice %53 {offsets = [1, 0], sizes = [16, 32], strides = [1, 1]} : vector<32x32xf32> to vector<16x32xf32>
    %56 = tpu.concatenate %54, %3, %55 in 1 : vector<16x32xf32>, vector<16x32xf32>, vector<16x32xf32> -> vector<16x96xf32>
    %cst_74 = arith.constant dense<0.000000e+00> : vector<16x32xf32>
    %57 = tpu.matmul %56, %10, %cst_74 {dimension_numbers = #tpu.dot_dimension_numbers<[1], [0], [0], [1], [0, 0, 1, 1], [], []>} : vector<16x96xf32>, vector<96x32xf32>, vector<16x32xf32> -> vector<16x32xf32>
    %cst_75 = arith.constant dense<0.000000e+00> : vector<16x32xf32>
    %58 = tpu.matmul %5, %11, %cst_75 {dimension_numbers = #tpu.dot_dimension_numbers<[1], [0], [0], [1], [0, 0, 1, 1], [], []>} : vector<16x4xf32>, vector<4x32xf32>, vector<16x32xf32> -> vector<16x32xf32>
    %59 = arith.addf %57, %58 : vector<16x32xf32>
    %60 = tpu.concatenate %52, %52 in 0 : vector<16x32xf32>, vector<16x32xf32> -> vector<32x32xf32>
    %61 = vector.extract_strided_slice %60 {offsets = [15, 0], sizes = [16, 32], strides = [1, 1]} : vector<32x32xf32> to vector<16x32xf32>
    %62 = vector.extract_strided_slice %60 {offsets = [1, 0], sizes = [16, 32], strides = [1, 1]} : vector<32x32xf32> to vector<16x32xf32>
    %63 = tpu.concatenate %61, %52, %62 in 1 : vector<16x32xf32>, vector<16x32xf32>, vector<16x32xf32> -> vector<16x96xf32>
    %cst_76 = arith.constant dense<0.000000e+00> : vector<16x32xf32>
    %64 = tpu.matmul %63, %12, %cst_76 {dimension_numbers = #tpu.dot_dimension_numbers<[1], [0], [0], [1], [0, 0, 1, 1], [], []>} : vector<16x96xf32>, vector<96x32xf32>, vector<16x32xf32> -> vector<16x32xf32>
    %cst_77 = arith.constant dense<0.000000e+00> : vector<16x32xf32>
    %65 = tpu.matmul %7, %13, %cst_77 {dimension_numbers = #tpu.dot_dimension_numbers<[1], [0], [0], [1], [0, 0, 1, 1], [], []>} : vector<16x4xf32>, vector<4x32xf32>, vector<16x32xf32> -> vector<16x32xf32>
    %66 = arith.addf %64, %65 : vector<16x32xf32>
    %cst_78 = arith.constant dense<0.000000e+00> : vector<16x96xf32>
    %67 = tpu.matmul %59, %14, %cst_78 {dimension_numbers = #tpu.dot_dimension_numbers<[1], [0], [0], [1], [0, 0, 1, 1], [], []>} : vector<16x32xf32>, vector<32x96xf32>, vector<16x96xf32> -> vector<16x96xf32>
    %68 = vector.broadcast %15 : vector<1x96xf32> to vector<16x96xf32>
    %69 = arith.addf %67, %68 : vector<16x96xf32>
    %70 = vector.extract_strided_slice %69 {offsets = [0, 0], sizes = [16, 32], strides = [1, 1]} : vector<16x96xf32> to vector<16x32xf32>
    %71 = vector.extract_strided_slice %69 {offsets = [0, 32], sizes = [16, 32], strides = [1, 1]} : vector<16x96xf32> to vector<16x32xf32>
    %72 = vector.extract_strided_slice %69 {offsets = [0, 64], sizes = [16, 32], strides = [1, 1]} : vector<16x96xf32> to vector<16x32xf32>
    %73 = tpu.concatenate %70, %70 in 0 : vector<16x32xf32>, vector<16x32xf32> -> vector<32x32xf32>
    %74 = tpu.concatenate %72, %72 in 0 : vector<16x32xf32>, vector<16x32xf32> -> vector<32x32xf32>
    %75 = tpu.iota {dimensions = array<i32: 1>} : vector<1x16xi32>
    %76 = tpu.iota {dimensions = array<i32: 0>} : vector<16x1xi32>
    %cst_79 = arith.constant 0.000000e+00 : f32
    %77 = vector.broadcast %cst_79 : f32 to vector<1x16xf32>
    %cst_80 = arith.constant 0.000000e+00 : f32
    %78 = vector.broadcast %cst_80 : f32 to vector<16x1xf32>
    %79 = vector.extract_strided_slice %73 {offsets = [0, 0], sizes = [16, 32], strides = [1, 1]} : vector<32x32xf32> to vector<16x32xf32>
    %80 = arith.mulf %79, %71 : vector<16x32xf32>
    %cst_81 = arith.constant dense<0.000000e+00> : vector<16xf32>
    %81 = vector.multi_reduction <add>, %80, %cst_81 [1] : vector<16x32xf32> to vector<16xf32>
    %82 = vector.shape_cast %81 : vector<16xf32> to vector<16x1xf32>
    %cst_82 = arith.constant dense<0.000000e+00> : vector<1xf32>
    %83 = vector.multi_reduction <add>, %82, %cst_82 [0] : vector<16x1xf32> to vector<1xf32>
    %84 = vector.shape_cast %83 : vector<1xf32> to vector<1x1xf32>
    %cst_83 = arith.constant 3.125000e-02 : f32
    %85 = vector.broadcast %cst_83 : f32 to vector<1x1xf32>
    %86 = arith.mulf %84, %85 : vector<1x1xf32>
    %c0_i32 = arith.constant 0 : i32
    %87 = vector.broadcast %c0_i32 : i32 to vector<1x16xi32>
    %88 = arith.cmpi eq, %75, %87 : vector<1x16xi32>
    %cst_84 = arith.constant 0.000000e+00 : f32
    %89 = vector.shape_cast %86 : vector<1x1xf32> to vector<1x1xf32>
    %90 = vector.broadcast %89 : vector<1x1xf32> to vector<1x16xf32>
    %91 = vector.broadcast %cst_84 : f32 to vector<1x16xf32>
    %92 = arith.select %88, %90, %91 : vector<1x16xi1>, vector<1x16xf32>
    %93 = arith.addf %77, %92 : vector<1x16xf32>
    %c0_i32_85 = arith.constant 0 : i32
    %94 = vector.broadcast %c0_i32_85 : i32 to vector<16x1xi32>
    %95 = arith.cmpi eq, %76, %94 : vector<16x1xi32>
    %cst_86 = arith.constant 0.000000e+00 : f32
    %96 = vector.shape_cast %86 : vector<1x1xf32> to vector<1x1xf32>
    %97 = vector.broadcast %96 : vector<1x1xf32> to vector<16x1xf32>
    %98 = vector.broadcast %cst_86 : f32 to vector<16x1xf32>
    %99 = arith.select %95, %97, %98 : vector<16x1xi1>, vector<16x1xf32>
    %100 = arith.addf %78, %99 : vector<16x1xf32>
    %101 = vector.extract_strided_slice %73 {offsets = [1, 0], sizes = [16, 32], strides = [1, 1]} : vector<32x32xf32> to vector<16x32xf32>
    %102 = arith.mulf %101, %71 : vector<16x32xf32>
    %cst_87 = arith.constant dense<0.000000e+00> : vector<16xf32>
    %103 = vector.multi_reduction <add>, %102, %cst_87 [1] : vector<16x32xf32> to vector<16xf32>
    %104 = vector.shape_cast %103 : vector<16xf32> to vector<16x1xf32>
    %cst_88 = arith.constant dense<0.000000e+00> : vector<1xf32>
    %105 = vector.multi_reduction <add>, %104, %cst_88 [0] : vector<16x1xf32> to vector<1xf32>
    %106 = vector.shape_cast %105 : vector<1xf32> to vector<1x1xf32>
    %cst_89 = arith.constant 3.125000e-02 : f32
    %107 = vector.broadcast %cst_89 : f32 to vector<1x1xf32>
    %108 = arith.mulf %106, %107 : vector<1x1xf32>
    %c1_i32 = arith.constant 1 : i32
    %109 = vector.broadcast %c1_i32 : i32 to vector<1x16xi32>
    %110 = arith.cmpi eq, %75, %109 : vector<1x16xi32>
    %cst_90 = arith.constant 0.000000e+00 : f32
    %111 = vector.shape_cast %108 : vector<1x1xf32> to vector<1x1xf32>
    %112 = vector.broadcast %111 : vector<1x1xf32> to vector<1x16xf32>
    %113 = vector.broadcast %cst_90 : f32 to vector<1x16xf32>
    %114 = arith.select %110, %112, %113 : vector<1x16xi1>, vector<1x16xf32>
    %115 = arith.addf %93, %114 : vector<1x16xf32>
    %c1_i32_91 = arith.constant 1 : i32
    %116 = vector.broadcast %c1_i32_91 : i32 to vector<16x1xi32>
    %117 = arith.cmpi eq, %76, %116 : vector<16x1xi32>
    %cst_92 = arith.constant 0.000000e+00 : f32
    %118 = vector.shape_cast %108 : vector<1x1xf32> to vector<1x1xf32>
    %119 = vector.broadcast %118 : vector<1x1xf32> to vector<16x1xf32>
    %120 = vector.broadcast %cst_92 : f32 to vector<16x1xf32>
    %121 = arith.select %117, %119, %120 : vector<16x1xi1>, vector<16x1xf32>
    %122 = arith.addf %100, %121 : vector<16x1xf32>
    %123 = vector.extract_strided_slice %73 {offsets = [2, 0], sizes = [16, 32], strides = [1, 1]} : vector<32x32xf32> to vector<16x32xf32>
    %124 = arith.mulf %123, %71 : vector<16x32xf32>
    %cst_93 = arith.constant dense<0.000000e+00> : vector<16xf32>
    %125 = vector.multi_reduction <add>, %124, %cst_93 [1] : vector<16x32xf32> to vector<16xf32>
    %126 = vector.shape_cast %125 : vector<16xf32> to vector<16x1xf32>
    %cst_94 = arith.constant dense<0.000000e+00> : vector<1xf32>
    %127 = vector.multi_reduction <add>, %126, %cst_94 [0] : vector<16x1xf32> to vector<1xf32>
    %128 = vector.shape_cast %127 : vector<1xf32> to vector<1x1xf32>
    %cst_95 = arith.constant 3.125000e-02 : f32
    %129 = vector.broadcast %cst_95 : f32 to vector<1x1xf32>
    %130 = arith.mulf %128, %129 : vector<1x1xf32>
    %c2_i32 = arith.constant 2 : i32
    %131 = vector.broadcast %c2_i32 : i32 to vector<1x16xi32>
    %132 = arith.cmpi eq, %75, %131 : vector<1x16xi32>
    %cst_96 = arith.constant 0.000000e+00 : f32
    %133 = vector.shape_cast %130 : vector<1x1xf32> to vector<1x1xf32>
    %134 = vector.broadcast %133 : vector<1x1xf32> to vector<1x16xf32>
    %135 = vector.broadcast %cst_96 : f32 to vector<1x16xf32>
    %136 = arith.select %132, %134, %135 : vector<1x16xi1>, vector<1x16xf32>
    %137 = arith.addf %115, %136 : vector<1x16xf32>
    %c2_i32_97 = arith.constant 2 : i32
    %138 = vector.broadcast %c2_i32_97 : i32 to vector<16x1xi32>
    %139 = arith.cmpi eq, %76, %138 : vector<16x1xi32>
    %cst_98 = arith.constant 0.000000e+00 : f32
    %140 = vector.shape_cast %130 : vector<1x1xf32> to vector<1x1xf32>
    %141 = vector.broadcast %140 : vector<1x1xf32> to vector<16x1xf32>
    %142 = vector.broadcast %cst_98 : f32 to vector<16x1xf32>
    %143 = arith.select %139, %141, %142 : vector<16x1xi1>, vector<16x1xf32>
    %144 = arith.addf %122, %143 : vector<16x1xf32>
    %145 = vector.extract_strided_slice %73 {offsets = [3, 0], sizes = [16, 32], strides = [1, 1]} : vector<32x32xf32> to vector<16x32xf32>
    %146 = arith.mulf %145, %71 : vector<16x32xf32>
    %cst_99 = arith.constant dense<0.000000e+00> : vector<16xf32>
    %147 = vector.multi_reduction <add>, %146, %cst_99 [1] : vector<16x32xf32> to vector<16xf32>
    %148 = vector.shape_cast %147 : vector<16xf32> to vector<16x1xf32>
    %cst_100 = arith.constant dense<0.000000e+00> : vector<1xf32>
    %149 = vector.multi_reduction <add>, %148, %cst_100 [0] : vector<16x1xf32> to vector<1xf32>
    %150 = vector.shape_cast %149 : vector<1xf32> to vector<1x1xf32>
    %cst_101 = arith.constant 3.125000e-02 : f32
    %151 = vector.broadcast %cst_101 : f32 to vector<1x1xf32>
    %152 = arith.mulf %150, %151 : vector<1x1xf32>
    %c3_i32 = arith.constant 3 : i32
    %153 = vector.broadcast %c3_i32 : i32 to vector<1x16xi32>
    %154 = arith.cmpi eq, %75, %153 : vector<1x16xi32>
    %cst_102 = arith.constant 0.000000e+00 : f32
    %155 = vector.shape_cast %152 : vector<1x1xf32> to vector<1x1xf32>
    %156 = vector.broadcast %155 : vector<1x1xf32> to vector<1x16xf32>
    %157 = vector.broadcast %cst_102 : f32 to vector<1x16xf32>
    %158 = arith.select %154, %156, %157 : vector<1x16xi1>, vector<1x16xf32>
    %159 = arith.addf %137, %158 : vector<1x16xf32>
    %c3_i32_103 = arith.constant 3 : i32
    %160 = vector.broadcast %c3_i32_103 : i32 to vector<16x1xi32>
    %161 = arith.cmpi eq, %76, %160 : vector<16x1xi32>
    %cst_104 = arith.constant 0.000000e+00 : f32
    %162 = vector.shape_cast %152 : vector<1x1xf32> to vector<1x1xf32>
    %163 = vector.broadcast %162 : vector<1x1xf32> to vector<16x1xf32>
    %164 = vector.broadcast %cst_104 : f32 to vector<16x1xf32>
    %165 = arith.select %161, %163, %164 : vector<16x1xi1>, vector<16x1xf32>
    %166 = arith.addf %144, %165 : vector<16x1xf32>
    %167 = vector.extract_strided_slice %73 {offsets = [4, 0], sizes = [16, 32], strides = [1, 1]} : vector<32x32xf32> to vector<16x32xf32>
    %168 = arith.mulf %167, %71 : vector<16x32xf32>
    %cst_105 = arith.constant dense<0.000000e+00> : vector<16xf32>
    %169 = vector.multi_reduction <add>, %168, %cst_105 [1] : vector<16x32xf32> to vector<16xf32>
    %170 = vector.shape_cast %169 : vector<16xf32> to vector<16x1xf32>
    %cst_106 = arith.constant dense<0.000000e+00> : vector<1xf32>
    %171 = vector.multi_reduction <add>, %170, %cst_106 [0] : vector<16x1xf32> to vector<1xf32>
    %172 = vector.shape_cast %171 : vector<1xf32> to vector<1x1xf32>
    %cst_107 = arith.constant 3.125000e-02 : f32
    %173 = vector.broadcast %cst_107 : f32 to vector<1x1xf32>
    %174 = arith.mulf %172, %173 : vector<1x1xf32>
    %c4_i32 = arith.constant 4 : i32
    %175 = vector.broadcast %c4_i32 : i32 to vector<1x16xi32>
    %176 = arith.cmpi eq, %75, %175 : vector<1x16xi32>
    %cst_108 = arith.constant 0.000000e+00 : f32
    %177 = vector.shape_cast %174 : vector<1x1xf32> to vector<1x1xf32>
    %178 = vector.broadcast %177 : vector<1x1xf32> to vector<1x16xf32>
    %179 = vector.broadcast %cst_108 : f32 to vector<1x16xf32>
    %180 = arith.select %176, %178, %179 : vector<1x16xi1>, vector<1x16xf32>
    %181 = arith.addf %159, %180 : vector<1x16xf32>
    %c4_i32_109 = arith.constant 4 : i32
    %182 = vector.broadcast %c4_i32_109 : i32 to vector<16x1xi32>
    %183 = arith.cmpi eq, %76, %182 : vector<16x1xi32>
    %cst_110 = arith.constant 0.000000e+00 : f32
    %184 = vector.shape_cast %174 : vector<1x1xf32> to vector<1x1xf32>
    %185 = vector.broadcast %184 : vector<1x1xf32> to vector<16x1xf32>
    %186 = vector.broadcast %cst_110 : f32 to vector<16x1xf32>
    %187 = arith.select %183, %185, %186 : vector<16x1xi1>, vector<16x1xf32>
    %188 = arith.addf %166, %187 : vector<16x1xf32>
    %189 = vector.extract_strided_slice %73 {offsets = [5, 0], sizes = [16, 32], strides = [1, 1]} : vector<32x32xf32> to vector<16x32xf32>
    %190 = arith.mulf %189, %71 : vector<16x32xf32>
    %cst_111 = arith.constant dense<0.000000e+00> : vector<16xf32>
    %191 = vector.multi_reduction <add>, %190, %cst_111 [1] : vector<16x32xf32> to vector<16xf32>
    %192 = vector.shape_cast %191 : vector<16xf32> to vector<16x1xf32>
    %cst_112 = arith.constant dense<0.000000e+00> : vector<1xf32>
    %193 = vector.multi_reduction <add>, %192, %cst_112 [0] : vector<16x1xf32> to vector<1xf32>
    %194 = vector.shape_cast %193 : vector<1xf32> to vector<1x1xf32>
    %cst_113 = arith.constant 3.125000e-02 : f32
    %195 = vector.broadcast %cst_113 : f32 to vector<1x1xf32>
    %196 = arith.mulf %194, %195 : vector<1x1xf32>
    %c5_i32 = arith.constant 5 : i32
    %197 = vector.broadcast %c5_i32 : i32 to vector<1x16xi32>
    %198 = arith.cmpi eq, %75, %197 : vector<1x16xi32>
    %cst_114 = arith.constant 0.000000e+00 : f32
    %199 = vector.shape_cast %196 : vector<1x1xf32> to vector<1x1xf32>
    %200 = vector.broadcast %199 : vector<1x1xf32> to vector<1x16xf32>
    %201 = vector.broadcast %cst_114 : f32 to vector<1x16xf32>
    %202 = arith.select %198, %200, %201 : vector<1x16xi1>, vector<1x16xf32>
    %203 = arith.addf %181, %202 : vector<1x16xf32>
    %c5_i32_115 = arith.constant 5 : i32
    %204 = vector.broadcast %c5_i32_115 : i32 to vector<16x1xi32>
    %205 = arith.cmpi eq, %76, %204 : vector<16x1xi32>
    %cst_116 = arith.constant 0.000000e+00 : f32
    %206 = vector.shape_cast %196 : vector<1x1xf32> to vector<1x1xf32>
    %207 = vector.broadcast %206 : vector<1x1xf32> to vector<16x1xf32>
    %208 = vector.broadcast %cst_116 : f32 to vector<16x1xf32>
    %209 = arith.select %205, %207, %208 : vector<16x1xi1>, vector<16x1xf32>
    %210 = arith.addf %188, %209 : vector<16x1xf32>
    %211 = vector.extract_strided_slice %73 {offsets = [6, 0], sizes = [16, 32], strides = [1, 1]} : vector<32x32xf32> to vector<16x32xf32>
    %212 = arith.mulf %211, %71 : vector<16x32xf32>
    %cst_117 = arith.constant dense<0.000000e+00> : vector<16xf32>
    %213 = vector.multi_reduction <add>, %212, %cst_117 [1] : vector<16x32xf32> to vector<16xf32>
    %214 = vector.shape_cast %213 : vector<16xf32> to vector<16x1xf32>
    %cst_118 = arith.constant dense<0.000000e+00> : vector<1xf32>
    %215 = vector.multi_reduction <add>, %214, %cst_118 [0] : vector<16x1xf32> to vector<1xf32>
    %216 = vector.shape_cast %215 : vector<1xf32> to vector<1x1xf32>
    %cst_119 = arith.constant 3.125000e-02 : f32
    %217 = vector.broadcast %cst_119 : f32 to vector<1x1xf32>
    %218 = arith.mulf %216, %217 : vector<1x1xf32>
    %c6_i32 = arith.constant 6 : i32
    %219 = vector.broadcast %c6_i32 : i32 to vector<1x16xi32>
    %220 = arith.cmpi eq, %75, %219 : vector<1x16xi32>
    %cst_120 = arith.constant 0.000000e+00 : f32
    %221 = vector.shape_cast %218 : vector<1x1xf32> to vector<1x1xf32>
    %222 = vector.broadcast %221 : vector<1x1xf32> to vector<1x16xf32>
    %223 = vector.broadcast %cst_120 : f32 to vector<1x16xf32>
    %224 = arith.select %220, %222, %223 : vector<1x16xi1>, vector<1x16xf32>
    %225 = arith.addf %203, %224 : vector<1x16xf32>
    %c6_i32_121 = arith.constant 6 : i32
    %226 = vector.broadcast %c6_i32_121 : i32 to vector<16x1xi32>
    %227 = arith.cmpi eq, %76, %226 : vector<16x1xi32>
    %cst_122 = arith.constant 0.000000e+00 : f32
    %228 = vector.shape_cast %218 : vector<1x1xf32> to vector<1x1xf32>
    %229 = vector.broadcast %228 : vector<1x1xf32> to vector<16x1xf32>
    %230 = vector.broadcast %cst_122 : f32 to vector<16x1xf32>
    %231 = arith.select %227, %229, %230 : vector<16x1xi1>, vector<16x1xf32>
    %232 = arith.addf %210, %231 : vector<16x1xf32>
    %233 = vector.extract_strided_slice %73 {offsets = [7, 0], sizes = [16, 32], strides = [1, 1]} : vector<32x32xf32> to vector<16x32xf32>
    %234 = arith.mulf %233, %71 : vector<16x32xf32>
    %cst_123 = arith.constant dense<0.000000e+00> : vector<16xf32>
    %235 = vector.multi_reduction <add>, %234, %cst_123 [1] : vector<16x32xf32> to vector<16xf32>
    %236 = vector.shape_cast %235 : vector<16xf32> to vector<16x1xf32>
    %cst_124 = arith.constant dense<0.000000e+00> : vector<1xf32>
    %237 = vector.multi_reduction <add>, %236, %cst_124 [0] : vector<16x1xf32> to vector<1xf32>
    %238 = vector.shape_cast %237 : vector<1xf32> to vector<1x1xf32>
    %cst_125 = arith.constant 3.125000e-02 : f32
    %239 = vector.broadcast %cst_125 : f32 to vector<1x1xf32>
    %240 = arith.mulf %238, %239 : vector<1x1xf32>
    %c7_i32 = arith.constant 7 : i32
    %241 = vector.broadcast %c7_i32 : i32 to vector<1x16xi32>
    %242 = arith.cmpi eq, %75, %241 : vector<1x16xi32>
    %cst_126 = arith.constant 0.000000e+00 : f32
    %243 = vector.shape_cast %240 : vector<1x1xf32> to vector<1x1xf32>
    %244 = vector.broadcast %243 : vector<1x1xf32> to vector<1x16xf32>
    %245 = vector.broadcast %cst_126 : f32 to vector<1x16xf32>
    %246 = arith.select %242, %244, %245 : vector<1x16xi1>, vector<1x16xf32>
    %247 = arith.addf %225, %246 : vector<1x16xf32>
    %c7_i32_127 = arith.constant 7 : i32
    %248 = vector.broadcast %c7_i32_127 : i32 to vector<16x1xi32>
    %249 = arith.cmpi eq, %76, %248 : vector<16x1xi32>
    %cst_128 = arith.constant 0.000000e+00 : f32
    %250 = vector.shape_cast %240 : vector<1x1xf32> to vector<1x1xf32>
    %251 = vector.broadcast %250 : vector<1x1xf32> to vector<16x1xf32>
    %252 = vector.broadcast %cst_128 : f32 to vector<16x1xf32>
    %253 = arith.select %249, %251, %252 : vector<16x1xi1>, vector<16x1xf32>
    %254 = arith.addf %232, %253 : vector<16x1xf32>
    %255 = vector.extract_strided_slice %73 {offsets = [8, 0], sizes = [16, 32], strides = [1, 1]} : vector<32x32xf32> to vector<16x32xf32>
    %256 = arith.mulf %255, %71 : vector<16x32xf32>
    %cst_129 = arith.constant dense<0.000000e+00> : vector<16xf32>
    %257 = vector.multi_reduction <add>, %256, %cst_129 [1] : vector<16x32xf32> to vector<16xf32>
    %258 = vector.shape_cast %257 : vector<16xf32> to vector<16x1xf32>
    %cst_130 = arith.constant dense<0.000000e+00> : vector<1xf32>
    %259 = vector.multi_reduction <add>, %258, %cst_130 [0] : vector<16x1xf32> to vector<1xf32>
    %260 = vector.shape_cast %259 : vector<1xf32> to vector<1x1xf32>
    %cst_131 = arith.constant 3.125000e-02 : f32
    %261 = vector.broadcast %cst_131 : f32 to vector<1x1xf32>
    %262 = arith.mulf %260, %261 : vector<1x1xf32>
    %c8_i32 = arith.constant 8 : i32
    %263 = vector.broadcast %c8_i32 : i32 to vector<1x16xi32>
    %264 = arith.cmpi eq, %75, %263 : vector<1x16xi32>
    %cst_132 = arith.constant 0.000000e+00 : f32
    %265 = vector.shape_cast %262 : vector<1x1xf32> to vector<1x1xf32>
    %266 = vector.broadcast %265 : vector<1x1xf32> to vector<1x16xf32>
    %267 = vector.broadcast %cst_132 : f32 to vector<1x16xf32>
    %268 = arith.select %264, %266, %267 : vector<1x16xi1>, vector<1x16xf32>
    %269 = arith.addf %247, %268 : vector<1x16xf32>
    %c8_i32_133 = arith.constant 8 : i32
    %270 = vector.broadcast %c8_i32_133 : i32 to vector<16x1xi32>
    %271 = arith.cmpi eq, %76, %270 : vector<16x1xi32>
    %cst_134 = arith.constant 0.000000e+00 : f32
    %272 = vector.shape_cast %262 : vector<1x1xf32> to vector<1x1xf32>
    %273 = vector.broadcast %272 : vector<1x1xf32> to vector<16x1xf32>
    %274 = vector.broadcast %cst_134 : f32 to vector<16x1xf32>
    %275 = arith.select %271, %273, %274 : vector<16x1xi1>, vector<16x1xf32>
    %276 = arith.addf %254, %275 : vector<16x1xf32>
    %277 = vector.extract_strided_slice %73 {offsets = [9, 0], sizes = [16, 32], strides = [1, 1]} : vector<32x32xf32> to vector<16x32xf32>
    %278 = arith.mulf %277, %71 : vector<16x32xf32>
    %cst_135 = arith.constant dense<0.000000e+00> : vector<16xf32>
    %279 = vector.multi_reduction <add>, %278, %cst_135 [1] : vector<16x32xf32> to vector<16xf32>
    %280 = vector.shape_cast %279 : vector<16xf32> to vector<16x1xf32>
    %cst_136 = arith.constant dense<0.000000e+00> : vector<1xf32>
    %281 = vector.multi_reduction <add>, %280, %cst_136 [0] : vector<16x1xf32> to vector<1xf32>
    %282 = vector.shape_cast %281 : vector<1xf32> to vector<1x1xf32>
    %cst_137 = arith.constant 3.125000e-02 : f32
    %283 = vector.broadcast %cst_137 : f32 to vector<1x1xf32>
    %284 = arith.mulf %282, %283 : vector<1x1xf32>
    %c9_i32 = arith.constant 9 : i32
    %285 = vector.broadcast %c9_i32 : i32 to vector<1x16xi32>
    %286 = arith.cmpi eq, %75, %285 : vector<1x16xi32>
    %cst_138 = arith.constant 0.000000e+00 : f32
    %287 = vector.shape_cast %284 : vector<1x1xf32> to vector<1x1xf32>
    %288 = vector.broadcast %287 : vector<1x1xf32> to vector<1x16xf32>
    %289 = vector.broadcast %cst_138 : f32 to vector<1x16xf32>
    %290 = arith.select %286, %288, %289 : vector<1x16xi1>, vector<1x16xf32>
    %291 = arith.addf %269, %290 : vector<1x16xf32>
    %c9_i32_139 = arith.constant 9 : i32
    %292 = vector.broadcast %c9_i32_139 : i32 to vector<16x1xi32>
    %293 = arith.cmpi eq, %76, %292 : vector<16x1xi32>
    %cst_140 = arith.constant 0.000000e+00 : f32
    %294 = vector.shape_cast %284 : vector<1x1xf32> to vector<1x1xf32>
    %295 = vector.broadcast %294 : vector<1x1xf32> to vector<16x1xf32>
    %296 = vector.broadcast %cst_140 : f32 to vector<16x1xf32>
    %297 = arith.select %293, %295, %296 : vector<16x1xi1>, vector<16x1xf32>
    %298 = arith.addf %276, %297 : vector<16x1xf32>
    %299 = vector.extract_strided_slice %73 {offsets = [10, 0], sizes = [16, 32], strides = [1, 1]} : vector<32x32xf32> to vector<16x32xf32>
    %300 = arith.mulf %299, %71 : vector<16x32xf32>
    %cst_141 = arith.constant dense<0.000000e+00> : vector<16xf32>
    %301 = vector.multi_reduction <add>, %300, %cst_141 [1] : vector<16x32xf32> to vector<16xf32>
    %302 = vector.shape_cast %301 : vector<16xf32> to vector<16x1xf32>
    %cst_142 = arith.constant dense<0.000000e+00> : vector<1xf32>
    %303 = vector.multi_reduction <add>, %302, %cst_142 [0] : vector<16x1xf32> to vector<1xf32>
    %304 = vector.shape_cast %303 : vector<1xf32> to vector<1x1xf32>
    %cst_143 = arith.constant 3.125000e-02 : f32
    %305 = vector.broadcast %cst_143 : f32 to vector<1x1xf32>
    %306 = arith.mulf %304, %305 : vector<1x1xf32>
    %c10_i32 = arith.constant 10 : i32
    %307 = vector.broadcast %c10_i32 : i32 to vector<1x16xi32>
    %308 = arith.cmpi eq, %75, %307 : vector<1x16xi32>
    %cst_144 = arith.constant 0.000000e+00 : f32
    %309 = vector.shape_cast %306 : vector<1x1xf32> to vector<1x1xf32>
    %310 = vector.broadcast %309 : vector<1x1xf32> to vector<1x16xf32>
    %311 = vector.broadcast %cst_144 : f32 to vector<1x16xf32>
    %312 = arith.select %308, %310, %311 : vector<1x16xi1>, vector<1x16xf32>
    %313 = arith.addf %291, %312 : vector<1x16xf32>
    %c10_i32_145 = arith.constant 10 : i32
    %314 = vector.broadcast %c10_i32_145 : i32 to vector<16x1xi32>
    %315 = arith.cmpi eq, %76, %314 : vector<16x1xi32>
    %cst_146 = arith.constant 0.000000e+00 : f32
    %316 = vector.shape_cast %306 : vector<1x1xf32> to vector<1x1xf32>
    %317 = vector.broadcast %316 : vector<1x1xf32> to vector<16x1xf32>
    %318 = vector.broadcast %cst_146 : f32 to vector<16x1xf32>
    %319 = arith.select %315, %317, %318 : vector<16x1xi1>, vector<16x1xf32>
    %320 = arith.addf %298, %319 : vector<16x1xf32>
    %321 = vector.extract_strided_slice %73 {offsets = [11, 0], sizes = [16, 32], strides = [1, 1]} : vector<32x32xf32> to vector<16x32xf32>
    %322 = arith.mulf %321, %71 : vector<16x32xf32>
    %cst_147 = arith.constant dense<0.000000e+00> : vector<16xf32>
    %323 = vector.multi_reduction <add>, %322, %cst_147 [1] : vector<16x32xf32> to vector<16xf32>
    %324 = vector.shape_cast %323 : vector<16xf32> to vector<16x1xf32>
    %cst_148 = arith.constant dense<0.000000e+00> : vector<1xf32>
    %325 = vector.multi_reduction <add>, %324, %cst_148 [0] : vector<16x1xf32> to vector<1xf32>
    %326 = vector.shape_cast %325 : vector<1xf32> to vector<1x1xf32>
    %cst_149 = arith.constant 3.125000e-02 : f32
    %327 = vector.broadcast %cst_149 : f32 to vector<1x1xf32>
    %328 = arith.mulf %326, %327 : vector<1x1xf32>
    %c11_i32 = arith.constant 11 : i32
    %329 = vector.broadcast %c11_i32 : i32 to vector<1x16xi32>
    %330 = arith.cmpi eq, %75, %329 : vector<1x16xi32>
    %cst_150 = arith.constant 0.000000e+00 : f32
    %331 = vector.shape_cast %328 : vector<1x1xf32> to vector<1x1xf32>
    %332 = vector.broadcast %331 : vector<1x1xf32> to vector<1x16xf32>
    %333 = vector.broadcast %cst_150 : f32 to vector<1x16xf32>
    %334 = arith.select %330, %332, %333 : vector<1x16xi1>, vector<1x16xf32>
    %335 = arith.addf %313, %334 : vector<1x16xf32>
    %c11_i32_151 = arith.constant 11 : i32
    %336 = vector.broadcast %c11_i32_151 : i32 to vector<16x1xi32>
    %337 = arith.cmpi eq, %76, %336 : vector<16x1xi32>
    %cst_152 = arith.constant 0.000000e+00 : f32
    %338 = vector.shape_cast %328 : vector<1x1xf32> to vector<1x1xf32>
    %339 = vector.broadcast %338 : vector<1x1xf32> to vector<16x1xf32>
    %340 = vector.broadcast %cst_152 : f32 to vector<16x1xf32>
    %341 = arith.select %337, %339, %340 : vector<16x1xi1>, vector<16x1xf32>
    %342 = arith.addf %320, %341 : vector<16x1xf32>
    %343 = vector.extract_strided_slice %73 {offsets = [12, 0], sizes = [16, 32], strides = [1, 1]} : vector<32x32xf32> to vector<16x32xf32>
    %344 = arith.mulf %343, %71 : vector<16x32xf32>
    %cst_153 = arith.constant dense<0.000000e+00> : vector<16xf32>
    %345 = vector.multi_reduction <add>, %344, %cst_153 [1] : vector<16x32xf32> to vector<16xf32>
    %346 = vector.shape_cast %345 : vector<16xf32> to vector<16x1xf32>
    %cst_154 = arith.constant dense<0.000000e+00> : vector<1xf32>
    %347 = vector.multi_reduction <add>, %346, %cst_154 [0] : vector<16x1xf32> to vector<1xf32>
    %348 = vector.shape_cast %347 : vector<1xf32> to vector<1x1xf32>
    %cst_155 = arith.constant 3.125000e-02 : f32
    %349 = vector.broadcast %cst_155 : f32 to vector<1x1xf32>
    %350 = arith.mulf %348, %349 : vector<1x1xf32>
    %c12_i32 = arith.constant 12 : i32
    %351 = vector.broadcast %c12_i32 : i32 to vector<1x16xi32>
    %352 = arith.cmpi eq, %75, %351 : vector<1x16xi32>
    %cst_156 = arith.constant 0.000000e+00 : f32
    %353 = vector.shape_cast %350 : vector<1x1xf32> to vector<1x1xf32>
    %354 = vector.broadcast %353 : vector<1x1xf32> to vector<1x16xf32>
    %355 = vector.broadcast %cst_156 : f32 to vector<1x16xf32>
    %356 = arith.select %352, %354, %355 : vector<1x16xi1>, vector<1x16xf32>
    %357 = arith.addf %335, %356 : vector<1x16xf32>
    %c12_i32_157 = arith.constant 12 : i32
    %358 = vector.broadcast %c12_i32_157 : i32 to vector<16x1xi32>
    %359 = arith.cmpi eq, %76, %358 : vector<16x1xi32>
    %cst_158 = arith.constant 0.000000e+00 : f32
    %360 = vector.shape_cast %350 : vector<1x1xf32> to vector<1x1xf32>
    %361 = vector.broadcast %360 : vector<1x1xf32> to vector<16x1xf32>
    %362 = vector.broadcast %cst_158 : f32 to vector<16x1xf32>
    %363 = arith.select %359, %361, %362 : vector<16x1xi1>, vector<16x1xf32>
    %364 = arith.addf %342, %363 : vector<16x1xf32>
    %365 = vector.extract_strided_slice %73 {offsets = [13, 0], sizes = [16, 32], strides = [1, 1]} : vector<32x32xf32> to vector<16x32xf32>
    %366 = arith.mulf %365, %71 : vector<16x32xf32>
    %cst_159 = arith.constant dense<0.000000e+00> : vector<16xf32>
    %367 = vector.multi_reduction <add>, %366, %cst_159 [1] : vector<16x32xf32> to vector<16xf32>
    %368 = vector.shape_cast %367 : vector<16xf32> to vector<16x1xf32>
    %cst_160 = arith.constant dense<0.000000e+00> : vector<1xf32>
    %369 = vector.multi_reduction <add>, %368, %cst_160 [0] : vector<16x1xf32> to vector<1xf32>
    %370 = vector.shape_cast %369 : vector<1xf32> to vector<1x1xf32>
    %cst_161 = arith.constant 3.125000e-02 : f32
    %371 = vector.broadcast %cst_161 : f32 to vector<1x1xf32>
    %372 = arith.mulf %370, %371 : vector<1x1xf32>
    %c13_i32 = arith.constant 13 : i32
    %373 = vector.broadcast %c13_i32 : i32 to vector<1x16xi32>
    %374 = arith.cmpi eq, %75, %373 : vector<1x16xi32>
    %cst_162 = arith.constant 0.000000e+00 : f32
    %375 = vector.shape_cast %372 : vector<1x1xf32> to vector<1x1xf32>
    %376 = vector.broadcast %375 : vector<1x1xf32> to vector<1x16xf32>
    %377 = vector.broadcast %cst_162 : f32 to vector<1x16xf32>
    %378 = arith.select %374, %376, %377 : vector<1x16xi1>, vector<1x16xf32>
    %379 = arith.addf %357, %378 : vector<1x16xf32>
    %c13_i32_163 = arith.constant 13 : i32
    %380 = vector.broadcast %c13_i32_163 : i32 to vector<16x1xi32>
    %381 = arith.cmpi eq, %76, %380 : vector<16x1xi32>
    %cst_164 = arith.constant 0.000000e+00 : f32
    %382 = vector.shape_cast %372 : vector<1x1xf32> to vector<1x1xf32>
    %383 = vector.broadcast %382 : vector<1x1xf32> to vector<16x1xf32>
    %384 = vector.broadcast %cst_164 : f32 to vector<16x1xf32>
    %385 = arith.select %381, %383, %384 : vector<16x1xi1>, vector<16x1xf32>
    %386 = arith.addf %364, %385 : vector<16x1xf32>
    %387 = vector.extract_strided_slice %73 {offsets = [14, 0], sizes = [16, 32], strides = [1, 1]} : vector<32x32xf32> to vector<16x32xf32>
    %388 = arith.mulf %387, %71 : vector<16x32xf32>
    %cst_165 = arith.constant dense<0.000000e+00> : vector<16xf32>
    %389 = vector.multi_reduction <add>, %388, %cst_165 [1] : vector<16x32xf32> to vector<16xf32>
    %390 = vector.shape_cast %389 : vector<16xf32> to vector<16x1xf32>
    %cst_166 = arith.constant dense<0.000000e+00> : vector<1xf32>
    %391 = vector.multi_reduction <add>, %390, %cst_166 [0] : vector<16x1xf32> to vector<1xf32>
    %392 = vector.shape_cast %391 : vector<1xf32> to vector<1x1xf32>
    %cst_167 = arith.constant 3.125000e-02 : f32
    %393 = vector.broadcast %cst_167 : f32 to vector<1x1xf32>
    %394 = arith.mulf %392, %393 : vector<1x1xf32>
    %c14_i32 = arith.constant 14 : i32
    %395 = vector.broadcast %c14_i32 : i32 to vector<1x16xi32>
    %396 = arith.cmpi eq, %75, %395 : vector<1x16xi32>
    %cst_168 = arith.constant 0.000000e+00 : f32
    %397 = vector.shape_cast %394 : vector<1x1xf32> to vector<1x1xf32>
    %398 = vector.broadcast %397 : vector<1x1xf32> to vector<1x16xf32>
    %399 = vector.broadcast %cst_168 : f32 to vector<1x16xf32>
    %400 = arith.select %396, %398, %399 : vector<1x16xi1>, vector<1x16xf32>
    %401 = arith.addf %379, %400 : vector<1x16xf32>
    %c14_i32_169 = arith.constant 14 : i32
    %402 = vector.broadcast %c14_i32_169 : i32 to vector<16x1xi32>
    %403 = arith.cmpi eq, %76, %402 : vector<16x1xi32>
    %cst_170 = arith.constant 0.000000e+00 : f32
    %404 = vector.shape_cast %394 : vector<1x1xf32> to vector<1x1xf32>
    %405 = vector.broadcast %404 : vector<1x1xf32> to vector<16x1xf32>
    %406 = vector.broadcast %cst_170 : f32 to vector<16x1xf32>
    %407 = arith.select %403, %405, %406 : vector<16x1xi1>, vector<16x1xf32>
    %408 = arith.addf %386, %407 : vector<16x1xf32>
    %409 = vector.extract_strided_slice %73 {offsets = [15, 0], sizes = [16, 32], strides = [1, 1]} : vector<32x32xf32> to vector<16x32xf32>
    %410 = arith.mulf %409, %71 : vector<16x32xf32>
    %cst_171 = arith.constant dense<0.000000e+00> : vector<16xf32>
    %411 = vector.multi_reduction <add>, %410, %cst_171 [1] : vector<16x32xf32> to vector<16xf32>
    %412 = vector.shape_cast %411 : vector<16xf32> to vector<16x1xf32>
    %cst_172 = arith.constant dense<0.000000e+00> : vector<1xf32>
    %413 = vector.multi_reduction <add>, %412, %cst_172 [0] : vector<16x1xf32> to vector<1xf32>
    %414 = vector.shape_cast %413 : vector<1xf32> to vector<1x1xf32>
    %cst_173 = arith.constant 3.125000e-02 : f32
    %415 = vector.broadcast %cst_173 : f32 to vector<1x1xf32>
    %416 = arith.mulf %414, %415 : vector<1x1xf32>
    %c15_i32 = arith.constant 15 : i32
    %417 = vector.broadcast %c15_i32 : i32 to vector<1x16xi32>
    %418 = arith.cmpi eq, %75, %417 : vector<1x16xi32>
    %cst_174 = arith.constant 0.000000e+00 : f32
    %419 = vector.shape_cast %416 : vector<1x1xf32> to vector<1x1xf32>
    %420 = vector.broadcast %419 : vector<1x1xf32> to vector<1x16xf32>
    %421 = vector.broadcast %cst_174 : f32 to vector<1x16xf32>
    %422 = arith.select %418, %420, %421 : vector<1x16xi1>, vector<1x16xf32>
    %423 = arith.addf %401, %422 : vector<1x16xf32>
    %c15_i32_175 = arith.constant 15 : i32
    %424 = vector.broadcast %c15_i32_175 : i32 to vector<16x1xi32>
    %425 = arith.cmpi eq, %76, %424 : vector<16x1xi32>
    %cst_176 = arith.constant 0.000000e+00 : f32
    %426 = vector.shape_cast %416 : vector<1x1xf32> to vector<1x1xf32>
    %427 = vector.broadcast %426 : vector<1x1xf32> to vector<16x1xf32>
    %428 = vector.broadcast %cst_176 : f32 to vector<16x1xf32>
    %429 = arith.select %425, %427, %428 : vector<16x1xi1>, vector<16x1xf32>
    %430 = arith.addf %408, %429 : vector<16x1xf32>
    %431 = vector.broadcast %430 : vector<16x1xf32> to vector<16x16xf32>
    %432 = vector.broadcast %423 : vector<1x16xf32> to vector<16x16xf32>
    %433 = arith.cmpf ogt, %431, %432 : vector<16x16xf32>
    %cst_177 = arith.constant 1.000000e+00 : f32
    %cst_178 = arith.constant 0.000000e+00 : f32
    %434 = vector.broadcast %cst_177 : f32 to vector<16x16xf32>
    %435 = vector.broadcast %cst_178 : f32 to vector<16x16xf32>
    %436 = arith.select %433, %434, %435 : vector<16x16xi1>, vector<16x16xf32>
    %cst_179 = arith.constant dense<0.000000e+00> : vector<16xf32>
    %437 = vector.multi_reduction <add>, %436, %cst_179 [0] : vector<16x16xf32> to vector<16xf32>
    %438 = vector.shape_cast %437 : vector<16xf32> to vector<1x16xf32>
    %cst_180 = arith.constant 8.000000e+00 : f32
    %439 = vector.broadcast %cst_180 : f32 to vector<1x16xf32>
    %440 = arith.cmpf olt, %438, %439 : vector<1x16xf32>
    %cst_181 = arith.constant -1.000000e+30 : f32
    %441 = vector.broadcast %cst_181 : f32 to vector<1x16xf32>
    %442 = arith.select %440, %423, %441 : vector<1x16xi1>, vector<1x16xf32>
    %cst_182 = arith.constant dense<0xFF800000> : vector<1xf32>
    %443 = vector.multi_reduction <maximumf>, %442, %cst_182 [1] : vector<1x16xf32> to vector<1xf32>
    %444 = vector.shape_cast %443 : vector<1xf32> to vector<1x1xf32>
    %445 = vector.broadcast %444 : vector<1x1xf32> to vector<1x16xf32>
    %446 = arith.subf %423, %445 : vector<1x16xf32>
    %447 = math.exp %446 : vector<1x16xf32>
    %cst_183 = arith.constant 0.000000e+00 : f32
    %448 = vector.broadcast %cst_183 : f32 to vector<1x16xf32>
    %449 = arith.select %440, %447, %448 : vector<1x16xi1>, vector<1x16xf32>
    %cst_184 = arith.constant dense<0.000000e+00> : vector<1xf32>
    %450 = vector.multi_reduction <add>, %449, %cst_184 [1] : vector<1x16xf32> to vector<1xf32>
    %451 = vector.shape_cast %450 : vector<1xf32> to vector<1x1xf32>
    %452 = vector.broadcast %451 : vector<1x1xf32> to vector<1x16xf32>
    %453 = arith.divf %449, %452 : vector<1x16xf32>
    %cst_185 = arith.constant 0.000000e+00 : f32
    %454 = vector.broadcast %cst_185 : f32 to vector<16x32xf32>
    %455 = vector.extract_strided_slice %74 {offsets = [0, 0], sizes = [16, 32], strides = [1, 1]} : vector<32x32xf32> to vector<16x32xf32>
    %c0_i32_186 = arith.constant 0 : i32
    %456 = vector.broadcast %c0_i32_186 : i32 to vector<1x16xi32>
    %457 = arith.cmpi eq, %75, %456 : vector<1x16xi32>
    %cst_187 = arith.constant 0.000000e+00 : f32
    %458 = vector.broadcast %cst_187 : f32 to vector<1x16xf32>
    %459 = arith.select %457, %453, %458 : vector<1x16xi1>, vector<1x16xf32>
    %cst_188 = arith.constant dense<0.000000e+00> : vector<1xf32>
    %460 = vector.multi_reduction <add>, %459, %cst_188 [1] : vector<1x16xf32> to vector<1xf32>
    %461 = vector.shape_cast %460 : vector<1xf32> to vector<1x1xf32>
    %462 = vector.broadcast %461 : vector<1x1xf32> to vector<16x32xf32>
    %463 = arith.mulf %462, %455 : vector<16x32xf32>
    %464 = arith.addf %454, %463 : vector<16x32xf32>
    %465 = vector.extract_strided_slice %74 {offsets = [1, 0], sizes = [16, 32], strides = [1, 1]} : vector<32x32xf32> to vector<16x32xf32>
    %c1_i32_189 = arith.constant 1 : i32
    %466 = vector.broadcast %c1_i32_189 : i32 to vector<1x16xi32>
    %467 = arith.cmpi eq, %75, %466 : vector<1x16xi32>
    %cst_190 = arith.constant 0.000000e+00 : f32
    %468 = vector.broadcast %cst_190 : f32 to vector<1x16xf32>
    %469 = arith.select %467, %453, %468 : vector<1x16xi1>, vector<1x16xf32>
    %cst_191 = arith.constant dense<0.000000e+00> : vector<1xf32>
    %470 = vector.multi_reduction <add>, %469, %cst_191 [1] : vector<1x16xf32> to vector<1xf32>
    %471 = vector.shape_cast %470 : vector<1xf32> to vector<1x1xf32>
    %472 = vector.broadcast %471 : vector<1x1xf32> to vector<16x32xf32>
    %473 = arith.mulf %472, %465 : vector<16x32xf32>
    %474 = arith.addf %464, %473 : vector<16x32xf32>
    %475 = vector.extract_strided_slice %74 {offsets = [2, 0], sizes = [16, 32], strides = [1, 1]} : vector<32x32xf32> to vector<16x32xf32>
    %c2_i32_192 = arith.constant 2 : i32
    %476 = vector.broadcast %c2_i32_192 : i32 to vector<1x16xi32>
    %477 = arith.cmpi eq, %75, %476 : vector<1x16xi32>
    %cst_193 = arith.constant 0.000000e+00 : f32
    %478 = vector.broadcast %cst_193 : f32 to vector<1x16xf32>
    %479 = arith.select %477, %453, %478 : vector<1x16xi1>, vector<1x16xf32>
    %cst_194 = arith.constant dense<0.000000e+00> : vector<1xf32>
    %480 = vector.multi_reduction <add>, %479, %cst_194 [1] : vector<1x16xf32> to vector<1xf32>
    %481 = vector.shape_cast %480 : vector<1xf32> to vector<1x1xf32>
    %482 = vector.broadcast %481 : vector<1x1xf32> to vector<16x32xf32>
    %483 = arith.mulf %482, %475 : vector<16x32xf32>
    %484 = arith.addf %474, %483 : vector<16x32xf32>
    %485 = vector.extract_strided_slice %74 {offsets = [3, 0], sizes = [16, 32], strides = [1, 1]} : vector<32x32xf32> to vector<16x32xf32>
    %c3_i32_195 = arith.constant 3 : i32
    %486 = vector.broadcast %c3_i32_195 : i32 to vector<1x16xi32>
    %487 = arith.cmpi eq, %75, %486 : vector<1x16xi32>
    %cst_196 = arith.constant 0.000000e+00 : f32
    %488 = vector.broadcast %cst_196 : f32 to vector<1x16xf32>
    %489 = arith.select %487, %453, %488 : vector<1x16xi1>, vector<1x16xf32>
    %cst_197 = arith.constant dense<0.000000e+00> : vector<1xf32>
    %490 = vector.multi_reduction <add>, %489, %cst_197 [1] : vector<1x16xf32> to vector<1xf32>
    %491 = vector.shape_cast %490 : vector<1xf32> to vector<1x1xf32>
    %492 = vector.broadcast %491 : vector<1x1xf32> to vector<16x32xf32>
    %493 = arith.mulf %492, %485 : vector<16x32xf32>
    %494 = arith.addf %484, %493 : vector<16x32xf32>
    %495 = vector.extract_strided_slice %74 {offsets = [4, 0], sizes = [16, 32], strides = [1, 1]} : vector<32x32xf32> to vector<16x32xf32>
    %c4_i32_198 = arith.constant 4 : i32
    %496 = vector.broadcast %c4_i32_198 : i32 to vector<1x16xi32>
    %497 = arith.cmpi eq, %75, %496 : vector<1x16xi32>
    %cst_199 = arith.constant 0.000000e+00 : f32
    %498 = vector.broadcast %cst_199 : f32 to vector<1x16xf32>
    %499 = arith.select %497, %453, %498 : vector<1x16xi1>, vector<1x16xf32>
    %cst_200 = arith.constant dense<0.000000e+00> : vector<1xf32>
    %500 = vector.multi_reduction <add>, %499, %cst_200 [1] : vector<1x16xf32> to vector<1xf32>
    %501 = vector.shape_cast %500 : vector<1xf32> to vector<1x1xf32>
    %502 = vector.broadcast %501 : vector<1x1xf32> to vector<16x32xf32>
    %503 = arith.mulf %502, %495 : vector<16x32xf32>
    %504 = arith.addf %494, %503 : vector<16x32xf32>
    %505 = vector.extract_strided_slice %74 {offsets = [5, 0], sizes = [16, 32], strides = [1, 1]} : vector<32x32xf32> to vector<16x32xf32>
    %c5_i32_201 = arith.constant 5 : i32
    %506 = vector.broadcast %c5_i32_201 : i32 to vector<1x16xi32>
    %507 = arith.cmpi eq, %75, %506 : vector<1x16xi32>
    %cst_202 = arith.constant 0.000000e+00 : f32
    %508 = vector.broadcast %cst_202 : f32 to vector<1x16xf32>
    %509 = arith.select %507, %453, %508 : vector<1x16xi1>, vector<1x16xf32>
    %cst_203 = arith.constant dense<0.000000e+00> : vector<1xf32>
    %510 = vector.multi_reduction <add>, %509, %cst_203 [1] : vector<1x16xf32> to vector<1xf32>
    %511 = vector.shape_cast %510 : vector<1xf32> to vector<1x1xf32>
    %512 = vector.broadcast %511 : vector<1x1xf32> to vector<16x32xf32>
    %513 = arith.mulf %512, %505 : vector<16x32xf32>
    %514 = arith.addf %504, %513 : vector<16x32xf32>
    %515 = vector.extract_strided_slice %74 {offsets = [6, 0], sizes = [16, 32], strides = [1, 1]} : vector<32x32xf32> to vector<16x32xf32>
    %c6_i32_204 = arith.constant 6 : i32
    %516 = vector.broadcast %c6_i32_204 : i32 to vector<1x16xi32>
    %517 = arith.cmpi eq, %75, %516 : vector<1x16xi32>
    %cst_205 = arith.constant 0.000000e+00 : f32
    %518 = vector.broadcast %cst_205 : f32 to vector<1x16xf32>
    %519 = arith.select %517, %453, %518 : vector<1x16xi1>, vector<1x16xf32>
    %cst_206 = arith.constant dense<0.000000e+00> : vector<1xf32>
    %520 = vector.multi_reduction <add>, %519, %cst_206 [1] : vector<1x16xf32> to vector<1xf32>
    %521 = vector.shape_cast %520 : vector<1xf32> to vector<1x1xf32>
    %522 = vector.broadcast %521 : vector<1x1xf32> to vector<16x32xf32>
    %523 = arith.mulf %522, %515 : vector<16x32xf32>
    %524 = arith.addf %514, %523 : vector<16x32xf32>
    %525 = vector.extract_strided_slice %74 {offsets = [7, 0], sizes = [16, 32], strides = [1, 1]} : vector<32x32xf32> to vector<16x32xf32>
    %c7_i32_207 = arith.constant 7 : i32
    %526 = vector.broadcast %c7_i32_207 : i32 to vector<1x16xi32>
    %527 = arith.cmpi eq, %75, %526 : vector<1x16xi32>
    %cst_208 = arith.constant 0.000000e+00 : f32
    %528 = vector.broadcast %cst_208 : f32 to vector<1x16xf32>
    %529 = arith.select %527, %453, %528 : vector<1x16xi1>, vector<1x16xf32>
    %cst_209 = arith.constant dense<0.000000e+00> : vector<1xf32>
    %530 = vector.multi_reduction <add>, %529, %cst_209 [1] : vector<1x16xf32> to vector<1xf32>
    %531 = vector.shape_cast %530 : vector<1xf32> to vector<1x1xf32>
    %532 = vector.broadcast %531 : vector<1x1xf32> to vector<16x32xf32>
    %533 = arith.mulf %532, %525 : vector<16x32xf32>
    %534 = arith.addf %524, %533 : vector<16x32xf32>
    %535 = vector.extract_strided_slice %74 {offsets = [8, 0], sizes = [16, 32], strides = [1, 1]} : vector<32x32xf32> to vector<16x32xf32>
    %c8_i32_210 = arith.constant 8 : i32
    %536 = vector.broadcast %c8_i32_210 : i32 to vector<1x16xi32>
    %537 = arith.cmpi eq, %75, %536 : vector<1x16xi32>
    %cst_211 = arith.constant 0.000000e+00 : f32
    %538 = vector.broadcast %cst_211 : f32 to vector<1x16xf32>
    %539 = arith.select %537, %453, %538 : vector<1x16xi1>, vector<1x16xf32>
    %cst_212 = arith.constant dense<0.000000e+00> : vector<1xf32>
    %540 = vector.multi_reduction <add>, %539, %cst_212 [1] : vector<1x16xf32> to vector<1xf32>
    %541 = vector.shape_cast %540 : vector<1xf32> to vector<1x1xf32>
    %542 = vector.broadcast %541 : vector<1x1xf32> to vector<16x32xf32>
    %543 = arith.mulf %542, %535 : vector<16x32xf32>
    %544 = arith.addf %534, %543 : vector<16x32xf32>
    %545 = vector.extract_strided_slice %74 {offsets = [9, 0], sizes = [16, 32], strides = [1, 1]} : vector<32x32xf32> to vector<16x32xf32>
    %c9_i32_213 = arith.constant 9 : i32
    %546 = vector.broadcast %c9_i32_213 : i32 to vector<1x16xi32>
    %547 = arith.cmpi eq, %75, %546 : vector<1x16xi32>
    %cst_214 = arith.constant 0.000000e+00 : f32
    %548 = vector.broadcast %cst_214 : f32 to vector<1x16xf32>
    %549 = arith.select %547, %453, %548 : vector<1x16xi1>, vector<1x16xf32>
    %cst_215 = arith.constant dense<0.000000e+00> : vector<1xf32>
    %550 = vector.multi_reduction <add>, %549, %cst_215 [1] : vector<1x16xf32> to vector<1xf32>
    %551 = vector.shape_cast %550 : vector<1xf32> to vector<1x1xf32>
    %552 = vector.broadcast %551 : vector<1x1xf32> to vector<16x32xf32>
    %553 = arith.mulf %552, %545 : vector<16x32xf32>
    %554 = arith.addf %544, %553 : vector<16x32xf32>
    %555 = vector.extract_strided_slice %74 {offsets = [10, 0], sizes = [16, 32], strides = [1, 1]} : vector<32x32xf32> to vector<16x32xf32>
    %c10_i32_216 = arith.constant 10 : i32
    %556 = vector.broadcast %c10_i32_216 : i32 to vector<1x16xi32>
    %557 = arith.cmpi eq, %75, %556 : vector<1x16xi32>
    %cst_217 = arith.constant 0.000000e+00 : f32
    %558 = vector.broadcast %cst_217 : f32 to vector<1x16xf32>
    %559 = arith.select %557, %453, %558 : vector<1x16xi1>, vector<1x16xf32>
    %cst_218 = arith.constant dense<0.000000e+00> : vector<1xf32>
    %560 = vector.multi_reduction <add>, %559, %cst_218 [1] : vector<1x16xf32> to vector<1xf32>
    %561 = vector.shape_cast %560 : vector<1xf32> to vector<1x1xf32>
    %562 = vector.broadcast %561 : vector<1x1xf32> to vector<16x32xf32>
    %563 = arith.mulf %562, %555 : vector<16x32xf32>
    %564 = arith.addf %554, %563 : vector<16x32xf32>
    %565 = vector.extract_strided_slice %74 {offsets = [11, 0], sizes = [16, 32], strides = [1, 1]} : vector<32x32xf32> to vector<16x32xf32>
    %c11_i32_219 = arith.constant 11 : i32
    %566 = vector.broadcast %c11_i32_219 : i32 to vector<1x16xi32>
    %567 = arith.cmpi eq, %75, %566 : vector<1x16xi32>
    %cst_220 = arith.constant 0.000000e+00 : f32
    %568 = vector.broadcast %cst_220 : f32 to vector<1x16xf32>
    %569 = arith.select %567, %453, %568 : vector<1x16xi1>, vector<1x16xf32>
    %cst_221 = arith.constant dense<0.000000e+00> : vector<1xf32>
    %570 = vector.multi_reduction <add>, %569, %cst_221 [1] : vector<1x16xf32> to vector<1xf32>
    %571 = vector.shape_cast %570 : vector<1xf32> to vector<1x1xf32>
    %572 = vector.broadcast %571 : vector<1x1xf32> to vector<16x32xf32>
    %573 = arith.mulf %572, %565 : vector<16x32xf32>
    %574 = arith.addf %564, %573 : vector<16x32xf32>
    %575 = vector.extract_strided_slice %74 {offsets = [12, 0], sizes = [16, 32], strides = [1, 1]} : vector<32x32xf32> to vector<16x32xf32>
    %c12_i32_222 = arith.constant 12 : i32
    %576 = vector.broadcast %c12_i32_222 : i32 to vector<1x16xi32>
    %577 = arith.cmpi eq, %75, %576 : vector<1x16xi32>
    %cst_223 = arith.constant 0.000000e+00 : f32
    %578 = vector.broadcast %cst_223 : f32 to vector<1x16xf32>
    %579 = arith.select %577, %453, %578 : vector<1x16xi1>, vector<1x16xf32>
    %cst_224 = arith.constant dense<0.000000e+00> : vector<1xf32>
    %580 = vector.multi_reduction <add>, %579, %cst_224 [1] : vector<1x16xf32> to vector<1xf32>
    %581 = vector.shape_cast %580 : vector<1xf32> to vector<1x1xf32>
    %582 = vector.broadcast %581 : vector<1x1xf32> to vector<16x32xf32>
    %583 = arith.mulf %582, %575 : vector<16x32xf32>
    %584 = arith.addf %574, %583 : vector<16x32xf32>
    %585 = vector.extract_strided_slice %74 {offsets = [13, 0], sizes = [16, 32], strides = [1, 1]} : vector<32x32xf32> to vector<16x32xf32>
    %c13_i32_225 = arith.constant 13 : i32
    %586 = vector.broadcast %c13_i32_225 : i32 to vector<1x16xi32>
    %587 = arith.cmpi eq, %75, %586 : vector<1x16xi32>
    %cst_226 = arith.constant 0.000000e+00 : f32
    %588 = vector.broadcast %cst_226 : f32 to vector<1x16xf32>
    %589 = arith.select %587, %453, %588 : vector<1x16xi1>, vector<1x16xf32>
    %cst_227 = arith.constant dense<0.000000e+00> : vector<1xf32>
    %590 = vector.multi_reduction <add>, %589, %cst_227 [1] : vector<1x16xf32> to vector<1xf32>
    %591 = vector.shape_cast %590 : vector<1xf32> to vector<1x1xf32>
    %592 = vector.broadcast %591 : vector<1x1xf32> to vector<16x32xf32>
    %593 = arith.mulf %592, %585 : vector<16x32xf32>
    %594 = arith.addf %584, %593 : vector<16x32xf32>
    %595 = vector.extract_strided_slice %74 {offsets = [14, 0], sizes = [16, 32], strides = [1, 1]} : vector<32x32xf32> to vector<16x32xf32>
    %c14_i32_228 = arith.constant 14 : i32
    %596 = vector.broadcast %c14_i32_228 : i32 to vector<1x16xi32>
    %597 = arith.cmpi eq, %75, %596 : vector<1x16xi32>
    %cst_229 = arith.constant 0.000000e+00 : f32
    %598 = vector.broadcast %cst_229 : f32 to vector<1x16xf32>
    %599 = arith.select %597, %453, %598 : vector<1x16xi1>, vector<1x16xf32>
    %cst_230 = arith.constant dense<0.000000e+00> : vector<1xf32>
    %600 = vector.multi_reduction <add>, %599, %cst_230 [1] : vector<1x16xf32> to vector<1xf32>
    %601 = vector.shape_cast %600 : vector<1xf32> to vector<1x1xf32>
    %602 = vector.broadcast %601 : vector<1x1xf32> to vector<16x32xf32>
    %603 = arith.mulf %602, %595 : vector<16x32xf32>
    %604 = arith.addf %594, %603 : vector<16x32xf32>
    %605 = vector.extract_strided_slice %74 {offsets = [15, 0], sizes = [16, 32], strides = [1, 1]} : vector<32x32xf32> to vector<16x32xf32>
    %c15_i32_231 = arith.constant 15 : i32
    %606 = vector.broadcast %c15_i32_231 : i32 to vector<1x16xi32>
    %607 = arith.cmpi eq, %75, %606 : vector<1x16xi32>
    %cst_232 = arith.constant 0.000000e+00 : f32
    %608 = vector.broadcast %cst_232 : f32 to vector<1x16xf32>
    %609 = arith.select %607, %453, %608 : vector<1x16xi1>, vector<1x16xf32>
    %cst_233 = arith.constant dense<0.000000e+00> : vector<1xf32>
    %610 = vector.multi_reduction <add>, %609, %cst_233 [1] : vector<1x16xf32> to vector<1xf32>
    %611 = vector.shape_cast %610 : vector<1xf32> to vector<1x1xf32>
    %612 = vector.broadcast %611 : vector<1x1xf32> to vector<16x32xf32>
    %613 = arith.mulf %612, %605 : vector<16x32xf32>
    %614 = arith.addf %604, %613 : vector<16x32xf32>
    %cst_234 = arith.constant dense<0.000000e+00> : vector<16x32xf32>
    %615 = tpu.matmul %614, %16, %cst_234 {dimension_numbers = #tpu.dot_dimension_numbers<[1], [0], [0], [1], [0, 0, 1, 1], [], []>} : vector<16x32xf32>, vector<32x32xf32>, vector<16x32xf32> -> vector<16x32xf32>
    %616 = vector.broadcast %17 : vector<1x32xf32> to vector<16x32xf32>
    %617 = arith.addf %615, %616 : vector<16x32xf32>
    %618 = arith.addf %59, %617 : vector<16x32xf32>
    %cst_235 = arith.constant dense<0.000000e+00> : vector<16x32xf32>
    %619 = tpu.matmul %0, %618, %cst_235 {dimension_numbers = #tpu.dot_dimension_numbers<[1], [0], [0], [1], [0, 0, 1, 1], [], []>} : vector<16x16xf32>, vector<16x32xf32>, vector<16x32xf32> -> vector<16x32xf32>
    %620 = arith.subf %618, %619 : vector<16x32xf32>
    %cst_236 = arith.constant dense<0.000000e+00> : vector<16x32xf32>
    %621 = tpu.matmul %620, %18, %cst_236 {dimension_numbers = #tpu.dot_dimension_numbers<[1], [0], [0], [1], [0, 0, 1, 1], [], []>} : vector<16x32xf32>, vector<32x32xf32>, vector<16x32xf32> -> vector<16x32xf32>
    %cst_237 = arith.constant 5.000000e-01 : f32
    %622 = vector.broadcast %cst_237 : f32 to vector<16x32xf32>
    %623 = arith.mulf %622, %621 : vector<16x32xf32>
    %cst_238 = arith.constant 4.471500e-02 : f32
    %624 = vector.broadcast %cst_238 : f32 to vector<16x32xf32>
    %625 = arith.mulf %624, %621 : vector<16x32xf32>
    %626 = arith.mulf %625, %621 : vector<16x32xf32>
    %627 = arith.mulf %626, %621 : vector<16x32xf32>
    %628 = arith.addf %621, %627 : vector<16x32xf32>
    %cst_239 = arith.constant 0.797884583 : f32
    %629 = vector.broadcast %cst_239 : f32 to vector<16x32xf32>
    %630 = arith.mulf %629, %628 : vector<16x32xf32>
    %631 = math.tanh %630 : vector<16x32xf32>
    %cst_240 = arith.constant 1.000000e+00 : f32
    %632 = vector.broadcast %cst_240 : f32 to vector<16x32xf32>
    %633 = arith.addf %632, %631 : vector<16x32xf32>
    %634 = arith.mulf %623, %633 : vector<16x32xf32>
    %cst_241 = arith.constant dense<0.000000e+00> : vector<16x32xf32>
    %635 = tpu.matmul %634, %19, %cst_241 {dimension_numbers = #tpu.dot_dimension_numbers<[1], [0], [0], [1], [0, 0, 1, 1], [], []>} : vector<16x32xf32>, vector<32x32xf32>, vector<16x32xf32> -> vector<16x32xf32>
    %636 = arith.addf %620, %635 : vector<16x32xf32>
    %cst_242 = arith.constant dense<0.000000e+00> : vector<16x32xf32>
    %637 = tpu.matmul %0, %636, %cst_242 {dimension_numbers = #tpu.dot_dimension_numbers<[1], [0], [0], [1], [0, 0, 1, 1], [], []>} : vector<16x16xf32>, vector<16x32xf32>, vector<16x32xf32> -> vector<16x32xf32>
    %638 = arith.subf %636, %637 : vector<16x32xf32>
    %cst_243 = arith.constant dense<0.000000e+00> : vector<16xf32>
    %639 = vector.multi_reduction <add>, %638, %cst_243 [1] : vector<16x32xf32> to vector<16xf32>
    %640 = vector.shape_cast %639 : vector<16xf32> to vector<16x1xf32>
    %cst_244 = arith.constant 3.200000e+01 : f32
    %641 = vector.broadcast %cst_244 : f32 to vector<16x1xf32>
    %642 = arith.divf %640, %641 : vector<16x1xf32>
    %643 = vector.broadcast %642 : vector<16x1xf32> to vector<16x32xf32>
    %644 = arith.subf %638, %643 : vector<16x32xf32>
    %645 = arith.mulf %644, %644 : vector<16x32xf32>
    %cst_245 = arith.constant dense<0.000000e+00> : vector<16xf32>
    %646 = vector.multi_reduction <add>, %645, %cst_245 [1] : vector<16x32xf32> to vector<16xf32>
    %647 = vector.shape_cast %646 : vector<16xf32> to vector<16x1xf32>
    %cst_246 = arith.constant 3.200000e+01 : f32
    %648 = vector.broadcast %cst_246 : f32 to vector<16x1xf32>
    %649 = arith.divf %647, %648 : vector<16x1xf32>
    %650 = vector.broadcast %642 : vector<16x1xf32> to vector<16x32xf32>
    %651 = arith.subf %638, %650 : vector<16x32xf32>
    %cst_247 = arith.constant 9.99999974E-6 : f32
    %652 = vector.broadcast %cst_247 : f32 to vector<16x1xf32>
    %653 = arith.addf %649, %652 : vector<16x1xf32>
    %654 = math.rsqrt %653 : vector<16x1xf32>
    %655 = vector.broadcast %654 : vector<16x1xf32> to vector<16x32xf32>
    %656 = arith.mulf %651, %655 : vector<16x32xf32>
    %657 = vector.broadcast %20 : vector<1x32xf32> to vector<16x32xf32>
    %658 = arith.mulf %656, %657 : vector<16x32xf32>
    %659 = vector.broadcast %21 : vector<1x32xf32> to vector<16x32xf32>
    %660 = arith.addf %658, %659 : vector<16x32xf32>
    %cst_248 = arith.constant dense<0.000000e+00> : vector<32xf32>
    %661 = vector.multi_reduction <add>, %660, %cst_248 [0] : vector<16x32xf32> to vector<32xf32>
    %662 = vector.shape_cast %661 : vector<32xf32> to vector<1x32xf32>
    %cst_249 = arith.constant 1.600000e+01 : f32
    %663 = vector.broadcast %cst_249 : f32 to vector<1x32xf32>
    %664 = arith.divf %662, %663 : vector<1x32xf32>
    %665 = vector.broadcast %664 : vector<1x32xf32> to vector<16x32xf32>
    %666 = arith.subf %660, %665 : vector<16x32xf32>
    %cst_250 = arith.constant dense<0.000000e+00> : vector<16x96xf32>
    %667 = tpu.matmul %66, %22, %cst_250 {dimension_numbers = #tpu.dot_dimension_numbers<[1], [0], [0], [1], [0, 0, 1, 1], [], []>} : vector<16x32xf32>, vector<32x96xf32>, vector<16x96xf32> -> vector<16x96xf32>
    %668 = vector.broadcast %23 : vector<1x96xf32> to vector<16x96xf32>
    %669 = arith.addf %667, %668 : vector<16x96xf32>
    %670 = vector.extract_strided_slice %669 {offsets = [0, 0], sizes = [16, 32], strides = [1, 1]} : vector<16x96xf32> to vector<16x32xf32>
    %671 = vector.extract_strided_slice %669 {offsets = [0, 32], sizes = [16, 32], strides = [1, 1]} : vector<16x96xf32> to vector<16x32xf32>
    %672 = vector.extract_strided_slice %669 {offsets = [0, 64], sizes = [16, 32], strides = [1, 1]} : vector<16x96xf32> to vector<16x32xf32>
    %673 = tpu.concatenate %670, %670 in 0 : vector<16x32xf32>, vector<16x32xf32> -> vector<32x32xf32>
    %674 = tpu.concatenate %672, %672 in 0 : vector<16x32xf32>, vector<16x32xf32> -> vector<32x32xf32>
    %675 = tpu.iota {dimensions = array<i32: 1>} : vector<1x16xi32>
    %676 = tpu.iota {dimensions = array<i32: 0>} : vector<16x1xi32>
    %cst_251 = arith.constant 0.000000e+00 : f32
    %677 = vector.broadcast %cst_251 : f32 to vector<1x16xf32>
    %cst_252 = arith.constant 0.000000e+00 : f32
    %678 = vector.broadcast %cst_252 : f32 to vector<16x1xf32>
    %679 = vector.extract_strided_slice %673 {offsets = [0, 0], sizes = [16, 32], strides = [1, 1]} : vector<32x32xf32> to vector<16x32xf32>
    %680 = arith.mulf %679, %671 : vector<16x32xf32>
    %cst_253 = arith.constant dense<0.000000e+00> : vector<16xf32>
    %681 = vector.multi_reduction <add>, %680, %cst_253 [1] : vector<16x32xf32> to vector<16xf32>
    %682 = vector.shape_cast %681 : vector<16xf32> to vector<16x1xf32>
    %cst_254 = arith.constant dense<0.000000e+00> : vector<1xf32>
    %683 = vector.multi_reduction <add>, %682, %cst_254 [0] : vector<16x1xf32> to vector<1xf32>
    %684 = vector.shape_cast %683 : vector<1xf32> to vector<1x1xf32>
    %cst_255 = arith.constant 3.125000e-02 : f32
    %685 = vector.broadcast %cst_255 : f32 to vector<1x1xf32>
    %686 = arith.mulf %684, %685 : vector<1x1xf32>
    %c0_i32_256 = arith.constant 0 : i32
    %687 = vector.broadcast %c0_i32_256 : i32 to vector<1x16xi32>
    %688 = arith.cmpi eq, %675, %687 : vector<1x16xi32>
    %cst_257 = arith.constant 0.000000e+00 : f32
    %689 = vector.shape_cast %686 : vector<1x1xf32> to vector<1x1xf32>
    %690 = vector.broadcast %689 : vector<1x1xf32> to vector<1x16xf32>
    %691 = vector.broadcast %cst_257 : f32 to vector<1x16xf32>
    %692 = arith.select %688, %690, %691 : vector<1x16xi1>, vector<1x16xf32>
    %693 = arith.addf %677, %692 : vector<1x16xf32>
    %c0_i32_258 = arith.constant 0 : i32
    %694 = vector.broadcast %c0_i32_258 : i32 to vector<16x1xi32>
    %695 = arith.cmpi eq, %676, %694 : vector<16x1xi32>
    %cst_259 = arith.constant 0.000000e+00 : f32
    %696 = vector.shape_cast %686 : vector<1x1xf32> to vector<1x1xf32>
    %697 = vector.broadcast %696 : vector<1x1xf32> to vector<16x1xf32>
    %698 = vector.broadcast %cst_259 : f32 to vector<16x1xf32>
    %699 = arith.select %695, %697, %698 : vector<16x1xi1>, vector<16x1xf32>
    %700 = arith.addf %678, %699 : vector<16x1xf32>
    %701 = vector.extract_strided_slice %673 {offsets = [1, 0], sizes = [16, 32], strides = [1, 1]} : vector<32x32xf32> to vector<16x32xf32>
    %702 = arith.mulf %701, %671 : vector<16x32xf32>
    %cst_260 = arith.constant dense<0.000000e+00> : vector<16xf32>
    %703 = vector.multi_reduction <add>, %702, %cst_260 [1] : vector<16x32xf32> to vector<16xf32>
    %704 = vector.shape_cast %703 : vector<16xf32> to vector<16x1xf32>
    %cst_261 = arith.constant dense<0.000000e+00> : vector<1xf32>
    %705 = vector.multi_reduction <add>, %704, %cst_261 [0] : vector<16x1xf32> to vector<1xf32>
    %706 = vector.shape_cast %705 : vector<1xf32> to vector<1x1xf32>
    %cst_262 = arith.constant 3.125000e-02 : f32
    %707 = vector.broadcast %cst_262 : f32 to vector<1x1xf32>
    %708 = arith.mulf %706, %707 : vector<1x1xf32>
    %c1_i32_263 = arith.constant 1 : i32
    %709 = vector.broadcast %c1_i32_263 : i32 to vector<1x16xi32>
    %710 = arith.cmpi eq, %675, %709 : vector<1x16xi32>
    %cst_264 = arith.constant 0.000000e+00 : f32
    %711 = vector.shape_cast %708 : vector<1x1xf32> to vector<1x1xf32>
    %712 = vector.broadcast %711 : vector<1x1xf32> to vector<1x16xf32>
    %713 = vector.broadcast %cst_264 : f32 to vector<1x16xf32>
    %714 = arith.select %710, %712, %713 : vector<1x16xi1>, vector<1x16xf32>
    %715 = arith.addf %693, %714 : vector<1x16xf32>
    %c1_i32_265 = arith.constant 1 : i32
    %716 = vector.broadcast %c1_i32_265 : i32 to vector<16x1xi32>
    %717 = arith.cmpi eq, %676, %716 : vector<16x1xi32>
    %cst_266 = arith.constant 0.000000e+00 : f32
    %718 = vector.shape_cast %708 : vector<1x1xf32> to vector<1x1xf32>
    %719 = vector.broadcast %718 : vector<1x1xf32> to vector<16x1xf32>
    %720 = vector.broadcast %cst_266 : f32 to vector<16x1xf32>
    %721 = arith.select %717, %719, %720 : vector<16x1xi1>, vector<16x1xf32>
    %722 = arith.addf %700, %721 : vector<16x1xf32>
    %723 = vector.extract_strided_slice %673 {offsets = [2, 0], sizes = [16, 32], strides = [1, 1]} : vector<32x32xf32> to vector<16x32xf32>
    %724 = arith.mulf %723, %671 : vector<16x32xf32>
    %cst_267 = arith.constant dense<0.000000e+00> : vector<16xf32>
    %725 = vector.multi_reduction <add>, %724, %cst_267 [1] : vector<16x32xf32> to vector<16xf32>
    %726 = vector.shape_cast %725 : vector<16xf32> to vector<16x1xf32>
    %cst_268 = arith.constant dense<0.000000e+00> : vector<1xf32>
    %727 = vector.multi_reduction <add>, %726, %cst_268 [0] : vector<16x1xf32> to vector<1xf32>
    %728 = vector.shape_cast %727 : vector<1xf32> to vector<1x1xf32>
    %cst_269 = arith.constant 3.125000e-02 : f32
    %729 = vector.broadcast %cst_269 : f32 to vector<1x1xf32>
    %730 = arith.mulf %728, %729 : vector<1x1xf32>
    %c2_i32_270 = arith.constant 2 : i32
    %731 = vector.broadcast %c2_i32_270 : i32 to vector<1x16xi32>
    %732 = arith.cmpi eq, %675, %731 : vector<1x16xi32>
    %cst_271 = arith.constant 0.000000e+00 : f32
    %733 = vector.shape_cast %730 : vector<1x1xf32> to vector<1x1xf32>
    %734 = vector.broadcast %733 : vector<1x1xf32> to vector<1x16xf32>
    %735 = vector.broadcast %cst_271 : f32 to vector<1x16xf32>
    %736 = arith.select %732, %734, %735 : vector<1x16xi1>, vector<1x16xf32>
    %737 = arith.addf %715, %736 : vector<1x16xf32>
    %c2_i32_272 = arith.constant 2 : i32
    %738 = vector.broadcast %c2_i32_272 : i32 to vector<16x1xi32>
    %739 = arith.cmpi eq, %676, %738 : vector<16x1xi32>
    %cst_273 = arith.constant 0.000000e+00 : f32
    %740 = vector.shape_cast %730 : vector<1x1xf32> to vector<1x1xf32>
    %741 = vector.broadcast %740 : vector<1x1xf32> to vector<16x1xf32>
    %742 = vector.broadcast %cst_273 : f32 to vector<16x1xf32>
    %743 = arith.select %739, %741, %742 : vector<16x1xi1>, vector<16x1xf32>
    %744 = arith.addf %722, %743 : vector<16x1xf32>
    %745 = vector.extract_strided_slice %673 {offsets = [3, 0], sizes = [16, 32], strides = [1, 1]} : vector<32x32xf32> to vector<16x32xf32>
    %746 = arith.mulf %745, %671 : vector<16x32xf32>
    %cst_274 = arith.constant dense<0.000000e+00> : vector<16xf32>
    %747 = vector.multi_reduction <add>, %746, %cst_274 [1] : vector<16x32xf32> to vector<16xf32>
    %748 = vector.shape_cast %747 : vector<16xf32> to vector<16x1xf32>
    %cst_275 = arith.constant dense<0.000000e+00> : vector<1xf32>
    %749 = vector.multi_reduction <add>, %748, %cst_275 [0] : vector<16x1xf32> to vector<1xf32>
    %750 = vector.shape_cast %749 : vector<1xf32> to vector<1x1xf32>
    %cst_276 = arith.constant 3.125000e-02 : f32
    %751 = vector.broadcast %cst_276 : f32 to vector<1x1xf32>
    %752 = arith.mulf %750, %751 : vector<1x1xf32>
    %c3_i32_277 = arith.constant 3 : i32
    %753 = vector.broadcast %c3_i32_277 : i32 to vector<1x16xi32>
    %754 = arith.cmpi eq, %675, %753 : vector<1x16xi32>
    %cst_278 = arith.constant 0.000000e+00 : f32
    %755 = vector.shape_cast %752 : vector<1x1xf32> to vector<1x1xf32>
    %756 = vector.broadcast %755 : vector<1x1xf32> to vector<1x16xf32>
    %757 = vector.broadcast %cst_278 : f32 to vector<1x16xf32>
    %758 = arith.select %754, %756, %757 : vector<1x16xi1>, vector<1x16xf32>
    %759 = arith.addf %737, %758 : vector<1x16xf32>
    %c3_i32_279 = arith.constant 3 : i32
    %760 = vector.broadcast %c3_i32_279 : i32 to vector<16x1xi32>
    %761 = arith.cmpi eq, %676, %760 : vector<16x1xi32>
    %cst_280 = arith.constant 0.000000e+00 : f32
    %762 = vector.shape_cast %752 : vector<1x1xf32> to vector<1x1xf32>
    %763 = vector.broadcast %762 : vector<1x1xf32> to vector<16x1xf32>
    %764 = vector.broadcast %cst_280 : f32 to vector<16x1xf32>
    %765 = arith.select %761, %763, %764 : vector<16x1xi1>, vector<16x1xf32>
    %766 = arith.addf %744, %765 : vector<16x1xf32>
    %767 = vector.extract_strided_slice %673 {offsets = [4, 0], sizes = [16, 32], strides = [1, 1]} : vector<32x32xf32> to vector<16x32xf32>
    %768 = arith.mulf %767, %671 : vector<16x32xf32>
    %cst_281 = arith.constant dense<0.000000e+00> : vector<16xf32>
    %769 = vector.multi_reduction <add>, %768, %cst_281 [1] : vector<16x32xf32> to vector<16xf32>
    %770 = vector.shape_cast %769 : vector<16xf32> to vector<16x1xf32>
    %cst_282 = arith.constant dense<0.000000e+00> : vector<1xf32>
    %771 = vector.multi_reduction <add>, %770, %cst_282 [0] : vector<16x1xf32> to vector<1xf32>
    %772 = vector.shape_cast %771 : vector<1xf32> to vector<1x1xf32>
    %cst_283 = arith.constant 3.125000e-02 : f32
    %773 = vector.broadcast %cst_283 : f32 to vector<1x1xf32>
    %774 = arith.mulf %772, %773 : vector<1x1xf32>
    %c4_i32_284 = arith.constant 4 : i32
    %775 = vector.broadcast %c4_i32_284 : i32 to vector<1x16xi32>
    %776 = arith.cmpi eq, %675, %775 : vector<1x16xi32>
    %cst_285 = arith.constant 0.000000e+00 : f32
    %777 = vector.shape_cast %774 : vector<1x1xf32> to vector<1x1xf32>
    %778 = vector.broadcast %777 : vector<1x1xf32> to vector<1x16xf32>
    %779 = vector.broadcast %cst_285 : f32 to vector<1x16xf32>
    %780 = arith.select %776, %778, %779 : vector<1x16xi1>, vector<1x16xf32>
    %781 = arith.addf %759, %780 : vector<1x16xf32>
    %c4_i32_286 = arith.constant 4 : i32
    %782 = vector.broadcast %c4_i32_286 : i32 to vector<16x1xi32>
    %783 = arith.cmpi eq, %676, %782 : vector<16x1xi32>
    %cst_287 = arith.constant 0.000000e+00 : f32
    %784 = vector.shape_cast %774 : vector<1x1xf32> to vector<1x1xf32>
    %785 = vector.broadcast %784 : vector<1x1xf32> to vector<16x1xf32>
    %786 = vector.broadcast %cst_287 : f32 to vector<16x1xf32>
    %787 = arith.select %783, %785, %786 : vector<16x1xi1>, vector<16x1xf32>
    %788 = arith.addf %766, %787 : vector<16x1xf32>
    %789 = vector.extract_strided_slice %673 {offsets = [5, 0], sizes = [16, 32], strides = [1, 1]} : vector<32x32xf32> to vector<16x32xf32>
    %790 = arith.mulf %789, %671 : vector<16x32xf32>
    %cst_288 = arith.constant dense<0.000000e+00> : vector<16xf32>
    %791 = vector.multi_reduction <add>, %790, %cst_288 [1] : vector<16x32xf32> to vector<16xf32>
    %792 = vector.shape_cast %791 : vector<16xf32> to vector<16x1xf32>
    %cst_289 = arith.constant dense<0.000000e+00> : vector<1xf32>
    %793 = vector.multi_reduction <add>, %792, %cst_289 [0] : vector<16x1xf32> to vector<1xf32>
    %794 = vector.shape_cast %793 : vector<1xf32> to vector<1x1xf32>
    %cst_290 = arith.constant 3.125000e-02 : f32
    %795 = vector.broadcast %cst_290 : f32 to vector<1x1xf32>
    %796 = arith.mulf %794, %795 : vector<1x1xf32>
    %c5_i32_291 = arith.constant 5 : i32
    %797 = vector.broadcast %c5_i32_291 : i32 to vector<1x16xi32>
    %798 = arith.cmpi eq, %675, %797 : vector<1x16xi32>
    %cst_292 = arith.constant 0.000000e+00 : f32
    %799 = vector.shape_cast %796 : vector<1x1xf32> to vector<1x1xf32>
    %800 = vector.broadcast %799 : vector<1x1xf32> to vector<1x16xf32>
    %801 = vector.broadcast %cst_292 : f32 to vector<1x16xf32>
    %802 = arith.select %798, %800, %801 : vector<1x16xi1>, vector<1x16xf32>
    %803 = arith.addf %781, %802 : vector<1x16xf32>
    %c5_i32_293 = arith.constant 5 : i32
    %804 = vector.broadcast %c5_i32_293 : i32 to vector<16x1xi32>
    %805 = arith.cmpi eq, %676, %804 : vector<16x1xi32>
    %cst_294 = arith.constant 0.000000e+00 : f32
    %806 = vector.shape_cast %796 : vector<1x1xf32> to vector<1x1xf32>
    %807 = vector.broadcast %806 : vector<1x1xf32> to vector<16x1xf32>
    %808 = vector.broadcast %cst_294 : f32 to vector<16x1xf32>
    %809 = arith.select %805, %807, %808 : vector<16x1xi1>, vector<16x1xf32>
    %810 = arith.addf %788, %809 : vector<16x1xf32>
    %811 = vector.extract_strided_slice %673 {offsets = [6, 0], sizes = [16, 32], strides = [1, 1]} : vector<32x32xf32> to vector<16x32xf32>
    %812 = arith.mulf %811, %671 : vector<16x32xf32>
    %cst_295 = arith.constant dense<0.000000e+00> : vector<16xf32>
    %813 = vector.multi_reduction <add>, %812, %cst_295 [1] : vector<16x32xf32> to vector<16xf32>
    %814 = vector.shape_cast %813 : vector<16xf32> to vector<16x1xf32>
    %cst_296 = arith.constant dense<0.000000e+00> : vector<1xf32>
    %815 = vector.multi_reduction <add>, %814, %cst_296 [0] : vector<16x1xf32> to vector<1xf32>
    %816 = vector.shape_cast %815 : vector<1xf32> to vector<1x1xf32>
    %cst_297 = arith.constant 3.125000e-02 : f32
    %817 = vector.broadcast %cst_297 : f32 to vector<1x1xf32>
    %818 = arith.mulf %816, %817 : vector<1x1xf32>
    %c6_i32_298 = arith.constant 6 : i32
    %819 = vector.broadcast %c6_i32_298 : i32 to vector<1x16xi32>
    %820 = arith.cmpi eq, %675, %819 : vector<1x16xi32>
    %cst_299 = arith.constant 0.000000e+00 : f32
    %821 = vector.shape_cast %818 : vector<1x1xf32> to vector<1x1xf32>
    %822 = vector.broadcast %821 : vector<1x1xf32> to vector<1x16xf32>
    %823 = vector.broadcast %cst_299 : f32 to vector<1x16xf32>
    %824 = arith.select %820, %822, %823 : vector<1x16xi1>, vector<1x16xf32>
    %825 = arith.addf %803, %824 : vector<1x16xf32>
    %c6_i32_300 = arith.constant 6 : i32
    %826 = vector.broadcast %c6_i32_300 : i32 to vector<16x1xi32>
    %827 = arith.cmpi eq, %676, %826 : vector<16x1xi32>
    %cst_301 = arith.constant 0.000000e+00 : f32
    %828 = vector.shape_cast %818 : vector<1x1xf32> to vector<1x1xf32>
    %829 = vector.broadcast %828 : vector<1x1xf32> to vector<16x1xf32>
    %830 = vector.broadcast %cst_301 : f32 to vector<16x1xf32>
    %831 = arith.select %827, %829, %830 : vector<16x1xi1>, vector<16x1xf32>
    %832 = arith.addf %810, %831 : vector<16x1xf32>
    %833 = vector.extract_strided_slice %673 {offsets = [7, 0], sizes = [16, 32], strides = [1, 1]} : vector<32x32xf32> to vector<16x32xf32>
    %834 = arith.mulf %833, %671 : vector<16x32xf32>
    %cst_302 = arith.constant dense<0.000000e+00> : vector<16xf32>
    %835 = vector.multi_reduction <add>, %834, %cst_302 [1] : vector<16x32xf32> to vector<16xf32>
    %836 = vector.shape_cast %835 : vector<16xf32> to vector<16x1xf32>
    %cst_303 = arith.constant dense<0.000000e+00> : vector<1xf32>
    %837 = vector.multi_reduction <add>, %836, %cst_303 [0] : vector<16x1xf32> to vector<1xf32>
    %838 = vector.shape_cast %837 : vector<1xf32> to vector<1x1xf32>
    %cst_304 = arith.constant 3.125000e-02 : f32
    %839 = vector.broadcast %cst_304 : f32 to vector<1x1xf32>
    %840 = arith.mulf %838, %839 : vector<1x1xf32>
    %c7_i32_305 = arith.constant 7 : i32
    %841 = vector.broadcast %c7_i32_305 : i32 to vector<1x16xi32>
    %842 = arith.cmpi eq, %675, %841 : vector<1x16xi32>
    %cst_306 = arith.constant 0.000000e+00 : f32
    %843 = vector.shape_cast %840 : vector<1x1xf32> to vector<1x1xf32>
    %844 = vector.broadcast %843 : vector<1x1xf32> to vector<1x16xf32>
    %845 = vector.broadcast %cst_306 : f32 to vector<1x16xf32>
    %846 = arith.select %842, %844, %845 : vector<1x16xi1>, vector<1x16xf32>
    %847 = arith.addf %825, %846 : vector<1x16xf32>
    %c7_i32_307 = arith.constant 7 : i32
    %848 = vector.broadcast %c7_i32_307 : i32 to vector<16x1xi32>
    %849 = arith.cmpi eq, %676, %848 : vector<16x1xi32>
    %cst_308 = arith.constant 0.000000e+00 : f32
    %850 = vector.shape_cast %840 : vector<1x1xf32> to vector<1x1xf32>
    %851 = vector.broadcast %850 : vector<1x1xf32> to vector<16x1xf32>
    %852 = vector.broadcast %cst_308 : f32 to vector<16x1xf32>
    %853 = arith.select %849, %851, %852 : vector<16x1xi1>, vector<16x1xf32>
    %854 = arith.addf %832, %853 : vector<16x1xf32>
    %855 = vector.extract_strided_slice %673 {offsets = [8, 0], sizes = [16, 32], strides = [1, 1]} : vector<32x32xf32> to vector<16x32xf32>
    %856 = arith.mulf %855, %671 : vector<16x32xf32>
    %cst_309 = arith.constant dense<0.000000e+00> : vector<16xf32>
    %857 = vector.multi_reduction <add>, %856, %cst_309 [1] : vector<16x32xf32> to vector<16xf32>
    %858 = vector.shape_cast %857 : vector<16xf32> to vector<16x1xf32>
    %cst_310 = arith.constant dense<0.000000e+00> : vector<1xf32>
    %859 = vector.multi_reduction <add>, %858, %cst_310 [0] : vector<16x1xf32> to vector<1xf32>
    %860 = vector.shape_cast %859 : vector<1xf32> to vector<1x1xf32>
    %cst_311 = arith.constant 3.125000e-02 : f32
    %861 = vector.broadcast %cst_311 : f32 to vector<1x1xf32>
    %862 = arith.mulf %860, %861 : vector<1x1xf32>
    %c8_i32_312 = arith.constant 8 : i32
    %863 = vector.broadcast %c8_i32_312 : i32 to vector<1x16xi32>
    %864 = arith.cmpi eq, %675, %863 : vector<1x16xi32>
    %cst_313 = arith.constant 0.000000e+00 : f32
    %865 = vector.shape_cast %862 : vector<1x1xf32> to vector<1x1xf32>
    %866 = vector.broadcast %865 : vector<1x1xf32> to vector<1x16xf32>
    %867 = vector.broadcast %cst_313 : f32 to vector<1x16xf32>
    %868 = arith.select %864, %866, %867 : vector<1x16xi1>, vector<1x16xf32>
    %869 = arith.addf %847, %868 : vector<1x16xf32>
    %c8_i32_314 = arith.constant 8 : i32
    %870 = vector.broadcast %c8_i32_314 : i32 to vector<16x1xi32>
    %871 = arith.cmpi eq, %676, %870 : vector<16x1xi32>
    %cst_315 = arith.constant 0.000000e+00 : f32
    %872 = vector.shape_cast %862 : vector<1x1xf32> to vector<1x1xf32>
    %873 = vector.broadcast %872 : vector<1x1xf32> to vector<16x1xf32>
    %874 = vector.broadcast %cst_315 : f32 to vector<16x1xf32>
    %875 = arith.select %871, %873, %874 : vector<16x1xi1>, vector<16x1xf32>
    %876 = arith.addf %854, %875 : vector<16x1xf32>
    %877 = vector.extract_strided_slice %673 {offsets = [9, 0], sizes = [16, 32], strides = [1, 1]} : vector<32x32xf32> to vector<16x32xf32>
    %878 = arith.mulf %877, %671 : vector<16x32xf32>
    %cst_316 = arith.constant dense<0.000000e+00> : vector<16xf32>
    %879 = vector.multi_reduction <add>, %878, %cst_316 [1] : vector<16x32xf32> to vector<16xf32>
    %880 = vector.shape_cast %879 : vector<16xf32> to vector<16x1xf32>
    %cst_317 = arith.constant dense<0.000000e+00> : vector<1xf32>
    %881 = vector.multi_reduction <add>, %880, %cst_317 [0] : vector<16x1xf32> to vector<1xf32>
    %882 = vector.shape_cast %881 : vector<1xf32> to vector<1x1xf32>
    %cst_318 = arith.constant 3.125000e-02 : f32
    %883 = vector.broadcast %cst_318 : f32 to vector<1x1xf32>
    %884 = arith.mulf %882, %883 : vector<1x1xf32>
    %c9_i32_319 = arith.constant 9 : i32
    %885 = vector.broadcast %c9_i32_319 : i32 to vector<1x16xi32>
    %886 = arith.cmpi eq, %675, %885 : vector<1x16xi32>
    %cst_320 = arith.constant 0.000000e+00 : f32
    %887 = vector.shape_cast %884 : vector<1x1xf32> to vector<1x1xf32>
    %888 = vector.broadcast %887 : vector<1x1xf32> to vector<1x16xf32>
    %889 = vector.broadcast %cst_320 : f32 to vector<1x16xf32>
    %890 = arith.select %886, %888, %889 : vector<1x16xi1>, vector<1x16xf32>
    %891 = arith.addf %869, %890 : vector<1x16xf32>
    %c9_i32_321 = arith.constant 9 : i32
    %892 = vector.broadcast %c9_i32_321 : i32 to vector<16x1xi32>
    %893 = arith.cmpi eq, %676, %892 : vector<16x1xi32>
    %cst_322 = arith.constant 0.000000e+00 : f32
    %894 = vector.shape_cast %884 : vector<1x1xf32> to vector<1x1xf32>
    %895 = vector.broadcast %894 : vector<1x1xf32> to vector<16x1xf32>
    %896 = vector.broadcast %cst_322 : f32 to vector<16x1xf32>
    %897 = arith.select %893, %895, %896 : vector<16x1xi1>, vector<16x1xf32>
    %898 = arith.addf %876, %897 : vector<16x1xf32>
    %899 = vector.extract_strided_slice %673 {offsets = [10, 0], sizes = [16, 32], strides = [1, 1]} : vector<32x32xf32> to vector<16x32xf32>
    %900 = arith.mulf %899, %671 : vector<16x32xf32>
    %cst_323 = arith.constant dense<0.000000e+00> : vector<16xf32>
    %901 = vector.multi_reduction <add>, %900, %cst_323 [1] : vector<16x32xf32> to vector<16xf32>
    %902 = vector.shape_cast %901 : vector<16xf32> to vector<16x1xf32>
    %cst_324 = arith.constant dense<0.000000e+00> : vector<1xf32>
    %903 = vector.multi_reduction <add>, %902, %cst_324 [0] : vector<16x1xf32> to vector<1xf32>
    %904 = vector.shape_cast %903 : vector<1xf32> to vector<1x1xf32>
    %cst_325 = arith.constant 3.125000e-02 : f32
    %905 = vector.broadcast %cst_325 : f32 to vector<1x1xf32>
    %906 = arith.mulf %904, %905 : vector<1x1xf32>
    %c10_i32_326 = arith.constant 10 : i32
    %907 = vector.broadcast %c10_i32_326 : i32 to vector<1x16xi32>
    %908 = arith.cmpi eq, %675, %907 : vector<1x16xi32>
    %cst_327 = arith.constant 0.000000e+00 : f32
    %909 = vector.shape_cast %906 : vector<1x1xf32> to vector<1x1xf32>
    %910 = vector.broadcast %909 : vector<1x1xf32> to vector<1x16xf32>
    %911 = vector.broadcast %cst_327 : f32 to vector<1x16xf32>
    %912 = arith.select %908, %910, %911 : vector<1x16xi1>, vector<1x16xf32>
    %913 = arith.addf %891, %912 : vector<1x16xf32>
    %c10_i32_328 = arith.constant 10 : i32
    %914 = vector.broadcast %c10_i32_328 : i32 to vector<16x1xi32>
    %915 = arith.cmpi eq, %676, %914 : vector<16x1xi32>
    %cst_329 = arith.constant 0.000000e+00 : f32
    %916 = vector.shape_cast %906 : vector<1x1xf32> to vector<1x1xf32>
    %917 = vector.broadcast %916 : vector<1x1xf32> to vector<16x1xf32>
    %918 = vector.broadcast %cst_329 : f32 to vector<16x1xf32>
    %919 = arith.select %915, %917, %918 : vector<16x1xi1>, vector<16x1xf32>
    %920 = arith.addf %898, %919 : vector<16x1xf32>
    %921 = vector.extract_strided_slice %673 {offsets = [11, 0], sizes = [16, 32], strides = [1, 1]} : vector<32x32xf32> to vector<16x32xf32>
    %922 = arith.mulf %921, %671 : vector<16x32xf32>
    %cst_330 = arith.constant dense<0.000000e+00> : vector<16xf32>
    %923 = vector.multi_reduction <add>, %922, %cst_330 [1] : vector<16x32xf32> to vector<16xf32>
    %924 = vector.shape_cast %923 : vector<16xf32> to vector<16x1xf32>
    %cst_331 = arith.constant dense<0.000000e+00> : vector<1xf32>
    %925 = vector.multi_reduction <add>, %924, %cst_331 [0] : vector<16x1xf32> to vector<1xf32>
    %926 = vector.shape_cast %925 : vector<1xf32> to vector<1x1xf32>
    %cst_332 = arith.constant 3.125000e-02 : f32
    %927 = vector.broadcast %cst_332 : f32 to vector<1x1xf32>
    %928 = arith.mulf %926, %927 : vector<1x1xf32>
    %c11_i32_333 = arith.constant 11 : i32
    %929 = vector.broadcast %c11_i32_333 : i32 to vector<1x16xi32>
    %930 = arith.cmpi eq, %675, %929 : vector<1x16xi32>
    %cst_334 = arith.constant 0.000000e+00 : f32
    %931 = vector.shape_cast %928 : vector<1x1xf32> to vector<1x1xf32>
    %932 = vector.broadcast %931 : vector<1x1xf32> to vector<1x16xf32>
    %933 = vector.broadcast %cst_334 : f32 to vector<1x16xf32>
    %934 = arith.select %930, %932, %933 : vector<1x16xi1>, vector<1x16xf32>
    %935 = arith.addf %913, %934 : vector<1x16xf32>
    %c11_i32_335 = arith.constant 11 : i32
    %936 = vector.broadcast %c11_i32_335 : i32 to vector<16x1xi32>
    %937 = arith.cmpi eq, %676, %936 : vector<16x1xi32>
    %cst_336 = arith.constant 0.000000e+00 : f32
    %938 = vector.shape_cast %928 : vector<1x1xf32> to vector<1x1xf32>
    %939 = vector.broadcast %938 : vector<1x1xf32> to vector<16x1xf32>
    %940 = vector.broadcast %cst_336 : f32 to vector<16x1xf32>
    %941 = arith.select %937, %939, %940 : vector<16x1xi1>, vector<16x1xf32>
    %942 = arith.addf %920, %941 : vector<16x1xf32>
    %943 = vector.extract_strided_slice %673 {offsets = [12, 0], sizes = [16, 32], strides = [1, 1]} : vector<32x32xf32> to vector<16x32xf32>
    %944 = arith.mulf %943, %671 : vector<16x32xf32>
    %cst_337 = arith.constant dense<0.000000e+00> : vector<16xf32>
    %945 = vector.multi_reduction <add>, %944, %cst_337 [1] : vector<16x32xf32> to vector<16xf32>
    %946 = vector.shape_cast %945 : vector<16xf32> to vector<16x1xf32>
    %cst_338 = arith.constant dense<0.000000e+00> : vector<1xf32>
    %947 = vector.multi_reduction <add>, %946, %cst_338 [0] : vector<16x1xf32> to vector<1xf32>
    %948 = vector.shape_cast %947 : vector<1xf32> to vector<1x1xf32>
    %cst_339 = arith.constant 3.125000e-02 : f32
    %949 = vector.broadcast %cst_339 : f32 to vector<1x1xf32>
    %950 = arith.mulf %948, %949 : vector<1x1xf32>
    %c12_i32_340 = arith.constant 12 : i32
    %951 = vector.broadcast %c12_i32_340 : i32 to vector<1x16xi32>
    %952 = arith.cmpi eq, %675, %951 : vector<1x16xi32>
    %cst_341 = arith.constant 0.000000e+00 : f32
    %953 = vector.shape_cast %950 : vector<1x1xf32> to vector<1x1xf32>
    %954 = vector.broadcast %953 : vector<1x1xf32> to vector<1x16xf32>
    %955 = vector.broadcast %cst_341 : f32 to vector<1x16xf32>
    %956 = arith.select %952, %954, %955 : vector<1x16xi1>, vector<1x16xf32>
    %957 = arith.addf %935, %956 : vector<1x16xf32>
    %c12_i32_342 = arith.constant 12 : i32
    %958 = vector.broadcast %c12_i32_342 : i32 to vector<16x1xi32>
    %959 = arith.cmpi eq, %676, %958 : vector<16x1xi32>
    %cst_343 = arith.constant 0.000000e+00 : f32
    %960 = vector.shape_cast %950 : vector<1x1xf32> to vector<1x1xf32>
    %961 = vector.broadcast %960 : vector<1x1xf32> to vector<16x1xf32>
    %962 = vector.broadcast %cst_343 : f32 to vector<16x1xf32>
    %963 = arith.select %959, %961, %962 : vector<16x1xi1>, vector<16x1xf32>
    %964 = arith.addf %942, %963 : vector<16x1xf32>
    %965 = vector.extract_strided_slice %673 {offsets = [13, 0], sizes = [16, 32], strides = [1, 1]} : vector<32x32xf32> to vector<16x32xf32>
    %966 = arith.mulf %965, %671 : vector<16x32xf32>
    %cst_344 = arith.constant dense<0.000000e+00> : vector<16xf32>
    %967 = vector.multi_reduction <add>, %966, %cst_344 [1] : vector<16x32xf32> to vector<16xf32>
    %968 = vector.shape_cast %967 : vector<16xf32> to vector<16x1xf32>
    %cst_345 = arith.constant dense<0.000000e+00> : vector<1xf32>
    %969 = vector.multi_reduction <add>, %968, %cst_345 [0] : vector<16x1xf32> to vector<1xf32>
    %970 = vector.shape_cast %969 : vector<1xf32> to vector<1x1xf32>
    %cst_346 = arith.constant 3.125000e-02 : f32
    %971 = vector.broadcast %cst_346 : f32 to vector<1x1xf32>
    %972 = arith.mulf %970, %971 : vector<1x1xf32>
    %c13_i32_347 = arith.constant 13 : i32
    %973 = vector.broadcast %c13_i32_347 : i32 to vector<1x16xi32>
    %974 = arith.cmpi eq, %675, %973 : vector<1x16xi32>
    %cst_348 = arith.constant 0.000000e+00 : f32
    %975 = vector.shape_cast %972 : vector<1x1xf32> to vector<1x1xf32>
    %976 = vector.broadcast %975 : vector<1x1xf32> to vector<1x16xf32>
    %977 = vector.broadcast %cst_348 : f32 to vector<1x16xf32>
    %978 = arith.select %974, %976, %977 : vector<1x16xi1>, vector<1x16xf32>
    %979 = arith.addf %957, %978 : vector<1x16xf32>
    %c13_i32_349 = arith.constant 13 : i32
    %980 = vector.broadcast %c13_i32_349 : i32 to vector<16x1xi32>
    %981 = arith.cmpi eq, %676, %980 : vector<16x1xi32>
    %cst_350 = arith.constant 0.000000e+00 : f32
    %982 = vector.shape_cast %972 : vector<1x1xf32> to vector<1x1xf32>
    %983 = vector.broadcast %982 : vector<1x1xf32> to vector<16x1xf32>
    %984 = vector.broadcast %cst_350 : f32 to vector<16x1xf32>
    %985 = arith.select %981, %983, %984 : vector<16x1xi1>, vector<16x1xf32>
    %986 = arith.addf %964, %985 : vector<16x1xf32>
    %987 = vector.extract_strided_slice %673 {offsets = [14, 0], sizes = [16, 32], strides = [1, 1]} : vector<32x32xf32> to vector<16x32xf32>
    %988 = arith.mulf %987, %671 : vector<16x32xf32>
    %cst_351 = arith.constant dense<0.000000e+00> : vector<16xf32>
    %989 = vector.multi_reduction <add>, %988, %cst_351 [1] : vector<16x32xf32> to vector<16xf32>
    %990 = vector.shape_cast %989 : vector<16xf32> to vector<16x1xf32>
    %cst_352 = arith.constant dense<0.000000e+00> : vector<1xf32>
    %991 = vector.multi_reduction <add>, %990, %cst_352 [0] : vector<16x1xf32> to vector<1xf32>
    %992 = vector.shape_cast %991 : vector<1xf32> to vector<1x1xf32>
    %cst_353 = arith.constant 3.125000e-02 : f32
    %993 = vector.broadcast %cst_353 : f32 to vector<1x1xf32>
    %994 = arith.mulf %992, %993 : vector<1x1xf32>
    %c14_i32_354 = arith.constant 14 : i32
    %995 = vector.broadcast %c14_i32_354 : i32 to vector<1x16xi32>
    %996 = arith.cmpi eq, %675, %995 : vector<1x16xi32>
    %cst_355 = arith.constant 0.000000e+00 : f32
    %997 = vector.shape_cast %994 : vector<1x1xf32> to vector<1x1xf32>
    %998 = vector.broadcast %997 : vector<1x1xf32> to vector<1x16xf32>
    %999 = vector.broadcast %cst_355 : f32 to vector<1x16xf32>
    %1000 = arith.select %996, %998, %999 : vector<1x16xi1>, vector<1x16xf32>
    %1001 = arith.addf %979, %1000 : vector<1x16xf32>
    %c14_i32_356 = arith.constant 14 : i32
    %1002 = vector.broadcast %c14_i32_356 : i32 to vector<16x1xi32>
    %1003 = arith.cmpi eq, %676, %1002 : vector<16x1xi32>
    %cst_357 = arith.constant 0.000000e+00 : f32
    %1004 = vector.shape_cast %994 : vector<1x1xf32> to vector<1x1xf32>
    %1005 = vector.broadcast %1004 : vector<1x1xf32> to vector<16x1xf32>
    %1006 = vector.broadcast %cst_357 : f32 to vector<16x1xf32>
    %1007 = arith.select %1003, %1005, %1006 : vector<16x1xi1>, vector<16x1xf32>
    %1008 = arith.addf %986, %1007 : vector<16x1xf32>
    %1009 = vector.extract_strided_slice %673 {offsets = [15, 0], sizes = [16, 32], strides = [1, 1]} : vector<32x32xf32> to vector<16x32xf32>
    %1010 = arith.mulf %1009, %671 : vector<16x32xf32>
    %cst_358 = arith.constant dense<0.000000e+00> : vector<16xf32>
    %1011 = vector.multi_reduction <add>, %1010, %cst_358 [1] : vector<16x32xf32> to vector<16xf32>
    %1012 = vector.shape_cast %1011 : vector<16xf32> to vector<16x1xf32>
    %cst_359 = arith.constant dense<0.000000e+00> : vector<1xf32>
    %1013 = vector.multi_reduction <add>, %1012, %cst_359 [0] : vector<16x1xf32> to vector<1xf32>
    %1014 = vector.shape_cast %1013 : vector<1xf32> to vector<1x1xf32>
    %cst_360 = arith.constant 3.125000e-02 : f32
    %1015 = vector.broadcast %cst_360 : f32 to vector<1x1xf32>
    %1016 = arith.mulf %1014, %1015 : vector<1x1xf32>
    %c15_i32_361 = arith.constant 15 : i32
    %1017 = vector.broadcast %c15_i32_361 : i32 to vector<1x16xi32>
    %1018 = arith.cmpi eq, %675, %1017 : vector<1x16xi32>
    %cst_362 = arith.constant 0.000000e+00 : f32
    %1019 = vector.shape_cast %1016 : vector<1x1xf32> to vector<1x1xf32>
    %1020 = vector.broadcast %1019 : vector<1x1xf32> to vector<1x16xf32>
    %1021 = vector.broadcast %cst_362 : f32 to vector<1x16xf32>
    %1022 = arith.select %1018, %1020, %1021 : vector<1x16xi1>, vector<1x16xf32>
    %1023 = arith.addf %1001, %1022 : vector<1x16xf32>
    %c15_i32_363 = arith.constant 15 : i32
    %1024 = vector.broadcast %c15_i32_363 : i32 to vector<16x1xi32>
    %1025 = arith.cmpi eq, %676, %1024 : vector<16x1xi32>
    %cst_364 = arith.constant 0.000000e+00 : f32
    %1026 = vector.shape_cast %1016 : vector<1x1xf32> to vector<1x1xf32>
    %1027 = vector.broadcast %1026 : vector<1x1xf32> to vector<16x1xf32>
    %1028 = vector.broadcast %cst_364 : f32 to vector<16x1xf32>
    %1029 = arith.select %1025, %1027, %1028 : vector<16x1xi1>, vector<16x1xf32>
    %1030 = arith.addf %1008, %1029 : vector<16x1xf32>
    %1031 = vector.broadcast %1030 : vector<16x1xf32> to vector<16x16xf32>
    %1032 = vector.broadcast %1023 : vector<1x16xf32> to vector<16x16xf32>
    %1033 = arith.cmpf ogt, %1031, %1032 : vector<16x16xf32>
    %cst_365 = arith.constant 1.000000e+00 : f32
    %cst_366 = arith.constant 0.000000e+00 : f32
    %1034 = vector.broadcast %cst_365 : f32 to vector<16x16xf32>
    %1035 = vector.broadcast %cst_366 : f32 to vector<16x16xf32>
    %1036 = arith.select %1033, %1034, %1035 : vector<16x16xi1>, vector<16x16xf32>
    %cst_367 = arith.constant dense<0.000000e+00> : vector<16xf32>
    %1037 = vector.multi_reduction <add>, %1036, %cst_367 [0] : vector<16x16xf32> to vector<16xf32>
    %1038 = vector.shape_cast %1037 : vector<16xf32> to vector<1x16xf32>
    %cst_368 = arith.constant 8.000000e+00 : f32
    %1039 = vector.broadcast %cst_368 : f32 to vector<1x16xf32>
    %1040 = arith.cmpf olt, %1038, %1039 : vector<1x16xf32>
    %cst_369 = arith.constant -1.000000e+30 : f32
    %1041 = vector.broadcast %cst_369 : f32 to vector<1x16xf32>
    %1042 = arith.select %1040, %1023, %1041 : vector<1x16xi1>, vector<1x16xf32>
    %cst_370 = arith.constant dense<0xFF800000> : vector<1xf32>
    %1043 = vector.multi_reduction <maximumf>, %1042, %cst_370 [1] : vector<1x16xf32> to vector<1xf32>
    %1044 = vector.shape_cast %1043 : vector<1xf32> to vector<1x1xf32>
    %1045 = vector.broadcast %1044 : vector<1x1xf32> to vector<1x16xf32>
    %1046 = arith.subf %1023, %1045 : vector<1x16xf32>
    %1047 = math.exp %1046 : vector<1x16xf32>
    %cst_371 = arith.constant 0.000000e+00 : f32
    %1048 = vector.broadcast %cst_371 : f32 to vector<1x16xf32>
    %1049 = arith.select %1040, %1047, %1048 : vector<1x16xi1>, vector<1x16xf32>
    %cst_372 = arith.constant dense<0.000000e+00> : vector<1xf32>
    %1050 = vector.multi_reduction <add>, %1049, %cst_372 [1] : vector<1x16xf32> to vector<1xf32>
    %1051 = vector.shape_cast %1050 : vector<1xf32> to vector<1x1xf32>
    %1052 = vector.broadcast %1051 : vector<1x1xf32> to vector<1x16xf32>
    %1053 = arith.divf %1049, %1052 : vector<1x16xf32>
    %cst_373 = arith.constant 0.000000e+00 : f32
    %1054 = vector.broadcast %cst_373 : f32 to vector<16x32xf32>
    %1055 = vector.extract_strided_slice %674 {offsets = [0, 0], sizes = [16, 32], strides = [1, 1]} : vector<32x32xf32> to vector<16x32xf32>
    %c0_i32_374 = arith.constant 0 : i32
    %1056 = vector.broadcast %c0_i32_374 : i32 to vector<1x16xi32>
    %1057 = arith.cmpi eq, %675, %1056 : vector<1x16xi32>
    %cst_375 = arith.constant 0.000000e+00 : f32
    %1058 = vector.broadcast %cst_375 : f32 to vector<1x16xf32>
    %1059 = arith.select %1057, %1053, %1058 : vector<1x16xi1>, vector<1x16xf32>
    %cst_376 = arith.constant dense<0.000000e+00> : vector<1xf32>
    %1060 = vector.multi_reduction <add>, %1059, %cst_376 [1] : vector<1x16xf32> to vector<1xf32>
    %1061 = vector.shape_cast %1060 : vector<1xf32> to vector<1x1xf32>
    %1062 = vector.broadcast %1061 : vector<1x1xf32> to vector<16x32xf32>
    %1063 = arith.mulf %1062, %1055 : vector<16x32xf32>
    %1064 = arith.addf %1054, %1063 : vector<16x32xf32>
    %1065 = vector.extract_strided_slice %674 {offsets = [1, 0], sizes = [16, 32], strides = [1, 1]} : vector<32x32xf32> to vector<16x32xf32>
    %c1_i32_377 = arith.constant 1 : i32
    %1066 = vector.broadcast %c1_i32_377 : i32 to vector<1x16xi32>
    %1067 = arith.cmpi eq, %675, %1066 : vector<1x16xi32>
    %cst_378 = arith.constant 0.000000e+00 : f32
    %1068 = vector.broadcast %cst_378 : f32 to vector<1x16xf32>
    %1069 = arith.select %1067, %1053, %1068 : vector<1x16xi1>, vector<1x16xf32>
    %cst_379 = arith.constant dense<0.000000e+00> : vector<1xf32>
    %1070 = vector.multi_reduction <add>, %1069, %cst_379 [1] : vector<1x16xf32> to vector<1xf32>
    %1071 = vector.shape_cast %1070 : vector<1xf32> to vector<1x1xf32>
    %1072 = vector.broadcast %1071 : vector<1x1xf32> to vector<16x32xf32>
    %1073 = arith.mulf %1072, %1065 : vector<16x32xf32>
    %1074 = arith.addf %1064, %1073 : vector<16x32xf32>
    %1075 = vector.extract_strided_slice %674 {offsets = [2, 0], sizes = [16, 32], strides = [1, 1]} : vector<32x32xf32> to vector<16x32xf32>
    %c2_i32_380 = arith.constant 2 : i32
    %1076 = vector.broadcast %c2_i32_380 : i32 to vector<1x16xi32>
    %1077 = arith.cmpi eq, %675, %1076 : vector<1x16xi32>
    %cst_381 = arith.constant 0.000000e+00 : f32
    %1078 = vector.broadcast %cst_381 : f32 to vector<1x16xf32>
    %1079 = arith.select %1077, %1053, %1078 : vector<1x16xi1>, vector<1x16xf32>
    %cst_382 = arith.constant dense<0.000000e+00> : vector<1xf32>
    %1080 = vector.multi_reduction <add>, %1079, %cst_382 [1] : vector<1x16xf32> to vector<1xf32>
    %1081 = vector.shape_cast %1080 : vector<1xf32> to vector<1x1xf32>
    %1082 = vector.broadcast %1081 : vector<1x1xf32> to vector<16x32xf32>
    %1083 = arith.mulf %1082, %1075 : vector<16x32xf32>
    %1084 = arith.addf %1074, %1083 : vector<16x32xf32>
    %1085 = vector.extract_strided_slice %674 {offsets = [3, 0], sizes = [16, 32], strides = [1, 1]} : vector<32x32xf32> to vector<16x32xf32>
    %c3_i32_383 = arith.constant 3 : i32
    %1086 = vector.broadcast %c3_i32_383 : i32 to vector<1x16xi32>
    %1087 = arith.cmpi eq, %675, %1086 : vector<1x16xi32>
    %cst_384 = arith.constant 0.000000e+00 : f32
    %1088 = vector.broadcast %cst_384 : f32 to vector<1x16xf32>
    %1089 = arith.select %1087, %1053, %1088 : vector<1x16xi1>, vector<1x16xf32>
    %cst_385 = arith.constant dense<0.000000e+00> : vector<1xf32>
    %1090 = vector.multi_reduction <add>, %1089, %cst_385 [1] : vector<1x16xf32> to vector<1xf32>
    %1091 = vector.shape_cast %1090 : vector<1xf32> to vector<1x1xf32>
    %1092 = vector.broadcast %1091 : vector<1x1xf32> to vector<16x32xf32>
    %1093 = arith.mulf %1092, %1085 : vector<16x32xf32>
    %1094 = arith.addf %1084, %1093 : vector<16x32xf32>
    %1095 = vector.extract_strided_slice %674 {offsets = [4, 0], sizes = [16, 32], strides = [1, 1]} : vector<32x32xf32> to vector<16x32xf32>
    %c4_i32_386 = arith.constant 4 : i32
    %1096 = vector.broadcast %c4_i32_386 : i32 to vector<1x16xi32>
    %1097 = arith.cmpi eq, %675, %1096 : vector<1x16xi32>
    %cst_387 = arith.constant 0.000000e+00 : f32
    %1098 = vector.broadcast %cst_387 : f32 to vector<1x16xf32>
    %1099 = arith.select %1097, %1053, %1098 : vector<1x16xi1>, vector<1x16xf32>
    %cst_388 = arith.constant dense<0.000000e+00> : vector<1xf32>
    %1100 = vector.multi_reduction <add>, %1099, %cst_388 [1] : vector<1x16xf32> to vector<1xf32>
    %1101 = vector.shape_cast %1100 : vector<1xf32> to vector<1x1xf32>
    %1102 = vector.broadcast %1101 : vector<1x1xf32> to vector<16x32xf32>
    %1103 = arith.mulf %1102, %1095 : vector<16x32xf32>
    %1104 = arith.addf %1094, %1103 : vector<16x32xf32>
    %1105 = vector.extract_strided_slice %674 {offsets = [5, 0], sizes = [16, 32], strides = [1, 1]} : vector<32x32xf32> to vector<16x32xf32>
    %c5_i32_389 = arith.constant 5 : i32
    %1106 = vector.broadcast %c5_i32_389 : i32 to vector<1x16xi32>
    %1107 = arith.cmpi eq, %675, %1106 : vector<1x16xi32>
    %cst_390 = arith.constant 0.000000e+00 : f32
    %1108 = vector.broadcast %cst_390 : f32 to vector<1x16xf32>
    %1109 = arith.select %1107, %1053, %1108 : vector<1x16xi1>, vector<1x16xf32>
    %cst_391 = arith.constant dense<0.000000e+00> : vector<1xf32>
    %1110 = vector.multi_reduction <add>, %1109, %cst_391 [1] : vector<1x16xf32> to vector<1xf32>
    %1111 = vector.shape_cast %1110 : vector<1xf32> to vector<1x1xf32>
    %1112 = vector.broadcast %1111 : vector<1x1xf32> to vector<16x32xf32>
    %1113 = arith.mulf %1112, %1105 : vector<16x32xf32>
    %1114 = arith.addf %1104, %1113 : vector<16x32xf32>
    %1115 = vector.extract_strided_slice %674 {offsets = [6, 0], sizes = [16, 32], strides = [1, 1]} : vector<32x32xf32> to vector<16x32xf32>
    %c6_i32_392 = arith.constant 6 : i32
    %1116 = vector.broadcast %c6_i32_392 : i32 to vector<1x16xi32>
    %1117 = arith.cmpi eq, %675, %1116 : vector<1x16xi32>
    %cst_393 = arith.constant 0.000000e+00 : f32
    %1118 = vector.broadcast %cst_393 : f32 to vector<1x16xf32>
    %1119 = arith.select %1117, %1053, %1118 : vector<1x16xi1>, vector<1x16xf32>
    %cst_394 = arith.constant dense<0.000000e+00> : vector<1xf32>
    %1120 = vector.multi_reduction <add>, %1119, %cst_394 [1] : vector<1x16xf32> to vector<1xf32>
    %1121 = vector.shape_cast %1120 : vector<1xf32> to vector<1x1xf32>
    %1122 = vector.broadcast %1121 : vector<1x1xf32> to vector<16x32xf32>
    %1123 = arith.mulf %1122, %1115 : vector<16x32xf32>
    %1124 = arith.addf %1114, %1123 : vector<16x32xf32>
    %1125 = vector.extract_strided_slice %674 {offsets = [7, 0], sizes = [16, 32], strides = [1, 1]} : vector<32x32xf32> to vector<16x32xf32>
    %c7_i32_395 = arith.constant 7 : i32
    %1126 = vector.broadcast %c7_i32_395 : i32 to vector<1x16xi32>
    %1127 = arith.cmpi eq, %675, %1126 : vector<1x16xi32>
    %cst_396 = arith.constant 0.000000e+00 : f32
    %1128 = vector.broadcast %cst_396 : f32 to vector<1x16xf32>
    %1129 = arith.select %1127, %1053, %1128 : vector<1x16xi1>, vector<1x16xf32>
    %cst_397 = arith.constant dense<0.000000e+00> : vector<1xf32>
    %1130 = vector.multi_reduction <add>, %1129, %cst_397 [1] : vector<1x16xf32> to vector<1xf32>
    %1131 = vector.shape_cast %1130 : vector<1xf32> to vector<1x1xf32>
    %1132 = vector.broadcast %1131 : vector<1x1xf32> to vector<16x32xf32>
    %1133 = arith.mulf %1132, %1125 : vector<16x32xf32>
    %1134 = arith.addf %1124, %1133 : vector<16x32xf32>
    %1135 = vector.extract_strided_slice %674 {offsets = [8, 0], sizes = [16, 32], strides = [1, 1]} : vector<32x32xf32> to vector<16x32xf32>
    %c8_i32_398 = arith.constant 8 : i32
    %1136 = vector.broadcast %c8_i32_398 : i32 to vector<1x16xi32>
    %1137 = arith.cmpi eq, %675, %1136 : vector<1x16xi32>
    %cst_399 = arith.constant 0.000000e+00 : f32
    %1138 = vector.broadcast %cst_399 : f32 to vector<1x16xf32>
    %1139 = arith.select %1137, %1053, %1138 : vector<1x16xi1>, vector<1x16xf32>
    %cst_400 = arith.constant dense<0.000000e+00> : vector<1xf32>
    %1140 = vector.multi_reduction <add>, %1139, %cst_400 [1] : vector<1x16xf32> to vector<1xf32>
    %1141 = vector.shape_cast %1140 : vector<1xf32> to vector<1x1xf32>
    %1142 = vector.broadcast %1141 : vector<1x1xf32> to vector<16x32xf32>
    %1143 = arith.mulf %1142, %1135 : vector<16x32xf32>
    %1144 = arith.addf %1134, %1143 : vector<16x32xf32>
    %1145 = vector.extract_strided_slice %674 {offsets = [9, 0], sizes = [16, 32], strides = [1, 1]} : vector<32x32xf32> to vector<16x32xf32>
    %c9_i32_401 = arith.constant 9 : i32
    %1146 = vector.broadcast %c9_i32_401 : i32 to vector<1x16xi32>
    %1147 = arith.cmpi eq, %675, %1146 : vector<1x16xi32>
    %cst_402 = arith.constant 0.000000e+00 : f32
    %1148 = vector.broadcast %cst_402 : f32 to vector<1x16xf32>
    %1149 = arith.select %1147, %1053, %1148 : vector<1x16xi1>, vector<1x16xf32>
    %cst_403 = arith.constant dense<0.000000e+00> : vector<1xf32>
    %1150 = vector.multi_reduction <add>, %1149, %cst_403 [1] : vector<1x16xf32> to vector<1xf32>
    %1151 = vector.shape_cast %1150 : vector<1xf32> to vector<1x1xf32>
    %1152 = vector.broadcast %1151 : vector<1x1xf32> to vector<16x32xf32>
    %1153 = arith.mulf %1152, %1145 : vector<16x32xf32>
    %1154 = arith.addf %1144, %1153 : vector<16x32xf32>
    %1155 = vector.extract_strided_slice %674 {offsets = [10, 0], sizes = [16, 32], strides = [1, 1]} : vector<32x32xf32> to vector<16x32xf32>
    %c10_i32_404 = arith.constant 10 : i32
    %1156 = vector.broadcast %c10_i32_404 : i32 to vector<1x16xi32>
    %1157 = arith.cmpi eq, %675, %1156 : vector<1x16xi32>
    %cst_405 = arith.constant 0.000000e+00 : f32
    %1158 = vector.broadcast %cst_405 : f32 to vector<1x16xf32>
    %1159 = arith.select %1157, %1053, %1158 : vector<1x16xi1>, vector<1x16xf32>
    %cst_406 = arith.constant dense<0.000000e+00> : vector<1xf32>
    %1160 = vector.multi_reduction <add>, %1159, %cst_406 [1] : vector<1x16xf32> to vector<1xf32>
    %1161 = vector.shape_cast %1160 : vector<1xf32> to vector<1x1xf32>
    %1162 = vector.broadcast %1161 : vector<1x1xf32> to vector<16x32xf32>
    %1163 = arith.mulf %1162, %1155 : vector<16x32xf32>
    %1164 = arith.addf %1154, %1163 : vector<16x32xf32>
    %1165 = vector.extract_strided_slice %674 {offsets = [11, 0], sizes = [16, 32], strides = [1, 1]} : vector<32x32xf32> to vector<16x32xf32>
    %c11_i32_407 = arith.constant 11 : i32
    %1166 = vector.broadcast %c11_i32_407 : i32 to vector<1x16xi32>
    %1167 = arith.cmpi eq, %675, %1166 : vector<1x16xi32>
    %cst_408 = arith.constant 0.000000e+00 : f32
    %1168 = vector.broadcast %cst_408 : f32 to vector<1x16xf32>
    %1169 = arith.select %1167, %1053, %1168 : vector<1x16xi1>, vector<1x16xf32>
    %cst_409 = arith.constant dense<0.000000e+00> : vector<1xf32>
    %1170 = vector.multi_reduction <add>, %1169, %cst_409 [1] : vector<1x16xf32> to vector<1xf32>
    %1171 = vector.shape_cast %1170 : vector<1xf32> to vector<1x1xf32>
    %1172 = vector.broadcast %1171 : vector<1x1xf32> to vector<16x32xf32>
    %1173 = arith.mulf %1172, %1165 : vector<16x32xf32>
    %1174 = arith.addf %1164, %1173 : vector<16x32xf32>
    %1175 = vector.extract_strided_slice %674 {offsets = [12, 0], sizes = [16, 32], strides = [1, 1]} : vector<32x32xf32> to vector<16x32xf32>
    %c12_i32_410 = arith.constant 12 : i32
    %1176 = vector.broadcast %c12_i32_410 : i32 to vector<1x16xi32>
    %1177 = arith.cmpi eq, %675, %1176 : vector<1x16xi32>
    %cst_411 = arith.constant 0.000000e+00 : f32
    %1178 = vector.broadcast %cst_411 : f32 to vector<1x16xf32>
    %1179 = arith.select %1177, %1053, %1178 : vector<1x16xi1>, vector<1x16xf32>
    %cst_412 = arith.constant dense<0.000000e+00> : vector<1xf32>
    %1180 = vector.multi_reduction <add>, %1179, %cst_412 [1] : vector<1x16xf32> to vector<1xf32>
    %1181 = vector.shape_cast %1180 : vector<1xf32> to vector<1x1xf32>
    %1182 = vector.broadcast %1181 : vector<1x1xf32> to vector<16x32xf32>
    %1183 = arith.mulf %1182, %1175 : vector<16x32xf32>
    %1184 = arith.addf %1174, %1183 : vector<16x32xf32>
    %1185 = vector.extract_strided_slice %674 {offsets = [13, 0], sizes = [16, 32], strides = [1, 1]} : vector<32x32xf32> to vector<16x32xf32>
    %c13_i32_413 = arith.constant 13 : i32
    %1186 = vector.broadcast %c13_i32_413 : i32 to vector<1x16xi32>
    %1187 = arith.cmpi eq, %675, %1186 : vector<1x16xi32>
    %cst_414 = arith.constant 0.000000e+00 : f32
    %1188 = vector.broadcast %cst_414 : f32 to vector<1x16xf32>
    %1189 = arith.select %1187, %1053, %1188 : vector<1x16xi1>, vector<1x16xf32>
    %cst_415 = arith.constant dense<0.000000e+00> : vector<1xf32>
    %1190 = vector.multi_reduction <add>, %1189, %cst_415 [1] : vector<1x16xf32> to vector<1xf32>
    %1191 = vector.shape_cast %1190 : vector<1xf32> to vector<1x1xf32>
    %1192 = vector.broadcast %1191 : vector<1x1xf32> to vector<16x32xf32>
    %1193 = arith.mulf %1192, %1185 : vector<16x32xf32>
    %1194 = arith.addf %1184, %1193 : vector<16x32xf32>
    %1195 = vector.extract_strided_slice %674 {offsets = [14, 0], sizes = [16, 32], strides = [1, 1]} : vector<32x32xf32> to vector<16x32xf32>
    %c14_i32_416 = arith.constant 14 : i32
    %1196 = vector.broadcast %c14_i32_416 : i32 to vector<1x16xi32>
    %1197 = arith.cmpi eq, %675, %1196 : vector<1x16xi32>
    %cst_417 = arith.constant 0.000000e+00 : f32
    %1198 = vector.broadcast %cst_417 : f32 to vector<1x16xf32>
    %1199 = arith.select %1197, %1053, %1198 : vector<1x16xi1>, vector<1x16xf32>
    %cst_418 = arith.constant dense<0.000000e+00> : vector<1xf32>
    %1200 = vector.multi_reduction <add>, %1199, %cst_418 [1] : vector<1x16xf32> to vector<1xf32>
    %1201 = vector.shape_cast %1200 : vector<1xf32> to vector<1x1xf32>
    %1202 = vector.broadcast %1201 : vector<1x1xf32> to vector<16x32xf32>
    %1203 = arith.mulf %1202, %1195 : vector<16x32xf32>
    %1204 = arith.addf %1194, %1203 : vector<16x32xf32>
    %1205 = vector.extract_strided_slice %674 {offsets = [15, 0], sizes = [16, 32], strides = [1, 1]} : vector<32x32xf32> to vector<16x32xf32>
    %c15_i32_419 = arith.constant 15 : i32
    %1206 = vector.broadcast %c15_i32_419 : i32 to vector<1x16xi32>
    %1207 = arith.cmpi eq, %675, %1206 : vector<1x16xi32>
    %cst_420 = arith.constant 0.000000e+00 : f32
    %1208 = vector.broadcast %cst_420 : f32 to vector<1x16xf32>
    %1209 = arith.select %1207, %1053, %1208 : vector<1x16xi1>, vector<1x16xf32>
    %cst_421 = arith.constant dense<0.000000e+00> : vector<1xf32>
    %1210 = vector.multi_reduction <add>, %1209, %cst_421 [1] : vector<1x16xf32> to vector<1xf32>
    %1211 = vector.shape_cast %1210 : vector<1xf32> to vector<1x1xf32>
    %1212 = vector.broadcast %1211 : vector<1x1xf32> to vector<16x32xf32>
    %1213 = arith.mulf %1212, %1205 : vector<16x32xf32>
    %1214 = arith.addf %1204, %1213 : vector<16x32xf32>
    %cst_422 = arith.constant dense<0.000000e+00> : vector<16x32xf32>
    %1215 = tpu.matmul %1214, %24, %cst_422 {dimension_numbers = #tpu.dot_dimension_numbers<[1], [0], [0], [1], [0, 0, 1, 1], [], []>} : vector<16x32xf32>, vector<32x32xf32>, vector<16x32xf32> -> vector<16x32xf32>
    %1216 = vector.broadcast %25 : vector<1x32xf32> to vector<16x32xf32>
    %1217 = arith.addf %1215, %1216 : vector<16x32xf32>
    %1218 = arith.addf %66, %1217 : vector<16x32xf32>
    %cst_423 = arith.constant dense<0.000000e+00> : vector<16x32xf32>
    %1219 = tpu.matmul %1, %1218, %cst_423 {dimension_numbers = #tpu.dot_dimension_numbers<[1], [0], [0], [1], [0, 0, 1, 1], [], []>} : vector<16x16xf32>, vector<16x32xf32>, vector<16x32xf32> -> vector<16x32xf32>
    %1220 = arith.subf %1218, %1219 : vector<16x32xf32>
    %1221 = vector.extract_strided_slice %26 {offsets = [0, 0], sizes = [32, 32], strides = [1, 1]} : vector<32x96xf32> to vector<32x32xf32>
    %cst_424 = arith.constant dense<0.000000e+00> : vector<16x32xf32>
    %1222 = tpu.matmul %1220, %1221, %cst_424 {dimension_numbers = #tpu.dot_dimension_numbers<[1], [0], [0], [1], [0, 0, 1, 1], [], []>} : vector<16x32xf32>, vector<32x32xf32>, vector<16x32xf32> -> vector<16x32xf32>
    %1223 = vector.extract_strided_slice %27 {offsets = [0, 0], sizes = [1, 32], strides = [1, 1]} : vector<1x96xf32> to vector<1x32xf32>
    %1224 = vector.broadcast %1223 : vector<1x32xf32> to vector<16x32xf32>
    %1225 = arith.addf %1222, %1224 : vector<16x32xf32>
    %1226 = vector.extract_strided_slice %26 {offsets = [0, 32], sizes = [32, 64], strides = [1, 1]} : vector<32x96xf32> to vector<32x64xf32>
    %cst_425 = arith.constant dense<0.000000e+00> : vector<16x64xf32>
    %1227 = tpu.matmul %666, %1226, %cst_425 {dimension_numbers = #tpu.dot_dimension_numbers<[1], [0], [0], [1], [0, 0, 1, 1], [], []>} : vector<16x32xf32>, vector<32x64xf32>, vector<16x64xf32> -> vector<16x64xf32>
    %1228 = vector.extract_strided_slice %27 {offsets = [0, 32], sizes = [1, 64], strides = [1, 1]} : vector<1x96xf32> to vector<1x64xf32>
    %1229 = vector.broadcast %1228 : vector<1x64xf32> to vector<16x64xf32>
    %1230 = arith.addf %1227, %1229 : vector<16x64xf32>
    %1231 = vector.extract_strided_slice %1230 {offsets = [0, 0], sizes = [16, 32], strides = [1, 1]} : vector<16x64xf32> to vector<16x32xf32>
    %1232 = vector.extract_strided_slice %1230 {offsets = [0, 32], sizes = [16, 32], strides = [1, 1]} : vector<16x64xf32> to vector<16x32xf32>
    %1233 = tpu.concatenate %1225, %1225 in 0 : vector<16x32xf32>, vector<16x32xf32> -> vector<32x32xf32>
    %1234 = tpu.concatenate %1232, %1232 in 0 : vector<16x32xf32>, vector<16x32xf32> -> vector<32x32xf32>
    %1235 = tpu.iota {dimensions = array<i32: 1>} : vector<1x16xi32>
    %1236 = tpu.iota {dimensions = array<i32: 0>} : vector<16x1xi32>
    %cst_426 = arith.constant 0.000000e+00 : f32
    %1237 = vector.broadcast %cst_426 : f32 to vector<1x16xf32>
    %cst_427 = arith.constant 0.000000e+00 : f32
    %1238 = vector.broadcast %cst_427 : f32 to vector<16x1xf32>
    %1239 = vector.extract_strided_slice %1233 {offsets = [0, 0], sizes = [16, 32], strides = [1, 1]} : vector<32x32xf32> to vector<16x32xf32>
    %1240 = arith.mulf %1239, %1231 : vector<16x32xf32>
    %cst_428 = arith.constant dense<0.000000e+00> : vector<16xf32>
    %1241 = vector.multi_reduction <add>, %1240, %cst_428 [1] : vector<16x32xf32> to vector<16xf32>
    %1242 = vector.shape_cast %1241 : vector<16xf32> to vector<16x1xf32>
    %cst_429 = arith.constant dense<0.000000e+00> : vector<1xf32>
    %1243 = vector.multi_reduction <add>, %1242, %cst_429 [0] : vector<16x1xf32> to vector<1xf32>
    %1244 = vector.shape_cast %1243 : vector<1xf32> to vector<1x1xf32>
    %cst_430 = arith.constant 3.125000e-02 : f32
    %1245 = vector.broadcast %cst_430 : f32 to vector<1x1xf32>
    %1246 = arith.mulf %1244, %1245 : vector<1x1xf32>
    %c0_i32_431 = arith.constant 0 : i32
    %1247 = vector.broadcast %c0_i32_431 : i32 to vector<1x16xi32>
    %1248 = arith.cmpi eq, %1235, %1247 : vector<1x16xi32>
    %cst_432 = arith.constant 0.000000e+00 : f32
    %1249 = vector.shape_cast %1246 : vector<1x1xf32> to vector<1x1xf32>
    %1250 = vector.broadcast %1249 : vector<1x1xf32> to vector<1x16xf32>
    %1251 = vector.broadcast %cst_432 : f32 to vector<1x16xf32>
    %1252 = arith.select %1248, %1250, %1251 : vector<1x16xi1>, vector<1x16xf32>
    %1253 = arith.addf %1237, %1252 : vector<1x16xf32>
    %c0_i32_433 = arith.constant 0 : i32
    %1254 = vector.broadcast %c0_i32_433 : i32 to vector<16x1xi32>
    %1255 = arith.cmpi eq, %1236, %1254 : vector<16x1xi32>
    %cst_434 = arith.constant 0.000000e+00 : f32
    %1256 = vector.shape_cast %1246 : vector<1x1xf32> to vector<1x1xf32>
    %1257 = vector.broadcast %1256 : vector<1x1xf32> to vector<16x1xf32>
    %1258 = vector.broadcast %cst_434 : f32 to vector<16x1xf32>
    %1259 = arith.select %1255, %1257, %1258 : vector<16x1xi1>, vector<16x1xf32>
    %1260 = arith.addf %1238, %1259 : vector<16x1xf32>
    %1261 = vector.extract_strided_slice %1233 {offsets = [1, 0], sizes = [16, 32], strides = [1, 1]} : vector<32x32xf32> to vector<16x32xf32>
    %1262 = arith.mulf %1261, %1231 : vector<16x32xf32>
    %cst_435 = arith.constant dense<0.000000e+00> : vector<16xf32>
    %1263 = vector.multi_reduction <add>, %1262, %cst_435 [1] : vector<16x32xf32> to vector<16xf32>
    %1264 = vector.shape_cast %1263 : vector<16xf32> to vector<16x1xf32>
    %cst_436 = arith.constant dense<0.000000e+00> : vector<1xf32>
    %1265 = vector.multi_reduction <add>, %1264, %cst_436 [0] : vector<16x1xf32> to vector<1xf32>
    %1266 = vector.shape_cast %1265 : vector<1xf32> to vector<1x1xf32>
    %cst_437 = arith.constant 3.125000e-02 : f32
    %1267 = vector.broadcast %cst_437 : f32 to vector<1x1xf32>
    %1268 = arith.mulf %1266, %1267 : vector<1x1xf32>
    %c1_i32_438 = arith.constant 1 : i32
    %1269 = vector.broadcast %c1_i32_438 : i32 to vector<1x16xi32>
    %1270 = arith.cmpi eq, %1235, %1269 : vector<1x16xi32>
    %cst_439 = arith.constant 0.000000e+00 : f32
    %1271 = vector.shape_cast %1268 : vector<1x1xf32> to vector<1x1xf32>
    %1272 = vector.broadcast %1271 : vector<1x1xf32> to vector<1x16xf32>
    %1273 = vector.broadcast %cst_439 : f32 to vector<1x16xf32>
    %1274 = arith.select %1270, %1272, %1273 : vector<1x16xi1>, vector<1x16xf32>
    %1275 = arith.addf %1253, %1274 : vector<1x16xf32>
    %c1_i32_440 = arith.constant 1 : i32
    %1276 = vector.broadcast %c1_i32_440 : i32 to vector<16x1xi32>
    %1277 = arith.cmpi eq, %1236, %1276 : vector<16x1xi32>
    %cst_441 = arith.constant 0.000000e+00 : f32
    %1278 = vector.shape_cast %1268 : vector<1x1xf32> to vector<1x1xf32>
    %1279 = vector.broadcast %1278 : vector<1x1xf32> to vector<16x1xf32>
    %1280 = vector.broadcast %cst_441 : f32 to vector<16x1xf32>
    %1281 = arith.select %1277, %1279, %1280 : vector<16x1xi1>, vector<16x1xf32>
    %1282 = arith.addf %1260, %1281 : vector<16x1xf32>
    %1283 = vector.extract_strided_slice %1233 {offsets = [2, 0], sizes = [16, 32], strides = [1, 1]} : vector<32x32xf32> to vector<16x32xf32>
    %1284 = arith.mulf %1283, %1231 : vector<16x32xf32>
    %cst_442 = arith.constant dense<0.000000e+00> : vector<16xf32>
    %1285 = vector.multi_reduction <add>, %1284, %cst_442 [1] : vector<16x32xf32> to vector<16xf32>
    %1286 = vector.shape_cast %1285 : vector<16xf32> to vector<16x1xf32>
    %cst_443 = arith.constant dense<0.000000e+00> : vector<1xf32>
    %1287 = vector.multi_reduction <add>, %1286, %cst_443 [0] : vector<16x1xf32> to vector<1xf32>
    %1288 = vector.shape_cast %1287 : vector<1xf32> to vector<1x1xf32>
    %cst_444 = arith.constant 3.125000e-02 : f32
    %1289 = vector.broadcast %cst_444 : f32 to vector<1x1xf32>
    %1290 = arith.mulf %1288, %1289 : vector<1x1xf32>
    %c2_i32_445 = arith.constant 2 : i32
    %1291 = vector.broadcast %c2_i32_445 : i32 to vector<1x16xi32>
    %1292 = arith.cmpi eq, %1235, %1291 : vector<1x16xi32>
    %cst_446 = arith.constant 0.000000e+00 : f32
    %1293 = vector.shape_cast %1290 : vector<1x1xf32> to vector<1x1xf32>
    %1294 = vector.broadcast %1293 : vector<1x1xf32> to vector<1x16xf32>
    %1295 = vector.broadcast %cst_446 : f32 to vector<1x16xf32>
    %1296 = arith.select %1292, %1294, %1295 : vector<1x16xi1>, vector<1x16xf32>
    %1297 = arith.addf %1275, %1296 : vector<1x16xf32>
    %c2_i32_447 = arith.constant 2 : i32
    %1298 = vector.broadcast %c2_i32_447 : i32 to vector<16x1xi32>
    %1299 = arith.cmpi eq, %1236, %1298 : vector<16x1xi32>
    %cst_448 = arith.constant 0.000000e+00 : f32
    %1300 = vector.shape_cast %1290 : vector<1x1xf32> to vector<1x1xf32>
    %1301 = vector.broadcast %1300 : vector<1x1xf32> to vector<16x1xf32>
    %1302 = vector.broadcast %cst_448 : f32 to vector<16x1xf32>
    %1303 = arith.select %1299, %1301, %1302 : vector<16x1xi1>, vector<16x1xf32>
    %1304 = arith.addf %1282, %1303 : vector<16x1xf32>
    %1305 = vector.extract_strided_slice %1233 {offsets = [3, 0], sizes = [16, 32], strides = [1, 1]} : vector<32x32xf32> to vector<16x32xf32>
    %1306 = arith.mulf %1305, %1231 : vector<16x32xf32>
    %cst_449 = arith.constant dense<0.000000e+00> : vector<16xf32>
    %1307 = vector.multi_reduction <add>, %1306, %cst_449 [1] : vector<16x32xf32> to vector<16xf32>
    %1308 = vector.shape_cast %1307 : vector<16xf32> to vector<16x1xf32>
    %cst_450 = arith.constant dense<0.000000e+00> : vector<1xf32>
    %1309 = vector.multi_reduction <add>, %1308, %cst_450 [0] : vector<16x1xf32> to vector<1xf32>
    %1310 = vector.shape_cast %1309 : vector<1xf32> to vector<1x1xf32>
    %cst_451 = arith.constant 3.125000e-02 : f32
    %1311 = vector.broadcast %cst_451 : f32 to vector<1x1xf32>
    %1312 = arith.mulf %1310, %1311 : vector<1x1xf32>
    %c3_i32_452 = arith.constant 3 : i32
    %1313 = vector.broadcast %c3_i32_452 : i32 to vector<1x16xi32>
    %1314 = arith.cmpi eq, %1235, %1313 : vector<1x16xi32>
    %cst_453 = arith.constant 0.000000e+00 : f32
    %1315 = vector.shape_cast %1312 : vector<1x1xf32> to vector<1x1xf32>
    %1316 = vector.broadcast %1315 : vector<1x1xf32> to vector<1x16xf32>
    %1317 = vector.broadcast %cst_453 : f32 to vector<1x16xf32>
    %1318 = arith.select %1314, %1316, %1317 : vector<1x16xi1>, vector<1x16xf32>
    %1319 = arith.addf %1297, %1318 : vector<1x16xf32>
    %c3_i32_454 = arith.constant 3 : i32
    %1320 = vector.broadcast %c3_i32_454 : i32 to vector<16x1xi32>
    %1321 = arith.cmpi eq, %1236, %1320 : vector<16x1xi32>
    %cst_455 = arith.constant 0.000000e+00 : f32
    %1322 = vector.shape_cast %1312 : vector<1x1xf32> to vector<1x1xf32>
    %1323 = vector.broadcast %1322 : vector<1x1xf32> to vector<16x1xf32>
    %1324 = vector.broadcast %cst_455 : f32 to vector<16x1xf32>
    %1325 = arith.select %1321, %1323, %1324 : vector<16x1xi1>, vector<16x1xf32>
    %1326 = arith.addf %1304, %1325 : vector<16x1xf32>
    %1327 = vector.extract_strided_slice %1233 {offsets = [4, 0], sizes = [16, 32], strides = [1, 1]} : vector<32x32xf32> to vector<16x32xf32>
    %1328 = arith.mulf %1327, %1231 : vector<16x32xf32>
    %cst_456 = arith.constant dense<0.000000e+00> : vector<16xf32>
    %1329 = vector.multi_reduction <add>, %1328, %cst_456 [1] : vector<16x32xf32> to vector<16xf32>
    %1330 = vector.shape_cast %1329 : vector<16xf32> to vector<16x1xf32>
    %cst_457 = arith.constant dense<0.000000e+00> : vector<1xf32>
    %1331 = vector.multi_reduction <add>, %1330, %cst_457 [0] : vector<16x1xf32> to vector<1xf32>
    %1332 = vector.shape_cast %1331 : vector<1xf32> to vector<1x1xf32>
    %cst_458 = arith.constant 3.125000e-02 : f32
    %1333 = vector.broadcast %cst_458 : f32 to vector<1x1xf32>
    %1334 = arith.mulf %1332, %1333 : vector<1x1xf32>
    %c4_i32_459 = arith.constant 4 : i32
    %1335 = vector.broadcast %c4_i32_459 : i32 to vector<1x16xi32>
    %1336 = arith.cmpi eq, %1235, %1335 : vector<1x16xi32>
    %cst_460 = arith.constant 0.000000e+00 : f32
    %1337 = vector.shape_cast %1334 : vector<1x1xf32> to vector<1x1xf32>
    %1338 = vector.broadcast %1337 : vector<1x1xf32> to vector<1x16xf32>
    %1339 = vector.broadcast %cst_460 : f32 to vector<1x16xf32>
    %1340 = arith.select %1336, %1338, %1339 : vector<1x16xi1>, vector<1x16xf32>
    %1341 = arith.addf %1319, %1340 : vector<1x16xf32>
    %c4_i32_461 = arith.constant 4 : i32
    %1342 = vector.broadcast %c4_i32_461 : i32 to vector<16x1xi32>
    %1343 = arith.cmpi eq, %1236, %1342 : vector<16x1xi32>
    %cst_462 = arith.constant 0.000000e+00 : f32
    %1344 = vector.shape_cast %1334 : vector<1x1xf32> to vector<1x1xf32>
    %1345 = vector.broadcast %1344 : vector<1x1xf32> to vector<16x1xf32>
    %1346 = vector.broadcast %cst_462 : f32 to vector<16x1xf32>
    %1347 = arith.select %1343, %1345, %1346 : vector<16x1xi1>, vector<16x1xf32>
    %1348 = arith.addf %1326, %1347 : vector<16x1xf32>
    %1349 = vector.extract_strided_slice %1233 {offsets = [5, 0], sizes = [16, 32], strides = [1, 1]} : vector<32x32xf32> to vector<16x32xf32>
    %1350 = arith.mulf %1349, %1231 : vector<16x32xf32>
    %cst_463 = arith.constant dense<0.000000e+00> : vector<16xf32>
    %1351 = vector.multi_reduction <add>, %1350, %cst_463 [1] : vector<16x32xf32> to vector<16xf32>
    %1352 = vector.shape_cast %1351 : vector<16xf32> to vector<16x1xf32>
    %cst_464 = arith.constant dense<0.000000e+00> : vector<1xf32>
    %1353 = vector.multi_reduction <add>, %1352, %cst_464 [0] : vector<16x1xf32> to vector<1xf32>
    %1354 = vector.shape_cast %1353 : vector<1xf32> to vector<1x1xf32>
    %cst_465 = arith.constant 3.125000e-02 : f32
    %1355 = vector.broadcast %cst_465 : f32 to vector<1x1xf32>
    %1356 = arith.mulf %1354, %1355 : vector<1x1xf32>
    %c5_i32_466 = arith.constant 5 : i32
    %1357 = vector.broadcast %c5_i32_466 : i32 to vector<1x16xi32>
    %1358 = arith.cmpi eq, %1235, %1357 : vector<1x16xi32>
    %cst_467 = arith.constant 0.000000e+00 : f32
    %1359 = vector.shape_cast %1356 : vector<1x1xf32> to vector<1x1xf32>
    %1360 = vector.broadcast %1359 : vector<1x1xf32> to vector<1x16xf32>
    %1361 = vector.broadcast %cst_467 : f32 to vector<1x16xf32>
    %1362 = arith.select %1358, %1360, %1361 : vector<1x16xi1>, vector<1x16xf32>
    %1363 = arith.addf %1341, %1362 : vector<1x16xf32>
    %c5_i32_468 = arith.constant 5 : i32
    %1364 = vector.broadcast %c5_i32_468 : i32 to vector<16x1xi32>
    %1365 = arith.cmpi eq, %1236, %1364 : vector<16x1xi32>
    %cst_469 = arith.constant 0.000000e+00 : f32
    %1366 = vector.shape_cast %1356 : vector<1x1xf32> to vector<1x1xf32>
    %1367 = vector.broadcast %1366 : vector<1x1xf32> to vector<16x1xf32>
    %1368 = vector.broadcast %cst_469 : f32 to vector<16x1xf32>
    %1369 = arith.select %1365, %1367, %1368 : vector<16x1xi1>, vector<16x1xf32>
    %1370 = arith.addf %1348, %1369 : vector<16x1xf32>
    %1371 = vector.extract_strided_slice %1233 {offsets = [6, 0], sizes = [16, 32], strides = [1, 1]} : vector<32x32xf32> to vector<16x32xf32>
    %1372 = arith.mulf %1371, %1231 : vector<16x32xf32>
    %cst_470 = arith.constant dense<0.000000e+00> : vector<16xf32>
    %1373 = vector.multi_reduction <add>, %1372, %cst_470 [1] : vector<16x32xf32> to vector<16xf32>
    %1374 = vector.shape_cast %1373 : vector<16xf32> to vector<16x1xf32>
    %cst_471 = arith.constant dense<0.000000e+00> : vector<1xf32>
    %1375 = vector.multi_reduction <add>, %1374, %cst_471 [0] : vector<16x1xf32> to vector<1xf32>
    %1376 = vector.shape_cast %1375 : vector<1xf32> to vector<1x1xf32>
    %cst_472 = arith.constant 3.125000e-02 : f32
    %1377 = vector.broadcast %cst_472 : f32 to vector<1x1xf32>
    %1378 = arith.mulf %1376, %1377 : vector<1x1xf32>
    %c6_i32_473 = arith.constant 6 : i32
    %1379 = vector.broadcast %c6_i32_473 : i32 to vector<1x16xi32>
    %1380 = arith.cmpi eq, %1235, %1379 : vector<1x16xi32>
    %cst_474 = arith.constant 0.000000e+00 : f32
    %1381 = vector.shape_cast %1378 : vector<1x1xf32> to vector<1x1xf32>
    %1382 = vector.broadcast %1381 : vector<1x1xf32> to vector<1x16xf32>
    %1383 = vector.broadcast %cst_474 : f32 to vector<1x16xf32>
    %1384 = arith.select %1380, %1382, %1383 : vector<1x16xi1>, vector<1x16xf32>
    %1385 = arith.addf %1363, %1384 : vector<1x16xf32>
    %c6_i32_475 = arith.constant 6 : i32
    %1386 = vector.broadcast %c6_i32_475 : i32 to vector<16x1xi32>
    %1387 = arith.cmpi eq, %1236, %1386 : vector<16x1xi32>
    %cst_476 = arith.constant 0.000000e+00 : f32
    %1388 = vector.shape_cast %1378 : vector<1x1xf32> to vector<1x1xf32>
    %1389 = vector.broadcast %1388 : vector<1x1xf32> to vector<16x1xf32>
    %1390 = vector.broadcast %cst_476 : f32 to vector<16x1xf32>
    %1391 = arith.select %1387, %1389, %1390 : vector<16x1xi1>, vector<16x1xf32>
    %1392 = arith.addf %1370, %1391 : vector<16x1xf32>
    %1393 = vector.extract_strided_slice %1233 {offsets = [7, 0], sizes = [16, 32], strides = [1, 1]} : vector<32x32xf32> to vector<16x32xf32>
    %1394 = arith.mulf %1393, %1231 : vector<16x32xf32>
    %cst_477 = arith.constant dense<0.000000e+00> : vector<16xf32>
    %1395 = vector.multi_reduction <add>, %1394, %cst_477 [1] : vector<16x32xf32> to vector<16xf32>
    %1396 = vector.shape_cast %1395 : vector<16xf32> to vector<16x1xf32>
    %cst_478 = arith.constant dense<0.000000e+00> : vector<1xf32>
    %1397 = vector.multi_reduction <add>, %1396, %cst_478 [0] : vector<16x1xf32> to vector<1xf32>
    %1398 = vector.shape_cast %1397 : vector<1xf32> to vector<1x1xf32>
    %cst_479 = arith.constant 3.125000e-02 : f32
    %1399 = vector.broadcast %cst_479 : f32 to vector<1x1xf32>
    %1400 = arith.mulf %1398, %1399 : vector<1x1xf32>
    %c7_i32_480 = arith.constant 7 : i32
    %1401 = vector.broadcast %c7_i32_480 : i32 to vector<1x16xi32>
    %1402 = arith.cmpi eq, %1235, %1401 : vector<1x16xi32>
    %cst_481 = arith.constant 0.000000e+00 : f32
    %1403 = vector.shape_cast %1400 : vector<1x1xf32> to vector<1x1xf32>
    %1404 = vector.broadcast %1403 : vector<1x1xf32> to vector<1x16xf32>
    %1405 = vector.broadcast %cst_481 : f32 to vector<1x16xf32>
    %1406 = arith.select %1402, %1404, %1405 : vector<1x16xi1>, vector<1x16xf32>
    %1407 = arith.addf %1385, %1406 : vector<1x16xf32>
    %c7_i32_482 = arith.constant 7 : i32
    %1408 = vector.broadcast %c7_i32_482 : i32 to vector<16x1xi32>
    %1409 = arith.cmpi eq, %1236, %1408 : vector<16x1xi32>
    %cst_483 = arith.constant 0.000000e+00 : f32
    %1410 = vector.shape_cast %1400 : vector<1x1xf32> to vector<1x1xf32>
    %1411 = vector.broadcast %1410 : vector<1x1xf32> to vector<16x1xf32>
    %1412 = vector.broadcast %cst_483 : f32 to vector<16x1xf32>
    %1413 = arith.select %1409, %1411, %1412 : vector<16x1xi1>, vector<16x1xf32>
    %1414 = arith.addf %1392, %1413 : vector<16x1xf32>
    %1415 = vector.extract_strided_slice %1233 {offsets = [8, 0], sizes = [16, 32], strides = [1, 1]} : vector<32x32xf32> to vector<16x32xf32>
    %1416 = arith.mulf %1415, %1231 : vector<16x32xf32>
    %cst_484 = arith.constant dense<0.000000e+00> : vector<16xf32>
    %1417 = vector.multi_reduction <add>, %1416, %cst_484 [1] : vector<16x32xf32> to vector<16xf32>
    %1418 = vector.shape_cast %1417 : vector<16xf32> to vector<16x1xf32>
    %cst_485 = arith.constant dense<0.000000e+00> : vector<1xf32>
    %1419 = vector.multi_reduction <add>, %1418, %cst_485 [0] : vector<16x1xf32> to vector<1xf32>
    %1420 = vector.shape_cast %1419 : vector<1xf32> to vector<1x1xf32>
    %cst_486 = arith.constant 3.125000e-02 : f32
    %1421 = vector.broadcast %cst_486 : f32 to vector<1x1xf32>
    %1422 = arith.mulf %1420, %1421 : vector<1x1xf32>
    %c8_i32_487 = arith.constant 8 : i32
    %1423 = vector.broadcast %c8_i32_487 : i32 to vector<1x16xi32>
    %1424 = arith.cmpi eq, %1235, %1423 : vector<1x16xi32>
    %cst_488 = arith.constant 0.000000e+00 : f32
    %1425 = vector.shape_cast %1422 : vector<1x1xf32> to vector<1x1xf32>
    %1426 = vector.broadcast %1425 : vector<1x1xf32> to vector<1x16xf32>
    %1427 = vector.broadcast %cst_488 : f32 to vector<1x16xf32>
    %1428 = arith.select %1424, %1426, %1427 : vector<1x16xi1>, vector<1x16xf32>
    %1429 = arith.addf %1407, %1428 : vector<1x16xf32>
    %c8_i32_489 = arith.constant 8 : i32
    %1430 = vector.broadcast %c8_i32_489 : i32 to vector<16x1xi32>
    %1431 = arith.cmpi eq, %1236, %1430 : vector<16x1xi32>
    %cst_490 = arith.constant 0.000000e+00 : f32
    %1432 = vector.shape_cast %1422 : vector<1x1xf32> to vector<1x1xf32>
    %1433 = vector.broadcast %1432 : vector<1x1xf32> to vector<16x1xf32>
    %1434 = vector.broadcast %cst_490 : f32 to vector<16x1xf32>
    %1435 = arith.select %1431, %1433, %1434 : vector<16x1xi1>, vector<16x1xf32>
    %1436 = arith.addf %1414, %1435 : vector<16x1xf32>
    %1437 = vector.extract_strided_slice %1233 {offsets = [9, 0], sizes = [16, 32], strides = [1, 1]} : vector<32x32xf32> to vector<16x32xf32>
    %1438 = arith.mulf %1437, %1231 : vector<16x32xf32>
    %cst_491 = arith.constant dense<0.000000e+00> : vector<16xf32>
    %1439 = vector.multi_reduction <add>, %1438, %cst_491 [1] : vector<16x32xf32> to vector<16xf32>
    %1440 = vector.shape_cast %1439 : vector<16xf32> to vector<16x1xf32>
    %cst_492 = arith.constant dense<0.000000e+00> : vector<1xf32>
    %1441 = vector.multi_reduction <add>, %1440, %cst_492 [0] : vector<16x1xf32> to vector<1xf32>
    %1442 = vector.shape_cast %1441 : vector<1xf32> to vector<1x1xf32>
    %cst_493 = arith.constant 3.125000e-02 : f32
    %1443 = vector.broadcast %cst_493 : f32 to vector<1x1xf32>
    %1444 = arith.mulf %1442, %1443 : vector<1x1xf32>
    %c9_i32_494 = arith.constant 9 : i32
    %1445 = vector.broadcast %c9_i32_494 : i32 to vector<1x16xi32>
    %1446 = arith.cmpi eq, %1235, %1445 : vector<1x16xi32>
    %cst_495 = arith.constant 0.000000e+00 : f32
    %1447 = vector.shape_cast %1444 : vector<1x1xf32> to vector<1x1xf32>
    %1448 = vector.broadcast %1447 : vector<1x1xf32> to vector<1x16xf32>
    %1449 = vector.broadcast %cst_495 : f32 to vector<1x16xf32>
    %1450 = arith.select %1446, %1448, %1449 : vector<1x16xi1>, vector<1x16xf32>
    %1451 = arith.addf %1429, %1450 : vector<1x16xf32>
    %c9_i32_496 = arith.constant 9 : i32
    %1452 = vector.broadcast %c9_i32_496 : i32 to vector<16x1xi32>
    %1453 = arith.cmpi eq, %1236, %1452 : vector<16x1xi32>
    %cst_497 = arith.constant 0.000000e+00 : f32
    %1454 = vector.shape_cast %1444 : vector<1x1xf32> to vector<1x1xf32>
    %1455 = vector.broadcast %1454 : vector<1x1xf32> to vector<16x1xf32>
    %1456 = vector.broadcast %cst_497 : f32 to vector<16x1xf32>
    %1457 = arith.select %1453, %1455, %1456 : vector<16x1xi1>, vector<16x1xf32>
    %1458 = arith.addf %1436, %1457 : vector<16x1xf32>
    %1459 = vector.extract_strided_slice %1233 {offsets = [10, 0], sizes = [16, 32], strides = [1, 1]} : vector<32x32xf32> to vector<16x32xf32>
    %1460 = arith.mulf %1459, %1231 : vector<16x32xf32>
    %cst_498 = arith.constant dense<0.000000e+00> : vector<16xf32>
    %1461 = vector.multi_reduction <add>, %1460, %cst_498 [1] : vector<16x32xf32> to vector<16xf32>
    %1462 = vector.shape_cast %1461 : vector<16xf32> to vector<16x1xf32>
    %cst_499 = arith.constant dense<0.000000e+00> : vector<1xf32>
    %1463 = vector.multi_reduction <add>, %1462, %cst_499 [0] : vector<16x1xf32> to vector<1xf32>
    %1464 = vector.shape_cast %1463 : vector<1xf32> to vector<1x1xf32>
    %cst_500 = arith.constant 3.125000e-02 : f32
    %1465 = vector.broadcast %cst_500 : f32 to vector<1x1xf32>
    %1466 = arith.mulf %1464, %1465 : vector<1x1xf32>
    %c10_i32_501 = arith.constant 10 : i32
    %1467 = vector.broadcast %c10_i32_501 : i32 to vector<1x16xi32>
    %1468 = arith.cmpi eq, %1235, %1467 : vector<1x16xi32>
    %cst_502 = arith.constant 0.000000e+00 : f32
    %1469 = vector.shape_cast %1466 : vector<1x1xf32> to vector<1x1xf32>
    %1470 = vector.broadcast %1469 : vector<1x1xf32> to vector<1x16xf32>
    %1471 = vector.broadcast %cst_502 : f32 to vector<1x16xf32>
    %1472 = arith.select %1468, %1470, %1471 : vector<1x16xi1>, vector<1x16xf32>
    %1473 = arith.addf %1451, %1472 : vector<1x16xf32>
    %c10_i32_503 = arith.constant 10 : i32
    %1474 = vector.broadcast %c10_i32_503 : i32 to vector<16x1xi32>
    %1475 = arith.cmpi eq, %1236, %1474 : vector<16x1xi32>
    %cst_504 = arith.constant 0.000000e+00 : f32
    %1476 = vector.shape_cast %1466 : vector<1x1xf32> to vector<1x1xf32>
    %1477 = vector.broadcast %1476 : vector<1x1xf32> to vector<16x1xf32>
    %1478 = vector.broadcast %cst_504 : f32 to vector<16x1xf32>
    %1479 = arith.select %1475, %1477, %1478 : vector<16x1xi1>, vector<16x1xf32>
    %1480 = arith.addf %1458, %1479 : vector<16x1xf32>
    %1481 = vector.extract_strided_slice %1233 {offsets = [11, 0], sizes = [16, 32], strides = [1, 1]} : vector<32x32xf32> to vector<16x32xf32>
    %1482 = arith.mulf %1481, %1231 : vector<16x32xf32>
    %cst_505 = arith.constant dense<0.000000e+00> : vector<16xf32>
    %1483 = vector.multi_reduction <add>, %1482, %cst_505 [1] : vector<16x32xf32> to vector<16xf32>
    %1484 = vector.shape_cast %1483 : vector<16xf32> to vector<16x1xf32>
    %cst_506 = arith.constant dense<0.000000e+00> : vector<1xf32>
    %1485 = vector.multi_reduction <add>, %1484, %cst_506 [0] : vector<16x1xf32> to vector<1xf32>
    %1486 = vector.shape_cast %1485 : vector<1xf32> to vector<1x1xf32>
    %cst_507 = arith.constant 3.125000e-02 : f32
    %1487 = vector.broadcast %cst_507 : f32 to vector<1x1xf32>
    %1488 = arith.mulf %1486, %1487 : vector<1x1xf32>
    %c11_i32_508 = arith.constant 11 : i32
    %1489 = vector.broadcast %c11_i32_508 : i32 to vector<1x16xi32>
    %1490 = arith.cmpi eq, %1235, %1489 : vector<1x16xi32>
    %cst_509 = arith.constant 0.000000e+00 : f32
    %1491 = vector.shape_cast %1488 : vector<1x1xf32> to vector<1x1xf32>
    %1492 = vector.broadcast %1491 : vector<1x1xf32> to vector<1x16xf32>
    %1493 = vector.broadcast %cst_509 : f32 to vector<1x16xf32>
    %1494 = arith.select %1490, %1492, %1493 : vector<1x16xi1>, vector<1x16xf32>
    %1495 = arith.addf %1473, %1494 : vector<1x16xf32>
    %c11_i32_510 = arith.constant 11 : i32
    %1496 = vector.broadcast %c11_i32_510 : i32 to vector<16x1xi32>
    %1497 = arith.cmpi eq, %1236, %1496 : vector<16x1xi32>
    %cst_511 = arith.constant 0.000000e+00 : f32
    %1498 = vector.shape_cast %1488 : vector<1x1xf32> to vector<1x1xf32>
    %1499 = vector.broadcast %1498 : vector<1x1xf32> to vector<16x1xf32>
    %1500 = vector.broadcast %cst_511 : f32 to vector<16x1xf32>
    %1501 = arith.select %1497, %1499, %1500 : vector<16x1xi1>, vector<16x1xf32>
    %1502 = arith.addf %1480, %1501 : vector<16x1xf32>
    %1503 = vector.extract_strided_slice %1233 {offsets = [12, 0], sizes = [16, 32], strides = [1, 1]} : vector<32x32xf32> to vector<16x32xf32>
    %1504 = arith.mulf %1503, %1231 : vector<16x32xf32>
    %cst_512 = arith.constant dense<0.000000e+00> : vector<16xf32>
    %1505 = vector.multi_reduction <add>, %1504, %cst_512 [1] : vector<16x32xf32> to vector<16xf32>
    %1506 = vector.shape_cast %1505 : vector<16xf32> to vector<16x1xf32>
    %cst_513 = arith.constant dense<0.000000e+00> : vector<1xf32>
    %1507 = vector.multi_reduction <add>, %1506, %cst_513 [0] : vector<16x1xf32> to vector<1xf32>
    %1508 = vector.shape_cast %1507 : vector<1xf32> to vector<1x1xf32>
    %cst_514 = arith.constant 3.125000e-02 : f32
    %1509 = vector.broadcast %cst_514 : f32 to vector<1x1xf32>
    %1510 = arith.mulf %1508, %1509 : vector<1x1xf32>
    %c12_i32_515 = arith.constant 12 : i32
    %1511 = vector.broadcast %c12_i32_515 : i32 to vector<1x16xi32>
    %1512 = arith.cmpi eq, %1235, %1511 : vector<1x16xi32>
    %cst_516 = arith.constant 0.000000e+00 : f32
    %1513 = vector.shape_cast %1510 : vector<1x1xf32> to vector<1x1xf32>
    %1514 = vector.broadcast %1513 : vector<1x1xf32> to vector<1x16xf32>
    %1515 = vector.broadcast %cst_516 : f32 to vector<1x16xf32>
    %1516 = arith.select %1512, %1514, %1515 : vector<1x16xi1>, vector<1x16xf32>
    %1517 = arith.addf %1495, %1516 : vector<1x16xf32>
    %c12_i32_517 = arith.constant 12 : i32
    %1518 = vector.broadcast %c12_i32_517 : i32 to vector<16x1xi32>
    %1519 = arith.cmpi eq, %1236, %1518 : vector<16x1xi32>
    %cst_518 = arith.constant 0.000000e+00 : f32
    %1520 = vector.shape_cast %1510 : vector<1x1xf32> to vector<1x1xf32>
    %1521 = vector.broadcast %1520 : vector<1x1xf32> to vector<16x1xf32>
    %1522 = vector.broadcast %cst_518 : f32 to vector<16x1xf32>
    %1523 = arith.select %1519, %1521, %1522 : vector<16x1xi1>, vector<16x1xf32>
    %1524 = arith.addf %1502, %1523 : vector<16x1xf32>
    %1525 = vector.extract_strided_slice %1233 {offsets = [13, 0], sizes = [16, 32], strides = [1, 1]} : vector<32x32xf32> to vector<16x32xf32>
    %1526 = arith.mulf %1525, %1231 : vector<16x32xf32>
    %cst_519 = arith.constant dense<0.000000e+00> : vector<16xf32>
    %1527 = vector.multi_reduction <add>, %1526, %cst_519 [1] : vector<16x32xf32> to vector<16xf32>
    %1528 = vector.shape_cast %1527 : vector<16xf32> to vector<16x1xf32>
    %cst_520 = arith.constant dense<0.000000e+00> : vector<1xf32>
    %1529 = vector.multi_reduction <add>, %1528, %cst_520 [0] : vector<16x1xf32> to vector<1xf32>
    %1530 = vector.shape_cast %1529 : vector<1xf32> to vector<1x1xf32>
    %cst_521 = arith.constant 3.125000e-02 : f32
    %1531 = vector.broadcast %cst_521 : f32 to vector<1x1xf32>
    %1532 = arith.mulf %1530, %1531 : vector<1x1xf32>
    %c13_i32_522 = arith.constant 13 : i32
    %1533 = vector.broadcast %c13_i32_522 : i32 to vector<1x16xi32>
    %1534 = arith.cmpi eq, %1235, %1533 : vector<1x16xi32>
    %cst_523 = arith.constant 0.000000e+00 : f32
    %1535 = vector.shape_cast %1532 : vector<1x1xf32> to vector<1x1xf32>
    %1536 = vector.broadcast %1535 : vector<1x1xf32> to vector<1x16xf32>
    %1537 = vector.broadcast %cst_523 : f32 to vector<1x16xf32>
    %1538 = arith.select %1534, %1536, %1537 : vector<1x16xi1>, vector<1x16xf32>
    %1539 = arith.addf %1517, %1538 : vector<1x16xf32>
    %c13_i32_524 = arith.constant 13 : i32
    %1540 = vector.broadcast %c13_i32_524 : i32 to vector<16x1xi32>
    %1541 = arith.cmpi eq, %1236, %1540 : vector<16x1xi32>
    %cst_525 = arith.constant 0.000000e+00 : f32
    %1542 = vector.shape_cast %1532 : vector<1x1xf32> to vector<1x1xf32>
    %1543 = vector.broadcast %1542 : vector<1x1xf32> to vector<16x1xf32>
    %1544 = vector.broadcast %cst_525 : f32 to vector<16x1xf32>
    %1545 = arith.select %1541, %1543, %1544 : vector<16x1xi1>, vector<16x1xf32>
    %1546 = arith.addf %1524, %1545 : vector<16x1xf32>
    %1547 = vector.extract_strided_slice %1233 {offsets = [14, 0], sizes = [16, 32], strides = [1, 1]} : vector<32x32xf32> to vector<16x32xf32>
    %1548 = arith.mulf %1547, %1231 : vector<16x32xf32>
    %cst_526 = arith.constant dense<0.000000e+00> : vector<16xf32>
    %1549 = vector.multi_reduction <add>, %1548, %cst_526 [1] : vector<16x32xf32> to vector<16xf32>
    %1550 = vector.shape_cast %1549 : vector<16xf32> to vector<16x1xf32>
    %cst_527 = arith.constant dense<0.000000e+00> : vector<1xf32>
    %1551 = vector.multi_reduction <add>, %1550, %cst_527 [0] : vector<16x1xf32> to vector<1xf32>
    %1552 = vector.shape_cast %1551 : vector<1xf32> to vector<1x1xf32>
    %cst_528 = arith.constant 3.125000e-02 : f32
    %1553 = vector.broadcast %cst_528 : f32 to vector<1x1xf32>
    %1554 = arith.mulf %1552, %1553 : vector<1x1xf32>
    %c14_i32_529 = arith.constant 14 : i32
    %1555 = vector.broadcast %c14_i32_529 : i32 to vector<1x16xi32>
    %1556 = arith.cmpi eq, %1235, %1555 : vector<1x16xi32>
    %cst_530 = arith.constant 0.000000e+00 : f32
    %1557 = vector.shape_cast %1554 : vector<1x1xf32> to vector<1x1xf32>
    %1558 = vector.broadcast %1557 : vector<1x1xf32> to vector<1x16xf32>
    %1559 = vector.broadcast %cst_530 : f32 to vector<1x16xf32>
    %1560 = arith.select %1556, %1558, %1559 : vector<1x16xi1>, vector<1x16xf32>
    %1561 = arith.addf %1539, %1560 : vector<1x16xf32>
    %c14_i32_531 = arith.constant 14 : i32
    %1562 = vector.broadcast %c14_i32_531 : i32 to vector<16x1xi32>
    %1563 = arith.cmpi eq, %1236, %1562 : vector<16x1xi32>
    %cst_532 = arith.constant 0.000000e+00 : f32
    %1564 = vector.shape_cast %1554 : vector<1x1xf32> to vector<1x1xf32>
    %1565 = vector.broadcast %1564 : vector<1x1xf32> to vector<16x1xf32>
    %1566 = vector.broadcast %cst_532 : f32 to vector<16x1xf32>
    %1567 = arith.select %1563, %1565, %1566 : vector<16x1xi1>, vector<16x1xf32>
    %1568 = arith.addf %1546, %1567 : vector<16x1xf32>
    %1569 = vector.extract_strided_slice %1233 {offsets = [15, 0], sizes = [16, 32], strides = [1, 1]} : vector<32x32xf32> to vector<16x32xf32>
    %1570 = arith.mulf %1569, %1231 : vector<16x32xf32>
    %cst_533 = arith.constant dense<0.000000e+00> : vector<16xf32>
    %1571 = vector.multi_reduction <add>, %1570, %cst_533 [1] : vector<16x32xf32> to vector<16xf32>
    %1572 = vector.shape_cast %1571 : vector<16xf32> to vector<16x1xf32>
    %cst_534 = arith.constant dense<0.000000e+00> : vector<1xf32>
    %1573 = vector.multi_reduction <add>, %1572, %cst_534 [0] : vector<16x1xf32> to vector<1xf32>
    %1574 = vector.shape_cast %1573 : vector<1xf32> to vector<1x1xf32>
    %cst_535 = arith.constant 3.125000e-02 : f32
    %1575 = vector.broadcast %cst_535 : f32 to vector<1x1xf32>
    %1576 = arith.mulf %1574, %1575 : vector<1x1xf32>
    %c15_i32_536 = arith.constant 15 : i32
    %1577 = vector.broadcast %c15_i32_536 : i32 to vector<1x16xi32>
    %1578 = arith.cmpi eq, %1235, %1577 : vector<1x16xi32>
    %cst_537 = arith.constant 0.000000e+00 : f32
    %1579 = vector.shape_cast %1576 : vector<1x1xf32> to vector<1x1xf32>
    %1580 = vector.broadcast %1579 : vector<1x1xf32> to vector<1x16xf32>
    %1581 = vector.broadcast %cst_537 : f32 to vector<1x16xf32>
    %1582 = arith.select %1578, %1580, %1581 : vector<1x16xi1>, vector<1x16xf32>
    %1583 = arith.addf %1561, %1582 : vector<1x16xf32>
    %c15_i32_538 = arith.constant 15 : i32
    %1584 = vector.broadcast %c15_i32_538 : i32 to vector<16x1xi32>
    %1585 = arith.cmpi eq, %1236, %1584 : vector<16x1xi32>
    %cst_539 = arith.constant 0.000000e+00 : f32
    %1586 = vector.shape_cast %1576 : vector<1x1xf32> to vector<1x1xf32>
    %1587 = vector.broadcast %1586 : vector<1x1xf32> to vector<16x1xf32>
    %1588 = vector.broadcast %cst_539 : f32 to vector<16x1xf32>
    %1589 = arith.select %1585, %1587, %1588 : vector<16x1xi1>, vector<16x1xf32>
    %1590 = arith.addf %1568, %1589 : vector<16x1xf32>
    %1591 = vector.broadcast %1590 : vector<16x1xf32> to vector<16x16xf32>
    %1592 = vector.broadcast %1583 : vector<1x16xf32> to vector<16x16xf32>
    %1593 = arith.cmpf ogt, %1591, %1592 : vector<16x16xf32>
    %cst_540 = arith.constant 1.000000e+00 : f32
    %cst_541 = arith.constant 0.000000e+00 : f32
    %1594 = vector.broadcast %cst_540 : f32 to vector<16x16xf32>
    %1595 = vector.broadcast %cst_541 : f32 to vector<16x16xf32>
    %1596 = arith.select %1593, %1594, %1595 : vector<16x16xi1>, vector<16x16xf32>
    %cst_542 = arith.constant dense<0.000000e+00> : vector<16xf32>
    %1597 = vector.multi_reduction <add>, %1596, %cst_542 [0] : vector<16x16xf32> to vector<16xf32>
    %1598 = vector.shape_cast %1597 : vector<16xf32> to vector<1x16xf32>
    %cst_543 = arith.constant 8.000000e+00 : f32
    %1599 = vector.broadcast %cst_543 : f32 to vector<1x16xf32>
    %1600 = arith.cmpf olt, %1598, %1599 : vector<1x16xf32>
    %cst_544 = arith.constant -1.000000e+30 : f32
    %1601 = vector.broadcast %cst_544 : f32 to vector<1x16xf32>
    %1602 = arith.select %1600, %1583, %1601 : vector<1x16xi1>, vector<1x16xf32>
    %cst_545 = arith.constant dense<0xFF800000> : vector<1xf32>
    %1603 = vector.multi_reduction <maximumf>, %1602, %cst_545 [1] : vector<1x16xf32> to vector<1xf32>
    %1604 = vector.shape_cast %1603 : vector<1xf32> to vector<1x1xf32>
    %1605 = vector.broadcast %1604 : vector<1x1xf32> to vector<1x16xf32>
    %1606 = arith.subf %1583, %1605 : vector<1x16xf32>
    %1607 = math.exp %1606 : vector<1x16xf32>
    %cst_546 = arith.constant 0.000000e+00 : f32
    %1608 = vector.broadcast %cst_546 : f32 to vector<1x16xf32>
    %1609 = arith.select %1600, %1607, %1608 : vector<1x16xi1>, vector<1x16xf32>
    %cst_547 = arith.constant dense<0.000000e+00> : vector<1xf32>
    %1610 = vector.multi_reduction <add>, %1609, %cst_547 [1] : vector<1x16xf32> to vector<1xf32>
    %1611 = vector.shape_cast %1610 : vector<1xf32> to vector<1x1xf32>
    %1612 = vector.broadcast %1611 : vector<1x1xf32> to vector<1x16xf32>
    %1613 = arith.divf %1609, %1612 : vector<1x16xf32>
    %cst_548 = arith.constant 0.000000e+00 : f32
    %1614 = vector.broadcast %cst_548 : f32 to vector<16x32xf32>
    %1615 = vector.extract_strided_slice %1234 {offsets = [0, 0], sizes = [16, 32], strides = [1, 1]} : vector<32x32xf32> to vector<16x32xf32>
    %c0_i32_549 = arith.constant 0 : i32
    %1616 = vector.broadcast %c0_i32_549 : i32 to vector<1x16xi32>
    %1617 = arith.cmpi eq, %1235, %1616 : vector<1x16xi32>
    %cst_550 = arith.constant 0.000000e+00 : f32
    %1618 = vector.broadcast %cst_550 : f32 to vector<1x16xf32>
    %1619 = arith.select %1617, %1613, %1618 : vector<1x16xi1>, vector<1x16xf32>
    %cst_551 = arith.constant dense<0.000000e+00> : vector<1xf32>
    %1620 = vector.multi_reduction <add>, %1619, %cst_551 [1] : vector<1x16xf32> to vector<1xf32>
    %1621 = vector.shape_cast %1620 : vector<1xf32> to vector<1x1xf32>
    %1622 = vector.broadcast %1621 : vector<1x1xf32> to vector<16x32xf32>
    %1623 = arith.mulf %1622, %1615 : vector<16x32xf32>
    %1624 = arith.addf %1614, %1623 : vector<16x32xf32>
    %1625 = vector.extract_strided_slice %1234 {offsets = [1, 0], sizes = [16, 32], strides = [1, 1]} : vector<32x32xf32> to vector<16x32xf32>
    %c1_i32_552 = arith.constant 1 : i32
    %1626 = vector.broadcast %c1_i32_552 : i32 to vector<1x16xi32>
    %1627 = arith.cmpi eq, %1235, %1626 : vector<1x16xi32>
    %cst_553 = arith.constant 0.000000e+00 : f32
    %1628 = vector.broadcast %cst_553 : f32 to vector<1x16xf32>
    %1629 = arith.select %1627, %1613, %1628 : vector<1x16xi1>, vector<1x16xf32>
    %cst_554 = arith.constant dense<0.000000e+00> : vector<1xf32>
    %1630 = vector.multi_reduction <add>, %1629, %cst_554 [1] : vector<1x16xf32> to vector<1xf32>
    %1631 = vector.shape_cast %1630 : vector<1xf32> to vector<1x1xf32>
    %1632 = vector.broadcast %1631 : vector<1x1xf32> to vector<16x32xf32>
    %1633 = arith.mulf %1632, %1625 : vector<16x32xf32>
    %1634 = arith.addf %1624, %1633 : vector<16x32xf32>
    %1635 = vector.extract_strided_slice %1234 {offsets = [2, 0], sizes = [16, 32], strides = [1, 1]} : vector<32x32xf32> to vector<16x32xf32>
    %c2_i32_555 = arith.constant 2 : i32
    %1636 = vector.broadcast %c2_i32_555 : i32 to vector<1x16xi32>
    %1637 = arith.cmpi eq, %1235, %1636 : vector<1x16xi32>
    %cst_556 = arith.constant 0.000000e+00 : f32
    %1638 = vector.broadcast %cst_556 : f32 to vector<1x16xf32>
    %1639 = arith.select %1637, %1613, %1638 : vector<1x16xi1>, vector<1x16xf32>
    %cst_557 = arith.constant dense<0.000000e+00> : vector<1xf32>
    %1640 = vector.multi_reduction <add>, %1639, %cst_557 [1] : vector<1x16xf32> to vector<1xf32>
    %1641 = vector.shape_cast %1640 : vector<1xf32> to vector<1x1xf32>
    %1642 = vector.broadcast %1641 : vector<1x1xf32> to vector<16x32xf32>
    %1643 = arith.mulf %1642, %1635 : vector<16x32xf32>
    %1644 = arith.addf %1634, %1643 : vector<16x32xf32>
    %1645 = vector.extract_strided_slice %1234 {offsets = [3, 0], sizes = [16, 32], strides = [1, 1]} : vector<32x32xf32> to vector<16x32xf32>
    %c3_i32_558 = arith.constant 3 : i32
    %1646 = vector.broadcast %c3_i32_558 : i32 to vector<1x16xi32>
    %1647 = arith.cmpi eq, %1235, %1646 : vector<1x16xi32>
    %cst_559 = arith.constant 0.000000e+00 : f32
    %1648 = vector.broadcast %cst_559 : f32 to vector<1x16xf32>
    %1649 = arith.select %1647, %1613, %1648 : vector<1x16xi1>, vector<1x16xf32>
    %cst_560 = arith.constant dense<0.000000e+00> : vector<1xf32>
    %1650 = vector.multi_reduction <add>, %1649, %cst_560 [1] : vector<1x16xf32> to vector<1xf32>
    %1651 = vector.shape_cast %1650 : vector<1xf32> to vector<1x1xf32>
    %1652 = vector.broadcast %1651 : vector<1x1xf32> to vector<16x32xf32>
    %1653 = arith.mulf %1652, %1645 : vector<16x32xf32>
    %1654 = arith.addf %1644, %1653 : vector<16x32xf32>
    %1655 = vector.extract_strided_slice %1234 {offsets = [4, 0], sizes = [16, 32], strides = [1, 1]} : vector<32x32xf32> to vector<16x32xf32>
    %c4_i32_561 = arith.constant 4 : i32
    %1656 = vector.broadcast %c4_i32_561 : i32 to vector<1x16xi32>
    %1657 = arith.cmpi eq, %1235, %1656 : vector<1x16xi32>
    %cst_562 = arith.constant 0.000000e+00 : f32
    %1658 = vector.broadcast %cst_562 : f32 to vector<1x16xf32>
    %1659 = arith.select %1657, %1613, %1658 : vector<1x16xi1>, vector<1x16xf32>
    %cst_563 = arith.constant dense<0.000000e+00> : vector<1xf32>
    %1660 = vector.multi_reduction <add>, %1659, %cst_563 [1] : vector<1x16xf32> to vector<1xf32>
    %1661 = vector.shape_cast %1660 : vector<1xf32> to vector<1x1xf32>
    %1662 = vector.broadcast %1661 : vector<1x1xf32> to vector<16x32xf32>
    %1663 = arith.mulf %1662, %1655 : vector<16x32xf32>
    %1664 = arith.addf %1654, %1663 : vector<16x32xf32>
    %1665 = vector.extract_strided_slice %1234 {offsets = [5, 0], sizes = [16, 32], strides = [1, 1]} : vector<32x32xf32> to vector<16x32xf32>
    %c5_i32_564 = arith.constant 5 : i32
    %1666 = vector.broadcast %c5_i32_564 : i32 to vector<1x16xi32>
    %1667 = arith.cmpi eq, %1235, %1666 : vector<1x16xi32>
    %cst_565 = arith.constant 0.000000e+00 : f32
    %1668 = vector.broadcast %cst_565 : f32 to vector<1x16xf32>
    %1669 = arith.select %1667, %1613, %1668 : vector<1x16xi1>, vector<1x16xf32>
    %cst_566 = arith.constant dense<0.000000e+00> : vector<1xf32>
    %1670 = vector.multi_reduction <add>, %1669, %cst_566 [1] : vector<1x16xf32> to vector<1xf32>
    %1671 = vector.shape_cast %1670 : vector<1xf32> to vector<1x1xf32>
    %1672 = vector.broadcast %1671 : vector<1x1xf32> to vector<16x32xf32>
    %1673 = arith.mulf %1672, %1665 : vector<16x32xf32>
    %1674 = arith.addf %1664, %1673 : vector<16x32xf32>
    %1675 = vector.extract_strided_slice %1234 {offsets = [6, 0], sizes = [16, 32], strides = [1, 1]} : vector<32x32xf32> to vector<16x32xf32>
    %c6_i32_567 = arith.constant 6 : i32
    %1676 = vector.broadcast %c6_i32_567 : i32 to vector<1x16xi32>
    %1677 = arith.cmpi eq, %1235, %1676 : vector<1x16xi32>
    %cst_568 = arith.constant 0.000000e+00 : f32
    %1678 = vector.broadcast %cst_568 : f32 to vector<1x16xf32>
    %1679 = arith.select %1677, %1613, %1678 : vector<1x16xi1>, vector<1x16xf32>
    %cst_569 = arith.constant dense<0.000000e+00> : vector<1xf32>
    %1680 = vector.multi_reduction <add>, %1679, %cst_569 [1] : vector<1x16xf32> to vector<1xf32>
    %1681 = vector.shape_cast %1680 : vector<1xf32> to vector<1x1xf32>
    %1682 = vector.broadcast %1681 : vector<1x1xf32> to vector<16x32xf32>
    %1683 = arith.mulf %1682, %1675 : vector<16x32xf32>
    %1684 = arith.addf %1674, %1683 : vector<16x32xf32>
    %1685 = vector.extract_strided_slice %1234 {offsets = [7, 0], sizes = [16, 32], strides = [1, 1]} : vector<32x32xf32> to vector<16x32xf32>
    %c7_i32_570 = arith.constant 7 : i32
    %1686 = vector.broadcast %c7_i32_570 : i32 to vector<1x16xi32>
    %1687 = arith.cmpi eq, %1235, %1686 : vector<1x16xi32>
    %cst_571 = arith.constant 0.000000e+00 : f32
    %1688 = vector.broadcast %cst_571 : f32 to vector<1x16xf32>
    %1689 = arith.select %1687, %1613, %1688 : vector<1x16xi1>, vector<1x16xf32>
    %cst_572 = arith.constant dense<0.000000e+00> : vector<1xf32>
    %1690 = vector.multi_reduction <add>, %1689, %cst_572 [1] : vector<1x16xf32> to vector<1xf32>
    %1691 = vector.shape_cast %1690 : vector<1xf32> to vector<1x1xf32>
    %1692 = vector.broadcast %1691 : vector<1x1xf32> to vector<16x32xf32>
    %1693 = arith.mulf %1692, %1685 : vector<16x32xf32>
    %1694 = arith.addf %1684, %1693 : vector<16x32xf32>
    %1695 = vector.extract_strided_slice %1234 {offsets = [8, 0], sizes = [16, 32], strides = [1, 1]} : vector<32x32xf32> to vector<16x32xf32>
    %c8_i32_573 = arith.constant 8 : i32
    %1696 = vector.broadcast %c8_i32_573 : i32 to vector<1x16xi32>
    %1697 = arith.cmpi eq, %1235, %1696 : vector<1x16xi32>
    %cst_574 = arith.constant 0.000000e+00 : f32
    %1698 = vector.broadcast %cst_574 : f32 to vector<1x16xf32>
    %1699 = arith.select %1697, %1613, %1698 : vector<1x16xi1>, vector<1x16xf32>
    %cst_575 = arith.constant dense<0.000000e+00> : vector<1xf32>
    %1700 = vector.multi_reduction <add>, %1699, %cst_575 [1] : vector<1x16xf32> to vector<1xf32>
    %1701 = vector.shape_cast %1700 : vector<1xf32> to vector<1x1xf32>
    %1702 = vector.broadcast %1701 : vector<1x1xf32> to vector<16x32xf32>
    %1703 = arith.mulf %1702, %1695 : vector<16x32xf32>
    %1704 = arith.addf %1694, %1703 : vector<16x32xf32>
    %1705 = vector.extract_strided_slice %1234 {offsets = [9, 0], sizes = [16, 32], strides = [1, 1]} : vector<32x32xf32> to vector<16x32xf32>
    %c9_i32_576 = arith.constant 9 : i32
    %1706 = vector.broadcast %c9_i32_576 : i32 to vector<1x16xi32>
    %1707 = arith.cmpi eq, %1235, %1706 : vector<1x16xi32>
    %cst_577 = arith.constant 0.000000e+00 : f32
    %1708 = vector.broadcast %cst_577 : f32 to vector<1x16xf32>
    %1709 = arith.select %1707, %1613, %1708 : vector<1x16xi1>, vector<1x16xf32>
    %cst_578 = arith.constant dense<0.000000e+00> : vector<1xf32>
    %1710 = vector.multi_reduction <add>, %1709, %cst_578 [1] : vector<1x16xf32> to vector<1xf32>
    %1711 = vector.shape_cast %1710 : vector<1xf32> to vector<1x1xf32>
    %1712 = vector.broadcast %1711 : vector<1x1xf32> to vector<16x32xf32>
    %1713 = arith.mulf %1712, %1705 : vector<16x32xf32>
    %1714 = arith.addf %1704, %1713 : vector<16x32xf32>
    %1715 = vector.extract_strided_slice %1234 {offsets = [10, 0], sizes = [16, 32], strides = [1, 1]} : vector<32x32xf32> to vector<16x32xf32>
    %c10_i32_579 = arith.constant 10 : i32
    %1716 = vector.broadcast %c10_i32_579 : i32 to vector<1x16xi32>
    %1717 = arith.cmpi eq, %1235, %1716 : vector<1x16xi32>
    %cst_580 = arith.constant 0.000000e+00 : f32
    %1718 = vector.broadcast %cst_580 : f32 to vector<1x16xf32>
    %1719 = arith.select %1717, %1613, %1718 : vector<1x16xi1>, vector<1x16xf32>
    %cst_581 = arith.constant dense<0.000000e+00> : vector<1xf32>
    %1720 = vector.multi_reduction <add>, %1719, %cst_581 [1] : vector<1x16xf32> to vector<1xf32>
    %1721 = vector.shape_cast %1720 : vector<1xf32> to vector<1x1xf32>
    %1722 = vector.broadcast %1721 : vector<1x1xf32> to vector<16x32xf32>
    %1723 = arith.mulf %1722, %1715 : vector<16x32xf32>
    %1724 = arith.addf %1714, %1723 : vector<16x32xf32>
    %1725 = vector.extract_strided_slice %1234 {offsets = [11, 0], sizes = [16, 32], strides = [1, 1]} : vector<32x32xf32> to vector<16x32xf32>
    %c11_i32_582 = arith.constant 11 : i32
    %1726 = vector.broadcast %c11_i32_582 : i32 to vector<1x16xi32>
    %1727 = arith.cmpi eq, %1235, %1726 : vector<1x16xi32>
    %cst_583 = arith.constant 0.000000e+00 : f32
    %1728 = vector.broadcast %cst_583 : f32 to vector<1x16xf32>
    %1729 = arith.select %1727, %1613, %1728 : vector<1x16xi1>, vector<1x16xf32>
    %cst_584 = arith.constant dense<0.000000e+00> : vector<1xf32>
    %1730 = vector.multi_reduction <add>, %1729, %cst_584 [1] : vector<1x16xf32> to vector<1xf32>
    %1731 = vector.shape_cast %1730 : vector<1xf32> to vector<1x1xf32>
    %1732 = vector.broadcast %1731 : vector<1x1xf32> to vector<16x32xf32>
    %1733 = arith.mulf %1732, %1725 : vector<16x32xf32>
    %1734 = arith.addf %1724, %1733 : vector<16x32xf32>
    %1735 = vector.extract_strided_slice %1234 {offsets = [12, 0], sizes = [16, 32], strides = [1, 1]} : vector<32x32xf32> to vector<16x32xf32>
    %c12_i32_585 = arith.constant 12 : i32
    %1736 = vector.broadcast %c12_i32_585 : i32 to vector<1x16xi32>
    %1737 = arith.cmpi eq, %1235, %1736 : vector<1x16xi32>
    %cst_586 = arith.constant 0.000000e+00 : f32
    %1738 = vector.broadcast %cst_586 : f32 to vector<1x16xf32>
    %1739 = arith.select %1737, %1613, %1738 : vector<1x16xi1>, vector<1x16xf32>
    %cst_587 = arith.constant dense<0.000000e+00> : vector<1xf32>
    %1740 = vector.multi_reduction <add>, %1739, %cst_587 [1] : vector<1x16xf32> to vector<1xf32>
    %1741 = vector.shape_cast %1740 : vector<1xf32> to vector<1x1xf32>
    %1742 = vector.broadcast %1741 : vector<1x1xf32> to vector<16x32xf32>
    %1743 = arith.mulf %1742, %1735 : vector<16x32xf32>
    %1744 = arith.addf %1734, %1743 : vector<16x32xf32>
    %1745 = vector.extract_strided_slice %1234 {offsets = [13, 0], sizes = [16, 32], strides = [1, 1]} : vector<32x32xf32> to vector<16x32xf32>
    %c13_i32_588 = arith.constant 13 : i32
    %1746 = vector.broadcast %c13_i32_588 : i32 to vector<1x16xi32>
    %1747 = arith.cmpi eq, %1235, %1746 : vector<1x16xi32>
    %cst_589 = arith.constant 0.000000e+00 : f32
    %1748 = vector.broadcast %cst_589 : f32 to vector<1x16xf32>
    %1749 = arith.select %1747, %1613, %1748 : vector<1x16xi1>, vector<1x16xf32>
    %cst_590 = arith.constant dense<0.000000e+00> : vector<1xf32>
    %1750 = vector.multi_reduction <add>, %1749, %cst_590 [1] : vector<1x16xf32> to vector<1xf32>
    %1751 = vector.shape_cast %1750 : vector<1xf32> to vector<1x1xf32>
    %1752 = vector.broadcast %1751 : vector<1x1xf32> to vector<16x32xf32>
    %1753 = arith.mulf %1752, %1745 : vector<16x32xf32>
    %1754 = arith.addf %1744, %1753 : vector<16x32xf32>
    %1755 = vector.extract_strided_slice %1234 {offsets = [14, 0], sizes = [16, 32], strides = [1, 1]} : vector<32x32xf32> to vector<16x32xf32>
    %c14_i32_591 = arith.constant 14 : i32
    %1756 = vector.broadcast %c14_i32_591 : i32 to vector<1x16xi32>
    %1757 = arith.cmpi eq, %1235, %1756 : vector<1x16xi32>
    %cst_592 = arith.constant 0.000000e+00 : f32
    %1758 = vector.broadcast %cst_592 : f32 to vector<1x16xf32>
    %1759 = arith.select %1757, %1613, %1758 : vector<1x16xi1>, vector<1x16xf32>
    %cst_593 = arith.constant dense<0.000000e+00> : vector<1xf32>
    %1760 = vector.multi_reduction <add>, %1759, %cst_593 [1] : vector<1x16xf32> to vector<1xf32>
    %1761 = vector.shape_cast %1760 : vector<1xf32> to vector<1x1xf32>
    %1762 = vector.broadcast %1761 : vector<1x1xf32> to vector<16x32xf32>
    %1763 = arith.mulf %1762, %1755 : vector<16x32xf32>
    %1764 = arith.addf %1754, %1763 : vector<16x32xf32>
    %1765 = vector.extract_strided_slice %1234 {offsets = [15, 0], sizes = [16, 32], strides = [1, 1]} : vector<32x32xf32> to vector<16x32xf32>
    %c15_i32_594 = arith.constant 15 : i32
    %1766 = vector.broadcast %c15_i32_594 : i32 to vector<1x16xi32>
    %1767 = arith.cmpi eq, %1235, %1766 : vector<1x16xi32>
    %cst_595 = arith.constant 0.000000e+00 : f32
    %1768 = vector.broadcast %cst_595 : f32 to vector<1x16xf32>
    %1769 = arith.select %1767, %1613, %1768 : vector<1x16xi1>, vector<1x16xf32>
    %cst_596 = arith.constant dense<0.000000e+00> : vector<1xf32>
    %1770 = vector.multi_reduction <add>, %1769, %cst_596 [1] : vector<1x16xf32> to vector<1xf32>
    %1771 = vector.shape_cast %1770 : vector<1xf32> to vector<1x1xf32>
    %1772 = vector.broadcast %1771 : vector<1x1xf32> to vector<16x32xf32>
    %1773 = arith.mulf %1772, %1765 : vector<16x32xf32>
    %1774 = arith.addf %1764, %1773 : vector<16x32xf32>
    %cst_597 = arith.constant dense<0.000000e+00> : vector<16x32xf32>
    %1775 = tpu.matmul %1774, %28, %cst_597 {dimension_numbers = #tpu.dot_dimension_numbers<[1], [0], [0], [1], [0, 0, 1, 1], [], []>} : vector<16x32xf32>, vector<32x32xf32>, vector<16x32xf32> -> vector<16x32xf32>
    %1776 = vector.broadcast %29 : vector<1x32xf32> to vector<16x32xf32>
    %1777 = arith.addf %1775, %1776 : vector<16x32xf32>
    %1778 = arith.addf %1220, %1777 : vector<16x32xf32>
    %cst_598 = arith.constant dense<0.000000e+00> : vector<16x32xf32>
    %1779 = tpu.matmul %1, %1778, %cst_598 {dimension_numbers = #tpu.dot_dimension_numbers<[1], [0], [0], [1], [0, 0, 1, 1], [], []>} : vector<16x16xf32>, vector<16x32xf32>, vector<16x32xf32> -> vector<16x32xf32>
    %1780 = arith.subf %1778, %1779 : vector<16x32xf32>
    %cst_599 = arith.constant dense<0.000000e+00> : vector<16x32xf32>
    %1781 = tpu.matmul %1780, %30, %cst_599 {dimension_numbers = #tpu.dot_dimension_numbers<[1], [0], [0], [1], [0, 0, 1, 1], [], []>} : vector<16x32xf32>, vector<32x32xf32>, vector<16x32xf32> -> vector<16x32xf32>
    %cst_600 = arith.constant 5.000000e-01 : f32
    %1782 = vector.broadcast %cst_600 : f32 to vector<16x32xf32>
    %1783 = arith.mulf %1782, %1781 : vector<16x32xf32>
    %cst_601 = arith.constant 4.471500e-02 : f32
    %1784 = vector.broadcast %cst_601 : f32 to vector<16x32xf32>
    %1785 = arith.mulf %1784, %1781 : vector<16x32xf32>
    %1786 = arith.mulf %1785, %1781 : vector<16x32xf32>
    %1787 = arith.mulf %1786, %1781 : vector<16x32xf32>
    %1788 = arith.addf %1781, %1787 : vector<16x32xf32>
    %cst_602 = arith.constant 0.797884583 : f32
    %1789 = vector.broadcast %cst_602 : f32 to vector<16x32xf32>
    %1790 = arith.mulf %1789, %1788 : vector<16x32xf32>
    %1791 = math.tanh %1790 : vector<16x32xf32>
    %cst_603 = arith.constant 1.000000e+00 : f32
    %1792 = vector.broadcast %cst_603 : f32 to vector<16x32xf32>
    %1793 = arith.addf %1792, %1791 : vector<16x32xf32>
    %1794 = arith.mulf %1783, %1793 : vector<16x32xf32>
    %cst_604 = arith.constant dense<0.000000e+00> : vector<16x32xf32>
    %1795 = tpu.matmul %1794, %31, %cst_604 {dimension_numbers = #tpu.dot_dimension_numbers<[1], [0], [0], [1], [0, 0, 1, 1], [], []>} : vector<16x32xf32>, vector<32x32xf32>, vector<16x32xf32> -> vector<16x32xf32>
    %1796 = arith.addf %1780, %1795 : vector<16x32xf32>
    %cst_605 = arith.constant dense<0.000000e+00> : vector<16x32xf32>
    %1797 = tpu.matmul %1, %1796, %cst_605 {dimension_numbers = #tpu.dot_dimension_numbers<[1], [0], [0], [1], [0, 0, 1, 1], [], []>} : vector<16x16xf32>, vector<16x32xf32>, vector<16x32xf32> -> vector<16x32xf32>
    %1798 = arith.subf %1796, %1797 : vector<16x32xf32>
    %1799 = arith.addf %1219, %1779 : vector<16x32xf32>
    %1800 = arith.addf %1799, %1797 : vector<16x32xf32>
    %1801 = tpu.concatenate %1800, %1800 in 0 : vector<16x32xf32>, vector<16x32xf32> -> vector<32x32xf32>
    %1802 = vector.extract_strided_slice %1801 {offsets = [15, 0], sizes = [16, 32], strides = [1, 1]} : vector<32x32xf32> to vector<16x32xf32>
    %1803 = vector.extract_strided_slice %1801 {offsets = [1, 0], sizes = [16, 32], strides = [1, 1]} : vector<32x32xf32> to vector<16x32xf32>
    %1804 = tpu.concatenate %1802, %1800, %1803 in 1 : vector<16x32xf32>, vector<16x32xf32>, vector<16x32xf32> -> vector<16x96xf32>
    %cst_606 = arith.constant dense<0.000000e+00> : vector<16x32xf32>
    %1805 = tpu.matmul %1804, %32, %cst_606 {dimension_numbers = #tpu.dot_dimension_numbers<[1], [0], [0], [1], [0, 0, 1, 1], [], []>} : vector<16x96xf32>, vector<96x32xf32>, vector<16x32xf32> -> vector<16x32xf32>
    %1806 = arith.addf %49, %1805 : vector<16x32xf32>
    %cst_607 = arith.constant dense<0.000000e+00> : vector<16xf32>
    %1807 = vector.multi_reduction <add>, %1798, %cst_607 [1] : vector<16x32xf32> to vector<16xf32>
    %1808 = vector.shape_cast %1807 : vector<16xf32> to vector<16x1xf32>
    %cst_608 = arith.constant 3.200000e+01 : f32
    %1809 = vector.broadcast %cst_608 : f32 to vector<16x1xf32>
    %1810 = arith.divf %1808, %1809 : vector<16x1xf32>
    %1811 = vector.broadcast %1810 : vector<16x1xf32> to vector<16x32xf32>
    %1812 = arith.subf %1798, %1811 : vector<16x32xf32>
    %1813 = arith.mulf %1812, %1812 : vector<16x32xf32>
    %cst_609 = arith.constant dense<0.000000e+00> : vector<16xf32>
    %1814 = vector.multi_reduction <add>, %1813, %cst_609 [1] : vector<16x32xf32> to vector<16xf32>
    %1815 = vector.shape_cast %1814 : vector<16xf32> to vector<16x1xf32>
    %cst_610 = arith.constant 3.200000e+01 : f32
    %1816 = vector.broadcast %cst_610 : f32 to vector<16x1xf32>
    %1817 = arith.divf %1815, %1816 : vector<16x1xf32>
    %1818 = vector.broadcast %1810 : vector<16x1xf32> to vector<16x32xf32>
    %1819 = arith.subf %1798, %1818 : vector<16x32xf32>
    %cst_611 = arith.constant 9.99999974E-6 : f32
    %1820 = vector.broadcast %cst_611 : f32 to vector<16x1xf32>
    %1821 = arith.addf %1817, %1820 : vector<16x1xf32>
    %1822 = math.rsqrt %1821 : vector<16x1xf32>
    %1823 = vector.broadcast %1822 : vector<16x1xf32> to vector<16x32xf32>
    %1824 = arith.mulf %1819, %1823 : vector<16x32xf32>
    %1825 = vector.broadcast %33 : vector<1x32xf32> to vector<16x32xf32>
    %1826 = arith.mulf %1824, %1825 : vector<16x32xf32>
    %1827 = vector.broadcast %34 : vector<1x32xf32> to vector<16x32xf32>
    %1828 = arith.addf %1826, %1827 : vector<16x32xf32>
    %cst_612 = arith.constant dense<0.000000e+00> : vector<32xf32>
    %1829 = vector.multi_reduction <add>, %1828, %cst_612 [0] : vector<16x32xf32> to vector<32xf32>
    %1830 = vector.shape_cast %1829 : vector<32xf32> to vector<1x32xf32>
    %cst_613 = arith.constant 1.600000e+01 : f32
    %1831 = vector.broadcast %cst_613 : f32 to vector<1x32xf32>
    %1832 = arith.divf %1830, %1831 : vector<1x32xf32>
    %1833 = vector.broadcast %1832 : vector<1x32xf32> to vector<16x32xf32>
    %1834 = arith.subf %1828, %1833 : vector<16x32xf32>
    %cst_614 = arith.constant dense<0.000000e+00> : vector<16x32xf32>
    %1835 = tpu.matmul %1834, %35, %cst_614 {dimension_numbers = #tpu.dot_dimension_numbers<[1], [0], [0], [1], [0, 0, 1, 1], [], []>} : vector<16x32xf32>, vector<32x32xf32>, vector<16x32xf32> -> vector<16x32xf32>
    %1836 = vector.broadcast %36 : vector<1x32xf32> to vector<16x32xf32>
    %1837 = arith.addf %1835, %1836 : vector<16x32xf32>
    %1838 = arith.addf %1806, %1837 : vector<16x32xf32>
    %1839 = vector.extract_strided_slice %1838 {offsets = [8, 0], sizes = [8, 32], strides = [1, 1]} : vector<16x32xf32> to vector<8x32xf32>
    %c0_615 = arith.constant 0 : index
    %c0_616 = arith.constant 0 : index
    %c0_617 = arith.constant 0 : index
    %1840 = vector.load %arg35[%c0_615, %c0_616, %c0_617] : memref<1x8x32xf32, #tpu.memory_space<vmem>>, vector<1x8x32xf32>
    %1841 = vector.shape_cast %1840 : vector<1x8x32xf32> to vector<8x32xf32>
    %1842 = vector.shape_cast %1839 : vector<8x32xf32> to vector<1x8x32xf32>
    tpu.vector_store %arg35[%c0_615, %c0_616, %c0_617], %1842 {strides = array<i32>} : memref<1x8x32xf32, #tpu.memory_space<vmem>>, vector<1x8x32xf32>,
    return
  }
  func.func @transform_0(%arg0: i32) -> (i32, i32) {
    %c0_i32 = arith.constant 0 : i32
    %c0_i32_0 = arith.constant 0 : i32
    %c0_i32_1 = arith.constant 0 : i32
    return %c0_i32, %c0_i32_0 : i32, i32
  }
  func.func @transform_1(%arg0: i32) -> (i32, i32) {
    %c0_i32 = arith.constant 0 : i32
    %c0_i32_0 = arith.constant 0 : i32
    %c0_i32_1 = arith.constant 0 : i32
    return %c0_i32, %c0_i32_0 : i32, i32
  }
  func.func @transform_2(%arg0: i32) -> (i32, i32, i32) {
    %c0_i32 = arith.constant 0 : i32
    %c0_i32_0 = arith.constant 0 : i32
    %c0_i32_1 = arith.constant 0 : i32
    return %arg0, %c0_i32, %c0_i32_0 : i32, i32, i32
  }
  func.func @transform_3(%arg0: i32) -> (i32, i32, i32) {
    %c0_i32 = arith.constant 0 : i32
    %c0_i32_0 = arith.constant 0 : i32
    %c0_i32_1 = arith.constant 0 : i32
    return %arg0, %c0_i32, %c0_i32_0 : i32, i32, i32
  }
  func.func @transform_4(%arg0: i32) -> (i32, i32, i32) {
    %c0_i32 = arith.constant 0 : i32
    %c0_i32_0 = arith.constant 0 : i32
    %c0_i32_1 = arith.constant 0 : i32
    return %arg0, %c0_i32, %c0_i32_0 : i32, i32, i32
  }
  func.func @transform_5(%arg0: i32) -> (i32, i32) {
    %c0_i32 = arith.constant 0 : i32
    %c0_i32_0 = arith.constant 0 : i32
    %c0_i32_1 = arith.constant 0 : i32
    return %c0_i32, %c0_i32_0 : i32, i32
  }
  func.func @transform_6(%arg0: i32) -> (i32, i32) {
    %c0_i32 = arith.constant 0 : i32
    %c0_i32_0 = arith.constant 0 : i32
    %c0_i32_1 = arith.constant 0 : i32
    return %c0_i32, %c0_i32_0 : i32, i32
  }
  func.func @transform_7(%arg0: i32) -> (i32, i32) {
    %c0_i32 = arith.constant 0 : i32
    %c0_i32_0 = arith.constant 0 : i32
    %c0_i32_1 = arith.constant 0 : i32
    return %c0_i32, %c0_i32_0 : i32, i32
  }
  func.func @transform_8(%arg0: i32) -> (i32, i32) {
    %c0_i32 = arith.constant 0 : i32
    %c0_i32_0 = arith.constant 0 : i32
    %c0_i32_1 = arith.constant 0 : i32
    return %c0_i32, %c0_i32_0 : i32, i32
  }
  func.func @transform_9(%arg0: i32) -> (i32, i32) {
    %c0_i32 = arith.constant 0 : i32
    %c0_i32_0 = arith.constant 0 : i32
    %c0_i32_1 = arith.constant 0 : i32
    return %c0_i32, %c0_i32_0 : i32, i32
  }
  func.func @transform_10(%arg0: i32) -> (i32, i32) {
    %c0_i32 = arith.constant 0 : i32
    %c0_i32_0 = arith.constant 0 : i32
    %c0_i32_1 = arith.constant 0 : i32
    return %c0_i32, %c0_i32_0 : i32, i32
  }
  func.func @transform_11(%arg0: i32) -> (i32, i32) {
    %c0_i32 = arith.constant 0 : i32
    %c0_i32_0 = arith.constant 0 : i32
    %c0_i32_1 = arith.constant 0 : i32
    return %c0_i32, %c0_i32_0 : i32, i32
  }
  func.func @transform_12(%arg0: i32) -> (i32, i32) {
    %c0_i32 = arith.constant 0 : i32
    %c0_i32_0 = arith.constant 0 : i32
    %c0_i32_1 = arith.constant 0 : i32
    return %c0_i32, %c0_i32_0 : i32, i32
  }
  func.func @transform_13(%arg0: i32) -> (i32, i32) {
    %c0_i32 = arith.constant 0 : i32
    %c0_i32_0 = arith.constant 0 : i32
    %c0_i32_1 = arith.constant 0 : i32
    return %c0_i32, %c0_i32_0 : i32, i32
  }
  func.func @transform_14(%arg0: i32) -> (i32, i32) {
    %c0_i32 = arith.constant 0 : i32
    %c0_i32_0 = arith.constant 0 : i32
    %c0_i32_1 = arith.constant 0 : i32
    return %c0_i32, %c0_i32_0 : i32, i32
  }
  func.func @transform_15(%arg0: i32) -> (i32, i32) {
    %c0_i32 = arith.constant 0 : i32
    %c0_i32_0 = arith.constant 0 : i32
    %c0_i32_1 = arith.constant 0 : i32
    return %c0_i32, %c0_i32_0 : i32, i32
  }
  func.func @transform_16(%arg0: i32) -> (i32, i32) {
    %c0_i32 = arith.constant 0 : i32
    %c0_i32_0 = arith.constant 0 : i32
    %c0_i32_1 = arith.constant 0 : i32
    return %c0_i32, %c0_i32_0 : i32, i32
  }
  func.func @transform_17(%arg0: i32) -> (i32, i32) {
    %c0_i32 = arith.constant 0 : i32
    %c0_i32_0 = arith.constant 0 : i32
    %c0_i32_1 = arith.constant 0 : i32
    return %c0_i32, %c0_i32_0 : i32, i32
  }
  func.func @transform_18(%arg0: i32) -> (i32, i32) {
    %c0_i32 = arith.constant 0 : i32
    %c0_i32_0 = arith.constant 0 : i32
    %c0_i32_1 = arith.constant 0 : i32
    return %c0_i32, %c0_i32_0 : i32, i32
  }
  func.func @transform_19(%arg0: i32) -> (i32, i32) {
    %c0_i32 = arith.constant 0 : i32
    %c0_i32_0 = arith.constant 0 : i32
    %c0_i32_1 = arith.constant 0 : i32
    return %c0_i32, %c0_i32_0 : i32, i32
  }
  func.func @transform_20(%arg0: i32) -> (i32, i32) {
    %c0_i32 = arith.constant 0 : i32
    %c0_i32_0 = arith.constant 0 : i32
    %c0_i32_1 = arith.constant 0 : i32
    return %c0_i32, %c0_i32_0 : i32, i32
  }
  func.func @transform_21(%arg0: i32) -> (i32, i32) {
    %c0_i32 = arith.constant 0 : i32
    %c0_i32_0 = arith.constant 0 : i32
    %c0_i32_1 = arith.constant 0 : i32
    return %c0_i32, %c0_i32_0 : i32, i32
  }
  func.func @transform_22(%arg0: i32) -> (i32, i32) {
    %c0_i32 = arith.constant 0 : i32
    %c0_i32_0 = arith.constant 0 : i32
    %c0_i32_1 = arith.constant 0 : i32
    return %c0_i32, %c0_i32_0 : i32, i32
  }
  func.func @transform_23(%arg0: i32) -> (i32, i32) {
    %c0_i32 = arith.constant 0 : i32
    %c0_i32_0 = arith.constant 0 : i32
    %c0_i32_1 = arith.constant 0 : i32
    return %c0_i32, %c0_i32_0 : i32, i32
  }
  func.func @transform_24(%arg0: i32) -> (i32, i32) {
    %c0_i32 = arith.constant 0 : i32
    %c0_i32_0 = arith.constant 0 : i32
    %c0_i32_1 = arith.constant 0 : i32
    return %c0_i32, %c0_i32_0 : i32, i32
  }
  func.func @transform_25(%arg0: i32) -> (i32, i32) {
    %c0_i32 = arith.constant 0 : i32
    %c0_i32_0 = arith.constant 0 : i32
    %c0_i32_1 = arith.constant 0 : i32
    return %c0_i32, %c0_i32_0 : i32, i32
  }
  func.func @transform_26(%arg0: i32) -> (i32, i32) {
    %c0_i32 = arith.constant 0 : i32
    %c0_i32_0 = arith.constant 0 : i32
    %c0_i32_1 = arith.constant 0 : i32
    return %c0_i32, %c0_i32_0 : i32, i32
  }
  func.func @transform_27(%arg0: i32) -> (i32, i32) {
    %c0_i32 = arith.constant 0 : i32
    %c0_i32_0 = arith.constant 0 : i32
    %c0_i32_1 = arith.constant 0 : i32
    return %c0_i32, %c0_i32_0 : i32, i32
  }
  func.func @transform_28(%arg0: i32) -> (i32, i32) {
    %c0_i32 = arith.constant 0 : i32
    %c0_i32_0 = arith.constant 0 : i32
    %c0_i32_1 = arith.constant 0 : i32
    return %c0_i32, %c0_i32_0 : i32, i32
  }
  func.func @transform_29(%arg0: i32) -> (i32, i32) {
    %c0_i32 = arith.constant 0 : i32
    %c0_i32_0 = arith.constant 0 : i32
    %c0_i32_1 = arith.constant 0 : i32
    return %c0_i32, %c0_i32_0 : i32, i32
  }
  func.func @transform_30(%arg0: i32) -> (i32, i32) {
    %c0_i32 = arith.constant 0 : i32
    %c0_i32_0 = arith.constant 0 : i32
    %c0_i32_1 = arith.constant 0 : i32
    return %c0_i32, %c0_i32_0 : i32, i32
  }
  func.func @transform_31(%arg0: i32) -> (i32, i32) {
    %c0_i32 = arith.constant 0 : i32
    %c0_i32_0 = arith.constant 0 : i32
    %c0_i32_1 = arith.constant 0 : i32
    return %c0_i32, %c0_i32_0 : i32, i32
  }
  func.func @transform_32(%arg0: i32) -> (i32, i32) {
    %c0_i32 = arith.constant 0 : i32
    %c0_i32_0 = arith.constant 0 : i32
    %c0_i32_1 = arith.constant 0 : i32
    return %c0_i32, %c0_i32_0 : i32, i32
  }
  func.func @transform_33(%arg0: i32) -> (i32, i32) {
    %c0_i32 = arith.constant 0 : i32
    %c0_i32_0 = arith.constant 0 : i32
    %c0_i32_1 = arith.constant 0 : i32
    return %c0_i32, %c0_i32_0 : i32, i32
  }
  func.func @transform_34(%arg0: i32) -> (i32, i32, i32) {
    %c0_i32 = arith.constant 0 : i32
    %c0_i32_0 = arith.constant 0 : i32
    %c0_i32_1 = arith.constant 0 : i32
    return %arg0, %c0_i32, %c0_i32_0 : i32, i32, i32
  }
}

</mosaic_0001>

<bundles_post_ra>
// kernel: autoformer_forward.1
= control target key start
LH: loop header
LB: loop body
LE: loop exit
PB: predicated region body
PF: predicated region fallthrough
CT: control target
= control target key end

     0   :  { %s7165_s6 = smov 1   ;;  %s7166_s10 = smov 2   ;;  %s9235_s0 = inlined_call_operand.smem [shape: u32[35], index: -1, kind: input, shape index: {}] }
   0x1   :  { %s7211_s5 = sld [smem:[%s9235_s0]]   ;;  %s7167_s14 = smov 3  }
   0x2   :  { %s7216_s9 = sld [smem:[%s9235_s0 + %s7165_s6]]   ;;  %s7168_s18 = smov 4  }
   0x3   :  { %s7221_s13 = sld [smem:[%s9235_s0 + %s7166_s10]]   ;;  %s7169_s22 = smov 5  }
   0x4   :  { %s7226_s17 = sld [smem:[%s9235_s0 + %s7167_s14]]   ;;  %s7170_s26 = smov 6  }
   0x5   :  { %s7231_s21 = sld [smem:[%s9235_s0 + %s7168_s18]]   ;;  %s7171_s30 = smov 7  }
   0x6   :  { %s7236_s25 = sld [smem:[%s9235_s0 + %s7169_s22]]   ;;  %s7172_s4 = smov 8  }
   0x7   :  { %s7241_s29 = sld [smem:[%s9235_s0 + %s7170_s26]]   ;;  %s7173_s10 = smov 9  }
   0x8   :  { %9295 = sst [smem:[#allocation2_spill]] %s7216_s9  ;;  %s7174_s15 = smov 10  }
   0x9   :  { %s7246_s3 = sld [smem:[%s9235_s0 + %s7171_s30]]   ;;  %s7175_s20 = smov 11  }
   0xa   :  { %s7251_s8 = sld [smem:[%s9235_s0 + %s7172_s4]]   ;;  %s7176_s26 = smov 12  }
   0xb   :  { %s7256_s14 = sld [smem:[%s9235_s0 + %s7173_s10]]   ;;  %s7177_s1 = smov 13  }
   0xc   :  { %s7261_s19 = sld [smem:[%s9235_s0 + %s7174_s15]]   ;;  %s7178_s7 = smov 14  }
   0xd   :  { %9296 = sst [smem:[#allocation3_spill]] %s7241_s29  ;;  %s7179_s15 = smov 15  }
   0xe   :  { %s7266_s24 = sld [smem:[%s9235_s0 + %s7175_s20]]   ;;  %s7180_s22 = smov 16  }
   0xf   :  { %s7271_s30 = sld [smem:[%s9235_s0 + %s7176_s26]]   ;;  %s7181_s28 = smov 17  }
  0x10   :  { %s7276_s6 = sld [smem:[%s9235_s0 + %s7177_s1]]  }
  0x11   :  { %s7281_s12 = sld [smem:[%s9235_s0 + %s7178_s7]]   ;;  %s7182_s7 = smov 18  }
  0x12   :  { %s7286_s20 = sld [smem:[%s9235_s0 + %s7179_s15]]   ;;  %s7183_s15 = smov 19  }
  0x13   :  { %s7291_s27 = sld [smem:[%s9235_s0 + %s7180_s22]]   ;;  %s7184_s22 = smov 20  }
  0x14   :  { %s7296_s4 = sld [smem:[%s9235_s0 + %s7181_s28]]   ;;  %s7185_s28 = smov 21  }
  0x15   :  { %s7301_s29 = sld [smem:[%s9235_s0 + %s7182_s7]]   ;;  %s7186_s7 = smov 22  }
  0x16   :  { %s7306_s9 = sld [smem:[%s9235_s0 + %s7183_s15]]   ;;  %s7187_s15 = smov 23  }
  0x19   :  { %9297 = sst [smem:[#allocation4_spill]] %s7291_s27 }
  0x1a   :  { %9298 = sst [smem:[#allocation5_spill]] %s7296_s4 }
  0x1b   :  { %9299 = sst [smem:[#allocation6_spill]] %s7301_s29 }
  0x1c   :  { %9300 = sst [smem:[#allocation7_spill]] %s7306_s9 }
  0x1d   :  { %s7311_s27 = sld [smem:[%s9235_s0 + %s7184_s22]]   ;;  %s7188_s22 = smov 24  }
  0x1e   :  { %s7316_s4 = sld [smem:[%s9235_s0 + %s7185_s28]]   ;;  %s7189_s28 = smov 25  }
  0x1f   :  { %s7321_s29 = sld [smem:[%s9235_s0 + %s7186_s7]]   ;;  %s7190_s7 = smov 26  }
  0x20   :  { %s7326_s9 = sld [smem:[%s9235_s0 + %s7187_s15]]   ;;  %s7191_s15 = smov 27  }
  0x23   :  { %9301 = sst [smem:[#allocation8_spill]] %s7311_s27 }
  0x24   :  { %9302 = sst [smem:[#allocation9_spill]] %s7316_s4 }
  0x25   :  { %9303 = sst [smem:[#allocation10_spill]] %s7321_s29 }
  0x26   :  { %9304 = sst [smem:[#allocation11_spill]] %s7326_s9 }
  0x27   :  { %s7331_s27 = sld [smem:[%s9235_s0 + %s7188_s22]]   ;;  %s7192_s22 = smov 28  }
  0x28   :  { %s7336_s4 = sld [smem:[%s9235_s0 + %s7189_s28]]   ;;  %s7193_s28 = smov 29  }
  0x29   :  { %s7341_s29 = sld [smem:[%s9235_s0 + %s7190_s7]]   ;;  %s7194_s7 = smov 30  }
  0x2a   :  { %s7346_s9 = sld [smem:[%s9235_s0 + %s7191_s15]]   ;;  %s7195_s15 = smov 31  }
  0x2d   :  { %9305 = sst [smem:[#allocation12_spill]] %s7331_s27 }
  0x2e   :  { %9306 = sst [smem:[#allocation13_spill]] %s7336_s4 }
  0x2f   :  { %9307 = sst [smem:[#allocation14_spill]] %s7341_s29 }
  0x30   :  { %9308 = sst [smem:[#allocation15_spill]] %s7346_s9 }
  0x31   :  { %s7351_s27 = sld [smem:[%s9235_s0 + %s7192_s22]]   ;;  %s7196_s22 = smov 32  }
  0x32   :  { %s7356_s4 = sld [smem:[%s9235_s0 + %s7193_s28]]   ;;  %s7197_s28 = smov 33  }
  0x33   :  { %s7361_s29 = sld [smem:[%s9235_s0 + %s7194_s7]]   ;;  %s7198_s7 = smov 34  }
  0x34   :  { %s7366_s9 = sld [smem:[%s9235_s0 + %s7195_s15]]   ;;  %s7383_s15 = smov 0  }
  0x37   :  { %9309 = sst [smem:[#allocation16_spill]] %s7351_s27 }
  0x38   :  { %9310 = sst [smem:[#allocation17_spill]] %s7356_s4 }
  0x39   :  { %9311 = sst [smem:[#allocation18_spill]] %s7361_s29 }
  0x3a   :  { %s7371_s27 = sld [smem:[%s9235_s0 + %s7196_s22]]  }
  0x3b   :  { %s7376_s4 = sld [smem:[%s9235_s0 + %s7197_s28]]  }
  0x3c   :  { %s7381_s29 = sld [smem:[%s9235_s0 + %s7198_s7]]  }
  0x3d LB: > { %s6354_s16 = sadd.s32 4294967295, %s7163_s15   ;;  %p6358_p0 = scmp.ge.s32.totalorder %s7163_s15, 1  ;;  %s7163_s15 = sphi %s7383_s15, %s79_s15  }
  0x3e   : > { %p967_p1 = scmp.lt.s32.totalorder %s7163_s15, 3 }
  0x40   : > { %p968_p2 = pnand %p6358_p0, %p967_p1 }
  0x41   : > { %p1062_p3 = scmp.lt.s32.totalorder (!%p968_p2), %s6354_s16, 1  ;;  %v1081_v0 = vld [vmem:[%s7211_s5] sm:$0xff] (!%p968_p2)  ;;  %vm9253_vm0 = vcmask (!%p968_p2), 130048   ;;  %v1092_v2 = vld [vmem:[%s7236_s25 + $0x8] sm:$0xff] (!%p968_p2)  ;;  %vm9272_vm1 = vcmask (!%p968_p2), 1046528   ;;  %v1093_v9 = vld [vmem:[%s7236_s25 + $0x10] sm:$0xff] (!%p968_p2) }
  0x42   : > { %971 = sbr.rel (%p968_p2) target bundleno = 6917 (0x1b05), region = 156  ;;  %6587 = vmatprep.mubr.msk.f32.mxu0 (!%p968_p2), %vm9253_vm0, %v1081_v0  ;;  %v1091_v1 = vld [vmem:[%s7236_s25] sm:$0xff] (!%p968_p2)  ;;  %v1094_v10 = vld [vmem:[%s7236_s25 + $0x18] sm:$0xff] (!%p968_p2)  ;;  %s7199_s22 = smov (!%p968_p2), 32   ;;  %v1082_v11 = vld [vmem:[%s7211_s5 + $0x8] sm:$0xff] (!%p968_p2)  ;;  %vm9271_vm2 = vcmask (!%p968_p2), 1045504  }
  0x43   : > { %v6863_v7 = vpack.c.bf16 (!%p968_p2), %v1092_v2, %v1091_v1  ;;  %v6867_v15 = vpack.c.bf16 (!%p968_p2), %v1094_v10, %v1093_v9  ;;  %s7200_s23 = smov (!%p968_p2), 64   ;;  %v1108_v18 = vld [vmem:[%s7251_s8] sm:$0xf] (!%p968_p2)  ;;  %vm9273_vm3 = vcmask (!%p968_p2), 1043456   ;;  %vm9266_vm4 = vcmask (!%p968_p2), 261120   ;;  %v1097_v36 = vld [vmem:[%s7246_s3 + $0x8] sm:$0xff] (!%p968_p2) }
  0x44   : > { %vm9246_vm5 = vcmask (!%p968_p2), 523264   ;;  %v1096_v35 = vld [vmem:[%s7246_s3] sm:$0xff] (!%p968_p2)  ;;  %vm9247_vm6 = vcmask (!%p968_p2), 31744   ;;  %v1098_v46 = vld [vmem:[%s7246_s3 + $0x10] sm:$0xff] (!%p968_p2)  ;;  %v1099_v47 = vld [vmem:[%s7246_s3 + $0x18] sm:$0xff] (!%p968_p2)  ;;  %vm9254_vm7 = vcmask (!%p968_p2), 1040384  }
  0x45   : > { %v6871_v42 = vpack.c.bf16 (!%p968_p2), %v1097_v36, %v1096_v35  ;;  %v6875_v49 = vpack.c.bf16 (!%p968_p2), %v1099_v47, %v1098_v46  ;;  %vm9245_vm8 = vcmask (!%p968_p2), 785408   ;;  %v1100_v51 = vld [vmem:[%s7246_s3 + $0x20] sm:$0xff] (!%p968_p2)  ;;  %v1101_v52 = vld [vmem:[%s7246_s3 + $0x28] sm:$0xff] (!%p968_p2)  ;;  %v1102_v54 = vld [vmem:[%s7246_s3 + $0x30] sm:$0xff] (!%p968_p2)  ;;  %s7201_s28 = smov (!%p968_p2), 96   ;;  %vm9277_vm9 = vcmask (!%p968_p2), 1042432  }
  0x46   : > { %v6879_v53 = vpack.c.bf16 (!%p968_p2), %v1101_v52, %v1100_v51  ;;  %v1103_v55 = vld [vmem:[%s7246_s3 + $0x38] sm:$0xff] (!%p968_p2)  ;;  %v1104_v57 = vld [vmem:[%s7246_s3 + $0x40] sm:$0xff] (!%p968_p2)  ;;  %v1105_v58 = vld [vmem:[%s7246_s3 + $0x48] sm:$0xff] (!%p968_p2)  ;;  %vm9270_vm10 = vcmask (!%p968_p2), 1044480   ;;  %vm9274_vm11 = vcmask (!%p968_p2), 1041408   ;;  %vm9250_vm12 = vcmask (!%p968_p2), 254976  }
  0x47   : > { %v6883_v56 = vpack.c.bf16 (!%p968_p2), %v1103_v55, %v1102_v54  ;;  %v6887_v59 = vpack.c.bf16 (!%p968_p2), %v1105_v58, %v1104_v57  ;;  %v1106_v60 = vld [vmem:[%s7246_s3 + $0x50] sm:$0xff] (!%p968_p2)  ;;  %v1107_v61 = vld [vmem:[%s7246_s3 + $0x58] sm:$0xff] (!%p968_p2)  ;;  %vm9248_vm13 = vcmask (!%p968_p2), 253952   ;;  %vm9252_vm14 = vcmask (!%p968_p2), 257024   ;;  %s9389_s2 = sld [smem:[#allocation4_spill]] (!%p968_p2)  ;;  %s9390_s7 = sld [smem:[#allocation7_spill]] (!%p968_p2) }
  0x48   : > { %v6891_v0 = vpack.c.bf16 (!%p968_p2), %v1107_v61, %v1106_v60  ;;  %vm9249_vm15 = vcmask (!%p968_p2), 256000   ;;  %s9394_s10 = sld [smem:[#allocation8_spill]] (!%p968_p2)  ;;  %s9523_s11 = sld [smem:[#allocation9_spill]] (!%p968_p2) }
  0x49   : > { %s9772_s16 = smov (!%p1062_p3, %s6354_s16), 1 }
  0x4a   : > { %s7396_s0 = sshll.u32 %s9772_s16, 4 }
  0x4b   : > { %s7402_s18 = scalar_lea.vmem %s7221_s13, %s7396_s0  ;;  %s1071_s26 = scalar_lea.vmem %s7226_s17, %s7396_s0 }
  0x4c   : > { %v1085_v3 = vld [vmem:[%s7402_s18] sm:$0xff]  ;;  %v7406_v4 = vld [vmem:[%s7402_s18 + $0x8] sm:$0xff]  ;;  %s1076_s1 = scalar_lea.vmem %s7231_s21, %s7396_s0  ;;  %s9559_s0 = sld [smem:[#allocation11_spill]] }
  0x4d   : > { %v6859_v5 = vpack.c.bf16 %v7406_v4, %v1085_v3  ;;  %v1372_v6 = vrot.slane %v1085_v3, 1  ;;  %v1373_v8 = vrot.slane %v7406_v4, 1  ;;  %v1385_v13 = vrot.slane %v1085_v3, 2  ;;  %v1087_v41 = vld [vmem:[%s1071_s26] sm:$0xff]  ;;  %v1088_v48 = vld [vmem:[%s1071_s26 + $0x8] sm:$0xff]  ;;  %s9564_s26 = sld [smem:[#allocation12_spill]] }
  0x4e   : > { %v1386_v14 = vrot.slane %v7406_v4, 2  ;;  %v1190_v19 = vsel %vm9266_vm4, %v1085_v3, 0.0  ;;  %v1191_v20 = vsel %vm9266_vm4, %v7406_v4, 0.0 }
  0x4f   : > { %6860 = vmatprep.subr.bf16.mxu0 %v6859_v5  ;;  %1375 = vrot.lane.b32.xlu0 %v1372_v6, %s7199_s22  ;;  %v1374_v12 = vsel %vm9272_vm1, %v1372_v6, %v1373_v8  ;;  %v1192_v21 = vadd.f32 %v1191_v20, %v1190_v19  ;;  %v1123_v6 = vld [vmem:[%s7266_s24 + $0x8] sm:$0xff] }
  0x50   : > { %6862 = vmatpush3.bf16.msra.mxu0 %v6859_v5  ;;  %1379 = vrot.lane.b32.xlu1 %v1373_v8, %s7199_s22  ;;  %v1387_v16 = vsel %vm9271_vm2, %v1385_v13, %v1386_v14  ;;  %v1388_v17 = vsel %vm9271_vm2, %v1386_v14, %v1385_v13  ;;  %v1122_v5 = vld [vmem:[%s7266_s24] sm:$0xff]  ;;  %v1125_v8 = vld [vmem:[%s7266_s24 + $0x18] sm:$0xff] }
  0x51   : > { %6864 = vmatprep.subr.bf16.mxu0 %v6863_v7  ;;  %v1193_v22 = vrot.slane %v1192_v21, 4  ;;  %v6381_v14 = vld [vmem:[%s7271_s30] ss:$0 sm:$0xff] }
  0x53   : > { %6588 = vmatmul.mubr.msk.f32.vlgmr.msra.gmra.mrb[0].mxu0 %vm9253_vm0, %v1082_v11  ;;  %1377 = vrot.lane.b32.xlu0 %v1374_v12, %s7199_s22  ;;  %v1194_v23 = vadd.f32 %v1193_v22, %v1192_v21  ;;  %vm9258_vm0 = vcmask 261127  }
  0x54   : > { %1389 = vrot.lane.b32.xlu1 %v1385_v13, %s7200_s23  ;;  %6866 = vmatpush3.bf16.msra.mxu0 %v6863_v7  ;;  %v1124_v7 = vld [vmem:[%s7266_s24 + $0x10] sm:$0xff] }
  0x55   : > { %6868 = vmatprep.subr.bf16.mxu0 %v6867_v15  ;;  %v1195_v24 = vrot.slane %v1194_v23, 2  ;;  %v6923_v9 = vpack.c.bf16 %v1125_v8, %v1124_v7 }
  0x57   : > { %1391 = vrot.lane.b32.xlu0 %v1387_v16, %s7200_s23  ;;  %v1196_v26 = vadd.f32 %v1195_v24, %v1194_v23 }
  0x58   : > { %1393 = vrot.lane.b32.xlu1 %v1388_v17, %s7200_s23  ;;  %6870 = vmatpush3.bf16.msra.mxu0 %v6867_v15 }
  0x59   : > { %6601 = vmatprep.subr.msk.mxu0 %vm9273_vm3, %v1108_v18  ;;  %v1197_v28 = vrot.slane %v1196_v26, 1 }
  0x5b   : > { %v1198_v30 = vadd.f32 %v1197_v28, %v1196_v26 }
  0x5d   : > { %v1200_v39 = vmul.f32 0.0625, %v1198_v30 }
  0xc1   : > { %v1376_v25 = vpop.permute.xlu0 %1375 }
  0xc2   : > { %v1380_v29 = vpop.permute.xlu1 %1379  ;;  %v1398_v31 = vsel %vm9266_vm4, %v7406_v4, %v1376_v25 }
  0xc3   : > { %v1400_v62 = vsel %vm9266_vm4, %v7406_v4, %v1380_v29  ;;  %v6919_v4 = vpack.c.bf16 %v1123_v6, %v1122_v5 }
  0xc5   : > { %v1378_v27 = vpop.permute.xlu0 %1377 }
  0xc6   : > { %v1399_v32 = vsel %vm9266_vm4, %v1085_v3, %v1378_v27  ;;  %v1390_v34 = vpop.permute.xlu1 %1389 }
  0xc7   : > { %v1402_v37 = vsel %vm9246_vm5, %v1398_v31, %v1390_v34 }
  0xc8   : > { %v1495_v43 = vrot.slane %v1402_v37, 7 }
  0xc9   : > { %v1392_v33 = vpop.permute.xlu0 %1391 }
  0xca   : > { %v1403_v38 = vsel %vm9246_vm5, %v1399_v32, %v1392_v33  ;;  %v1394_v63 = vpop.permute.xlu1 %1393 }
  0xcb   : > { %v1496_v44 = vrot.slane %v1403_v38, 7  ;;  %v1404_v1 = vsel %vm9246_vm5, %v1400_v62, %v1394_v63  ;;  %vm9251_vm5 = vcmask 258048  }
  0xcc   : > { %v1498_v2 = vrot.slane %v1404_v1, 7 }
  0xcd   : > { %v1497_v50 = vsel %vm9254_vm7, %v1495_v43, %v1496_v44 }
  0xce   : > { %v1499_v3 = vsel %vm9254_vm7, %v1496_v44, %v1498_v2 }
 0x126   : > { %v7438_v40 = vpop.f32.mrb[0].mxu0 }
 0x127   : > { %v1274_v45 = vpop.f32.mrb[1].mxu0  ;;  %6598 = vmatprep.mubr.msk.f32.mxu0 %vm9266_vm4, %v7438_v40 }
 0x128   : > { %6599 = vmatmul.mubr.msk.f32.vlgmr.msra.gmra.mrb[2].mxu0 %vm9266_vm4, %v1200_v39 }
 0x129   : > { %6602 = vmatpush3.msk.msra.mxu0 %vm9273_vm3, %v1108_v18  ;;  %6603 = vmatprep.mubr.msk.f32.mxu0 %vm9247_vm6, %v1087_v41 }
 0x12a   : > { %6872 = vmatprep.subr.bf16.mxu0 %v6871_v42 }
 0x12c   : > { %6604 = vmatmul.mubr.msk.f32.vlgmr.msra.gmra.mrb[4].mxu0 %vm9247_vm6, %v1088_v48  ;;  %vm9265_vm6 = vcmask 260096  }
 0x12d   : > { %6874 = vmatpush3.bf16.msra.mxu0 %v6871_v42  ;;  %6630 = vmatprep.mubr.msk.f32.mxu0 %vm9245_vm8, %v1497_v50 }
 0x12e   : > { %6876 = vmatprep.subr.bf16.mxu0 %v6875_v49 }
 0x131   : > { %6878 = vmatpush3.bf16.msra.mxu0 %v6875_v49 }
 0x132   : > { %6880 = vmatprep.subr.bf16.mxu0 %v6879_v53 }
 0x135   : > { %6882 = vmatpush3.bf16.msra.mxu0 %v6879_v53 }
 0x136   : > { %6884 = vmatprep.subr.bf16.mxu0 %v6883_v56 }
 0x139   : > { %6886 = vmatpush3.bf16.msra.mxu0 %v6883_v56 }
 0x13a   : > { %6888 = vmatprep.subr.bf16.mxu0 %v6887_v59 }
 0x13d   : > { %6890 = vmatpush3.bf16.msra.mxu0 %v6887_v59 }
 0x13e   : > { %6892 = vmatprep.subr.bf16.mxu0 %v6891_v0 }
 0x141   : > { %6894 = vmatpush3.bf16.msra.mxu0 %v6891_v0 }
 0x142   : > { %6920 = vmatprep.subr.bf16.mxu0 %v6919_v4 }
 0x144   : > { %6631 = vmatmul.mubr.msk.f32.vlgmr.msra.gmra.mrb[4].mxu0 %vm9245_vm8, %v1499_v3  ;;  %vm9264_vm8 = vcmask 259072  }
 0x145   : > { %6922 = vmatpush3.bf16.msra.mxu0 %v6919_v4 }
 0x146   : > { %6924 = vmatprep.subr.bf16.mxu0 %v6923_v9 }
 0x149   : > { %6926 = vmatpush3.bf16.msra.mxu0 %v6923_v9 }
 0x1fb   : > { %v7467_v10 = vpop.f32.mrb[2].mxu0 }
 0x1fc   : > { %v1361_v11 = vpop.f32.mrb[3].mxu0 }
 0x217   : > { %v7469_v12 = vpop.f32.mrb[4].mxu0 }
 0x218   : > { %v7471_v13 = vpop.f32.mrb[5].mxu0 }
 0x219   : > { %6673 = vmatprep.mubr.msk.f32.mxu0 %vm9266_vm4, %v7471_v13 }
 0x21a   : > { %6674 = vmatmul.mubr.msk.f32.vlgmr.msra.gmra.mrb[6].mxu0 %vm9266_vm4, %v7469_v12 }
 0x2ed   : > { %v6675_v15 = vpop.f32.mrb[6].mxu0 }
 0x2ee   : > { %v7478_v16 = vadd.f32 %v6675_v15, %v6381_v14  ;;  %v1862_v17 = vpop.f32.mrb[7].mxu0 }
 0x2ef   : > { %v7480_v18 = vadd.f32 %v6381_v14, %v1862_v17 }
 0x2f0   : > { %1880 = vrot.lane.b32.xlu1 %v7478_v16, %s7201_s28  ;;  %v1964_v19 = vrot.slane %v7478_v16, 6  ;;  %v1910_v20 = vrot.slane %v7478_v16, 7  ;;  %v2072_v21 = vrot.slane %v7478_v16, 4  ;;  %v2018_v22 = vrot.slane %v7478_v16, 5 }
 0x2f1   : > { %1878 = vrot.lane.b32.xlu0 %v7480_v18, %s7201_s28  ;;  %v2178_v23 = vrot.slane %v7478_v16, 2  ;;  %v2125_v24 = vrot.slane %v7478_v16, 3  ;;  %v1963_v25 = vrot.slane %v7480_v18, 6  ;;  %v2231_v26 = vrot.slane %v7478_v16, 1 }
 0x2f2   : > { %v2071_v27 = vrot.slane %v7480_v18, 4  ;;  %v1909_v28 = vrot.slane %v7480_v18, 7  ;;  %v2177_v29 = vrot.slane %v7480_v18, 2  ;;  %v2017_v30 = vrot.slane %v7480_v18, 5 }
 0x2f3   : > { %v2124_v32 = vrot.slane %v7480_v18, 3  ;;  %v2230_v34 = vrot.slane %v7480_v18, 1  ;;  %v1965_v36 = vsel %vm9274_vm11, %v1963_v25, %v1964_v19 }
 0x2f4   : > { %1970 = vrot.lane.b32.xlu1 %v1964_v19, %s7201_s28  ;;  %v1911_v31 = vsel %vm9254_vm7, %v1909_v28, %v1910_v20  ;;  %v2019_v33 = vsel %vm9277_vm9, %v2017_v30, %v2018_v22  ;;  %v2073_v38 = vsel %vm9273_vm3, %v2071_v27, %v2072_v21  ;;  %v2179_v39 = vsel %vm9271_vm2, %v2177_v29, %v2178_v23 }
 0x2f5   : > { %1916 = vrot.lane.b32.xlu0 %v1910_v20, %s7201_s28  ;;  %v2126_v35 = vsel %vm9270_vm10, %v2124_v32, %v2125_v24  ;;  %v2232_v37 = vsel %vm9272_vm1, %v2230_v34, %v2231_v26  ;;  %vm9255_vm7 = vcmask 261126  }
 0x2f8   : > { %2078 = vrot.lane.b32.xlu1 %v2072_v21, %s7201_s28 }
 0x2f9   : > { %2024 = vrot.lane.b32.xlu0 %v2018_v22, %s7201_s28 }
 0x2fc   : > { %2184 = vrot.lane.b32.xlu1 %v2178_v23, %s7201_s28 }
 0x2fd   : > { %2131 = vrot.lane.b32.xlu0 %v2125_v24, %s7201_s28 }
 0x300   : > { %1966 = vrot.lane.b32.xlu1 %v1963_v25, %s7201_s28 }
 0x301   : > { %2237 = vrot.lane.b32.xlu0 %v2231_v26, %s7201_s28 }
 0x304   : > { %2074 = vrot.lane.b32.xlu1 %v2071_v27, %s7201_s28 }
 0x305   : > { %1912 = vrot.lane.b32.xlu0 %v1909_v28, %s7201_s28 }
 0x308   : > { %2180 = vrot.lane.b32.xlu1 %v2177_v29, %s7201_s28 }
 0x309   : > { %2020 = vrot.lane.b32.xlu0 %v2017_v30, %s7201_s28 }
 0x30c   : > { %1914 = vrot.lane.b32.xlu1 %v1911_v31, %s7201_s28 }
 0x30d   : > { %2127 = vrot.lane.b32.xlu0 %v2124_v32, %s7201_s28 }
 0x310   : > { %2022 = vrot.lane.b32.xlu1 %v2019_v33, %s7201_s28 }
 0x311   : > { %2233 = vrot.lane.b32.xlu0 %v2230_v34, %s7201_s28 }
 0x314   : > { %2129 = vrot.lane.b32.xlu1 %v2126_v35, %s7201_s28 }
 0x315   : > { %1968 = vrot.lane.b32.xlu0 %v1965_v36, %s7201_s28 }
 0x318   : > { %2235 = vrot.lane.b32.xlu1 %v2232_v37, %s7201_s28 }
 0x319   : > { %2076 = vrot.lane.b32.xlu0 %v2073_v38, %s7201_s28 }
 0x31d   : > { %2182 = vrot.lane.b32.xlu0 %v2179_v39, %s7201_s28 }
 0x362   : > { %v1881_v41 = vpop.permute.xlu1 %1880 }
 0x363   : > { %v1879_v42 = vpop.permute.xlu0 %1878  ;;  %v1885_v43 = vmul.f32 %v1881_v41, %v7478_v16  ;;  %v2284_v46 = vmul.f32 %v1881_v41, %v7480_v18 }
 0x364   : > { %v1884_v44 = vmul.f32 %v1879_v42, %v7480_v18  ;;  %v2283_v49 = vmul.f32 %v1879_v42, %v7478_v16 }
 0x365   : > { %v1889_v45 = vsel %vm9266_vm4, %v1885_v43, 0.0  ;;  %v2288_v51 = vsel %vm9266_vm4, %v2284_v46, 0.0 }
 0x366   : > { %v1971_v47 = vpop.permute.xlu1 %1970  ;;  %1890 = vadd.xlane.f32.xlu1 %v1889_v45  ;;  %v1886_v48 = vsel %vm9266_vm4, %v1884_v44, 0.0  ;;  %v2285_v54 = vsel %vm9266_vm4, %v2283_v49, 0.0 }
 0x367   : > { %v1917_v50 = vpop.permute.xlu0 %1916  ;;  %1887 = vadd.xlane.f32.xlu0 %v1886_v48  ;;  %v1977_v52 = vmul.f32 %v1971_v47, %v7480_v18  ;;  %v2349_v15 = vmul.f32 %v1971_v47, %v7478_v16 }
 0x368   : > { %v1923_v55 = vmul.f32 %v1917_v50, %v7480_v18  ;;  %v2310_v6 = vmul.f32 %v1917_v50, %v7478_v16 }
 0x369   : > { %v1986_v57 = vsel %vm9250_vm12, %v1977_v52, 0.0  ;;  %v2356_v22 = vsel %vm9250_vm12, %v2349_v15, 0.0  ;;  %vm9257_vm12 = vcmask 261122  }
 0x36a   : > { %v2079_v53 = vpop.permute.xlu1 %2078  ;;  %2289 = vadd.xlane.f32.xlu1 %v2288_v51  ;;  %v1932_v60 = vsel %vm9248_vm13, %v1923_v55, 0.0  ;;  %v2317_v9 = vsel %vm9248_vm13, %v2310_v6, 0.0  ;;  %vm9261_vm13 = vcmask 261121  }
 0x36b   : > { %v2025_v56 = vpop.permute.xlu0 %2024  ;;  %2286 = vadd.xlane.f32.xlu0 %v2285_v54  ;;  %v2085_v58 = vmul.f32 %v2079_v53, %v7480_v18  ;;  %v2427_v23 = vmul.f32 %v2079_v53, %v7478_v16 }
 0x36c   : > { %v2031_v61 = vmul.f32 %v2025_v56, %v7480_v18  ;;  %v2388_v11 = vmul.f32 %v2025_v56, %v7478_v16 }
 0x36d   : > { %v2094_v63 = vsel %vm9252_vm14, %v2085_v58, 0.0  ;;  %v2434_v27 = vsel %vm9252_vm14, %v2427_v23, 0.0  ;;  %vm9256_vm14 = vcmask 261124  }
 0x36e   : > { %v7540_v59 = vpop.permute.xlu1 %2184  ;;  %1987 = vadd.xlane.f32.xlu1 %v1986_v57  ;;  %v2040_v1 = vsel %vm9249_vm15, %v2031_v61, 0.0  ;;  %v2395_v19 = vsel %vm9249_vm15, %v2388_v11, 0.0  ;;  %vm9263_vm15 = vcmask 261123  }
 0x36f   : > { %v2132_v62 = vpop.permute.xlu0 %2131  ;;  %1933 = vadd.xlane.f32.xlu0 %v1932_v60  ;;  %v2191_v0 = vmul.f32 %v7540_v59, %v7480_v18 }
 0x370   : > { %v2138_v2 = vmul.f32 %v2132_v62, %v7480_v18  ;;  %v2466_v20 = vmul.f32 %v2132_v62, %v7478_v16 }
 0x371   : > { %v2200_v5 = vsel %vm9264_vm8, %v2191_v0, 0.0 }
 0x372   : > { %2095 = vadd.xlane.f32.xlu1 %v2094_v63  ;;  %v2147_v7 = vsel %vm9251_vm5, %v2138_v2, 0.0  ;;  %v1967_v21 = vpop.permute.xlu1 %1966  ;;  %v2473_v25 = vsel %vm9251_vm5, %v2466_v20, 0.0  ;;  %vm9262_vm5 = vcmask 261125  }
 0x373   : > { %v7549_v3 = vpop.permute.xlu0 %2237  ;;  %2041 = vadd.xlane.f32.xlu0 %v2040_v1  ;;  %v1975_v31 = vmul.f32 %v1967_v21, %v7480_v18  ;;  %v2347_v44 = vmul.f32 %v1967_v21, %v7478_v16 }
 0x374   : > { %v2244_v4 = vmul.f32 %v7549_v3, %v7480_v18 }
 0x375   : > { %v1979_v35 = vsel %vm9257_vm12, %v1975_v31, 0.0  ;;  %v2350_v48 = vsel %vm9257_vm12, %v2347_v44, 0.0 }
 0x376   : > { %2201 = vadd.xlane.f32.xlu1 %v2200_v5  ;;  %v2253_v14 = vsel %vm9265_vm6, %v2244_v4, 0.0  ;;  %v2075_v29 = vpop.permute.xlu1 %2074 }
 0x377   : > { %2148 = vadd.xlane.f32.xlu0 %v2147_v7  ;;  %v1913_v8 = vpop.permute.xlu0 %1912  ;;  %v2083_v36 = vmul.f32 %v2075_v29, %v7480_v18  ;;  %v2425_v49 = vmul.f32 %v2075_v29, %v7478_v16 }
 0x378   : > { %v1921_v26 = vmul.f32 %v1913_v8, %v7480_v18  ;;  %v2308_v46 = vmul.f32 %v1913_v8, %v7478_v16 }
 0x379   : > { %v2087_v41 = vsel %vm9256_vm14, %v2083_v36, 0.0  ;;  %v2428_v52 = vsel %vm9256_vm14, %v2425_v49, 0.0 }
 0x37a   : > { %2318 = vadd.xlane.f32.xlu1 %v2317_v9  ;;  %v1925_v30 = vsel %vm9261_vm13, %v1921_v26, 0.0  ;;  %v2181_v37 = vpop.permute.xlu1 %2180  ;;  %v2311_v50 = vsel %vm9261_vm13, %v2308_v46, 0.0 }
 0x37b   : > { %2254 = vadd.xlane.f32.xlu0 %v2253_v14  ;;  %v2021_v17 = vpop.permute.xlu0 %2020  ;;  %v2189_v42 = vmul.f32 %v2181_v37, %v7480_v18  ;;  %v2503_v53 = vmul.f32 %v2181_v37, %v7478_v16 }
 0x37c   : > { %v2029_v28 = vmul.f32 %v2021_v17, %v7480_v18  ;;  %v2386_v51 = vmul.f32 %v2021_v17, %v7478_v16 }
 0x37d   : > { %v2193_v45 = vsel %vm9255_vm7, %v2189_v42, 0.0  ;;  %v2506_v58 = vsel %vm9255_vm7, %v2503_v53, 0.0 }
 0x37e   : > { %2396 = vadd.xlane.f32.xlu1 %v2395_v19  ;;  %v2033_v32 = vsel %vm9263_vm15, %v2029_v28, 0.0  ;;  %v1915_v47 = vpop.permute.xlu1 %1914  ;;  %v2389_v56 = vsel %vm9263_vm15, %v2386_v51, 0.0 }
 0x37f   : > { %2357 = vadd.xlane.f32.xlu0 %v2356_v22  ;;  %v2128_v24 = vpop.permute.xlu0 %2127  ;;  %v1922_v60 = vmul.f32 %v1915_v47, %v7478_v16  ;;  %v2505_v22 = vmul.f32 %v7540_v59, %v7478_v16  ;;  %v2309_v26 = vmul.f32 %v1915_v47, %v7480_v18 }
 0x380   : > { %v2136_v33 = vmul.f32 %v2128_v24, %v7480_v18  ;;  %v2464_v57 = vmul.f32 %v2128_v24, %v7478_v16 }
 0x381   : > { %v1928_v1 = vsel %vm9266_vm4, %v1922_v60, 0.0  ;;  %v2314_v29 = vsel %vm9266_vm4, %v2309_v26, 0.0 }
 0x382   : > { %2474 = vadd.xlane.f32.xlu1 %v2473_v25  ;;  %v2140_v38 = vsel %vm9262_vm5, %v2136_v33, 0.0  ;;  %v2023_v55 = vpop.permute.xlu1 %2022  ;;  %v2467_v62 = vsel %vm9262_vm5, %v2464_v57, 0.0  ;;  %v2512_v25 = vsel %vm9264_vm8, %v2505_v22, 0.0 }
 0x383   : > { %2435 = vadd.xlane.f32.xlu0 %v2434_v27  ;;  %v2234_v34 = vpop.permute.xlu0 %2233  ;;  %v2030_v63 = vmul.f32 %v2023_v55, %v7478_v16  ;;  %v2387_v59 = vmul.f32 %v2023_v55, %v7480_v18 }
 0x384   : > { %v2242_v39 = vmul.f32 %v2234_v34, %v7480_v18  ;;  %v2542_v11 = vmul.f32 %v2234_v34, %v7478_v16 }
 0x385   : > { %v2036_v5 = vsel %vm9266_vm4, %v2030_v63, 0.0 }
 0x386   : > { %1926 = vadd.xlane.f32.xlu1 %v1925_v30  ;;  %v2246_v43 = vsel %vm9258_vm0, %v2242_v39, 0.0  ;;  %v2130_v0 = vpop.permute.xlu1 %2129  ;;  %v2545_v19 = vsel %vm9258_vm0, %v2542_v11, 0.0 }
 0x387   : > { %2034 = vadd.xlane.f32.xlu0 %v2033_v32  ;;  %v1969_v54 = vpop.permute.xlu0 %1968  ;;  %v2137_v6 = vmul.f32 %v2130_v0, %v7478_v16  ;;  %v2392_v32 = vsel %vm9266_vm4, %v2387_v59, 0.0  ;;  %v2465_v33 = vmul.f32 %v2130_v0, %v7480_v18 }
 0x388   : > { %v1976_v2 = vmul.f32 %v1969_v54, %v7478_v16  ;;  %v2348_v24 = vmul.f32 %v1969_v54, %v7480_v18 }
 0x389   : > { %v2143_v9 = vsel %vm9266_vm4, %v2137_v6, 0.0  ;;  %v2470_v36 = vsel %vm9266_vm4, %v2465_v33, 0.0 }
 0x38a   : > { %1980 = vadd.xlane.f32.xlu1 %v1979_v35  ;;  %v1982_v7 = vsel %vm9266_vm4, %v1976_v2, 0.0  ;;  %v2236_v14 = vpop.permute.xlu1 %2235  ;;  %v2353_v27 = vsel %vm9266_vm4, %v2348_v24, 0.0  ;;  %v2544_v35 = vmul.f32 %v7549_v3, %v7478_v16 }
 0x38b   : > { %2141 = vadd.xlane.f32.xlu0 %v2140_v38  ;;  %v2077_v61 = vpop.permute.xlu0 %2076  ;;  %v2243_v20 = vmul.f32 %v2236_v14, %v7478_v16  ;;  %v2543_v37 = vmul.f32 %v2236_v14, %v7480_v18 }
 0x38c   : > { %v2084_v4 = vmul.f32 %v2077_v61, %v7478_v16  ;;  %v2426_v28 = vmul.f32 %v2077_v61, %v7480_v18  ;;  %v2551_v38 = vsel %vm9265_vm6, %v2544_v35, 0.0 }
 0x38d   : > { %v2249_v23 = vsel %vm9266_vm4, %v2243_v20, 0.0  ;;  %v2548_v39 = vsel %vm9266_vm4, %v2543_v37, 0.0 }
 0x38e   : > { %2088 = vadd.xlane.f32.xlu1 %v2087_v41  ;;  %v2090_v15 = vsel %vm9266_vm4, %v2084_v4, 0.0  ;;  %v2431_v30 = vsel %vm9266_vm4, %v2426_v28, 0.0 }
 0x38f   : > { %2247 = vadd.xlane.f32.xlu0 %v2246_v43  ;;  %v2183_v8 = vpop.permute.xlu0 %2182 }
 0x390   : > { %v2190_v17 = vmul.f32 %v2183_v8, %v7478_v16  ;;  %v2504_v31 = vmul.f32 %v2183_v8, %v7480_v18 }
 0x392   : > { %2194 = vadd.xlane.f32.xlu1 %v2193_v45  ;;  %v2196_v21 = vsel %vm9266_vm4, %v2190_v17, 0.0  ;;  %v2509_v34 = vsel %vm9266_vm4, %v2504_v31, 0.0  ;;  %vm9312_vm4 = vcmask 1040384  }
 0x393   : > { %2351 = vadd.xlane.f32.xlu0 %v2350_v48 }
 0x396   : > { %2312 = vadd.xlane.f32.xlu1 %v2311_v50 }
 0x397   : > { %2429 = vadd.xlane.f32.xlu0 %v2428_v52 }
 0x39a   : > { %2390 = vadd.xlane.f32.xlu1 %v2389_v56 }
 0x39b   : > { %2507 = vadd.xlane.f32.xlu0 %v2506_v58 }
 0x39e   : > { %2468 = vadd.xlane.f32.xlu1 %v2467_v62 }
 0x39f   : > { %1929 = vadd.xlane.f32.xlu0 %v1928_v1 }
 0x3a2   : > { %2037 = vadd.xlane.f32.xlu1 %v2036_v5 }
 0x3a3   : > { %1983 = vadd.xlane.f32.xlu0 %v1982_v7 }
 0x3a6   : > { %2144 = vadd.xlane.f32.xlu1 %v2143_v9 }
 0x3a7   : > { %2091 = vadd.xlane.f32.xlu0 %v2090_v15  ;;  %v1871_v15 = vlaneseq }
 0x3a9   : > { %v7666_v22 = vshrl.u32 %v1871_v15, 7  ;;  %v7668_v24 = vand.u32 127, %v1871_v15 }
 0x3aa   : > { %2546 = vadd.xlane.f32.xlu1 %v2545_v19 }
 0x3ab   : > { %2197 = vadd.xlane.f32.xlu0 %v2196_v21  ;;  %vm1900_vm7 = vcmp.eq.s32.totalorder %v7668_v24, 0  ;;  %vm9260_vm14 = vcmp.eq.s32.totalorder %v7666_v22, 0  ;;  %vm9267_vm12 = vcmp.eq.s32.totalorder %v7668_v24, 8  ;;  %vm2007_vm13 = vcmp.eq.s32.totalorder %v7668_v24, 2 }
 0x3ac   : > { %vm9293_vm5 = vcmp.eq.s32.totalorder %v7668_v24, 3  ;;  %vm9268_vm15 = vcmp.eq.s32.totalorder %v7666_v22, 2  ;;  %vm9278_vm8 = vcmp.eq.s32.totalorder %v7668_v24, 4  ;;  %vm2168_vm6 = vcmp.eq.s32.totalorder %v7668_v24, 5 }
 0x3ae   : > { %2250 = vadd.xlane.f32.xlu1 %v2249_v23 }
 0x3af   : > { %2513 = vadd.xlane.f32.xlu0 %v2512_v25 }
 0x3b2   : > { %2354 = vadd.xlane.f32.xlu1 %v2353_v27  ;;  %v7673_v27 = vadd.s32 8, %v7666_v22 }
 0x3b3   : > { %2315 = vadd.xlane.f32.xlu0 %v2314_v29 }
 0x3b4   : > { %vm9259_vm0 = vcmp.eq.s32.totalorder %v7673_v27, 8 }
 0x3b6   : > { %2432 = vadd.xlane.f32.xlu1 %v2431_v30 }
 0x3b7   : > { %2393 = vadd.xlane.f32.xlu0 %v2392_v32 }
 0x3ba   : > { %2510 = vadd.xlane.f32.xlu1 %v2509_v34 }
 0x3bb   : > { %2471 = vadd.xlane.f32.xlu0 %v2470_v36 }
 0x3be   : > { %2552 = vadd.xlane.f32.xlu1 %v2551_v38 }
 0x3bf   : > { %2549 = vadd.xlane.f32.xlu0 %v2548_v39 }
 0x3f3   : > { %v1891_v41 = vpop.xlane.xlu1 %1890 }
 0x3f4   : > { %v1888_v42 = vpop.xlane.xlu0 %1887 }
 0x3f5   : > { %v1892_v54 = vadd.f32 %v1891_v41, %v1888_v42 }
 0x3f7   : > { %v2290_v43 = vpop.xlane.xlu1 %2289  ;;  %v1893_v58 = vrot.slane %v1892_v54, 4 }
 0x3f8   : > { %v2287_v44 = vpop.xlane.xlu0 %2286 }
 0x3f9   : > { %v2291_v55 = vadd.f32 %v2290_v43, %v2287_v44  ;;  %v1894_v63 = vadd.f32 %v1893_v58, %v1892_v54 }
 0x3fb   : > { %v7628_v45 = vpop.xlane.xlu1 %1987  ;;  %v2292_v60 = vrot.slane %v2291_v55, 4  ;;  %v1895_v5 = vrot.slane %v1894_v63, 2 }
 0x3fc   : > { %v7630_v46 = vpop.xlane.xlu0 %1933  ;;  %v1995_v31 = vrot.slane %v7628_v45, 2 }
 0x3fd   : > { %v2293_v0 = vadd.f32 %v2292_v60, %v2291_v55  ;;  %v1896_v8 = vadd.f32 %v1895_v5, %v1894_v63  ;;  %v1941_v32 = vrot.slane %v7630_v46, 1 }
 0x3ff   : > { %v7632_v3 = vpop.xlane.xlu1 %2095  ;;  %v2294_v6 = vrot.slane %v2293_v0, 2  ;;  %v1897_v17 = vrot.slane %v1896_v8, 1 }
 0x400   : > { %v7634_v47 = vpop.xlane.xlu0 %2041  ;;  %v2103_v34 = vrot.slane %v7632_v3, 4 }
 0x401   : > { %v2295_v9 = vadd.f32 %v2294_v6, %v2293_v0  ;;  %v1898_v23 = vadd.f32 %v1897_v17, %v1896_v8  ;;  %v2050_v35 = vrot.slane %v7634_v47, 3 }
 0x403   : > { %v7636_v48 = vpop.xlane.xlu1 %2201  ;;  %v2296_v19 = vrot.slane %v2295_v9, 1  ;;  %v1899_v29 = vmul.f32 0.03125, %v1898_v23 }
 0x404   : > { %v7638_v49 = vpop.xlane.xlu0 %2148  ;;  %v2209_v41 = vrot.slane %v7636_v48, 6 }
 0x405   : > { %v2297_v25 = vadd.f32 %v2296_v19, %v2295_v9  ;;  %v7689_v38 = vsel %vm1900_vm7, %v1899_v29, 0.0  ;;  %v7693_v39 = vsel %vm9260_vm14, %v1899_v29, 0.0  ;;  %v2156_v42 = vrot.slane %v7638_v49, 5 }
 0x406   : > { %vm9269_vm14 = vcmp.eq.s32.totalorder %v7666_v22, 1 }
 0x407   : > { %v7640_v50 = vpop.xlane.xlu1 %2318  ;;  %v2298_v59 = vmul.f32 0.03125, %v2297_v25 }
 0x408   : > { %v7642_v51 = vpop.xlane.xlu0 %2254  ;;  %v2326_v44 = vrot.slane %v7640_v50, 1 }
 0x409   : > { %v7699_v43 = vsel %vm9267_vm12, %v2298_v59, 0.0  ;;  %v7706_v47 = vsel %vm9259_vm0, %v2298_v59, 0.0  ;;  %v2262_v49 = vrot.slane %v7642_v51, 7  ;;  %vm1953_vm0 = vcmp.eq.s32.totalorder %v7668_v24, 1  ;;  %vm9313_vm12 = vmmov %vm9312_vm4 }
 0x40b   : > { %v7644_v52 = vpop.xlane.xlu1 %2396 }
 0x40c   : > { %v7646_v53 = vpop.xlane.xlu0 %2357 }
 0x40d   : > { %v2365_v5 = vrot.slane %v7646_v53, 2 }
 0x40f   : > { %v7648_v56 = vpop.xlane.xlu1 %2474 }
 0x410   : > { %v7650_v57 = vpop.xlane.xlu0 %2435  ;;  %v2482_v15 = vrot.slane %v7648_v56, 5 }
 0x413   : > { %v1927_v61 = vpop.xlane.xlu1 %1926 }
 0x414   : > { %v2035_v62 = vpop.xlane.xlu0 %2034  ;;  %v1938_v36 = vrot.slane %v1927_v61, 1  ;;  %v2404_v61 = vrot.slane %v7644_v52, 3 }
 0x415   : > { %v2047_v54 = vrot.slane %v2035_v62, 3 }
 0x417   : > { %v1981_v1 = vpop.xlane.xlu1 %1980 }
 0x418   : > { %v7652_v2 = vpop.xlane.xlu0 %2141  ;;  %v1992_v63 = vrot.slane %v1981_v1, 2 }
 0x419   : > { %v2153_v25 = vrot.slane %v7652_v2, 5 }
 0x41b   : > { %v7654_v7 = vpop.xlane.xlu1 %2088 }
 0x41c   : > { %v7656_v4 = vpop.xlane.xlu0 %2247 }
 0x41f   : > { %v7658_v11 = vpop.xlane.xlu1 %2194 }
 0x420   : > { %v7660_v14 = vpop.xlane.xlu0 %2351 }
 0x423   : > { %v7662_v20 = vpop.xlane.xlu1 %2312 }
 0x424   : > { %v7664_v21 = vpop.xlane.xlu0 %2429 }
 0x427   : > { %v7670_v26 = vpop.xlane.xlu1 %2390 }
 0x428   : > { %v7675_v28 = vpop.xlane.xlu0 %2507 }
 0x42b   : > { %v7679_v30 = vpop.xlane.xlu1 %2468 }
 0x42c   : > { %v1930_v33 = vpop.xlane.xlu0 %1929 }
 0x42d   : > { %v1939_v37 = vrot.slane %v1930_v33, 1  ;;  %v2443_v33 = vrot.slane %v7650_v57, 4 }
 0x42f   : > { %v1940_v45 = vsel %vm9272_vm1, %v1938_v36, %v1939_v37  ;;  %v1942_v46 = vsel %vm9272_vm1, %v1939_v37, %v1941_v32  ;;  %v2038_v3 = vpop.xlane.xlu1 %2037  ;;  %v2100_v36 = vrot.slane %v7654_v7, 4  ;;  %v2259_v7 = vrot.slane %v7656_v4, 7 }
 0x430   : > { %v1945_v55 = vadd.f32 %v1942_v46, %v1940_v45  ;;  %v2048_v58 = vrot.slane %v2038_v3, 3  ;;  %v1984_v60 = vpop.xlane.xlu0 %1983 }
 0x431   : > { %v1993_v0 = vrot.slane %v1984_v60, 2 }
 0x432   : > { %v1946_v6 = vrot.slane %v1945_v55, 4  ;;  %v2049_v8 = vsel %vm9270_vm10, %v2047_v54, %v2048_v58  ;;  %v2051_v9 = vsel %vm9270_vm10, %v2048_v58, %v2050_v35 }
 0x433   : > { %v2054_v17 = vadd.f32 %v2051_v9, %v2049_v8  ;;  %v1994_v62 = vsel %vm9271_vm2, %v1992_v63, %v1993_v0  ;;  %v1996_v19 = vsel %vm9271_vm2, %v1993_v0, %v1995_v31  ;;  %v2145_v23 = vpop.xlane.xlu1 %2144  ;;  %v2206_v9 = vrot.slane %v7658_v11, 6 }
 0x434   : > { %v1947_v29 = vadd.f32 %v1946_v6, %v1945_v55  ;;  %v1999_v1 = vadd.f32 %v1996_v19, %v1994_v62  ;;  %v2154_v59 = vrot.slane %v2145_v23, 5  ;;  %v2092_v32 = vpop.xlane.xlu0 %2091  ;;  %v2362_v19 = vrot.slane %v7660_v14, 2 }
 0x435   : > { %v2055_v35 = vrot.slane %v2054_v17, 4  ;;  %v2101_v37 = vrot.slane %v2092_v32, 4  ;;  %v2323_v14 = vrot.slane %v7662_v20, 1 }
 0x436   : > { %v1948_v45 = vrot.slane %v1947_v29, 2  ;;  %v2000_v46 = vrot.slane %v1999_v1, 4  ;;  %v2155_v3 = vsel %vm9277_vm9, %v2153_v25, %v2154_v59  ;;  %v2157_v31 = vsel %vm9277_vm9, %v2154_v59, %v2156_v42 }
 0x437   : > { %v2056_v54 = vadd.f32 %v2055_v35, %v2054_v17  ;;  %v2160_v2 = vadd.f32 %v2157_v31, %v2155_v3  ;;  %v2102_v55 = vsel %vm9273_vm3, %v2100_v36, %v2101_v37  ;;  %v2104_v58 = vsel %vm9273_vm3, %v2101_v37, %v2103_v34  ;;  %v7724_v60 = vpop.xlane.xlu1 %2546 }
 0x438   : > { %v1949_v63 = vadd.f32 %v1948_v45, %v1947_v29  ;;  %v2001_v0 = vadd.f32 %v2000_v46, %v1999_v1  ;;  %v2107_v6 = vadd.f32 %v2104_v58, %v2102_v55  ;;  %v2198_v8 = vpop.xlane.xlu0 %2197 }
 0x439   : > { %v2057_v62 = vrot.slane %v2056_v54, 2  ;;  %v2161_v42 = vrot.slane %v2160_v2, 4  ;;  %v2207_v17 = vrot.slane %v2198_v8, 6  ;;  %v2440_v8 = vrot.slane %v7664_v21, 4 }
 0x43a   : > { %v1950_v34 = vrot.slane %v1949_v63, 1  ;;  %v2002_v23 = vrot.slane %v2001_v0, 2  ;;  %v2108_v4 = vrot.slane %v2107_v6, 4 }
 0x43b   : > { %v2058_v25 = vadd.f32 %v2057_v62, %v2056_v54  ;;  %v2162_v29 = vadd.f32 %v2161_v42, %v2160_v2  ;;  %v2208_v1 = vsel %vm9274_vm11, %v2206_v9, %v2207_v17  ;;  %v2210_v11 = vsel %vm9274_vm11, %v2207_v17, %v2209_v41  ;;  %v2251_v59 = vpop.xlane.xlu1 %2250 }
 0x43c   : > { %v1951_v32 = vadd.f32 %v1950_v34, %v1949_v63  ;;  %v2003_v36 = vadd.f32 %v2002_v23, %v2001_v0  ;;  %v2109_v35 = vadd.f32 %v2108_v4, %v2107_v6  ;;  %v2213_v37 = vadd.f32 %v2210_v11, %v2208_v1  ;;  %v7736_v45 = vpop.xlane.xlu0 %2513 }
 0x43d   : > { %v2059_v46 = vrot.slane %v2058_v25, 1  ;;  %v2163_v3 = vrot.slane %v2162_v29, 2  ;;  %v2260_v31 = vrot.slane %v2251_v59, 7  ;;  %v2401_v17 = vrot.slane %v7670_v26, 3 }
 0x43e   : > { %v1952_v54 = vmul.f32 0.03125, %v1951_v32  ;;  %v2004_v48 = vrot.slane %v2003_v36, 1  ;;  %v2110_v41 = vrot.slane %v2109_v35, 2  ;;  %v2214_v2 = vrot.slane %v2213_v37, 4 }
 0x43f   : > { %v2060_v55 = vadd.f32 %v2059_v46, %v2058_v25  ;;  %v2164_v58 = vadd.f32 %v2163_v3, %v2162_v29  ;;  %v2261_v63 = vsel %vm9312_vm4, %v2259_v7, %v2260_v31  ;;  %v2263_v0 = vsel %vm9313_vm12, %v2260_v31, %v2262_v49  ;;  %v2355_v6 = vpop.xlane.xlu1 %2354 }
 0x440   : > { %v1954_v9 = vsel %vm1953_vm0, %v1952_v54, 0.0  ;;  %v2005_v62 = vadd.f32 %v2004_v48, %v2003_v36  ;;  %v2111_v42 = vadd.f32 %v2110_v41, %v2109_v35  ;;  %v2518_v34 = vrot.slane %v7675_v28, 6  ;;  %v2316_v7 = vpop.xlane.xlu0 %2315 }
 0x441   : > { %v7751_v23 = vmul.f32 0.03125, %v2060_v55  ;;  %v2165_v4 = vrot.slane %v2164_v58, 1  ;;  %v2215_v29 = vadd.f32 %v2214_v2, %v2213_v37  ;;  %v2266_v49 = vadd.f32 %v2263_v0, %v2261_v63 }
 0x442   : > { %v2006_v25 = vmul.f32 0.03125, %v2005_v62  ;;  %v2112_v51 = vrot.slane %v2111_v42, 1  ;;  %v2479_v1 = vrot.slane %v7679_v30, 5  ;;  %v1955_v21 = vadd.f32 %v1954_v9, %v7689_v38 }
 0x443   : > { %v2166_v11 = vadd.f32 %v2165_v4, %v2164_v58  ;;  %vm9275_vm4 = vcmp.eq.s32.totalorder %v7668_v24, 6  ;;  %v2363_v59 = vrot.slane %v2355_v6, 2  ;;  %v2433_v32 = vpop.xlane.xlu1 %2432  ;;  %v1958_v26 = vsel %vm9269_vm14, %v1952_v54, 0.0 }
 0x444   : > { %v2008_v36 = vsel %vm2007_vm13, %v2006_v25, 0.0  ;;  %v2113_v35 = vadd.f32 %v2112_v51, %v2111_v42  ;;  %v2216_v46 = vrot.slane %v2215_v29, 2  ;;  %v2063_v37 = vsel %vm9293_vm5, %v7751_v23, 0.0  ;;  %v2394_v6 = vpop.xlane.xlu0 %2393 }
 0x445   : > { %v2009_v3 = vadd.f32 %v2008_v36, %v1955_v21  ;;  %v7763_v31 = vmul.f32 0.03125, %v2166_v11  ;;  %v2267_v38 = vrot.slane %v2266_v49, 4  ;;  %v2364_v2 = vsel %vm9271_vm2, %v2362_v19, %v2363_v59 }
 0x446   : > { %v7765_v48 = vmul.f32 0.03125, %v2113_v35  ;;  %v2217_v41 = vadd.f32 %v2216_v46, %v2215_v29  ;;  %v2366_v54 = vsel %vm9271_vm2, %v2363_v59, %v2365_v5  ;;  %v1960_v55 = vadd.f32 %v1958_v26, %v7693_v39 }
 0x447   : > { %v2064_v58 = vadd.f32 %v2063_v37, %v2009_v3  ;;  %v2557_v63 = vrot.slane %v7724_v60, 7  ;;  %v2521_v0 = vrot.slane %v7736_v45, 6  ;;  %v2012_v9 = vsel %vm9268_vm15, %v2006_v25, 0.0  ;;  %v2511_v53 = vpop.xlane.xlu1 %2510 }
 0x448   : > { %v2116_v62 = vsel %vm9278_vm8, %v7765_v48, 0.0  ;;  %v2218_v19 = vrot.slane %v2217_v41, 1  ;;  %v2268_v42 = vadd.f32 %v2267_v38, %v2266_v49  ;;  %v2169_v39 = vsel %vm2168_vm6, %v7763_v31, 0.0 }
 0x449   : > { %v2117_v5 = vadd.f32 %v2116_v62, %v2064_v58  ;;  %vm9276_vm12 = vcmp.eq.s32.totalorder %v7668_v24, 7  ;;  %v2369_v4 = vadd.f32 %v2366_v54, %v2364_v2  ;;  %v2324_v45 = vrot.slane %v2316_v7, 1 }
 0x44a   : > { %v2219_v51 = vadd.f32 %v2218_v19, %v2217_v41  ;;  %v2269_v29 = vrot.slane %v2268_v42, 2  ;;  %v2441_v21 = vrot.slane %v2433_v32, 4  ;;  %v2402_v25 = vrot.slane %v2394_v6, 3 }
 0x44b   : > { %v2170_v11 = vadd.f32 %v2169_v39, %v2117_v5  ;;  %v2370_v59 = vrot.slane %v2369_v4, 4  ;;  %v2325_v49 = vsel %vm9272_vm1, %v2323_v14, %v2324_v45  ;;  %v2327_v26 = vsel %vm9272_vm1, %v2324_v45, %v2326_v44  ;;  %v2472_v44 = vpop.xlane.xlu0 %2471 }
 0x44c   : > { %vm9279_vm15 = vcmp.eq.s32.totalorder %v7666_v22, 3  ;;  %v7790_v36 = vmul.f32 0.03125, %v2219_v51  ;;  %v2270_v35 = vadd.f32 %v2269_v29, %v2268_v42  ;;  %v2330_v7 = vadd.f32 %v2327_v26, %v2325_v49 }
 0x44d   : > { %v2442_v46 = vsel %vm9273_vm3, %v2440_v8, %v2441_v21  ;;  %v2371_v32 = vadd.f32 %v2370_v59, %v2369_v4  ;;  %v2444_v37 = vsel %vm9273_vm3, %v2441_v21, %v2443_v33  ;;  %v2403_v20 = vsel %vm9270_vm10, %v2401_v17, %v2402_v25  ;;  %v2553_v8 = vpop.xlane.xlu1 %2552 }
 0x44e   : > { %v2405_v50 = vsel %vm9270_vm10, %v2402_v25, %v2404_v61  ;;  %v2014_v14 = vadd.f32 %v2012_v9, %v1960_v55  ;;  %v2222_v3 = vsel %vm9275_vm4, %v7790_v36, 0.0  ;;  %v2271_v38 = vrot.slane %v2270_v35, 1 }
 0x44f   : > { %v2331_v41 = vrot.slane %v2330_v7, 4  ;;  %v2223_v2 = vadd.f32 %v2222_v3, %v2170_v11  ;;  %v2372_v54 = vrot.slane %v2371_v32, 2  ;;  %v2447_v57 = vadd.f32 %v2444_v37, %v2442_v46  ;;  %v2550_v29 = vpop.xlane.xlu0 %2549 }
 0x450   : > { %v2408_v58 = vadd.f32 %v2405_v50, %v2403_v20  ;;  %v2272_v33 = vadd.f32 %v2271_v38, %v2270_v35  ;;  %vm2377_vm14 = vcmp.eq.s32.totalorder %v7668_v24, 10  ;;  %v2519_v52 = vrot.slane %v2511_v53, 6 }
 0x451   : > { %v2332_v17 = vadd.f32 %v2331_v41, %v2330_v7  ;;  %v2480_v6 = vrot.slane %v2472_v44, 5  ;;  %v2373_v61 = vadd.f32 %v2372_v54, %v2371_v32  ;;  %vm2338_vm10 = vcmp.eq.s32.totalorder %v7668_v24, 9 }
 0x452   : > { %vm9286_vm2 = vcmp.eq.s32.totalorder %v7673_v27, 9  ;;  %v2448_v55 = vrot.slane %v2447_v57, 4  ;;  %v2409_v9 = vrot.slane %v2408_v58, 4  ;;  %v2560_v62 = vrot.slane %v2553_v8, 7 }
 0x453   : > { %v7806_v19 = vmul.f32 0.03125, %v2272_v33  ;;  %vm9282_vm1 = vcmp.eq.s32.totalorder %v7673_v27, 10  ;;  %v2333_v42 = vrot.slane %v2332_v17, 2  ;;  %v2520_v39 = vsel %vm9274_vm11, %v2518_v34, %v2519_v52 }
 0x454   : > { %v2522_v53 = vsel %vm9274_vm11, %v2519_v52, %v2521_v0  ;;  %v2374_v5 = vrot.slane %v2373_v61, 1  ;;  %v2449_v4 = vadd.f32 %v2448_v55, %v2447_v57  ;;  %v2410_v45 = vadd.f32 %v2409_v9, %v2408_v58 }
 0x455   : > { %v2525_v51 = vadd.f32 %v2522_v53, %v2520_v39  ;;  %vm9281_vm3 = vcmp.eq.s32.totalorder %v7666_v22, 4  ;;  %v2275_v21 = vsel %vm9276_vm12, %v7806_v19, 0.0  ;;  %v2334_v25 = vadd.f32 %v2333_v42, %v2332_v17 }
 0x456   : > { %v2481_v28 = vsel %vm9277_vm9, %v2479_v1, %v2480_v6  ;;  %v2483_v34 = vsel %vm9277_vm9, %v2480_v6, %v2482_v15  ;;  %v2276_v0 = vadd.f32 %v2275_v21, %v2223_v2  ;;  %v2375_v11 = vadd.f32 %v2374_v5, %v2373_v61 }
 0x457   : > { %v2450_v59 = vrot.slane %v2449_v4, 2  ;;  %vm2416_vm11 = vcmp.eq.s32.totalorder %v7668_v24, 11  ;;  %vm9280_vm4 = vcmp.eq.s32.totalorder %v7673_v27, 11  ;;  %v2411_v49 = vrot.slane %v2410_v45, 2 }
 0x458   : > { %v2335_v26 = vrot.slane %v2334_v25, 1  ;;  %v2526_v35 = vrot.slane %v2525_v51, 4  ;;  %v2486_v7 = vadd.f32 %v2483_v34, %v2481_v28  ;;  %v2558_v46 = vrot.slane %v2550_v29, 7 }
 0x459   : > { %v2067_v30 = vsel %vm9279_vm15, %v7751_v23, 0.0  ;;  %v2376_v1 = vmul.f32 0.03125, %v2375_v11  ;;  %vm2455_vm12 = vcmp.eq.s32.totalorder %v7668_v24, 12  ;;  %v2451_v56 = vadd.f32 %v2450_v59, %v2449_v4 }
 0x45a   : > { %v2412_v15 = vadd.f32 %v2411_v49, %v2410_v45  ;;  %v2336_v32 = vadd.f32 %v2335_v26, %v2334_v25  ;;  %v2527_v37 = vadd.f32 %v2526_v35, %v2525_v51  ;;  %v2487_v20 = vrot.slane %v2486_v7, 4 }
 0x45b   : > { %vm9314_vm9 = vcmask 1040384   ;;  %v2069_v44 = vadd.f32 %v2067_v30, %v2014_v14  ;;  %v2301_v3 = vadd.f32 %v7699_v43, %v2276_v0  ;;  %v2452_v38 = vrot.slane %v2451_v56, 1 }
 0x45c   : > { %v2559_v50 = vsel %vm9314_vm9, %v2557_v63, %v2558_v46  ;;  %v2413_v41 = vrot.slane %v2412_v15, 1  ;;  %vm9284_vm8 = vcmp.eq.s32.totalorder %v7666_v22, 5  ;;  %v2337_v23 = vmul.f32 0.03125, %v2336_v32  ;;  %vm9315_vm15 = vmmov %vm9314_vm9 }
 0x45d   : > { %v2528_v8 = vrot.slane %v2527_v37, 2  ;;  %v2488_v2 = vadd.f32 %v2487_v20, %v2486_v7  ;;  %v2561_v54 = vsel %vm9315_vm15, %v2558_v46, %v2560_v62  ;;  %v2378_v57 = vsel %vm2377_vm14, %v2376_v1, 0.0 }
 0x45e   : > { %v2453_v58 = vadd.f32 %v2452_v38, %v2451_v56  ;;  %v2414_v33 = vadd.f32 %v2413_v41, %v2412_v15  ;;  %v2564_v60 = vadd.f32 %v2561_v54, %v2559_v50  ;;  %v2339_v63 = vsel %vm2338_vm10, %v2337_v23, 0.0 }
 0x45f   : > { %v2344_v43 = vsel %vm9286_vm2, %v2337_v23, 0.0  ;;  %v2529_v14 = vadd.f32 %v2528_v8, %v2527_v37  ;;  %v2489_v17 = vrot.slane %v2488_v2, 2  ;;  %v2383_v52 = vsel %vm9282_vm1, %v2376_v1, 0.0 }
 0x460   : > { %v2340_v6 = vadd.f32 %v2339_v63, %v2301_v3  ;;  %v2346_v61 = vadd.f32 %v2344_v43, %v7706_v47  ;;  %v2415_v55 = vmul.f32 0.03125, %v2414_v33  ;;  %v2454_v9 = vmul.f32 0.03125, %v2453_v58 }
 0x461   : > { %v2530_v62 = vrot.slane %v2529_v14, 1  ;;  %v2490_v42 = vadd.f32 %v2489_v17, %v2488_v2  ;;  %v2565_v39 = vrot.slane %v2564_v60, 4  ;;  %v2120_v53 = vsel %vm9281_vm3, %v7765_v48, 0.0 }
 0x462   : > { %vm9283_vm9 = vcmp.eq.s32.totalorder %v7673_v27, 12  ;;  %v2379_v5 = vadd.f32 %v2378_v57, %v2340_v6  ;;  %v2385_v4 = vadd.f32 %v2383_v52, %v2346_v61  ;;  %v2417_v45 = vsel %vm2416_vm11, %v2415_v55, 0.0 }
 0x463   : > { %v2422_v51 = vsel %vm9280_vm4, %v2415_v55, 0.0  ;;  %vm9285_vm15 = vcmp.eq.s32.totalorder %v7673_v27, 13  ;;  %v2491_v47 = vrot.slane %v2490_v42, 1  ;;  %v2531_v25 = vadd.f32 %v2530_v62, %v2529_v14 }
 0x464   : > { %v2418_v29 = vadd.f32 %v2417_v45, %v2379_v5  ;;  %v2424_v21 = vadd.f32 %v2422_v51, %v2385_v4  ;;  %v2566_v28 = vadd.f32 %v2565_v39, %v2564_v60  ;;  %v2122_v34 = vadd.f32 %v2120_v53, %v2069_v44 }
 0x465   : > { %v2456_v48 = vsel %vm2455_vm12, %v2454_v9, 0.0  ;;  %v2461_v0 = vsel %vm9283_vm9, %v2454_v9, 0.0  ;;  %v2492_v11 = vadd.f32 %v2491_v47, %v2490_v42  ;;  %vm2494_vm4 = vcmp.eq.s32.totalorder %v7668_v24, 13 }
 0x466   : > { %v2463_v59 = vadd.f32 %v2461_v0, %v2424_v21  ;;  %v2567_v49 = vrot.slane %v2566_v28, 2  ;;  %v2457_v26 = vadd.f32 %v2456_v48, %v2418_v29  ;;  %vm9288_vm3 = vcmp.eq.s32.totalorder %v7666_v22, 6 }
 0x467   : > { %v2493_v35 = vmul.f32 0.03125, %v2492_v11  ;;  %v2173_v7 = vsel %vm9284_vm8, %v7763_v31, 0.0  ;;  %vm9287_vm1 = vcmp.eq.s32.totalorder %v7673_v27, 14  ;;  %v2532_v46 = vmul.f32 0.03125, %v2531_v25 }
 0x468   : > { %v2568_v30 = vadd.f32 %v2567_v49, %v2566_v28  ;;  %v2175_v56 = vadd.f32 %v2173_v7, %v2122_v34  ;;  %vm9289_vm9 = vcmp.eq.s32.totalorder %v7668_v24, 14  ;;  %v2226_v32 = vsel %vm9288_vm3, %v7790_v36, 0.0 }
 0x469   : > { %v2500_v1 = vsel %vm9285_vm15, %v2493_v35, 0.0  ;;  %v2495_v15 = vsel %vm2494_vm4, %v2493_v35, 0.0  ;;  %vm9290_vm8 = vcmp.eq.s32.totalorder %v7666_v22, 7  ;;  %v2539_v50 = vsel %vm9287_vm1, %v2532_v46, 0.0 }
 0x46a   : > { %v2502_v37 = vadd.f32 %v2500_v1, %v2463_v59  ;;  %v2569_v20 = vrot.slane %v2568_v30, 1  ;;  %v2496_v31 = vadd.f32 %v2495_v15, %v2457_v26  ;;  %v2534_v44 = vsel %vm9289_vm9, %v2532_v46, 0.0 }
 0x46b   : > { %vm9292_vm15 = vcmp.eq.s32.totalorder %v7668_v24, 15  ;;  %v2228_v38 = vadd.f32 %v2226_v32, %v2175_v56  ;;  %vm9291_vm2 = vcmp.eq.s32.totalorder %v7673_v27, 15  ;;  %v2279_v36 = vsel %vm9290_vm8, %v7806_v19, 0.0 }
 0x46c   : > { %v2570_v3 = vadd.f32 %v2569_v20, %v2568_v30  ;;  %v2535_v41 = vadd.f32 %v2534_v44, %v2496_v31  ;;  %v2541_v23 = vadd.f32 %v2539_v50, %v2502_v37  ;;  %v7202_v60 = vmov 0.0  }
 0x46d   : > { %v2281_v57 = vadd.f32 %v2279_v36, %v2228_v38  ;;  %vm9316_vm9 = vcmask 130048  }
 0x46e   : > { %v2571_v8 = vmul.f32 0.03125, %v2570_v3  ;;  %vm9317_vm8 = vmmov %vm9316_vm9 }
 0x470   : > { %v2573_v2 = vsel %vm9292_vm15, %v2571_v8, 0.0  ;;  %v2578_v54 = vsel %vm9291_vm2, %v2571_v8, 0.0  ;;  %vm9318_vm15 = vmmov %vm9317_vm8 }
 0x471   : > { %v2574_v58 = vadd.f32 %v2573_v2, %v2535_v41  ;;  %v2580_v33 = vadd.f32 %v2578_v54, %v2541_v23 }
 0x473   : > { %vm2581_vm1 = vcmp.gt.f32.partialorder %v2281_v57, %v2574_v58  ;;  %vm2582_vm3 = vcmp.gt.f32.partialorder %v2580_v33, %v2574_v58 }
 0x474   : > { %v2583_v63 = vsel %vm2581_vm1, 1.0, %v7202_v60  ;;  %v2584_v43 = vsel %vm2582_vm3, 1.0, %v7202_v60  ;;  %vm9319_vm1 = vmmov %vm9317_vm8 }
 0x475   : > { %v2585_v14 = vsel %vm9316_vm9, %v2583_v63, 0.0  ;;  %v2586_v19 = vsel %vm9317_vm8, %v2584_v43, 0.0  ;;  %vm9320_vm3 = vmmov %vm9319_vm1  ;;  %v1121_v63 = vld [vmem:[%s7261_s19] sm:$0xf] }
 0x476   : > { %v2587_v17 = vadd.f32 %v2586_v19, %v2585_v14  ;;  %vm9321_vm8 = vmmov %vm9319_vm1  ;;  %v1109_v43 = vld [vmem:[%s7256_s14] sm:$0xff]  ;;  %v1110_v14 = vld [vmem:[%s7256_s14 + $0x8] sm:$0xff] }
 0x477   : > { %vm9323_vm9 = vmmov %vm9319_vm1  ;;  %v1089_v19 = vld [vmem:[%s1076_s1] sm:$0xff] }
 0x478   : > { %v2588_v52 = vrot.slane %v2587_v17, 4 }
 0x47a   : > { %v2589_v6 = vadd.f32 %v2588_v52, %v2587_v17  ;;  %v1090_v17 = vld [vmem:[%s1076_s1 + $0x8] sm:$0xff]  ;;  %v6895_v52 = vpack.c.bf16 %v1110_v14, %v1109_v43  ;;  %s9566_s1 = sld [smem:[#allocation10_spill]] }
 0x47c   : > { %v2590_v61 = vrot.slane %v2589_v6, 2 }
 0x47e   : > { %v2591_v55 = vadd.f32 %v2590_v61, %v2589_v6  ;;  %v1127_v6 = vld [vmem:[%s7276_s6] sm:$0xff]  ;;  %v1128_v61 = vld [vmem:[%s7276_s6 + $0x8] sm:$0xff] }
 0x480   : > { %v2592_v9 = vrot.slane %v2591_v55, 1 }
 0x482   : > { %v2593_v62 = vadd.f32 %v2592_v9, %v2591_v55  ;;  %v1111_v55 = vld [vmem:[%s7256_s14 + $0x10] sm:$0xff]  ;;  %v1112_v9 = vld [vmem:[%s7256_s14 + $0x18] sm:$0xff] }
 0x484   : > { %vm2594_vm2 = vcmp.lt.f32.partialorder %v2593_v62, 8.0  ;;  %v6927_v62 = vpack.c.bf16 %v1128_v61, %v1127_v6 }
 0x485   : > { %v2595_v42 = vsel %vm2594_vm2, %v2574_v58, -1e+30 }
 0x486   : > { %v2596_v39 = vsel %vm9318_vm15, %v2595_v42, -inf  ;;  %vm9324_vm15 = vcmp.eq.s32.totalorder %v7668_v24, 4  ;;  %v6899_v42 = vpack.c.bf16 %v1112_v9, %v1111_v55  ;;  %6928 = vmatprep.subr.bf16.mxu0 %v6927_v62 }
 0x487   : > { %2597 = vmax.xlane.f32.xlu0 %v2596_v39  ;;  %v1129_v39 = vld [vmem:[%s7276_s6 + $0x10] sm:$0xff]  ;;  %6930 = vmatpush3.bf16.msra.mxu0 %v6927_v62 }
 0x514   : > { %v2598_v53 = vpop.xlane.xlu0 %2597 }
 0x515   : > { %v2599_v5 = vsub.f32 %v2574_v58, %v2598_v53  ;;  %v1130_v53 = vld [vmem:[%s7276_s6 + $0x18] sm:$0xff] }
 0x517   : > { %v2600_v4 = vmul.f32 1.442695, %v2599_v5  ;;  %v6931_v5 = vpack.c.bf16 %v1130_v53, %v1129_v39 }
 0x519   : > { %7124 = vpow2.f32 %v2600_v4  ;;  %6932 = vmatprep.subr.bf16.mxu0 %v6931_v5 }
 0x51a   : > { %6934 = vmatpush3.bf16.msra.mxu0 %v6931_v5 }
 0x523   : > { %v7125_v45 = vpop.eup %7124 }
 0x524   : > { %v2602_v51 = vsel %vm2594_vm2, %v7125_v45, 0.0  ;;  %vm9322_vm2 = vmmov %vm9319_vm1 }
 0x525   : > { %v2603_v47 = vsel %vm9319_vm1, %v2602_v51, 0.0 }
 0x526   : > { %2604 = vadd.xlane.f32.xlu1 %v2603_v47 }
 0x5b3   : > { %v2605_v29 = vpop.xlane.xlu1 %2604 }
 0x5b4   : > { %7126 = vrcp.f32 %v2605_v29 }
 0x5be   : > { %v7127_v21 = vpop.eup %7126 }
 0x5bf   : > { %v2607_v25 = vmul.f32 %v7127_v21, %v2602_v51 }
 0x5c1   : > { %v2632_v28 = vsel %vm2007_vm13, %v2607_v25, 0.0  ;;  %v2616_v34 = vsel %vm1953_vm0, %v2607_v25, 0.0  ;;  %v2648_v11 = vsel %vm9293_vm5, %v2607_v25, 0.0  ;;  %v2608_v59 = vsel %vm1900_vm7, %v2607_v25, 0.0  ;;  %vm9329_vm5 = vmmov %vm9319_vm1 }
 0x5c2   : > { %v2633_v48 = vsel %vm9320_vm3, %v2632_v28, 0.0  ;;  %v2617_v0 = vsel %vm9321_vm8, %v2616_v34, 0.0  ;;  %v2649_v49 = vsel %vm9322_vm2, %v2648_v11, 0.0  ;;  %v2609_v26 = vsel %vm9323_vm9, %v2608_v59, 0.0  ;;  %vm9325_vm3 = vmmov %vm9319_vm1 }
 0x5c3   : > { %2634 = vadd.xlane.f32.xlu1 %v2633_v48  ;;  %2618 = vadd.xlane.f32.xlu0 %v2617_v0  ;;  %v2680_v35 = vsel %vm2168_vm6, %v2607_v25, 0.0  ;;  %v2664_v7 = vsel %vm9324_vm15, %v2607_v25, 0.0  ;;  %vm9326_vm8 = vcmp.eq.s32.totalorder %v7668_v24, 7  ;;  %vm9327_vm2 = vcmp.eq.s32.totalorder %v7668_v24, 6  ;;  %vm9328_vm9 = vmmov %vm9319_vm1 }
 0x5c4   : > { %v2681_v46 = vsel %vm9319_vm1, %v2680_v35, 0.0  ;;  %v2665_v30 = vsel %vm9325_vm3, %v2664_v7, 0.0  ;;  %v2712_v1 = vsel %vm9326_vm8, %v2607_v25, 0.0  ;;  %v2696_v56 = vsel %vm9327_vm2, %v2607_v25, 0.0  ;;  %vm9331_vm3 = vmmov %vm9319_vm1 }
 0x5c5   : > { %v2713_v15 = vsel %vm9328_vm9, %v2712_v1, 0.0  ;;  %v2697_v32 = vsel %vm9329_vm5, %v2696_v56, 0.0  ;;  %vm9330_vm15 = vcmp.eq.s32.totalorder %v7668_v24, 8  ;;  %v2736_v20 = vsel %vm2338_vm10, %v2607_v25, 0.0  ;;  %vm9332_vm5 = vmmov %vm9319_vm1 }
 0x5c6   : > { %v2728_v37 = vsel %vm9330_vm15, %v2607_v25, 0.0  ;;  %v2737_v50 = vsel %vm9331_vm3, %v2736_v20, 0.0  ;;  %v2768_v44 = vsel %vm2416_vm11, %v2607_v25, 0.0  ;;  %v2752_v3 = vsel %vm2377_vm14, %v2607_v25, 0.0  ;;  %vm9333_vm8 = vmmov %vm9319_vm1 }
 0x5c7   : > { %2650 = vadd.xlane.f32.xlu1 %v2649_v49  ;;  %2610 = vadd.xlane.f32.xlu0 %v2609_v26  ;;  %v2729_v31 = vsel %vm9319_vm1, %v2728_v37, 0.0  ;;  %v2769_v38 = vsel %vm9332_vm5, %v2768_v44, 0.0  ;;  %v2753_v41 = vsel %vm9333_vm8, %v2752_v3, 0.0  ;;  %v2800_v23 = vsel %vm2494_vm4, %v2607_v25, 0.0  ;;  %vm9334_vm2 = vmmov %vm9319_vm1 }
 0x5c8   : > { %v2784_v36 = vsel %vm2455_vm12, %v2607_v25, 0.0  ;;  %v2801_v8 = vsel %vm9334_vm2, %v2800_v23, 0.0  ;;  %vm9335_vm9 = vmmov %vm9319_vm1  ;;  %vm9336_vm15 = vcmp.eq.s32.totalorder %v7668_v24, 15  ;;  %vm9337_vm1 = vcmp.eq.s32.totalorder %v7668_v24, 14 }
 0x5c9   : > { %v2785_v2 = vsel %vm9335_vm9, %v2784_v36, 0.0  ;;  %v2832_v54 = vsel %vm9336_vm15, %v2607_v25, 0.0  ;;  %v2816_v57 = vsel %vm9337_vm1, %v2607_v25, 0.0  ;;  %vm9338_vm3 = vmmov %vm9334_vm2  ;;  %vm9340_vm8 = vcmask 1043456  }
 0x5ca   : > { %v2833_v58 = vsel %vm9338_vm3, %v2832_v54, 0.0  ;;  %vm9339_vm5 = vmmov %vm9334_vm2  ;;  %6633 = vmatprep.subr.msk.mxu1 %vm9340_vm8, %v1121_v63  ;;  %vm9342_vm9 = vcmask 31744   ;;  %vm9344_vm1 = vcmask 1046528  }
 0x5cb   : > { %2682 = vadd.xlane.f32.xlu1 %v2681_v46  ;;  %2666 = vadd.xlane.f32.xlu0 %v2665_v30  ;;  %v2817_v33 = vsel %vm9339_vm5, %v2816_v57, 0.0  ;;  %vm9341_vm2 = vmmov %vm9340_vm8  ;;  %vm9346_vm5 = vcmask 1045504  }
 0x5cc   : > { %6634 = vmatpush3.msk.msra.mxu1 %vm9341_vm2, %v1121_v63  ;;  %6635 = vmatprep.mubr.msk.f32.mxu1 %vm9342_vm9, %v1089_v19  ;;  %vm9343_vm15 = vmmov %vm9342_vm9  ;;  %vm9348_vm2 = vcmask 1044480  }
 0x5cd   : > { %6896 = vmatprep.subr.bf16.mxu1 %v6895_v52  ;;  %6636 = vmatmul.mubr.msk.f32.vlgmr.msra.gmra.mrb[0].mxu1 %vm9343_vm15, %v1090_v17  ;;  %vm9345_vm3 = vmmov %vm9344_vm1  ;;  %vm9350_vm15 = vcmask 1043456  }
 0x5ce   : > { %6898 = vmatpush3.bf16.msra.mxu1 %v6895_v52  ;;  %vm9347_vm8 = vmmov %vm9346_vm5 }
 0x5cf   : > { %2714 = vadd.xlane.f32.xlu1 %v2713_v15  ;;  %2698 = vadd.xlane.f32.xlu0 %v2697_v32  ;;  %vm9349_vm9 = vmmov %vm9348_vm2 }
 0x5d0   : > { %6900 = vmatprep.subr.bf16.mxu1 %v6899_v42 }
 0x5d2   : > { %6902 = vmatpush3.bf16.msra.mxu1 %v6899_v42 }
 0x5d3   : > { %2730 = vadd.xlane.f32.xlu1 %v2729_v31  ;;  %2738 = vadd.xlane.f32.xlu0 %v2737_v50 }
 0x5d7   : > { %2770 = vadd.xlane.f32.xlu1 %v2769_v38  ;;  %2754 = vadd.xlane.f32.xlu0 %v2753_v41 }
 0x5db   : > { %2802 = vadd.xlane.f32.xlu1 %v2801_v8  ;;  %2786 = vadd.xlane.f32.xlu0 %v2785_v2 }
 0x5df   : > { %2834 = vadd.xlane.f32.xlu1 %v2833_v58  ;;  %2818 = vadd.xlane.f32.xlu0 %v2817_v33 }
 0x650   : > { %v2635_v4 = vpop.xlane.xlu1 %2634  ;;  %v2619_v45 = vpop.xlane.xlu0 %2618 }
 0x651   : > { %v2636_v51 = vmul.f32 %v2635_v4, %v7480_v18  ;;  %v2637_v47 = vmul.f32 %v2635_v4, %v7478_v16  ;;  %v2620_v29 = vmul.f32 %v2619_v45, %v7480_v18  ;;  %v2621_v21 = vmul.f32 %v2619_v45, %v7478_v16 }
 0x653   : > { %v2624_v25 = vrot.slane %v2620_v29, 1  ;;  %v2625_v28 = vrot.slane %v2621_v21, 1  ;;  %v2640_v34 = vrot.slane %v2636_v51, 2  ;;  %v2641_v48 = vrot.slane %v2637_v47, 2 }
 0x654   : > { %v2651_v0 = vpop.xlane.xlu1 %2650  ;;  %v2611_v11 = vpop.xlane.xlu0 %2610 }
 0x655   : > { %v2652_v59 = vmul.f32 %v2651_v0, %v7480_v18  ;;  %v2653_v49 = vmul.f32 %v2651_v0, %v7478_v16  ;;  %v2626_v26 = vsel %vm9344_vm1, %v2624_v25, %v2625_v28  ;;  %v2627_v35 = vsel %vm9345_vm3, %v2625_v28, %v2624_v25  ;;  %vm9351_vm1 = vmmov %vm9350_vm15 }
 0x656   : > { %v2612_v7 = vmul.f32 %v2611_v11, %v7480_v18  ;;  %v2613_v46 = vmul.f32 %v2611_v11, %v7478_v16  ;;  %v2642_v56 = vsel %vm9346_vm5, %v2640_v34, %v2641_v48  ;;  %v2643_v15 = vsel %vm9347_vm8, %v2641_v48, %v2640_v34 }
 0x657   : > { %v2656_v30 = vrot.slane %v2652_v59, 3  ;;  %v2657_v1 = vrot.slane %v2653_v49, 3  ;;  %vm9352_vm3 = vcmask 1042432   ;;  %vm9354_vm8 = vcmask 1041408  }
 0x658   : > { %v2630_v32 = vadd.f32 %v2626_v26, %v2612_v7  ;;  %v2631_v37 = vadd.f32 %v2627_v35, %v2613_v46  ;;  %v2683_v20 = vpop.xlane.xlu1 %2682  ;;  %v2667_v31 = vpop.xlane.xlu0 %2666  ;;  %vm9353_vm5 = vmmov %vm9352_vm3 }
 0x659   : > { %v2658_v50 = vsel %vm9348_vm2, %v2656_v30, %v2657_v1  ;;  %v2659_v44 = vsel %vm9349_vm9, %v2657_v1, %v2656_v30  ;;  %v2684_v3 = vmul.f32 %v2683_v20, %v7480_v18  ;;  %v2685_v38 = vmul.f32 %v2683_v20, %v7478_v16  ;;  %vm9355_vm2 = vmmov %vm9354_vm8 }
 0x65a   : > { %v2646_v41 = vadd.f32 %v2642_v56, %v2630_v32  ;;  %v2647_v23 = vadd.f32 %v2643_v15, %v2631_v37  ;;  %v2668_v36 = vmul.f32 %v2667_v31, %v7480_v18  ;;  %v2669_v8 = vmul.f32 %v2667_v31, %v7478_v16 }
 0x65b   : > { %v2688_v2 = vrot.slane %v2684_v3, 5  ;;  %v2689_v54 = vrot.slane %v2685_v38, 5  ;;  %vm9356_vm9 = vcmask 1040384  }
 0x65c   : > { %v2662_v57 = vadd.f32 %v2658_v50, %v2646_v41  ;;  %v2663_v58 = vadd.f32 %v2659_v44, %v2647_v23  ;;  %v2672_v33 = vrot.slane %v2668_v36, 4  ;;  %v2673_v63 = vrot.slane %v2669_v8, 4  ;;  %v2715_v43 = vpop.xlane.xlu1 %2714  ;;  %v2699_v14 = vpop.xlane.xlu0 %2698 }
 0x65d   : > { %v2716_v19 = vmul.f32 %v2715_v43, %v7480_v18  ;;  %v2717_v17 = vmul.f32 %v2715_v43, %v7478_v16  ;;  %v2700_v61 = vmul.f32 %v2699_v14, %v7480_v18  ;;  %v2701_v55 = vmul.f32 %v2699_v14, %v7478_v16 }
 0x65e   : > { %v2674_v52 = vsel %vm9350_vm15, %v2672_v33, %v2673_v63  ;;  %v2675_v6 = vsel %vm9351_vm1, %v2673_v63, %v2672_v33  ;;  %v2690_v9 = vsel %vm9352_vm3, %v2688_v2, %v2689_v54  ;;  %v2691_v62 = vsel %vm9353_vm5, %v2689_v54, %v2688_v2  ;;  %vm9357_vm15 = vmmov %vm9356_vm9 }
 0x65f   : > { %v2678_v42 = vadd.f32 %v2674_v52, %v2662_v57  ;;  %v2679_v39 = vadd.f32 %v2675_v6, %v2663_v58  ;;  %v2720_v53 = vrot.slane %v2716_v19, 7  ;;  %v2721_v5 = vrot.slane %v2717_v17, 7 }
 0x660   : > { %v2704_v4 = vrot.slane %v2700_v61, 6  ;;  %v2705_v45 = vrot.slane %v2701_v55, 6  ;;  %v2731_v51 = vpop.xlane.xlu1 %2730  ;;  %v2739_v47 = vpop.xlane.xlu0 %2738  ;;  %vm9358_vm1 = vcmask 1046528   ;;  %vm9360_vm5 = vcmask 1045504  }
 0x661   : > { %v2694_v29 = vadd.f32 %v2690_v9, %v2678_v42  ;;  %v2695_v21 = vadd.f32 %v2691_v62, %v2679_v39  ;;  %v2740_v0 = vmul.f32 %v2739_v47, %v7478_v16  ;;  %v2741_v11 = vmul.f32 %v2739_v47, %v7480_v18  ;;  %vm9359_vm3 = vmmov %vm9358_vm1 }
 0x662   : > { %v2706_v25 = vsel %vm9354_vm8, %v2704_v4, %v2705_v45  ;;  %v2707_v28 = vsel %vm9355_vm2, %v2705_v45, %v2704_v4  ;;  %v2722_v59 = vsel %vm9356_vm9, %v2720_v53, %v2721_v5  ;;  %v2723_v49 = vsel %vm9357_vm15, %v2721_v5, %v2720_v53  ;;  %vm9361_vm8 = vmmov %vm9360_vm5  ;;  %v1113_v53 = vld [vmem:[%s7256_s14 + $0x20] sm:$0xff]  ;;  %v1114_v5 = vld [vmem:[%s7256_s14 + $0x28] sm:$0xff] }
 0x663   : > { %v2710_v34 = vadd.f32 %v2706_v25, %v2694_v29  ;;  %v2711_v48 = vadd.f32 %v2707_v28, %v2695_v21  ;;  %v2732_v26 = vmul.f32 %v2731_v51, %v7478_v16  ;;  %v2733_v35 = vmul.f32 %v2731_v51, %v7480_v18 }
 0x664   : > { %v2771_v7 = vpop.xlane.xlu1 %2770  ;;  %v2755_v46 = vpop.xlane.xlu0 %2754  ;;  %v2744_v56 = vrot.slane %v2740_v0, 1  ;;  %v2745_v15 = vrot.slane %v2741_v11, 1  ;;  %vm9362_vm2 = vcmask 1044480   ;;  %vm9364_vm15 = vcmask 1042432  }
 0x665   : > { %v2726_v30 = vadd.f32 %v2722_v59, %v2710_v34  ;;  %v2727_v1 = vadd.f32 %v2723_v49, %v2711_v48  ;;  %v2772_v32 = vmul.f32 %v2771_v7, %v7478_v16  ;;  %v2773_v37 = vmul.f32 %v2771_v7, %v7480_v18  ;;  %vm9363_vm9 = vmmov %vm9362_vm2  ;;  %v1115_v59 = vld [vmem:[%s7256_s14 + $0x30] sm:$0xff]  ;;  %v1116_v49 = vld [vmem:[%s7256_s14 + $0x38] sm:$0xff] }
 0x666   : > { %v2756_v20 = vmul.f32 %v2755_v46, %v7478_v16  ;;  %v2757_v31 = vmul.f32 %v2755_v46, %v7480_v18  ;;  %v2746_v3 = vsel %vm9358_vm1, %v2744_v56, %v2745_v15  ;;  %v2747_v38 = vsel %vm9359_vm3, %v2745_v15, %v2744_v56 }
 0x667   : > { %v2734_v50 = vadd.f32 %v2732_v26, %v2726_v30  ;;  %v2735_v44 = vadd.f32 %v2733_v35, %v2727_v1  ;;  %v2776_v41 = vrot.slane %v2772_v32, 3  ;;  %v2777_v23 = vrot.slane %v2773_v37, 3 }
 0x668   : > { %v2760_v36 = vrot.slane %v2756_v20, 2  ;;  %v2761_v8 = vrot.slane %v2757_v31, 2  ;;  %v2803_v2 = vpop.xlane.xlu1 %2802  ;;  %v2787_v54 = vpop.xlane.xlu0 %2786  ;;  %v6903_v34 = vpack.c.bf16 %v1114_v5, %v1113_v53  ;;  %vm9365_vm1 = vcmask 1043456   ;;  %v7152_v20 = vld [vmem:[%s7402_s18 + $0x8] sm:$0xff]  ;;  %s9562_s18 = sld [smem:[#allocation2_spill]] }
 0x669   : > { %v2750_v57 = vadd.f32 %v2746_v3, %v2734_v50  ;;  %v2751_v58 = vadd.f32 %v2747_v38, %v2735_v44  ;;  %v2804_v33 = vmul.f32 %v2803_v2, %v7478_v16  ;;  %v2805_v63 = vmul.f32 %v2803_v2, %v7480_v18  ;;  %vm9366_vm3 = vmmov %vm9365_vm1  ;;  %v1117_v3 = vld [vmem:[%s7256_s14 + $0x40] sm:$0xff]  ;;  %v1118_v38 = vld [vmem:[%s7256_s14 + $0x48] sm:$0xff] }
 0x66a   : > { %v2762_v43 = vsel %vm9360_vm5, %v2760_v36, %v2761_v8  ;;  %v2763_v14 = vsel %vm9361_vm8, %v2761_v8, %v2760_v36  ;;  %v2778_v19 = vsel %vm9362_vm2, %v2776_v41, %v2777_v23  ;;  %v2779_v17 = vsel %vm9363_vm9, %v2777_v23, %v2776_v41  ;;  %6904 = vmatprep.subr.bf16.mxu1 %v6903_v34  ;;  %vm9367_vm5 = vmmov %vm9364_vm15 }
 0x66b   : > { %v2766_v52 = vadd.f32 %v2762_v43, %v2750_v57  ;;  %v2767_v6 = vadd.f32 %v2763_v14, %v2751_v58  ;;  %v2808_v61 = vrot.slane %v2804_v33, 5  ;;  %v2809_v55 = vrot.slane %v2805_v63, 5  ;;  %6906 = vmatpush3.bf16.msra.mxu1 %v6903_v34  ;;  %v1120_v58 = vld [vmem:[%s7256_s14 + $0x58] sm:$0xff] }
 0x66c   : > { %v2788_v9 = vmul.f32 %v2787_v54, %v7478_v16  ;;  %v2789_v62 = vmul.f32 %v2787_v54, %v7480_v18  ;;  %v2835_v42 = vpop.xlane.xlu1 %2834  ;;  %v2819_v39 = vpop.xlane.xlu0 %2818  ;;  %v6907_v1 = vpack.c.bf16 %v1116_v49, %v1115_v59  ;;  %vm9368_vm8 = vcmask 1041408  }
 0x66d   : > { %v2782_v4 = vadd.f32 %v2778_v19, %v2766_v52  ;;  %v2783_v45 = vadd.f32 %v2779_v17, %v2767_v6  ;;  %v2836_v29 = vmul.f32 %v2835_v42, %v7478_v16  ;;  %v2837_v21 = vmul.f32 %v2835_v42, %v7480_v18  ;;  %vm9369_vm2 = vmmov %vm9368_vm8 }
 0x66e   : > { %v2792_v51 = vrot.slane %v2788_v9, 4  ;;  %v2793_v47 = vrot.slane %v2789_v62, 4  ;;  %v2820_v25 = vmul.f32 %v2819_v39, %v7478_v16  ;;  %v2821_v28 = vmul.f32 %v2819_v39, %v7480_v18  ;;  %6908 = vmatprep.subr.bf16.mxu1 %v6907_v1 }
 0x66f   : > { %v2810_v48 = vsel %vm9364_vm15, %v2808_v61, %v2809_v55  ;;  %v2811_v16 = vsel %vm9367_vm5, %v2809_v55, %v2808_v61  ;;  %v2840_v18 = vrot.slane %v2836_v29, 7  ;;  %v2841_v30 = vrot.slane %v2837_v21, 7  ;;  %6910 = vmatpush3.bf16.msra.mxu1 %v6907_v1  ;;  %v7153_v61 = vld [vmem:[%s7211_s5] sm:$0xff]  ;;  %v8057_v1 = vld [vmem:[%s7211_s5 + $0x8] sm:$0xff] }
 0x670   : > { %v2794_v0 = vsel %vm9365_vm1, %v2792_v51, %v2793_v47  ;;  %v2795_v11 = vsel %vm9366_vm3, %v2793_v47, %v2792_v51  ;;  %v2824_v7 = vrot.slane %v2820_v25, 6  ;;  %v2825_v46 = vrot.slane %v2821_v28, 6 }
 0x671   : > { %v2798_v26 = vadd.f32 %v2794_v0, %v2782_v4  ;;  %v2799_v35 = vadd.f32 %v2795_v11, %v2783_v45  ;;  %v1282_v31 = vsub.f32 %v7152_v20, %v7438_v40  ;;  %vm9370_vm9 = vcmask 1040384   ;;  %v1119_v40 = vld [vmem:[%s7256_s14 + $0x50] sm:$0xff]  ;;  %v6384_v0 = vld [vmem:[%s7281_s12] ss:$0 sm:$0xff] }
 0x672   : > { %v2827_v15 = vsel %vm9368_vm8, %v2825_v46, %v2824_v7  ;;  %v2826_v37 = vsel %vm9369_vm2, %v2824_v7, %v2825_v46  ;;  %v2843_v41 = vsel %vm9370_vm9, %v2841_v30, %v2840_v18  ;;  %vm9371_vm15 = vmmov %vm9370_vm9  ;;  %v6911_v36 = vpack.c.bf16 %v1118_v38, %v1117_v3  ;;  %v1132_v7 = vld [vmem:[%s7286_s20] sm:$0xff]  ;;  %v1133_v46 = vld [vmem:[%s7286_s20 + $0x8] sm:$0xff] }
 0x673   : > { %v2815_v56 = vadd.f32 %v2811_v16, %v2799_v35  ;;  %v2814_v32 = vadd.f32 %v2810_v48, %v2798_v26  ;;  %v2842_v23 = vsel %vm9371_vm15, %v2840_v18, %v2841_v30  ;;  %v1582_v54 = vrot.slane %v1282_v31, 1  ;;  %v1137_v3 = vld [vmem:[%s9389_s2 + $0x8] sm:$0xff] }
 0x674   : > { %v1583_v57 = vrot.slane %v7202_v60, 1  ;;  %6912 = vmatprep.subr.bf16.mxu1 %v6911_v36  ;;  %v6915_v33 = vpack.c.bf16 %v1120_v58, %v1119_v40  ;;  %vm9372_vm1 = vcmask 1046528   ;;  %v1594_v43 = vrot.slane %v1282_v31, 2 }
 0x675   : > { %v2831_v50 = vadd.f32 %v2827_v15, %v2815_v56  ;;  %v2830_v44 = vadd.f32 %v2826_v37, %v2814_v32  ;;  %6914 = vmatpush3.bf16.msra.mxu1 %v6911_v36  ;;  %v1595_v14 = vrot.slane %v7202_v60, 2  ;;  %vm9373_vm3 = vcmask 1045504   ;;  %v1134_v15 = vld [vmem:[%s7286_s20 + $0x10] sm:$0xff]  ;;  %v1135_v32 = vld [vmem:[%s7286_s20 + $0x18] sm:$0xff] }
 0x676   : > { %v1584_v63 = vsel %vm9372_vm1, %v1582_v54, %v1583_v57  ;;  %6916 = vmatprep.subr.bf16.mxu1 %v6915_v33  ;;  %vm9374_vm5 = vmmov %vm9373_vm3  ;;  %vm9375_vm8 = vcmask 261120   ;;  %vm9377_vm9 = vcmask 130048   ;;  %v6939_v30 = vpack.c.bf16 %v1133_v46, %v1132_v7 }
 0x677   : > { %v2847_v8 = vadd.f32 %v2843_v41, %v2831_v50  ;;  %v2846_v2 = vadd.f32 %v2842_v23, %v2830_v44  ;;  %v1596_v19 = vsel %vm9373_vm3, %v1594_v43, %v1595_v14  ;;  %v1597_v17 = vsel %vm9374_vm5, %v1595_v14, %v1594_v43  ;;  %vm9376_vm2 = vmmov %vm9375_vm8  ;;  %v1136_v44 = vld [vmem:[%s9389_s2] sm:$0xff]  ;;  %v1138_v41 = vld [vmem:[%s9389_s2 + $0x10] sm:$0xff] }
 0x678   : > { %vm9378_vm15 = vmmov %vm9376_vm2  ;;  %vm9380_vm3 = vcmask 523264   ;;  %v6947_v38 = vpack.c.bf16 %v1137_v3, %v1136_v44  ;;  %v1139_v23 = vld [vmem:[%s9389_s2 + $0x18] sm:$0xff] }
 0x679   : > { %2858 = vrot.lane.b32.xlu1 %v2847_v8, %s7200_s23  ;;  %2856 = vrot.lane.b32.xlu0 %v2846_v2, %s7200_s23  ;;  %vm9379_vm1 = vmmov %vm9376_vm2  ;;  %v6951_v36 = vpack.c.bf16 %v1139_v23, %v1138_v41  ;;  %v1142_v8 = vld [vmem:[%s9390_s7] sm:$0xff]  ;;  %v1143_v2 = vld [vmem:[%s9390_s7 + $0x8] sm:$0xff] }
 0x67a   : > { %6918 = vmatpush3.bf16.msra.mxu1 %v6915_v33  ;;  %vm9381_vm5 = vmmov %vm9379_vm1 }
 0x67b   : > { %6948 = vmatprep.subr.bf16.mxu1 %v6947_v38 }
 0x67d   : > { %1585 = vrot.lane.b32.xlu1 %v1582_v54, %s7199_s22  ;;  %1587 = vrot.lane.b32.xlu0 %v1584_v63, %s7199_s22  ;;  %v6959_v54 = vpack.c.bf16 %v1143_v2, %v1142_v8 }
 0x681   : > { %1589 = vrot.lane.b32.xlu1 %v1583_v57, %s7199_s22  ;;  %1598 = vrot.lane.b32.xlu0 %v1594_v43, %s7200_s23 }
 0x685   : > { %1600 = vrot.lane.b32.xlu1 %v1596_v19, %s7200_s23  ;;  %1602 = vrot.lane.b32.xlu0 %v1597_v17, %s7200_s23 }
 0x6eb   : > { %v2859_v52 = vpop.permute.xlu1 %2858  ;;  %v2857_v6 = vpop.permute.xlu0 %2856 }
 0x6ec   : > { %6684 = vmatprep.mubr.msk.f32.mxu0 %vm9375_vm8, %v2857_v6  ;;  %vm9382_vm8 = vmmov %vm9380_vm3 }
 0x6ed   : > { %6685 = vmatmul.mubr.msk.f32.vlgmr.msra.gmra.mrb[8].mxu0 %vm9376_vm2, %v2859_v52  ;;  %vm9383_vm2 = vmmov %vm9380_vm3 }
 0x6ee   : > { %6691 = vmatprep.mubr.msk.f32.mxu0 %vm9377_vm9, %v7153_v61  ;;  %vm9384_vm9 = vcmask 1040384  }
 0x6ef   : > { %v1586_v55 = vpop.permute.xlu1 %1585  ;;  %v1588_v9 = vpop.permute.xlu0 %1587 }
 0x6f0   : > { %v1607_v39 = vsel %vm9378_vm15, 0.0, %v1586_v55  ;;  %v1608_v4 = vsel %vm9381_vm5, %v1282_v31, %v1588_v9  ;;  %vm9385_vm15 = vmmov %vm9384_vm9  ;;  %vm9388_vm5 = vcmask 130048  }
 0x6f3   : > { %v1590_v62 = vpop.permute.xlu1 %1589  ;;  %v1599_v42 = vpop.permute.xlu0 %1598 }
 0x6f4   : > { %v1609_v53 = vsel %vm9379_vm1, 0.0, %v1590_v62  ;;  %v1610_v5 = vsel %vm9380_vm3, %v1607_v39, %v1599_v42  ;;  %vm9386_vm1 = vcmask 785408  }
 0x6f5   : > { %v1700_v21 = vrot.slane %v1610_v5, 7  ;;  %vm9387_vm3 = vmmov %vm9386_vm1  ;;  %v1145_v5 = vld [vmem:[%s9390_s7 + $0x18] sm:$0xff] }
 0x6f7   : > { %v1601_v45 = vpop.permute.xlu1 %1600  ;;  %v1603_v51 = vpop.permute.xlu0 %1602 }
 0x6f8   : > { %v1611_v47 = vsel %vm9382_vm8, %v1608_v4, %v1601_v45  ;;  %v1612_v29 = vsel %vm9383_vm2, %v1609_v53, %v1603_v51  ;;  %vm9391_vm8 = vcmask 261120   ;;  %v1144_v53 = vld [vmem:[%s9390_s7 + $0x10] sm:$0xff] }
 0x6f9   : > { %v1701_v25 = vrot.slane %v1611_v47, 7  ;;  %v1703_v28 = vrot.slane %v1612_v29, 7  ;;  %vm9392_vm2 = vmmov %vm9391_vm8  ;;  %v6963_v47 = vpack.c.bf16 %v1145_v5, %v1144_v53 }
 0x6fb   : > { %v1702_v34 = vsel %vm9384_vm9, %v1700_v21, %v1701_v25  ;;  %v1704_v48 = vsel %vm9385_vm15, %v1701_v25, %v1703_v28  ;;  %vm9393_vm9 = vmmov %vm9388_vm5 }
 0x6fc   : > { %6662 = vmatprep.mubr.msk.f32.mxu1 %vm9386_vm1, %v1702_v34  ;;  %vm9395_vm15 = vmmov %vm9392_vm2 }
 0x6fd   : > { %6663 = vmatmul.mubr.msk.f32.vlgmr.msra.gmra.mrb[0].mxu1 %vm9387_vm3, %v1704_v48  ;;  %vm9396_vm1 = vmmov %vm9392_vm2  ;;  %v6397_v48 = vld [vmem:[%s9394_s10] ss:$0 sm:$0xff]  ;;  %s9568_s10 = sld [smem:[#allocation5_spill]] }
 0x6fe   : > { %6950 = vmatpush3.bf16.msra.mxu1 %v6947_v38  ;;  %vm9397_vm3 = vmmov %vm9396_vm1 }
 0x6ff   : > { %6952 = vmatprep.subr.bf16.mxu1 %v6951_v36 }
 0x702   : > { %6954 = vmatpush3.bf16.msra.mxu1 %v6951_v36 }
 0x703   : > { %6960 = vmatprep.subr.bf16.mxu1 %v6959_v54 }
 0x7c0   : > { %v6686_v11 = vpop.f32.mrb[8].mxu0 }
 0x7c1   : > { %v2936_v59 = vadd.f32 %v6686_v11, %v6384_v0  ;;  %v2930_v49 = vpop.f32.mrb[9].mxu0 }
 0x7c2   : > { %v2931_v26 = vadd.f32 %v6384_v0, %v2930_v49 }
 0x7c3   : > { %v2940_v35 = vadd.f32 %v7469_v12, %v2936_v59 }
 0x7c4   : > { %v2939_v16 = vadd.f32 %v2931_v26, %v7471_v13  ;;  %v6943_v13 = vpack.c.bf16 %v1135_v32, %v1134_v15 }
 0x7c6   : > { %v6935_v18 = vpack.c.bf16 %v2940_v35, %v2939_v16 }
 0x7c8   : > { %6936 = vmatprep.subr.bf16.mxu0 %v6935_v18 }
 0x7c9   : > { %6938 = vmatpush3.bf16.msra.mxu0 %v6935_v18 }
 0x7ca   : > { %6940 = vmatprep.subr.bf16.mxu0 %v6939_v30 }
 0x7cc   : > { %6692 = vmatmul.mubr.msk.f32.vlgmr.msra.gmra.mrb[10].mxu0 %vm9388_vm5, %v8057_v1  ;;  %vm9398_vm5 = vmmov %vm9396_vm1 }
 0x7cd   : > { %6942 = vmatpush3.bf16.msra.mxu0 %v6939_v30 }
 0x7ce   : > { %6944 = vmatprep.subr.bf16.mxu0 %v6943_v13 }
 0x7d0   : > { %v8061_v56 = vpop.f32.mrb[0].mxu1 }
 0x7d1   : > { %v8063_v12 = vpop.f32.mrb[1].mxu1  ;;  %6946 = vmatpush3.bf16.msra.mxu0 %v6943_v13 }
 0x89f   : > { %v6693_v37 = vpop.f32.mrb[10].mxu0 }
 0x8a0   : > { %v3007_v20 = vpop.f32.mrb[11].mxu0  ;;  %v3017_v50 = vsub.f32 %v2940_v35, %v6693_v37 }
 0x8a1   : > { %v3016_v31 = vsub.f32 %v2939_v16, %v3007_v20 }
 0x8a3   : > { %6702 = vmatprep.mubr.msk.f32.mxu0 %vm9391_vm8, %v3016_v31  ;;  %vm9399_vm8 = vmmov %vm9393_vm9 }
 0x8a4   : > { %6703 = vmatmul.mubr.msk.f32.vlgmr.msra.gmra.mrb[12].mxu0 %vm9392_vm2, %v3017_v50  ;;  %vm9400_vm2 = vcmask 1040384  }
 0x8a5   : > { %6720 = vmatprep.mubr.msk.f32.mxu0 %vm9393_vm9, %v7153_v61  ;;  %vm9401_vm9 = vcmask 1042432  }
 0x977   : > { %v6704_v57 = vpop.f32.mrb[12].mxu0 }
 0x978   : > { %v3102_v40 = vmul.f32 0.044715, %v6704_v57  ;;  %v3090_v58 = vpop.f32.mrb[13].mxu0  ;;  %v3100_v4 = vmul.f32 0.5, %v6704_v57 }
 0x979   : > { %v3101_v33 = vmul.f32 0.044715, %v3090_v58  ;;  %v3099_v42 = vmul.f32 0.5, %v3090_v58 }
 0x97a   : > { %v3104_v63 = vmul.f32 %v6704_v57, %v3102_v40 }
 0x97b   : > { %v3103_v43 = vmul.f32 %v3101_v33, %v3090_v58 }
 0x97c   : > { %v3106_v14 = vmul.f32 %v6704_v57, %v3104_v63 }
 0x97d   : > { %v3105_v19 = vmul.f32 %v3103_v43, %v3090_v58 }
 0x97e   : > { %v3108_v17 = vadd.f32 %v6704_v57, %v3106_v14 }
 0x97f   : > { %v3107_v52 = vadd.f32 %v3105_v19, %v3090_v58 }
 0x980   : > { %v3110_v6 = vmul.f32 0.7978846, %v3108_v17 }
 0x981   : > { %v3109_v61 = vmul.f32 0.7978846, %v3107_v52 }
 0x982   : > { %7128 = vtanh.f32 %v3110_v6 }
 0x983   : > { %7130 = vtanh.f32 %v3109_v61 }
 0x98c   : > { %v7129_v55 = vpop.eup %7128 }
 0x98d   : > { %v7131_v9 = vpop.eup %7130  ;;  %v3114_v62 = vadd.f32 1.0, %v7129_v55 }
 0x98e   : > { %v3113_v39 = vadd.f32 1.0, %v7131_v9 }
 0x98f   : > { %v3116_v51 = vmul.f32 %v3114_v62, %v3100_v4 }
 0x990   : > { %v3115_v45 = vmul.f32 %v3113_v39, %v3099_v42 }
 0x992   : > { %6713 = vmatprep.mubr.msk.f32.mxu1 %vm9395_vm15, %v3115_v45  ;;  %vm9402_vm15 = vcmask 1044480  }
 0x993   : > { %6714 = vmatmul.mubr.msk.f32.vlgmr.msra.gmra.mrb[2].mxu1 %vm9396_vm1, %v3116_v51  ;;  %vm9403_vm1 = vcmask 1041408  }
 0x994   : > { %6962 = vmatpush3.bf16.msra.mxu1 %v6959_v54  ;;  %6731 = vmatprep.mubr.msk.f32.mxu1 %vm9397_vm3, %v8063_v12  ;;  %vm9404_vm3 = vcmask 1046528  }
 0x995   : > { %6964 = vmatprep.subr.bf16.mxu1 %v6963_v47 }
 0x998   : > { %6966 = vmatpush3.bf16.msra.mxu1 %v6963_v47 }
 0x99b   : > { %6732 = vmatmul.mubr.msk.f32.vlgmr.msra.gmra.mrb[4].mxu1 %vm9398_vm5, %v8061_v56  ;;  %vm9405_vm5 = vcmask 1043456  }
 0xa66   : > { %v6715_v29 = vpop.f32.mrb[2].mxu1 }
 0xa67   : > { %v8084_v21 = vadd.f32 %v6715_v29, %v3017_v50  ;;  %v3189_v25 = vpop.f32.mrb[3].mxu1 }
 0xa68   : > { %v8086_v28 = vadd.f32 %v3189_v25, %v3016_v31 }
 0xa6a   : > { %v6955_v34 = vpack.c.bf16 %v8084_v21, %v8086_v28 }
 0xa6c   : > { %6956 = vmatprep.subr.bf16.mxu0 %v6955_v34 }
 0xa6d   : > { %6958 = vmatpush3.bf16.msra.mxu0 %v6955_v34 }
 0xa6e   : > { %v6733_v0 = vpop.f32.mrb[4].mxu1 }
 0xa6f   : > { %v8091_v11 = vadd.f32 %v6733_v0, %v6397_v48  ;;  %v3410_v59 = vpop.f32.mrb[5].mxu1 }
 0xa70   : > { %v8093_v49 = vadd.f32 %v6397_v48, %v3410_v59  ;;  %6721 = vmatmul.mubr.msk.f32.vlgmr.msra.gmra.mrb[14].mxu0 %vm9399_vm8, %v8057_v1  ;;  %vm9406_vm8 = vcmask 1045504  }
 0xa71   : > { %3423 = vrot.lane.b32.xlu0 %v8091_v11, %s7201_s28  ;;  %v3498_v26 = vrot.slane %v8091_v11, 6  ;;  %v3450_v35 = vrot.slane %v8091_v11, 7  ;;  %v3594_v7 = vrot.slane %v8091_v11, 4  ;;  %v3546_v46 = vrot.slane %v8091_v11, 5 }
 0xa72   : > { %3421 = vrot.lane.b32.xlu1 %v8093_v49, %s7201_s28  ;;  %v3690_v16 = vrot.slane %v8091_v11, 2  ;;  %v3642_v18 = vrot.slane %v8091_v11, 3  ;;  %v3497_v30 = vrot.slane %v8093_v49, 6  ;;  %v3738_v1 = vrot.slane %v8091_v11, 1 }
 0xa73   : > { %v3593_v15 = vrot.slane %v8093_v49, 4  ;;  %v3449_v32 = vrot.slane %v8093_v49, 7  ;;  %v3689_v13 = vrot.slane %v8093_v49, 2  ;;  %v3545_v37 = vrot.slane %v8093_v49, 5 }
 0xa74   : > { %v3641_v31 = vrot.slane %v8093_v49, 3  ;;  %v3737_v44 = vrot.slane %v8093_v49, 1  ;;  %v3499_v38 = vsel %vm9403_vm1, %v3497_v30, %v3498_v26 }
 0xa75   : > { %3504 = vrot.lane.b32.xlu0 %v3498_v26, %s7201_s28  ;;  %v3451_v20 = vsel %vm9400_vm2, %v3449_v32, %v3450_v35  ;;  %v3547_v50 = vsel %vm9401_vm9, %v3545_v37, %v3546_v46  ;;  %v3595_v23 = vsel %vm9405_vm5, %v3593_v15, %v3594_v7  ;;  %v3691_v36 = vsel %vm9406_vm8, %v3689_v13, %v3690_v16 }
 0xa76   : > { %3456 = vrot.lane.b32.xlu1 %v3450_v35, %s7201_s28  ;;  %v3643_v3 = vsel %vm9402_vm15, %v3641_v31, %v3642_v18  ;;  %v3739_v41 = vsel %vm9404_vm3, %v3737_v44, %v3738_v1  ;;  %vm9407_vm2 = vcmask 261120   ;;  %vm9411_vm3 = vcmask 253952  }
 0xa77   : > { %vm9408_vm9 = vmmov %vm9407_vm2  ;;  %vm9412_vm5 = vcmask 256000   ;;  %vm9413_vm8 = vcmask 254976  }
 0xa78   : > { %vm9409_vm15 = vmmov %vm9407_vm2 }
 0xa79   : > { %3600 = vrot.lane.b32.xlu0 %v3594_v7, %s7201_s28  ;;  %vm9410_vm1 = vmmov %vm9407_vm2 }
 0xa7a   : > { %3552 = vrot.lane.b32.xlu1 %v3546_v46, %s7201_s28 }
 0xa7d   : > { %3696 = vrot.lane.b32.xlu0 %v3690_v16, %s7201_s28 }
 0xa7e   : > { %3648 = vrot.lane.b32.xlu1 %v3642_v18, %s7201_s28 }
 0xa81   : > { %3500 = vrot.lane.b32.xlu0 %v3497_v30, %s7201_s28 }
 0xa82   : > { %3744 = vrot.lane.b32.xlu1 %v3738_v1, %s7201_s28 }
 0xa85   : > { %3596 = vrot.lane.b32.xlu0 %v3593_v15, %s7201_s28 }
 0xa86   : > { %3452 = vrot.lane.b32.xlu1 %v3449_v32, %s7201_s28 }
 0xa89   : > { %3692 = vrot.lane.b32.xlu0 %v3689_v13, %s7201_s28 }
 0xa8a   : > { %3548 = vrot.lane.b32.xlu1 %v3545_v37, %s7201_s28 }
 0xa8d   : > { %3454 = vrot.lane.b32.xlu0 %v3451_v20, %s7201_s28 }
 0xa8e   : > { %3644 = vrot.lane.b32.xlu1 %v3641_v31, %s7201_s28 }
 0xa91   : > { %3550 = vrot.lane.b32.xlu0 %v3547_v50, %s7201_s28 }
 0xa92   : > { %3740 = vrot.lane.b32.xlu1 %v3737_v44, %s7201_s28 }
 0xa95   : > { %3646 = vrot.lane.b32.xlu0 %v3643_v3, %s7201_s28 }
 0xa96   : > { %3502 = vrot.lane.b32.xlu1 %v3499_v38, %s7201_s28 }
 0xa99   : > { %3742 = vrot.lane.b32.xlu0 %v3739_v41, %s7201_s28 }
 0xa9a   : > { %3598 = vrot.lane.b32.xlu1 %v3595_v23, %s7201_s28 }
 0xa9e   : > { %3694 = vrot.lane.b32.xlu1 %v3691_v36, %s7201_s28 }
 0xae3   : > { %v3424_v8 = vpop.permute.xlu0 %3423 }
 0xae4   : > { %v3428_v2 = vmul.f32 %v3424_v8, %v8091_v11  ;;  %v3422_v54 = vpop.permute.xlu1 %3421  ;;  %v3786_v40 = vmul.f32 %v3424_v8, %v8093_v49 }
 0xae5   : > { %v3427_v57 = vmul.f32 %v3422_v54, %v8093_v49  ;;  %v3785_v33 = vmul.f32 %v3422_v54, %v8091_v11 }
 0xae6   : > { %v3432_v58 = vsel %vm9407_vm2, %v3428_v2, 0.0  ;;  %v3790_v17 = vsel %vm9409_vm15, %v3786_v40, 0.0  ;;  %vm9414_vm2 = vcmask 258048   ;;  %vm9416_vm15 = vcmask 260096  }
 0xae7   : > { %v3505_v63 = vpop.permute.xlu0 %3504  ;;  %3433 = vadd.xlane.f32.xlu0 %v3432_v58  ;;  %v3429_v43 = vsel %vm9408_vm9, %v3427_v57, 0.0  ;;  %v3787_v52 = vsel %vm9410_vm1, %v3785_v33, 0.0  ;;  %vm9415_vm9 = vcmask 257024   ;;  %vm9417_vm1 = vcmask 259072  }
 0xae8   : > { %v3457_v14 = vpop.permute.xlu1 %3456  ;;  %3430 = vadd.xlane.f32.xlu1 %v3429_v43  ;;  %v3511_v9 = vmul.f32 %v3505_v63, %v8093_v49  ;;  %v3845_v48 = vmul.f32 %v3505_v63, %v8091_v11 }
 0xae9   : > { %v3463_v19 = vmul.f32 %v3457_v14, %v8093_v49  ;;  %v3809_v26 = vmul.f32 %v3457_v14, %v8091_v11 }
 0xaea   : > { %v3518_v4 = vsel %vm9413_vm8, %v3511_v9, 0.0 }
 0xaeb   : > { %3791 = vadd.xlane.f32.xlu0 %v3790_v17  ;;  %v3601_v61 = vpop.permute.xlu0 %3600  ;;  %v3470_v62 = vsel %vm9411_vm3, %v3463_v19, 0.0  ;;  %vm9418_vm3 = vmmov %vm9413_vm8 }
 0xaec   : > { %v3553_v6 = vpop.permute.xlu1 %3552  ;;  %3788 = vadd.xlane.f32.xlu1 %v3787_v52  ;;  %v3607_v5 = vmul.f32 %v3601_v61, %v8093_v49  ;;  %v3917_v7 = vmul.f32 %v3601_v61, %v8091_v11  ;;  %v3852_v46 = vsel %vm9418_vm3, %v3845_v48, 0.0  ;;  %vm9420_vm8 = vmmov %vm9415_vm9  ;;  %vm9425_vm3 = vcmask 261121  }
 0xaed   : > { %v3559_v55 = vmul.f32 %v3553_v6, %v8093_v49  ;;  %v3881_v18 = vmul.f32 %v3553_v6, %v8091_v11 }
 0xaee   : > { %v3614_v34 = vsel %vm9415_vm9, %v3607_v5, 0.0  ;;  %v3924_v15 = vsel %vm9420_vm8, %v3917_v7, 0.0  ;;  %vm9422_vm9 = vcmask 261123   ;;  %vm9427_vm8 = vcmask 261122  }
 0xaef   : > { %3471 = vadd.xlane.f32.xlu0 %v3470_v62  ;;  %v3566_v42 = vsel %vm9412_vm5, %v3559_v55, 0.0  ;;  %v8159_v45 = vpop.permute.xlu0 %3696  ;;  %vm9419_vm5 = vcmask 253952  }
 0xaf0   : > { %v3649_v39 = vpop.permute.xlu1 %3648  ;;  %3567 = vadd.xlane.f32.xlu1 %v3566_v42  ;;  %v3703_v25 = vmul.f32 %v8159_v45, %v8093_v49  ;;  %v3816_v30 = vsel %vm9419_vm5, %v3809_v26, 0.0  ;;  %vm9426_vm5 = vcmask 261127  }
 0xaf1   : > { %v3655_v53 = vmul.f32 %v3649_v39, %v8093_v49  ;;  %v3953_v13 = vmul.f32 %v3649_v39, %v8091_v11 }
 0xaf2   : > { %v3710_v35 = vsel %vm9417_vm1, %v3703_v25, 0.0  ;;  %vm9424_vm1 = vcmask 261125  }
 0xaf3   : > { %3519 = vadd.xlane.f32.xlu0 %v3518_v4  ;;  %v3662_v51 = vsel %vm9414_vm2, %v3655_v53, 0.0  ;;  %v3501_v37 = vpop.permute.xlu0 %3500  ;;  %vm9421_vm2 = vcmask 256000  }
 0xaf4   : > { %v8162_v47 = vpop.permute.xlu1 %3744  ;;  %3663 = vadd.xlane.f32.xlu1 %v3662_v51  ;;  %v3888_v20 = vsel %vm9421_vm2, %v3881_v18, 0.0  ;;  %v3509_v8 = vmul.f32 %v3501_v37, %v8093_v49  ;;  %v3843_v54 = vmul.f32 %v3501_v37, %v8091_v11  ;;  %vm9428_vm2 = vmmov %vm9427_vm8 }
 0xaf5   : > { %v3751_v29 = vmul.f32 %v8162_v47, %v8093_v49 }
 0xaf6   : > { %v3512_v33 = vsel %vm9427_vm8, %v3509_v8, 0.0  ;;  %v3846_v43 = vsel %vm9428_vm2, %v3843_v54, 0.0  ;;  %vm9434_vm8 = vcmask 261120   ;;  %vm9435_vm2 = vcmask 261123  }
 0xaf7   : > { %3615 = vadd.xlane.f32.xlu0 %v3614_v34  ;;  %v3758_v0 = vsel %vm9416_vm15, %v3751_v29, 0.0  ;;  %vm9423_vm15 = vcmask 258048   ;;  %v3597_v36 = vpop.permute.xlu0 %3596 }
 0xaf8   : > { %3759 = vadd.xlane.f32.xlu1 %v3758_v0  ;;  %v3453_v59 = vpop.permute.xlu1 %3452  ;;  %v3960_v38 = vsel %vm9423_vm15, %v3953_v13, 0.0  ;;  %v3605_v40 = vmul.f32 %v3597_v36, %v8093_v49  ;;  %v3915_v63 = vmul.f32 %v3597_v36, %v8091_v11 }
 0xaf9   : > { %v3461_v3 = vmul.f32 %v3453_v59, %v8093_v49  ;;  %v3807_v55 = vmul.f32 %v3453_v59, %v8091_v11 }
 0xafb   : > { %3711 = vadd.xlane.f32.xlu0 %v3710_v35  ;;  %v3464_v2 = vsel %vm9425_vm3, %v3461_v3, 0.0  ;;  %v3693_v58 = vpop.permute.xlu0 %3692 }
 0xafc   : > { %3853 = vadd.xlane.f32.xlu1 %v3852_v46  ;;  %v3549_v16 = vpop.permute.xlu1 %3548  ;;  %v3701_v14 = vmul.f32 %v3693_v58, %v8093_v49  ;;  %v3987_v17 = vmul.f32 %v3693_v58, %v8091_v11 }
 0xafd   : > { %v3557_v1 = vmul.f32 %v3549_v16, %v8093_v49  ;;  %v3879_v39 = vmul.f32 %v3549_v16, %v8091_v11 }
 0xaff   : > { %3817 = vadd.xlane.f32.xlu0 %v3816_v30  ;;  %v3560_v50 = vsel %vm9422_vm9, %v3557_v1, 0.0  ;;  %vm9429_vm9 = vcmask 261124   ;;  %v3455_v6 = vpop.permute.xlu0 %3454  ;;  %v3882_v34 = vsel %vm9435_vm2, %v3879_v39, 0.0  ;;  %v3989_v1 = vmul.f32 %v8159_v45, %v8091_v11 }
 0xb00   : > { %3925 = vadd.xlane.f32.xlu1 %v3924_v15  ;;  %v3645_v32 = vpop.permute.xlu1 %3644  ;;  %v3608_v19 = vsel %vm9429_vm9, %v3605_v40, 0.0  ;;  %vm9430_vm15 = vmmov %vm9429_vm9  ;;  %v3462_v62 = vmul.f32 %v3455_v6, %v8091_v11  ;;  %v3808_v37 = vmul.f32 %v3455_v6, %v8093_v49  ;;  %vm9442_vm2 = vcmask 259072  }
 0xb01   : > { %v3653_v31 = vmul.f32 %v3645_v32, %v8093_v49  ;;  %v3918_v52 = vsel %vm9430_vm15, %v3915_v63, 0.0  ;;  %v3951_v25 = vmul.f32 %v3645_v32, %v8091_v11  ;;  %vm9436_vm9 = vmmov %vm9434_vm8  ;;  %vm9437_vm15 = vcmask 261125  }
 0xb02   : > { %v3467_v51 = vsel %vm9434_vm8, %v3462_v62, 0.0  ;;  %v4025_v63 = vmul.f32 %v8162_v47, %v8091_v11 }
 0xb03   : > { %3889 = vadd.xlane.f32.xlu0 %v3888_v20  ;;  %v3656_v23 = vsel %vm9424_vm1, %v3653_v31, 0.0  ;;  %vm9431_vm1 = vcmask 261126   ;;  %v3551_v29 = vpop.permute.xlu0 %3550  ;;  %v3954_v35 = vsel %vm9437_vm15, %v3951_v25, 0.0  ;;  %v3996_v31 = vsel %vm9442_vm2, %v3989_v1, 0.0 }
 0xb04   : > { %3561 = vadd.xlane.f32.xlu1 %v3560_v50  ;;  %v8183_v44 = vpop.permute.xlu1 %3740  ;;  %v3704_v9 = vsel %vm9431_vm1, %v3701_v14, 0.0  ;;  %vm9432_vm3 = vmmov %vm9431_vm1  ;;  %v3558_v26 = vmul.f32 %v3551_v29, %v8091_v11  ;;  %v3880_v3 = vmul.f32 %v3551_v29, %v8093_v49 }
 0xb05   : > { %v3749_v41 = vmul.f32 %v8183_v44, %v8093_v49  ;;  %v3990_v42 = vsel %vm9432_vm3, %v3987_v17, 0.0  ;;  %vm9438_vm1 = vmmov %vm9434_vm8  ;;  %v4023_v32 = vmul.f32 %v8183_v44, %v8091_v11 }
 0xb06   : > { %vm9439_vm3 = vmmov %vm9438_vm1 }
 0xb07   : > { %3961 = vadd.xlane.f32.xlu0 %v3960_v38  ;;  %v3752_v57 = vsel %vm9426_vm5, %v3749_v41, 0.0  ;;  %vm9433_vm5 = vcmask 261121   ;;  %v3647_v7 = vpop.permute.xlu0 %3646  ;;  %v3563_v30 = vsel %vm9439_vm3, %v3558_v26, 0.0  ;;  %vm9441_vm8 = vmmov %vm9438_vm1 }
 0xb08   : > { %3657 = vadd.xlane.f32.xlu1 %v3656_v23  ;;  %v3503_v61 = vpop.permute.xlu1 %3502  ;;  %v3810_v5 = vsel %vm9433_vm5, %v3807_v55, 0.0  ;;  %v3654_v18 = vmul.f32 %v3647_v7, %v8091_v11  ;;  %vm9440_vm5 = vmmov %vm9438_vm1  ;;  %v3952_v23 = vmul.f32 %v3647_v7, %v8093_v49 }
 0xb09   : > { %v3510_v4 = vmul.f32 %v3503_v61, %v8091_v11  ;;  %vm9444_vm15 = vmmov %vm9438_vm1  ;;  %v3844_v44 = vmul.f32 %v3503_v61, %v8093_v49 }
 0xb0a   : > { %v3659_v13 = vsel %vm9441_vm8, %v3654_v18, 0.0  ;;  %v3813_v38 = vsel %vm9444_vm15, %v3808_v37, 0.0  ;;  %vm9445_vm3 = vmmov %vm9438_vm1 }
 0xb0b   : > { %3465 = vadd.xlane.f32.xlu0 %v3464_v2  ;;  %v3515_v0 = vsel %vm9436_vm9, %v3510_v4, 0.0  ;;  %v3743_v20 = vpop.permute.xlu0 %3742  ;;  %vm9443_vm9 = vcmask 261127   ;;  %v3885_v36 = vsel %vm9445_vm3, %v3880_v3, 0.0  ;;  %vm9447_vm8 = vmmov %vm9438_vm1  ;;  %vm9452_vm3 = vcmask 1046528  }
 0xb0c   : > { %3753 = vadd.xlane.f32.xlu1 %v3752_v57  ;;  %v3599_v53 = vpop.permute.xlu1 %3598  ;;  %v3750_v50 = vmul.f32 %v3743_v20, %v8091_v11  ;;  %v4026_v45 = vsel %vm9443_vm9, %v4023_v32, 0.0  ;;  %v4024_v54 = vmul.f32 %v3743_v20, %v8093_v49  ;;  %v3957_v57 = vsel %vm9447_vm8, %v3952_v23, 0.0  ;;  %vm9448_vm2 = vmmov %vm9438_vm1 }
 0xb0d   : > { %v3606_v48 = vmul.f32 %v3599_v53, %v8091_v11  ;;  %v3916_v8 = vmul.f32 %v3599_v53, %v8093_v49  ;;  %vm9449_vm9 = vmmov %vm9438_vm1  ;;  %vm9454_vm8 = vcmask 1045504  }
 0xb0e   : > { %v3755_v41 = vsel %vm9438_vm1, %v3750_v50, 0.0  ;;  %vm9450_vm15 = vmmov %vm9438_vm1 }
 0xb0f   : > { %3513 = vadd.xlane.f32.xlu0 %v3512_v33  ;;  %v3611_v16 = vsel %vm9438_vm1, %v3606_v48, 0.0  ;;  %v3921_v58 = vsel %vm9448_vm2, %v3916_v8, 0.0  ;;  %v4029_v33 = vsel %vm9449_vm9, %v4024_v54, 0.0  ;;  %vm9455_vm2 = vmmov %vm9454_vm8  ;;  %vm9456_vm9 = vcmask 1043456  }
 0xb10   : > { %3847 = vadd.xlane.f32.xlu1 %v3846_v43  ;;  %v3695_v59 = vpop.permute.xlu1 %3694 }
 0xb11   : > { %v3702_v46 = vmul.f32 %v3695_v59, %v8091_v11  ;;  %v3988_v40 = vmul.f32 %v3695_v59, %v8093_v49 }
 0xb13   : > { %3609 = vadd.xlane.f32.xlu0 %v3608_v19  ;;  %v3707_v15 = vsel %vm9440_vm5, %v3702_v46, 0.0  ;;  %vm9446_vm5 = vmmov %vm9438_vm1  ;;  %v3993_v43 = vsel %vm9450_vm15, %v3988_v40, 0.0  ;;  %vm9451_vm1 = vcmask 260096  }
 0xb14   : > { %3919 = vadd.xlane.f32.xlu1 %v3918_v52  ;;  %v3849_v2 = vsel %vm9446_vm5, %v3844_v44, 0.0  ;;  %v4032_v14 = vsel %vm9451_vm1, %v4025_v63, 0.0  ;;  %vm9453_vm5 = vmmov %vm9452_vm3  ;;  %vm9458_vm1 = vcmask 1044480  }
 0xb15   : > { %vm9457_vm15 = vmmov %vm9456_vm9 }
 0xb17   : > { %3705 = vadd.xlane.f32.xlu0 %v3704_v9 }
 0xb18   : > { %3991 = vadd.xlane.f32.xlu1 %v3990_v42 }
 0xb1b   : > { %3811 = vadd.xlane.f32.xlu0 %v3810_v5 }
 0xb1c   : > { %3468 = vadd.xlane.f32.xlu1 %v3467_v51 }
 0xb1f   : > { %3883 = vadd.xlane.f32.xlu0 %v3882_v34 }
 0xb20   : > { %3516 = vadd.xlane.f32.xlu1 %v3515_v0 }
 0xb23   : > { %3955 = vadd.xlane.f32.xlu0 %v3954_v35 }
 0xb24   : > { %3612 = vadd.xlane.f32.xlu1 %v3611_v16 }
 0xb27   : > { %3564 = vadd.xlane.f32.xlu0 %v3563_v30 }
 0xb28   : > { %3708 = vadd.xlane.f32.xlu1 %v3707_v15 }
 0xb2b   : > { %3660 = vadd.xlane.f32.xlu0 %v3659_v13 }
 0xb2c   : > { %3997 = vadd.xlane.f32.xlu1 %v3996_v31 }
 0xb2f   : > { %4027 = vadd.xlane.f32.xlu0 %v4026_v45 }
 0xb30   : > { %3814 = vadd.xlane.f32.xlu1 %v3813_v38 }
 0xb33   : > { %3756 = vadd.xlane.f32.xlu0 %v3755_v41 }
 0xb34   : > { %3886 = vadd.xlane.f32.xlu1 %v3885_v36 }
 0xb37   : > { %3850 = vadd.xlane.f32.xlu0 %v3849_v2 }
 0xb38   : > { %3958 = vadd.xlane.f32.xlu1 %v3957_v57 }
 0xb3b   : > { %3922 = vadd.xlane.f32.xlu0 %v3921_v58 }
 0xb3c   : > { %4030 = vadd.xlane.f32.xlu1 %v4029_v33 }
 0xb3f   : > { %3994 = vadd.xlane.f32.xlu0 %v3993_v43 }
 0xb43   : > { %4033 = vadd.xlane.f32.xlu0 %v4032_v14  ;;  %v8247_v19 = vpop.f32.mrb[14].mxu0 }
 0xb44   : > { %v8249_v17 = vpop.f32.mrb[15].mxu0 }
 0xb74   : > { %v3434_v52 = vpop.xlane.xlu0 %3433 }
 0xb75   : > { %v3431_v6 = vpop.xlane.xlu1 %3430 }
 0xb76   : > { %v3435_v35 = vadd.f32 %v3434_v52, %v3431_v6 }
 0xb78   : > { %v3792_v61 = vpop.xlane.xlu0 %3791  ;;  %v3436_v18 = vrot.slane %v3435_v35, 4 }
 0xb79   : > { %v3789_v55 = vpop.xlane.xlu1 %3788 }
 0xb7a   : > { %v3793_v16 = vadd.f32 %v3792_v61, %v3789_v55  ;;  %v3437_v32 = vadd.f32 %v3436_v18, %v3435_v35 }
 0xb7c   : > { %v3472_v9 = vpop.xlane.xlu0 %3471  ;;  %v3794_v15 = vrot.slane %v3793_v16, 4  ;;  %v3438_v31 = vrot.slane %v3437_v32, 2 }
 0xb7d   : > { %v8251_v62 = vpop.xlane.xlu1 %3567  ;;  %v3479_v38 = vrot.slane %v3472_v9, 1 }
 0xb7e   : > { %v3795_v20 = vadd.f32 %v3794_v15, %v3793_v16  ;;  %v3439_v23 = vadd.f32 %v3438_v31, %v3437_v32 }
 0xb80   : > { %v3520_v42 = vpop.xlane.xlu0 %3519  ;;  %v3796_v3 = vrot.slane %v3795_v20, 2  ;;  %v3440_v43 = vrot.slane %v3439_v23, 1 }
 0xb81   : > { %v8253_v39 = vpop.xlane.xlu1 %3663  ;;  %v3527_v58 = vrot.slane %v3520_v42, 2  ;;  %v3575_v42 = vrot.slane %v8251_v62, 3 }
 0xb82   : > { %v3797_v40 = vadd.f32 %v3796_v3, %v3795_v20  ;;  %v3441_v32 = vadd.f32 %v3440_v43, %v3439_v23  ;;  %v3671_v31 = vrot.slane %v8253_v39, 5 }
 0xb84   : > { %v3616_v47 = vpop.xlane.xlu0 %3615  ;;  %v3798_v35 = vrot.slane %v3797_v40, 1 }
 0xb85   : > { %v8255_v53 = vpop.xlane.xlu1 %3759  ;;  %v3623_v16 = vrot.slane %v3616_v47, 4 }
 0xb88   : > { %v8257_v5 = vpop.xlane.xlu0 %3711 }
 0xb89   : > { %v8259_v4 = vpop.xlane.xlu1 %3853  ;;  %v3719_v23 = vrot.slane %v8257_v5, 6 }
 0xb8c   : > { %v8261_v51 = vpop.xlane.xlu0 %3817 }
 0xb8d   : > { %v8263_v29 = vpop.xlane.xlu1 %3925 }
 0xb90   : > { %v8265_v25 = vpop.xlane.xlu0 %3889 }
 0xb91   : > { %v8267_v34 = vpop.xlane.xlu1 %3561 }
 0xb94   : > { %v8269_v48 = vpop.xlane.xlu0 %3961 }
 0xb95   : > { %v8271_v0 = vpop.xlane.xlu1 %3657 }
 0xb98   : > { %v3466_v59 = vpop.xlane.xlu0 %3465 }
 0xb99   : > { %v8273_v26 = vpop.xlane.xlu1 %3753  ;;  %v3476_v44 = vrot.slane %v3466_v59, 1 }
 0xb9c   : > { %v3514_v7 = vpop.xlane.xlu0 %3513 }
 0xb9d   : > { %v8275_v46 = vpop.xlane.xlu1 %3847  ;;  %v3524_v33 = vrot.slane %v3514_v7, 2 }
 0xba0   : > { %v3610_v30 = vpop.xlane.xlu0 %3609 }
 0xba1   : > { %v8277_v1 = vpop.xlane.xlu1 %3919  ;;  %v3620_v18 = vrot.slane %v3610_v30, 4 }
 0xba4   : > { %v3706_v13 = vpop.xlane.xlu0 %3705 }
 0xba5   : > { %v8279_v37 = vpop.xlane.xlu1 %3991  ;;  %v3716_v62 = vrot.slane %v3706_v13, 6 }
 0xba8   : > { %v8281_v50 = vpop.xlane.xlu0 %3811 }
 0xba9   : > { %v3469_v45 = vpop.xlane.xlu1 %3468 }
 0xbaa   : > { %v3477_v41 = vrot.slane %v3469_v45, 1  ;;  %v3572_v45 = vrot.slane %v8267_v34, 3 }
 0xbac   : > { %v3478_v36 = vsel %vm9452_vm3, %v3476_v44, %v3477_v41  ;;  %v3480_v8 = vsel %vm9453_vm5, %v3477_v41, %v3479_v38  ;;  %v8285_v2 = vpop.xlane.xlu0 %3883  ;;  %vm9459_vm3 = vmmov %vm9458_vm1  ;;  %vm9460_vm5 = vcmask 1041408  }
 0xbad   : > { %v3483_v54 = vadd.f32 %v3480_v8, %v3478_v36  ;;  %v3517_v57 = vpop.xlane.xlu1 %3516 }
 0xbae   : > { %v3525_v63 = vrot.slane %v3517_v57, 2 }
 0xbaf   : > { %v3484_v14 = vrot.slane %v3483_v54, 4 }
 0xbb0   : > { %v3526_v52 = vsel %vm9454_vm8, %v3524_v33, %v3525_v63  ;;  %v3528_v6 = vsel %vm9455_vm2, %v3525_v63, %v3527_v58  ;;  %v8289_v61 = vpop.xlane.xlu0 %3955  ;;  %v3442_v63 = vmul.f32 0.03125, %v3441_v32  ;;  %vm9461_vm8 = vmmov %vm9460_vm5  ;;  %vm9462_vm2 = vcmask 1042432  }
 0xbb1   : > { %v3485_v55 = vadd.f32 %v3484_v14, %v3483_v54  ;;  %v3531_v9 = vadd.f32 %v3528_v6, %v3526_v52  ;;  %v3613_v59 = vpop.xlane.xlu1 %3612  ;;  %v3799_v54 = vadd.f32 %v3798_v35, %v3797_v40  ;;  %v3668_v35 = vrot.slane %v8271_v0, 5 }
 0xbb2   : > { %v3621_v15 = vrot.slane %v3613_v59, 4 }
 0xbb3   : > { %v3486_v7 = vrot.slane %v3485_v55, 2  ;;  %v3532_v20 = vrot.slane %v3531_v9, 4  ;;  %v8303_v13 = vmul.f32 0.03125, %v3799_v54 }
 0xbb4   : > { %v3622_v3 = vsel %vm9456_vm9, %v3620_v18, %v3621_v15  ;;  %v3624_v38 = vsel %vm9457_vm15, %v3621_v15, %v3623_v16  ;;  %v3565_v44 = vpop.xlane.xlu0 %3564  ;;  %vm9463_vm9 = vmmov %vm9462_vm2  ;;  %vm9464_vm15 = vcmp.eq.s32.totalorder %v7666_v22, 0 }
 0xbb5   : > { %v3487_v41 = vadd.f32 %v3486_v7, %v3485_v55  ;;  %v3533_v36 = vadd.f32 %v3532_v20, %v3531_v9  ;;  %v3627_v8 = vadd.f32 %v3624_v38, %v3622_v3  ;;  %v3573_v47 = vrot.slane %v3565_v44, 3  ;;  %v3709_v30 = vpop.xlane.xlu1 %3708 }
 0xbb6   : > { %v3717_v57 = vrot.slane %v3709_v30, 6  ;;  %v3443_v7 = vsel %vm1900_vm7, %v3442_v63, 0.0  ;;  %v8314_v44 = vsel %vm9464_vm15, %v3442_v63, 0.0  ;;  %v3767_v30 = vrot.slane %v8255_v53, 7 }
 0xbb7   : > { %v3488_v58 = vrot.slane %v3487_v41, 1  ;;  %v3534_v33 = vrot.slane %v3533_v36, 2  ;;  %v3628_v39 = vrot.slane %v3627_v8, 4  ;;  %v3574_v34 = vsel %vm9458_vm1, %v3572_v45, %v3573_v47 }
 0xbb8   : > { %v3576_v43 = vsel %vm9459_vm3, %v3573_v47, %v3575_v42  ;;  %v3718_v14 = vsel %vm9460_vm5, %v3716_v62, %v3717_v57  ;;  %v3720_v52 = vsel %vm9461_vm8, %v3717_v57, %v3719_v23  ;;  %v3661_v6 = vpop.xlane.xlu0 %3660  ;;  %vm9465_vm1 = vcmp.eq.s32.totalorder %v7668_v24, 8 }
 0xbb9   : > { %v3489_v55 = vadd.f32 %v3488_v58, %v3487_v41  ;;  %v3535_v9 = vadd.f32 %v3534_v33, %v3533_v36  ;;  %v3629_v40 = vadd.f32 %v3628_v39, %v3627_v8  ;;  %v3579_v59 = vadd.f32 %v3576_v43, %v3574_v34  ;;  %v8301_v5 = vpop.xlane.xlu1 %3997 }
 0xbba   : > { %v3723_v16 = vadd.f32 %v3720_v52, %v3718_v14  ;;  %v3669_v18 = vrot.slane %v3661_v6, 5  ;;  %v8321_v47 = vsel %vm9465_vm1, %v8303_v13, 0.0  ;;  %v3861_v23 = vrot.slane %v8259_v4, 2 }
 0xbbb   : > { %v3536_v15 = vrot.slane %v3535_v9, 1  ;;  %v3630_v32 = vrot.slane %v3629_v40, 2  ;;  %v3580_v42 = vrot.slane %v3579_v59, 4  ;;  %v8316_v0 = vmul.f32 0.03125, %v3489_v55 }
 0xbbc   : > { %v3724_v20 = vrot.slane %v3723_v16, 4  ;;  %v3670_v45 = vsel %vm9462_vm2, %v3668_v35, %v3669_v18  ;;  %v3672_v3 = vsel %vm9463_vm9, %v3669_v18, %v3671_v31  ;;  %v8310_v38 = vpop.xlane.xlu0 %4027  ;;  %v3825_v62 = vrot.slane %v8261_v51, 1 }
 0xbbd   : > { %v3537_v41 = vadd.f32 %v3536_v15, %v3535_v9  ;;  %v3631_v36 = vadd.f32 %v3630_v32, %v3629_v40  ;;  %v3815_v8 = vpop.xlane.xlu1 %3814  ;;  %v3581_v54 = vadd.f32 %v3580_v42, %v3579_v59  ;;  %v3675_v58 = vadd.f32 %v3672_v3, %v3670_v45 }
 0xbbe   : > { %v3725_v31 = vadd.f32 %v3724_v20, %v3723_v16  ;;  %v3897_v33 = vrot.slane %v8265_v25, 3  ;;  %v3822_v39 = vrot.slane %v8281_v50, 1  ;;  %v3823_v63 = vrot.slane %v3815_v8, 1 }
 0xbbf   : > { %v3632_v57 = vrot.slane %v3631_v36, 1  ;;  %v3582_v34 = vrot.slane %v3581_v54, 2  ;;  %v3491_v14 = vsel %vm1953_vm0, %v8316_v0, 0.0  ;;  %v8331_v53 = vmul.f32 0.03125, %v3537_v41 }
 0xbc0   : > { %v3757_v43 = vpop.xlane.xlu0 %3756  ;;  %v3726_v52 = vrot.slane %v3725_v31, 2  ;;  %v3676_v6 = vrot.slane %v3675_v58, 4  ;;  %v3969_v51 = vrot.slane %v8269_v48, 5  ;;  %v3764_v55 = vrot.slane %v8273_v26, 7 }
 0xbc1   : > { %v3887_v4 = vpop.xlane.xlu1 %3886  ;;  %v3633_v9 = vadd.f32 %v3632_v57, %v3631_v36  ;;  %v3583_v25 = vadd.f32 %v3582_v34, %v3581_v54  ;;  %v3894_v50 = vrot.slane %v8285_v2, 3  ;;  %vm9466_vm3 = vcmask 1046528  }
 0xbc2   : > { %v3677_v40 = vadd.f32 %v3676_v6, %v3675_v58  ;;  %v3824_v59 = vsel %vm9466_vm3, %v3822_v39, %v3823_v63  ;;  %vm9467_vm5 = vmmov %vm9466_vm3  ;;  %v3492_v16 = vadd.f32 %v3491_v14, %v3443_v7  ;;  %v3765_v32 = vrot.slane %v3757_v43, 7 }
 0xbc3   : > { %v3826_v35 = vsel %vm9467_vm5, %v3823_v63, %v3825_v62  ;;  %v3584_v18 = vrot.slane %v3583_v25, 1  ;;  %v3539_v48 = vsel %vm2007_vm13, %v8331_v53, 0.0  ;;  %v3727_v20 = vadd.f32 %v3726_v52, %v3725_v31 }
 0xbc4   : > { %v3829_v15 = vadd.f32 %v3826_v35, %v3824_v59  ;;  %v3851_v42 = vpop.xlane.xlu0 %3850  ;;  %v3678_v26 = vrot.slane %v3677_v40, 2  ;;  %v3895_v45 = vrot.slane %v3887_v4, 3  ;;  %v8341_v3 = vmul.f32 0.03125, %v3633_v9 }
 0xbc5   : > { %v3585_v2 = vadd.f32 %v3584_v18, %v3583_v25  ;;  %vm9468_vm8 = vcmask 1040384   ;;  %vm9470_vm9 = vcmask 1044480   ;;  %v3959_v57 = vpop.xlane.xlu1 %3958  ;;  %v3540_v58 = vadd.f32 %v3539_v48, %v3492_v16 }
 0xbc6   : > { %v3830_v41 = vrot.slane %v3829_v15, 4  ;;  %v3766_v36 = vsel %vm9468_vm8, %v3764_v55, %v3765_v32  ;;  %v3679_v8 = vadd.f32 %v3678_v26, %v3677_v40  ;;  %vm9469_vm2 = vmmov %vm9468_vm8  ;;  %v3896_v54 = vsel %vm9470_vm9, %v3894_v50, %v3895_v45 }
 0xbc7   : > { %v3768_v7 = vsel %vm9469_vm2, %v3765_v32, %v3767_v30  ;;  %vm9471_vm15 = vmmov %vm9470_vm9  ;;  %v8347_v39 = vmul.f32 0.03125, %v3585_v2  ;;  %v3728_v63 = vrot.slane %v3727_v20, 1  ;;  %v3859_v52 = vrot.slane %v3851_v42, 2 }
 0xbc8   : > { %v3898_v62 = vsel %vm9471_vm15, %v3895_v45, %v3897_v33  ;;  %v3831_v31 = vadd.f32 %v3830_v41, %v3829_v15  ;;  %v3771_v34 = vadd.f32 %v3768_v7, %v3766_v36  ;;  %v3680_v43 = vrot.slane %v3679_v8, 1  ;;  %v3923_v6 = vpop.xlane.xlu0 %3922 }
 0xbc9   : > { %v3901_v14 = vadd.f32 %v3898_v62, %v3896_v54  ;;  %v3858_v4 = vrot.slane %v8275_v46, 2  ;;  %v3966_v55 = vrot.slane %v8289_v61, 5  ;;  %vm9472_vm1 = vcmp.eq.s32.totalorder %v7668_v24, 3 }
 0xbca   : > { %v3587_v30 = vsel %vm9472_vm1, %v8347_v39, 0.0  ;;  %v3967_v33 = vrot.slane %v3959_v57, 5  ;;  %vm9473_vm3 = vcmp.eq.s32.totalorder %v7668_v24, 4  ;;  %v3681_v50 = vadd.f32 %v3680_v43, %v3679_v8 }
 0xbcb   : > { %v3635_v9 = vsel %vm9473_vm3, %v8341_v3, 0.0  ;;  %v3588_v25 = vadd.f32 %v3587_v30, %v3540_v58  ;;  %v3832_v40 = vrot.slane %v3831_v31, 2  ;;  %v3772_v59 = vrot.slane %v3771_v34, 4 }
 0xbcc   : > { %v3902_v35 = vrot.slane %v3901_v14, 4  ;;  %vm9474_vm5 = vcmask 1045504   ;;  %v3729_v18 = vadd.f32 %v3728_v63, %v3727_v20  ;;  %v8359_v15 = vmul.f32 0.03125, %v3681_v50  ;;  %v3995_v36 = vpop.xlane.xlu0 %3994 }
 0xbcd   : > { %v3860_v16 = vsel %vm9474_vm5, %v3858_v4, %v3859_v52  ;;  %vm9475_vm8 = vmmov %vm9474_vm5  ;;  %v3636_v61 = vadd.f32 %v3635_v9, %v3588_v25  ;;  %v3833_v32 = vadd.f32 %v3832_v40, %v3831_v31  ;;  %v3773_v42 = vadd.f32 %v3772_v59, %v3771_v34 }
 0xbce   : > { %v3862_v46 = vsel %vm9475_vm8, %v3859_v52, %v3861_v23  ;;  %v3903_v48 = vadd.f32 %v3902_v35, %v3901_v14  ;;  %vm9476_vm2 = vcmask 1042432   ;;  %vm9477_vm9 = vcmp.eq.s32.totalorder %v7673_v27, 8  ;;  %v4031_v35 = vpop.xlane.xlu1 %4030 }
 0xbcf   : > { %v3865_v26 = vadd.f32 %v3862_v46, %v3860_v16  ;;  %v3968_v45 = vsel %vm9476_vm2, %v3966_v55, %v3967_v33  ;;  %v8365_v2 = vsel %vm9477_vm9, %v8303_v13, 0.0  ;;  %v3933_v41 = vrot.slane %v8263_v29, 4  ;;  %vm9478_vm15 = vmmov %vm9476_vm2 }
 0xbd0   : > { %v3683_v23 = vsel %vm2168_vm6, %v8359_v15, 0.0  ;;  %v3970_v20 = vsel %vm9478_vm15, %v3967_v33, %v3969_v51  ;;  %v3930_v8 = vrot.slane %v8277_v1, 4  ;;  %v3834_v7 = vrot.slane %v3833_v32, 1  ;;  %v4034_v25 = vpop.xlane.xlu0 %4033 }
 0xbd1   : > { %v3774_v54 = vrot.slane %v3773_v42, 2  ;;  %v3904_v62 = vrot.slane %v3903_v48, 2  ;;  %v8373_v57 = vmul.f32 0.03125, %v3729_v18  ;;  %v3866_v58 = vrot.slane %v3865_v26, 4 }
 0xbd2   : > { %v3973_v31 = vadd.f32 %v3970_v20, %v3968_v45  ;;  %v3931_v13 = vrot.slane %v3923_v6, 4  ;;  %v4002_v34 = vrot.slane %v8279_v37, 6  ;;  %vm9479_vm1 = vcmp.eq.s32.totalorder %v7666_v22, 1 }
 0xbd3   : > { %v3493_v29 = vsel %vm9479_vm1, %v8316_v0, 0.0  ;;  %v3684_v63 = vadd.f32 %v3683_v23, %v3636_v61  ;;  %v3775_v43 = vadd.f32 %v3774_v54, %v3773_v42  ;;  %v3905_v51 = vadd.f32 %v3904_v62, %v3903_v48 }
 0xbd4   : > { %v3867_v14 = vadd.f32 %v3866_v58, %v3865_v26  ;;  %v3974_v52 = vrot.slane %v3973_v31, 4  ;;  %vm9480_vm3 = vcmask 1043456   ;;  %v4005_v4 = vrot.slane %v8301_v5, 6 }
 0xbd5   : > { %v3932_v1 = vsel %vm9480_vm3, %v3930_v8, %v3931_v13  ;;  %v3835_v55 = vadd.f32 %v3834_v7, %v3833_v32  ;;  %v3776_v30 = vrot.slane %v3775_v43, 1  ;;  %vm9481_vm5 = vmmov %vm9480_vm3  ;;  %v3495_v6 = vadd.f32 %v3493_v29, %v8314_v44 }
 0xbd6   : > { %v3934_v33 = vsel %vm9481_vm5, %v3931_v13, %v3933_v41  ;;  %vm9482_vm8 = vcmp.eq.s32.totalorder %v7668_v24, 6  ;;  %v3868_v0 = vrot.slane %v3867_v14, 2  ;;  %v3975_v9 = vadd.f32 %v3974_v52, %v3973_v31 }
 0xbd7   : > { %v3731_v37 = vsel %vm9482_vm8, %v8373_v57, 0.0  ;;  %vm9483_vm2 = vcmp.eq.s32.totalorder %v7666_v22, 2  ;;  %v3777_v59 = vadd.f32 %v3776_v30, %v3775_v43  ;;  %v3937_v5 = vadd.f32 %v3934_v33, %v3932_v1 }
 0xbd8   : > { %v3541_v50 = vsel %vm9483_vm2, %v8331_v53, 0.0  ;;  %v3732_v40 = vadd.f32 %v3731_v37, %v3684_v63  ;;  %v3906_v16 = vrot.slane %v3905_v51, 1  ;;  %v3869_v46 = vadd.f32 %v3868_v0, %v3867_v14 }
 0xbd9   : > { %v3976_v18 = vrot.slane %v3975_v9, 2  ;;  %v4003_v61 = vrot.slane %v3995_v36, 6  ;;  %v3836_v44 = vmul.f32 0.03125, %v3835_v55  ;;  %v8389_v32 = vmul.f32 0.03125, %v3777_v59 }
 0xbda   : > { %v3938_v42 = vrot.slane %v3937_v5, 4  ;;  %v4041_v48 = vrot.slane %v4034_v25, 7  ;;  %v3870_v26 = vrot.slane %v3869_v46, 1  ;;  %v4039_v45 = vrot.slane %v4031_v35, 7 }
 0xbdb   : > { %vm9484_vm9 = vcmask 1041408   ;;  %v3543_v53 = vadd.f32 %v3541_v50, %v3495_v6  ;;  %v4038_v20 = vrot.slane %v8310_v38, 7  ;;  %vm9486_vm1 = vcmp.eq.s32.totalorder %v7668_v24, 7 }
 0xbdc   : > { %v4004_v41 = vsel %vm9484_vm9, %v4002_v34, %v4003_v61  ;;  %vm9485_vm15 = vmmov %vm9484_vm9  ;;  %v3779_v8 = vsel %vm9486_vm1, %v8389_v32, 0.0  ;;  %v3977_v7 = vadd.f32 %v3976_v18, %v3975_v9  ;;  %v3907_v54 = vadd.f32 %v3906_v16, %v3905_v51 }
 0xbdd   : > { %v4006_v23 = vsel %vm9485_vm15, %v4003_v61, %v4005_v4  ;;  %v3780_v36 = vadd.f32 %v3779_v8, %v3732_v40  ;;  %v3871_v62 = vadd.f32 %v3870_v26, %v3869_v46  ;;  %v3939_v58 = vadd.f32 %v3938_v42, %v3937_v5 }
 0xbde   : > { %vm9487_vm3 = vcmp.eq.s32.totalorder %v7666_v22, 3  ;;  %vm9488_vm5 = vcmp.eq.s32.totalorder %v7673_v27, 9  ;;  %v4009_v34 = vadd.f32 %v4006_v23, %v4004_v41  ;;  %vm9489_vm8 = vcmask 1040384  }
 0xbdf   : > { %v3589_v31 = vsel %vm9487_vm3, %v8347_v39, 0.0  ;;  %v3840_v13 = vsel %vm9488_vm5, %v3836_v44, 0.0  ;;  %v4042_v29 = vsel %vm9489_vm8, %v4039_v45, %v4041_v48  ;;  %v3802_v38 = vadd.f32 %v8321_v47, %v3780_v36  ;;  %vm9490_vm2 = vmmov %vm9489_vm8 }
 0xbe0   : > { %v3872_v63 = vmul.f32 0.03125, %v3871_v62  ;;  %v3940_v43 = vrot.slane %v3939_v58, 2  ;;  %v4040_v14 = vsel %vm9490_vm2, %v4038_v20, %v4039_v45  ;;  %v3837_v51 = vsel %vm2338_vm10, %v3836_v44, 0.0 }
 0xbe1   : > { %v3978_v52 = vrot.slane %v3977_v7, 1  ;;  %v4010_v1 = vrot.slane %v4009_v34, 4  ;;  %v4045_v4 = vadd.f32 %v4042_v29, %v4040_v14  ;;  %v3842_v39 = vadd.f32 %v3840_v13, %v8365_v2 }
 0xbe2   : > { %v3908_v55 = vmul.f32 0.03125, %v3907_v54  ;;  %v3838_v30 = vadd.f32 %v3837_v51, %v3802_v38  ;;  %vm9491_vm9 = vcmp.eq.s32.totalorder %v7673_v27, 10  ;;  %v3873_v47 = vsel %vm2377_vm14, %v3872_v63, 0.0 }
 0xbe3   : > { %v3876_v33 = vsel %vm9491_vm9, %v3872_v63, 0.0  ;;  %v3941_v6 = vadd.f32 %v3940_v43, %v3939_v58  ;;  %v4011_v37 = vadd.f32 %v4010_v1, %v4009_v34  ;;  %v4046_v0 = vrot.slane %v4045_v4, 4 }
 0xbe4   : > { %v3591_v9 = vadd.f32 %v3589_v31, %v3543_v53  ;;  %v3874_v25 = vadd.f32 %v3873_v47, %v3838_v30  ;;  %v3878_v50 = vadd.f32 %v3876_v33, %v3842_v39  ;;  %v3979_v40 = vadd.f32 %v3978_v52, %v3977_v7 }
 0xbe5   : > { %v3942_v59 = vrot.slane %v3941_v6, 1  ;;  %v4012_v5 = vrot.slane %v4011_v37, 2  ;;  %v4047_v35 = vadd.f32 %v4046_v0, %v4045_v4  ;;  %vm9492_vm15 = vcmp.eq.s32.totalorder %v7666_v22, 4 }
 0xbe6   : > { %v3637_v2 = vsel %vm9492_vm15, %v8341_v3, 0.0  ;;  %v3909_v16 = vsel %vm2416_vm11, %v3908_v55, 0.0  ;;  %vm9493_vm1 = vcmp.eq.s32.totalorder %v7673_v27, 11  ;;  %vm9494_vm3 = vcmp.eq.s32.totalorder %v7666_v22, 5 }
 0xbe7   : > { %v3912_v46 = vsel %vm9493_vm1, %v3908_v55, 0.0  ;;  %v3943_v18 = vadd.f32 %v3942_v59, %v3941_v6  ;;  %v4013_v61 = vadd.f32 %v4012_v5, %v4011_v37  ;;  %v4048_v44 = vrot.slane %v4047_v35, 2 }
 0xbe8   : > { %v3639_v42 = vadd.f32 %v3637_v2, %v3591_v9  ;;  %v3685_v48 = vsel %vm9494_vm3, %v8359_v15, 0.0  ;;  %v3914_v26 = vadd.f32 %v3912_v46, %v3878_v50  ;;  %v3910_v45 = vadd.f32 %v3909_v16, %v3874_v25 }
 0xbe9   : > { %v3980_v41 = vmul.f32 0.03125, %v3979_v40  ;;  %v3944_v23 = vmul.f32 0.03125, %v3943_v18  ;;  %v4014_v53 = vrot.slane %v4013_v61, 1  ;;  %v4049_v3 = vadd.f32 %v4048_v44, %v4047_v35 }
 0xbea   : > { %vm9495_vm5 = vcmp.eq.s32.totalorder %v7673_v27, 12  ;;  %v3687_v54 = vadd.f32 %v3685_v48, %v3639_v42  ;;  %vm9496_vm8 = vcmp.eq.s32.totalorder %v7673_v27, 13  ;;  %vm9497_vm2 = vcmp.eq.s32.totalorder %v7666_v22, 6 }
 0xbeb   : > { %v3945_v20 = vsel %vm2455_vm12, %v3944_v23, 0.0  ;;  %v3948_v8 = vsel %vm9495_vm5, %v3944_v23, 0.0  ;;  %v4015_v7 = vadd.f32 %v4014_v53, %v4013_v61  ;;  %v4050_v36 = vrot.slane %v4049_v3, 1 }
 0xbec   : > { %v3950_v62 = vadd.f32 %v3948_v8, %v3914_v26  ;;  %v3946_v58 = vadd.f32 %v3945_v20, %v3910_v45  ;;  %v3984_v15 = vsel %vm9496_vm8, %v3980_v41, 0.0  ;;  %v3981_v34 = vsel %vm2494_vm4, %v3980_v41, 0.0 }
 0xbed   : > { %v4016_v31 = vmul.f32 0.03125, %v4015_v7  ;;  %v4051_v13 = vadd.f32 %v4050_v36, %v4049_v3  ;;  %v3733_v29 = vsel %vm9497_vm2, %v8373_v57, 0.0  ;;  %vm9498_vm9 = vcmp.eq.s32.totalorder %v7666_v22, 7 }
 0xbee   : > { %v3986_v38 = vadd.f32 %v3984_v15, %v3950_v62  ;;  %v3982_v63 = vadd.f32 %v3981_v34, %v3946_v58  ;;  %v3781_v43 = vsel %vm9498_vm9, %v8389_v32, 0.0  ;;  %vm9499_vm15 = vcmp.eq.s32.totalorder %v7673_v27, 14 }
 0xbef   : > { %v4020_v14 = vsel %vm9499_vm15, %v4016_v31, 0.0  ;;  %vm9500_vm1 = vcmp.eq.s32.totalorder %v7668_v24, 14  ;;  %v4052_v52 = vmul.f32 0.03125, %v4051_v13  ;;  %v3735_v4 = vadd.f32 %v3733_v29, %v3687_v54 }
 0xbf0   : > { %v4017_v51 = vsel %vm9500_vm1, %v4016_v31, 0.0  ;;  %v4022_v1 = vadd.f32 %v4020_v14, %v3986_v38  ;;  %vm9501_vm3 = vcmp.eq.s32.totalorder %v7668_v24, 15  ;;  %vm9502_vm5 = vcmp.eq.s32.totalorder %v7673_v27, 15 }
 0xbf1   : > { %v4018_v39 = vadd.f32 %v4017_v51, %v3982_v63  ;;  %v4053_v55 = vsel %vm9501_vm3, %v4052_v52, 0.0  ;;  %v4056_v57 = vsel %vm9502_vm5, %v4052_v52, 0.0  ;;  %v3783_v30 = vadd.f32 %v3781_v43, %v3735_v4 }
 0xbf2   : > { %v4058_v47 = vadd.f32 %v4056_v57, %v4022_v1  ;;  %vm9503_vm9 = vcmask 130048  }
 0xbf3   : > { %v4054_v33 = vadd.f32 %v4053_v55, %v4018_v39  ;;  %vm9504_vm15 = vmmov %vm9503_vm9 }
 0xbf4   : > { %vm9505_vm3 = vmmov %vm9503_vm9 }
 0xbf5   : > { %vm4059_vm8 = vcmp.gt.f32.partialorder %v3783_v30, %v4054_v33  ;;  %vm4060_vm2 = vcmp.gt.f32.partialorder %v4058_v47, %v4054_v33  ;;  %vm9506_vm5 = vmmov %vm9505_vm3 }
 0xbf6   : > { %v4061_v32 = vsel %vm4059_vm8, 1.0, %v7202_v60  ;;  %v4062_v6 = vsel %vm4060_vm2, 1.0, %v7202_v60  ;;  %vm9507_vm8 = vmmov %vm9505_vm3 }
 0xbf7   : > { %v4063_v37 = vsel %vm9503_vm9, %v4061_v32, 0.0  ;;  %v4064_v0 = vsel %vm9504_vm15, %v4062_v6, 0.0  ;;  %vm9508_vm2 = vmmov %vm9505_vm3  ;;  %vm9509_vm9 = vcmp.eq.s32.totalorder %v7668_v24, 3 }
 0xbf8   : > { %v4065_v9 = vadd.f32 %v4064_v0, %v4063_v37  ;;  %vm9510_vm15 = vmmov %vm9508_vm2  ;;  %v1147_v0 = vld [vmem:[%s9523_s11] sm:$0xff] }
 0xbfa   : > { %v4066_v25 = vrot.slane %v4065_v9, 4 }
 0xbfc   : > { %v4067_v50 = vadd.f32 %v4066_v25, %v4065_v9  ;;  %v1148_v9 = vld [vmem:[%s9523_s11 + $0x8] sm:$0xff]  ;;  %v1149_v25 = vld [vmem:[%s9523_s11 + $0x10] sm:$0xff] }
 0xbfe   : > { %v4068_v40 = vrot.slane %v4067_v50, 2 }
 0xc00   : > { %v4069_v59 = vadd.f32 %v4068_v40, %v4067_v50  ;;  %v6967_v50 = vpack.c.bf16 %v1148_v9, %v1147_v0  ;;  %v1150_v40 = vld [vmem:[%s9523_s11 + $0x18] sm:$0xff] }
 0xc02   : > { %v4070_v5 = vrot.slane %v4069_v59, 1  ;;  %6968 = vmatprep.subr.bf16.mxu0 %v6967_v50 }
 0xc03   : > { %6970 = vmatpush3.bf16.msra.mxu0 %v6967_v50 }
 0xc04   : > { %v4071_v35 = vadd.f32 %v4070_v5, %v4069_v59  ;;  %v6971_v59 = vpack.c.bf16 %v1150_v40, %v1149_v25 }
 0xc06   : > { %vm4072_vm1 = vcmp.lt.f32.partialorder %v4071_v35, 8.0  ;;  %6972 = vmatprep.subr.bf16.mxu0 %v6971_v59 }
 0xc07   : > { %v4073_v2 = vsel %vm4072_vm1, %v4054_v33, -1e+30  ;;  %6974 = vmatpush3.bf16.msra.mxu0 %v6971_v59 }
 0xc08   : > { %v4074_v16 = vsel %vm9505_vm3, %v4073_v2, -inf  ;;  %vm9512_vm3 = vcmp.eq.s32.totalorder %v7668_v24, 4 }
 0xc09   : > { %4075 = vmax.xlane.f32.xlu1 %v4074_v16 }
 0xc96   : > { %v4076_v46 = vpop.xlane.xlu1 %4075 }
 0xc97   : > { %v4077_v18 = vsub.f32 %v4054_v33, %v4076_v46 }
 0xc99   : > { %v4078_v61 = vmul.f32 1.442695, %v4077_v18 }
 0xc9b   : > { %7132 = vpow2.f32 %v4078_v61 }
 0xca5   : > { %v7133_v44 = vpop.eup %7132 }
 0xca6   : > { %v4080_v42 = vsel %vm4072_vm1, %v7133_v44, 0.0  ;;  %vm9511_vm1 = vmmov %vm9508_vm2 }
 0xca7   : > { %v4081_v48 = vsel %vm9506_vm5, %v4080_v42, 0.0  ;;  %vm9513_vm5 = vmmov %vm9511_vm1 }
 0xca8   : > { %4082 = vadd.xlane.f32.xlu0 %v4081_v48 }
 0xd35   : > { %v4083_v26 = vpop.xlane.xlu0 %4082 }
 0xd36   : > { %7134 = vrcp.f32 %v4083_v26 }
 0xd40   : > { %v7135_v45 = vpop.eup %7134 }
 0xd41   : > { %v4085_v41 = vmul.f32 %v7135_v45, %v4080_v42 }
 0xd43   : > { %v4110_v23 = vsel %vm2007_vm13, %v4085_v41, 0.0  ;;  %v4094_v53 = vsel %vm1953_vm0, %v4085_v41, 0.0  ;;  %v4126_v8 = vsel %vm9509_vm9, %v4085_v41, 0.0  ;;  %v4086_v7 = vsel %vm1900_vm7, %v4085_v41, 0.0 }
 0xd44   : > { %v4111_v3 = vsel %vm9507_vm8, %v4110_v23, 0.0  ;;  %v4095_v20 = vsel %vm9508_vm2, %v4094_v53, 0.0  ;;  %v4127_v36 = vsel %vm9510_vm15, %v4126_v8, 0.0  ;;  %v4087_v54 = vsel %vm9511_vm1, %v4086_v7, 0.0  ;;  %vm9514_vm8 = vmmov %vm9511_vm1 }
 0xd45   : > { %4112 = vadd.xlane.f32.xlu0 %v4111_v3  ;;  %4096 = vadd.xlane.f32.xlu1 %v4095_v20  ;;  %v4158_v62 = vsel %vm2168_vm6, %v4085_v41, 0.0  ;;  %v4142_v58 = vsel %vm9512_vm3, %v4085_v41, 0.0  ;;  %vm9515_vm2 = vcmp.eq.s32.totalorder %v7668_v24, 7  ;;  %vm9516_vm9 = vcmp.eq.s32.totalorder %v7668_v24, 6  ;;  %vm9517_vm15 = vmmov %vm9511_vm1 }
 0xd46   : > { %v4159_v15 = vsel %vm9513_vm5, %v4158_v62, 0.0  ;;  %v4143_v31 = vsel %vm9514_vm8, %v4142_v58, 0.0  ;;  %v4190_v13 = vsel %vm9515_vm2, %v4085_v41, 0.0  ;;  %v4174_v34 = vsel %vm9516_vm9, %v4085_v41, 0.0  ;;  %vm9519_vm5 = vmmov %vm9511_vm1 }
 0xd47   : > { %v4191_v29 = vsel %vm9517_vm15, %v4190_v13, 0.0  ;;  %v4175_v38 = vsel %vm9511_vm1, %v4174_v34, 0.0  ;;  %vm9518_vm3 = vcmp.eq.s32.totalorder %v7668_v24, 8  ;;  %v4214_v43 = vsel %vm2338_vm10, %v4085_v41, 0.0  ;;  %vm9520_vm8 = vmmov %vm9511_vm1 }
 0xd48   : > { %v4206_v63 = vsel %vm9518_vm3, %v4085_v41, 0.0  ;;  %v4215_v51 = vsel %vm9520_vm8, %v4214_v43, 0.0  ;;  %v4246_v52 = vsel %vm2416_vm11, %v4085_v41, 0.0  ;;  %v4230_v1 = vsel %vm2377_vm14, %v4085_v41, 0.0  ;;  %vm9521_vm2 = vmmov %vm9511_vm1 }
 0xd49   : > { %4128 = vadd.xlane.f32.xlu0 %v4127_v36  ;;  %4088 = vadd.xlane.f32.xlu1 %v4087_v54  ;;  %v4207_v14 = vsel %vm9519_vm5, %v4206_v63, 0.0  ;;  %v4247_v4 = vsel %vm9521_vm2, %v4246_v52, 0.0  ;;  %vm9522_vm9 = vmmov %vm9511_vm1  ;;  %v4278_v55 = vsel %vm2494_vm4, %v4085_v41, 0.0  ;;  %v4262_v57 = vsel %vm2455_vm12, %v4085_v41, 0.0 }
 0xd4a   : > { %v4231_v39 = vsel %vm9522_vm9, %v4230_v1, 0.0  ;;  %vm9524_vm15 = vmmov %vm9511_vm1  ;;  %v4263_v33 = vsel %vm9511_vm1, %v4262_v57, 0.0  ;;  %vm9525_vm3 = vcmp.eq.s32.totalorder %v7668_v24, 15  ;;  %vm9526_vm5 = vcmp.eq.s32.totalorder %v7668_v24, 14 }
 0xd4b   : > { %v4279_v30 = vsel %vm9524_vm15, %v4278_v55, 0.0  ;;  %v4310_v47 = vsel %vm9525_vm3, %v4085_v41, 0.0  ;;  %v4294_v32 = vsel %vm9526_vm5, %v4085_v41, 0.0  ;;  %vm9527_vm8 = vmmov %vm9511_vm1  ;;  %vm9529_vm9 = vcmask 1046528  }
 0xd4c   : > { %v4311_v6 = vsel %vm9527_vm8, %v4310_v47, 0.0  ;;  %vm9528_vm2 = vmmov %vm9511_vm1  ;;  %vm9531_vm1 = vcmask 1045504   ;;  %vm9533_vm5 = vcmask 1044480  }
 0xd4d   : > { %4160 = vadd.xlane.f32.xlu0 %v4159_v15  ;;  %4144 = vadd.xlane.f32.xlu1 %v4143_v31  ;;  %v4295_v37 = vsel %vm9528_vm2, %v4294_v32, 0.0  ;;  %vm9530_vm15 = vmmov %vm9529_vm9  ;;  %vm9535_vm2 = vcmask 1043456  }
 0xd4e   : > { %vm9532_vm3 = vmmov %vm9531_vm1 }
 0xd4f   : > { %vm9534_vm8 = vmmov %vm9533_vm5 }
 0xd51   : > { %4192 = vadd.xlane.f32.xlu0 %v4191_v29  ;;  %4176 = vadd.xlane.f32.xlu1 %v4175_v38 }
 0xd55   : > { %4208 = vadd.xlane.f32.xlu0 %v4207_v14  ;;  %4216 = vadd.xlane.f32.xlu1 %v4215_v51 }
 0xd59   : > { %4248 = vadd.xlane.f32.xlu0 %v4247_v4  ;;  %4232 = vadd.xlane.f32.xlu1 %v4231_v39 }
 0xd5d   : > { %4280 = vadd.xlane.f32.xlu0 %v4279_v30  ;;  %4264 = vadd.xlane.f32.xlu1 %v4263_v33 }
 0xd61   : > { %4312 = vadd.xlane.f32.xlu0 %v4311_v6  ;;  %4296 = vadd.xlane.f32.xlu1 %v4295_v37 }
 0xdd2   : > { %v4113_v5 = vpop.xlane.xlu0 %4112  ;;  %v4097_v35 = vpop.xlane.xlu1 %4096 }
 0xdd3   : > { %v4114_v2 = vmul.f32 %v4113_v5, %v8093_v49  ;;  %v4115_v16 = vmul.f32 %v4113_v5, %v8091_v11  ;;  %v4098_v46 = vmul.f32 %v4097_v35, %v8093_v49  ;;  %v4099_v18 = vmul.f32 %v4097_v35, %v8091_v11 }
 0xdd5   : > { %v4102_v61 = vrot.slane %v4098_v46, 1  ;;  %v4103_v44 = vrot.slane %v4099_v18, 1  ;;  %v4118_v42 = vrot.slane %v4114_v2, 2  ;;  %v4119_v48 = vrot.slane %v4115_v16, 2 }
 0xdd6   : > { %v4129_v26 = vpop.xlane.xlu0 %4128  ;;  %v4089_v45 = vpop.xlane.xlu1 %4088 }
 0xdd7   : > { %v4130_v41 = vmul.f32 %v4129_v26, %v8093_v49  ;;  %v4131_v23 = vmul.f32 %v4129_v26, %v8091_v11  ;;  %v4104_v53 = vsel %vm9529_vm9, %v4102_v61, %v4103_v44  ;;  %v4105_v3 = vsel %vm9530_vm15, %v4103_v44, %v4102_v61  ;;  %vm9536_vm9 = vmmov %vm9535_vm2 }
 0xdd8   : > { %v4090_v20 = vmul.f32 %v4089_v45, %v8093_v49  ;;  %v4091_v8 = vmul.f32 %v4089_v45, %v8091_v11  ;;  %v4120_v54 = vsel %vm9531_vm1, %v4118_v42, %v4119_v48  ;;  %v4121_v62 = vsel %vm9532_vm3, %v4119_v48, %v4118_v42 }
 0xdd9   : > { %v4134_v7 = vrot.slane %v4130_v41, 3  ;;  %v4135_v36 = vrot.slane %v4131_v23, 3  ;;  %vm9537_vm15 = vcmask 1042432   ;;  %vm9539_vm3 = vcmask 1041408  }
 0xdda   : > { %v4108_v58 = vadd.f32 %v4104_v53, %v4090_v20  ;;  %v4109_v15 = vadd.f32 %v4105_v3, %v4091_v8  ;;  %v4161_v31 = vpop.xlane.xlu0 %4160  ;;  %v4145_v13 = vpop.xlane.xlu1 %4144  ;;  %vm9538_vm1 = vmmov %vm9537_vm15 }
 0xddb   : > { %v4136_v34 = vsel %vm9533_vm5, %v4134_v7, %v4135_v36  ;;  %v4137_v29 = vsel %vm9534_vm8, %v4135_v36, %v4134_v7  ;;  %v4162_v38 = vmul.f32 %v4161_v31, %v8093_v49  ;;  %v4163_v63 = vmul.f32 %v4161_v31, %v8091_v11  ;;  %vm9540_vm5 = vmmov %vm9539_vm3 }
 0xddc   : > { %v4124_v43 = vadd.f32 %v4120_v54, %v4108_v58  ;;  %v4125_v14 = vadd.f32 %v4121_v62, %v4109_v15  ;;  %v4146_v51 = vmul.f32 %v4145_v13, %v8093_v49  ;;  %v4147_v52 = vmul.f32 %v4145_v13, %v8091_v11 }
 0xddd   : > { %v4166_v1 = vrot.slane %v4162_v38, 5  ;;  %v4167_v4 = vrot.slane %v4163_v63, 5  ;;  %vm9541_vm8 = vcmask 1040384  }
 0xdde   : > { %v4140_v39 = vadd.f32 %v4136_v34, %v4124_v43  ;;  %v4141_v55 = vadd.f32 %v4137_v29, %v4125_v14  ;;  %v4150_v57 = vrot.slane %v4146_v51, 4  ;;  %v4151_v30 = vrot.slane %v4147_v52, 4  ;;  %v4193_v33 = vpop.xlane.xlu0 %4192  ;;  %v4177_v47 = vpop.xlane.xlu1 %4176 }
 0xddf   : > { %v4194_v32 = vmul.f32 %v4193_v33, %v8093_v49  ;;  %v4195_v6 = vmul.f32 %v4193_v33, %v8091_v11  ;;  %v4178_v9 = vmul.f32 %v4177_v47, %v8093_v49  ;;  %v4179_v25 = vmul.f32 %v4177_v47, %v8091_v11 }
 0xde0   : > { %v4152_v37 = vsel %vm9535_vm2, %v4150_v57, %v4151_v30  ;;  %v4153_v0 = vsel %vm9536_vm9, %v4151_v30, %v4150_v57  ;;  %v4168_v50 = vsel %vm9537_vm15, %v4166_v1, %v4167_v4  ;;  %v4169_v40 = vsel %vm9538_vm1, %v4167_v4, %v4166_v1  ;;  %vm9542_vm2 = vmmov %vm9541_vm8 }
 0xde1   : > { %v4156_v59 = vadd.f32 %v4152_v37, %v4140_v39  ;;  %v4157_v5 = vadd.f32 %v4153_v0, %v4141_v55  ;;  %v4198_v35 = vrot.slane %v4194_v32, 7  ;;  %v4199_v2 = vrot.slane %v4195_v6, 7 }
 0xde2   : > { %v4182_v16 = vrot.slane %v4178_v9, 6  ;;  %v4183_v46 = vrot.slane %v4179_v25, 6  ;;  %v4209_v18 = vpop.xlane.xlu0 %4208  ;;  %v4217_v61 = vpop.xlane.xlu1 %4216  ;;  %vm9543_vm9 = vcmask 1046528   ;;  %vm9545_vm1 = vcmask 1045504  }
 0xde3   : > { %v4172_v44 = vadd.f32 %v4168_v50, %v4156_v59  ;;  %v4173_v42 = vadd.f32 %v4169_v40, %v4157_v5  ;;  %v4218_v23 = vmul.f32 %v4217_v61, %v8091_v11  ;;  %v4219_v53 = vmul.f32 %v4217_v61, %v8093_v49  ;;  %vm9544_vm15 = vmmov %vm9543_vm9 }
 0xde4   : > { %v4184_v48 = vsel %vm9539_vm3, %v4182_v16, %v4183_v46  ;;  %v4185_v26 = vsel %vm9540_vm5, %v4183_v46, %v4182_v16  ;;  %v4200_v3 = vsel %vm9541_vm8, %v4198_v35, %v4199_v2  ;;  %v4201_v20 = vsel %vm9542_vm2, %v4199_v2, %v4198_v35  ;;  %vm9546_vm3 = vmmov %vm9545_vm1 }
 0xde5   : > { %v4188_v45 = vadd.f32 %v4184_v48, %v4172_v44  ;;  %v4189_v41 = vadd.f32 %v4185_v26, %v4173_v42  ;;  %v4210_v8 = vmul.f32 %v4209_v18, %v8091_v11  ;;  %v4211_v7 = vmul.f32 %v4209_v18, %v8093_v49 }
 0xde6   : > { %v4249_v36 = vpop.xlane.xlu0 %4248  ;;  %v4233_v54 = vpop.xlane.xlu1 %4232  ;;  %v4222_v15 = vrot.slane %v4218_v23, 1  ;;  %v4223_v31 = vrot.slane %v4219_v53, 1  ;;  %vm9547_vm5 = vcmask 1044480   ;;  %vm9549_vm2 = vcmask 1043456  }
 0xde7   : > { %v4204_v62 = vadd.f32 %v4200_v3, %v4188_v45  ;;  %v4205_v58 = vadd.f32 %v4201_v20, %v4189_v41  ;;  %v4250_v13 = vmul.f32 %v4249_v36, %v8091_v11  ;;  %v4251_v34 = vmul.f32 %v4249_v36, %v8093_v49  ;;  %vm9548_vm8 = vmmov %vm9547_vm5 }
 0xde8   : > { %v4234_v29 = vmul.f32 %v4233_v54, %v8091_v11  ;;  %v4235_v38 = vmul.f32 %v4233_v54, %v8093_v49  ;;  %v4224_v14 = vsel %vm9543_vm9, %v4222_v15, %v4223_v31  ;;  %v4225_v51 = vsel %vm9544_vm15, %v4223_v31, %v4222_v15  ;;  %vm9550_vm9 = vmmov %vm9549_vm2 }
 0xde9   : > { %v4212_v63 = vadd.f32 %v4210_v8, %v4204_v62  ;;  %v4213_v43 = vadd.f32 %v4211_v7, %v4205_v58  ;;  %v4254_v52 = vrot.slane %v4250_v13, 3  ;;  %v4255_v1 = vrot.slane %v4251_v34, 3 }
 0xdea   : > { %v4238_v4 = vrot.slane %v4234_v29, 2  ;;  %v4239_v39 = vrot.slane %v4235_v38, 2  ;;  %v4281_v55 = vpop.xlane.xlu0 %4280  ;;  %v4265_v57 = vpop.xlane.xlu1 %4264  ;;  %vm9551_vm15 = vcmask 1042432  }
 0xdeb   : > { %v4228_v30 = vadd.f32 %v4224_v14, %v4212_v63  ;;  %v4229_v33 = vadd.f32 %v4225_v51, %v4213_v43  ;;  %v4282_v47 = vmul.f32 %v4281_v55, %v8091_v11  ;;  %v4283_v32 = vmul.f32 %v4281_v55, %v8093_v49 }
 0xdec   : > { %v4240_v6 = vsel %vm9545_vm1, %v4238_v4, %v4239_v39  ;;  %v4241_v37 = vsel %vm9546_vm3, %v4239_v39, %v4238_v4  ;;  %v4256_v25 = vsel %vm9547_vm5, %v4254_v52, %v4255_v1  ;;  %v4257_v50 = vsel %vm9548_vm8, %v4255_v1, %v4254_v52  ;;  %vm9552_vm1 = vmmov %vm9551_vm15 }
 0xded   : > { %v4244_v0 = vadd.f32 %v4240_v6, %v4228_v30  ;;  %v4245_v9 = vadd.f32 %v4241_v37, %v4229_v33  ;;  %v4266_v40 = vmul.f32 %v4265_v57, %v8091_v11  ;;  %v4267_v59 = vmul.f32 %v4265_v57, %v8093_v49  ;;  %v1153_v6 = vld [vmem:[%s9559_s0 + $0x8] sm:$0xff]  ;;  %v8577_v37 = vld [vmem:[%s9559_s0 + $0x10] sm:$0xff] }
 0xdee   : > { %v4313_v5 = vpop.xlane.xlu0 %4312  ;;  %v4297_v35 = vpop.xlane.xlu1 %4296  ;;  %v4286_v2 = vrot.slane %v4282_v47, 5  ;;  %v4287_v16 = vrot.slane %v4283_v32, 5  ;;  %vm9553_vm3 = vcmask 1041408   ;;  %vm9555_vm8 = vcmask 1040384   ;;  %v1152_v32 = vld [vmem:[%s9559_s0] sm:$0xff] }
 0xdef   : > { %v4260_v46 = vadd.f32 %v4256_v25, %v4244_v0  ;;  %v4261_v18 = vadd.f32 %v4257_v50, %v4245_v9  ;;  %v4270_v61 = vrot.slane %v4266_v40, 4  ;;  %v4271_v44 = vrot.slane %v4267_v59, 4  ;;  %vm9554_vm5 = vmmov %vm9553_vm3  ;;  %v8580_v0 = vld [vmem:[%s9559_s0 + $0x18] sm:$0xff]  ;;  %v8587_v50 = vld [vmem:[%s9562_s18] sm:$0xff] }
 0xdf0   : > { %v4314_v42 = vmul.f32 %v4313_v5, %v8091_v11  ;;  %v4315_v48 = vmul.f32 %v4313_v5, %v8093_v49  ;;  %v4298_v26 = vmul.f32 %v4297_v35, %v8091_v11  ;;  %v4299_v45 = vmul.f32 %v4297_v35, %v8093_v49  ;;  %v8592_v40 = vld [vmem:[%s9564_s26] ss:$0 sm:$0xff]  ;;  %s9569_s26 = sld [smem:[#allocation6_spill]] }
 0xdf1   : > { %v4272_v41 = vsel %vm9549_vm2, %v4270_v61, %v4271_v44  ;;  %v4273_v23 = vsel %vm9550_vm9, %v4271_v44, %v4270_v61  ;;  %v4288_v7 = vsel %vm9551_vm15, %v4286_v2, %v4287_v16  ;;  %v4289_v36 = vsel %vm9552_vm1, %v4287_v16, %v4286_v2  ;;  %vm9556_vm2 = vmmov %vm9555_vm8  ;;  %v6400_v16 = vld [vmem:[%s9566_s1] ss:$0 sm:$0xff]  ;;  %s9700_s1 = sld [smem:[#allocation13_spill]] }
 0xdf2   : > { %v4276_v53 = vadd.f32 %v4272_v41, %v4260_v46  ;;  %v4277_v3 = vadd.f32 %v4273_v23, %v4261_v18  ;;  %v4302_v20 = vrot.slane %v4298_v26, 6  ;;  %v4303_v8 = vrot.slane %v4299_v45, 6 }
 0xdf3   : > { %v4318_v54 = vrot.slane %v4314_v42, 7  ;;  %v4319_v62 = vrot.slane %v4315_v48, 7  ;;  %v3276_v43 = vsub.f32 %v8084_v21, %v8247_v19  ;;  %vm9557_vm9 = vcmask 261120  }
 0xdf4   : > { %v4292_v58 = vadd.f32 %v4288_v7, %v4276_v53  ;;  %v4293_v15 = vadd.f32 %v4289_v36, %v4277_v3  ;;  %v4304_v11 = vsel %vm9553_vm3, %v4302_v20, %v4303_v8  ;;  %v4305_v49 = vsel %vm9554_vm5, %v4303_v8, %v4302_v20  ;;  %vm9558_vm15 = vmmov %vm9557_vm9 }
 0xdf5   : > { %v4320_v34 = vsel %vm9555_vm8, %v4318_v54, %v4319_v62  ;;  %v4321_v29 = vsel %vm9556_vm2, %v4319_v62, %v4318_v54  ;;  %v3280_v14 = vsel %vm9557_vm9, %v3276_v43, 0.0  ;;  %v3275_v51 = vsub.f32 %v8086_v28, %v8249_v17  ;;  %vm9560_vm1 = vmmov %vm9557_vm9 }
 0xdf6   : > { %v4308_v31 = vadd.f32 %v4304_v11, %v4292_v58  ;;  %v4309_v13 = vadd.f32 %v4305_v49, %v4293_v15  ;;  %vm9561_vm3 = vmmov %vm9560_vm1  ;;  %v7114_v9 = vpack.i.bf16 %v1153_v6, %v1152_v32  ;;  %v7119_v25 = vpack.i.bf16 %v8580_v0, %v8577_v37  ;;  %v1084_v58 = vld [vmem:[%s9562_s18 + $0x8] sm:$0xff] }
 0xdf7   : > { %v3277_v52 = vsel %vm9558_vm15, %v3275_v51, 0.0  ;;  %vm9563_vm5 = vmmov %vm9560_vm1  ;;  %vm9567_vm2 = vcmask 130048   ;;  %v6979_v59 = vpack.c.bf16 %v1153_v6, %v1152_v32 }
 0xdf8   : > { %v4325_v38 = vadd.f32 %v4321_v29, %v4309_v13  ;;  %v4324_v63 = vadd.f32 %v4320_v34, %v4308_v31  ;;  %vm9565_vm8 = vmmov %vm9560_vm1  ;;  %6749 = vmatprep.mubr.msk.f32.mxu1 %vm9567_vm2, %v8587_v50  ;;  %v6396_v31 = vld [vmem:[%s9569_s26] ss:$0 sm:$0xff]  ;;  %s9736_s26 = sld [smem:[#allocation15_spill]] }
 0xdf9   : > { %6980 = vmatprep.subr.bf16.mxu0 %v6979_v59  ;;  %vm9570_vm9 = vmmov %vm9567_vm2 }
 0xdfa   : > { %4336 = vrot.lane.b32.xlu0 %v4325_v38, %s7200_s23  ;;  %4334 = vrot.lane.b32.xlu1 %v4324_v63, %s7200_s23  ;;  %vm9571_vm15 = vmmov %vm9560_vm1 }
 0xe19   : > { %3281 = vadd.xlane.f32.xlu0 %v3280_v14 }
 0xe1e   : > { %3278 = vadd.xlane.f32.xlu1 %v3277_v52 }
 0xe6c   : > { %v4337_v1 = vpop.permute.xlu0 %4336  ;;  %v4335_v4 = vpop.permute.xlu1 %4334 }
 0xe6d   : > { %6742 = vmatprep.mubr.msk.f32.mxu0 %vm9560_vm1, %v4335_v4 }
 0xe6e   : > { %6743 = vmatmul.mubr.msk.f32.vlgmr.msra.gmra.mrb[16].mxu0 %vm9561_vm3, %v4337_v1  ;;  %vm9572_vm3 = vmmov %vm9560_vm1 }
 0xe6f   : > { %6982 = vmatpush3.bf16.msra.mxu0 %v6979_v59 }
 0xea6   : > { %v3282_v21 = vpop.xlane.xlu0 %3281 }
 0xea7   : > { %v3285_v19 = vmul.f32 0.03125, %v3282_v21 }
 0xea9   : > { %v3287_v39 = vsub.f32 %v3276_v43, %v3285_v19 }
 0xeab   : > { %v3279_v55 = vpop.xlane.xlu1 %3278  ;;  %v3289_v57 = vmul.f32 %v3287_v39, %v3287_v39 }
 0xeac   : > { %v3284_v28 = vmul.f32 0.03125, %v3279_v55 }
 0xead   : > { %v3293_v17 = vsel %vm9563_vm5, %v3289_v57, 0.0  ;;  %vm9573_vm5 = vmmov %vm9560_vm1 }
 0xeae   : > { %v3286_v30 = vsub.f32 %v3275_v51, %v3284_v28  ;;  %3294 = vadd.xlane.f32.xlu0 %v3293_v17  ;;  %v6983_v28 = vpack.c.bf16 %v8580_v0, %v8577_v37 }
 0xeb0   : > { %v3288_v33 = vmul.f32 %v3286_v30, %v3286_v30  ;;  %6984 = vmatprep.subr.bf16.mxu0 %v6983_v28 }
 0xeb1   : > { %6986 = vmatpush3.bf16.msra.mxu0 %v6983_v28 }
 0xeb2   : > { %v3290_v47 = vsel %vm9565_vm8, %v3288_v33, 0.0  ;;  %vm9574_vm8 = vmmov %vm9567_vm2 }
 0xeb3   : > { %3291 = vadd.xlane.f32.xlu1 %v3290_v47  ;;  %vm9575_vm2 = vmmov %vm9560_vm1 }
 0xec4   : > { %7115 = vrot.lane.b32.xlu1 %v7114_v9, %s7201_s28  ;;  %7120 = vrot.lane.b32.xlu0 %v7119_v25, %s7201_s28 }
 0xec8   : > { %4605 = vrot.lane.b32.xlu1 %v8592_v40, %s7201_s28 }
 0xf3b   : > { %v3295_v5 = vpop.xlane.xlu0 %3294 }
 0xf3c   : > { %v3297_v35 = vmul.f32 0.03125, %v3295_v5 }
 0xf3e   : > { %v3299_v2 = vadd.f32 1e-05, %v3297_v35 }
 0xf3f   : > { %v7121_v23 = vpop.permute.xlu0 %7120 }
 0xf40   : > { %7136 = vrsqrt.f32 %v3299_v2  ;;  %v3292_v46 = vpop.xlane.xlu1 %3291  ;;  %v7123_v36 = vunpack.i.h.bf16 %v7121_v23  ;;  %v7122_v54 = vunpack.i.l.bf16 %v7121_v23 }
 0xf41   : > { %v3296_v18 = vmul.f32 0.03125, %v3292_v46  ;;  %v6744_v61 = vpop.f32.mrb[16].mxu0 }
 0xf42   : > { %v4414_v44 = vadd.f32 %v6744_v61, %v6400_v16  ;;  %v4408_v42 = vpop.f32.mrb[17].mxu0  ;;  %v6991_v11 = vpack.c.bf16 %v7123_v36, %v7122_v54 }
 0xf43   : > { %v3298_v48 = vadd.f32 1e-05, %v3296_v18  ;;  %v4409_v26 = vadd.f32 %v6400_v16, %v4408_v42 }
 0xf44   : > { %v4418_v45 = vadd.f32 %v8061_v56, %v4414_v44  ;;  %v7116_v41 = vpop.permute.xlu1 %7115  ;;  %v6395_v56 = vld [vmem:[%s9568_s10] ss:$0 sm:$0xff]  ;;  %s9731_s10 = sld [smem:[#allocation14_spill]] }
 0xf45   : > { %7138 = vrsqrt.f32 %v3298_v48  ;;  %v4417_v53 = vadd.f32 %v4409_v26, %v8063_v12  ;;  %v7118_v3 = vunpack.i.h.bf16 %v7116_v41  ;;  %v7117_v20 = vunpack.i.l.bf16 %v7116_v41 }
 0xf47   : > { %v6975_v8 = vpack.c.bf16 %v4418_v45, %v4417_v53  ;;  %v6987_v7 = vpack.c.bf16 %v7118_v3, %v7117_v20 }
 0xf48   : > { %v4606_v37 = vpop.permute.xlu1 %4605 }
 0xf49   : > { %6976 = vmatprep.subr.bf16.mxu1 %v6975_v8 }
 0xf4a   : > { %v7137_v62 = vpop.eup %7136  ;;  %6978 = vmatpush3.bf16.msra.mxu1 %v6975_v8 }
 0xf4b   : > { %v3303_v15 = vmul.f32 %v7137_v62, %v3287_v39  ;;  %6988 = vmatprep.subr.bf16.mxu1 %v6987_v7 }
 0xf4d   : > { %6750 = vmatmul.mubr.msk.f32.vlgmr.msra.gmra.mrb[6].mxu1 %vm9570_vm9, %v1084_v58  ;;  %v3311_v49 = vmul.f32 %v6395_v56, %v3303_v15  ;;  %vm9576_vm9 = vmmov %vm9560_vm1 }
 0xf4e   : > { %6990 = vmatpush3.bf16.msra.mxu1 %v6987_v7 }
 0xf4f   : > { %v7139_v12 = vpop.eup %7138  ;;  %6992 = vmatprep.subr.bf16.mxu1 %v6991_v11  ;;  %v3319_v29 = vadd.f32 %v6396_v31, %v3311_v49 }
 0xf50   : > { %v3302_v13 = vmul.f32 %v7139_v12, %v3286_v30 }
 0xf51   : > { %v3321_v43 = vsel %vm9560_vm1, %v3319_v29, 0.0  ;;  %vm9578_vm1 = vcmask 1042432  }
 0xf52   : > { %6994 = vmatpush3.bf16.msra.mxu1 %v6991_v11  ;;  %v3310_v34 = vmul.f32 %v6395_v56, %v3302_v13 }
 0xf54   : > { %v3318_v38 = vadd.f32 %v6396_v31, %v3310_v34 }
 0xf56   : > { %v3320_v63 = vsel %vm9571_vm15, %v3318_v38, 0.0  ;;  %vm9577_vm15 = vcmask 1040384  }
 0xf57   : > { %v3322_v14 = vadd.f32 %v3321_v43, %v3320_v63 }
 0xf59   : > { %v3323_v51 = vrot.slane %v3322_v14, 4 }
 0xf5b   : > { %v3324_v52 = vadd.f32 %v3323_v51, %v3322_v14 }
 0xf5d   : > { %v3325_v1 = vrot.slane %v3324_v52, 2 }
 0xf5f   : > { %v3326_v4 = vadd.f32 %v3325_v1, %v3324_v52 }
 0xf61   : > { %v3327_v21 = vrot.slane %v3326_v4, 1 }
 0xf63   : > { %v3328_v19 = vadd.f32 %v3327_v21, %v3326_v4 }
 0xf65   : > { %v3329_v39 = vmul.f32 0.0625, %v3328_v19 }
 0xf67   : > { %v3330_v55 = vsub.f32 %v3318_v38, %v3329_v39  ;;  %v3331_v57 = vsub.f32 %v3319_v29, %v3329_v39 }
 0xf69   : > { %6771 = vmatprep.mubr.msk.f32.mxu1 %vm9572_vm3, %v3330_v55  ;;  %vm9579_vm3 = vcmask 1041408  }
 0xf6a   : > { %6772 = vmatmul.mubr.msk.f32.vlgmr.msra.gmra.mrb[8].mxu1 %vm9573_vm5, %v3331_v57  ;;  %vm9580_vm5 = vmmov %vm9575_vm2 }
 0xf6b   : > { %6789 = vmatprep.mubr.msk.f32.mxu1 %vm9574_vm8, %v8587_v50  ;;  %vm9581_vm8 = vmmov %vm9575_vm2 }
0x1020   : > { %v8611_v17 = vpop.f32.mrb[6].mxu1 }
0x1021   : > { %v8613_v30 = vpop.f32.mrb[7].mxu1  ;;  %v8619_v47 = vsub.f32 %v4418_v45, %v8611_v17 }
0x1022   : > { %v8616_v33 = vsub.f32 %v4417_v53, %v8613_v30 }
0x1024   : > { %6760 = vmatprep.mubr.msk.f32.mxu0 %vm9575_vm2, %v8616_v33  ;;  %vm9582_vm2 = vcmask 1044480  }
0x1025   : > { %6761 = vmatmul.mubr.msk.f32.vlgmr.msra.gmra.mrb[18].mxu0 %vm9576_vm9, %v8619_v47  ;;  %vm9583_vm9 = vcmask 1043456  }
0x103d   : > { %v6773_v32 = vpop.f32.mrb[8].mxu1 }
0x103e   : > { %v4680_v6 = vpop.f32.mrb[9].mxu1  ;;  %v8625_v0 = vadd.f32 %v6773_v32, %v4606_v37 }
0x103f   : > { %v8627_v9 = vadd.f32 %v4680_v6, %v4606_v37 }
0x1040   : > { %v8633_v50 = vrot.slane %v8625_v0, 7  ;;  %v8639_v35 = vrot.slane %v8625_v0, 5  ;;  %v8645_v16 = vrot.slane %v8625_v0, 6  ;;  %v8660_v26 = vrot.slane %v8625_v0, 3 }
0x1041   : > { %v8630_v25 = vrot.slane %v8627_v9, 7  ;;  %v8636_v5 = vrot.slane %v8627_v9, 5  ;;  %v8642_v2 = vrot.slane %v8627_v9, 6  ;;  %v8657_v48 = vrot.slane %v8627_v9, 3 }
0x1042   : > { %v8669_v23 = vrot.slane %v8627_v9, 4  ;;  %v8672_v53 = vrot.slane %v8625_v0, 4  ;;  %v8679_v36 = vrot.slane %v8627_v9, 1  ;;  %v8682_v54 = vrot.slane %v8625_v0, 1 }
0x1043   : > { %v4715_v61 = vsel %vm9577_vm15, %v8630_v25, %v8633_v50  ;;  %v4799_v45 = vsel %vm9578_vm1, %v8636_v5, %v8639_v35  ;;  %v4757_v41 = vsel %vm9579_vm3, %v8642_v2, %v8645_v16  ;;  %v4883_v62 = vsel %vm9582_vm2, %v8657_v48, %v8660_v26  ;;  %vm9584_vm15 = vmmov %vm9580_vm5 }
0x1044   : > { %v4841_v58 = vsel %vm9583_vm9, %v8669_v23, %v8672_v53  ;;  %v8691_v15 = vrot.slane %v8627_v9, 2  ;;  %v8694_v11 = vrot.slane %v8625_v0, 2  ;;  %vm9585_vm1 = vmmov %vm9580_vm5  ;;  %vm9586_vm3 = vcmask 1046528  }
0x1045   : > { %v4967_v13 = vsel %vm9586_vm3, %v8679_v36, %v8682_v54  ;;  %vm9589_vm2 = vmmov %vm9585_vm1 }
0x1046   : > { %vm9590_vm9 = vmmov %vm9585_vm1 }
0x1047   : > { %vm9593_vm3 = vmmov %vm9589_vm2 }
0x10f8   : > { %v6762_v59 = vpop.f32.mrb[18].mxu0 }
0x10f9   : > { %v8648_v46 = vadd.f32 %v6762_v59, %v8592_v40  ;;  %v4580_v18 = vpop.f32.mrb[19].mxu0 }
0x10fa   : > { %v8711_v14 = vadd.f32 %v8592_v40, %v4580_v18 }
0x10fb   : > { %v4690_v44 = vmul.f32 %v8625_v0, %v8648_v46  ;;  %v4720_v42 = vmul.f32 %v4715_v61, %v8648_v46  ;;  %v4804_v8 = vmul.f32 %v4799_v45, %v8648_v46  ;;  %v4762_v7 = vmul.f32 %v4757_v41, %v8648_v46 }
0x10fc   : > { %v4888_v12 = vmul.f32 %v4883_v62, %v8648_v46  ;;  %v4846_v31 = vmul.f32 %v4841_v58, %v8648_v46  ;;  %v4972_v63 = vmul.f32 %v4967_v13, %v8648_v46  ;;  %v5029_v1 = vmul.f32 %v8630_v25, %v8648_v46 }
0x10fd   : > { %v4694_v3 = vsel %vm9580_vm5, %v4690_v44, 0.0  ;;  %v4725_v20 = vsel %vm9581_vm8, %v4720_v42, 0.0  ;;  %v4809_v56 = vsel %vm9584_vm15, %v4804_v8, 0.0  ;;  %v4767_v49 = vsel %vm9585_vm1, %v4762_v7, 0.0  ;;  %vm9588_vm8 = vmmov %vm9585_vm1 }
0x10fe   : > { %4695 = vadd.xlane.f32.xlu1 %v4694_v3  ;;  %4726 = vadd.xlane.f32.xlu0 %v4725_v20  ;;  %vm9587_vm5 = vcmask 1045504   ;;  %v4893_v29 = vsel %vm9588_vm8, %v4888_v12, 0.0  ;;  %v4851_v38 = vsel %vm9589_vm2, %v4846_v31, 0.0  ;;  %v4977_v51 = vsel %vm9590_vm9, %v4972_v63, 0.0  ;;  %vm9591_vm15 = vmmov %vm9585_vm1 }
0x10ff   : > { %v4925_v34 = vsel %vm9587_vm5, %v8691_v15, %v8694_v11  ;;  %v5007_v4 = vmul.f32 %v8627_v9, %v8648_v46  ;;  %v8720_v21 = vmul.f32 %v4757_v41, %v8711_v14  ;;  %v8723_v19 = vmul.f32 %v4715_v61, %v8711_v14 }
0x1100   : > { %v4930_v43 = vmul.f32 %v4925_v34, %v8648_v46  ;;  %vm9592_vm1 = vcmask 261121   ;;  %v5031_v55 = vmul.f32 %v8633_v50, %v8648_v46  ;;  %v5065_v57 = vmul.f32 %v8642_v2, %v8648_v46 }
0x1101   : > { %v5032_v40 = vsel %vm9592_vm1, %v5029_v1, 0.0  ;;  %v5009_v39 = vsel %vm9593_vm3, %v5007_v4, 0.0  ;;  %v8732_v28 = vmul.f32 %v4841_v58, %v8711_v14  ;;  %v8735_v32 = vmul.f32 %v4799_v45, %v8711_v14 }
0x1102   : > { %4810 = vadd.xlane.f32.xlu1 %v4809_v56  ;;  %4768 = vadd.xlane.f32.xlu0 %v4767_v49  ;;  %v4935_v52 = vsel %vm9591_vm15, %v4930_v43, 0.0  ;;  %v8738_v6 = vmul.f32 %v4925_v34, %v8711_v14  ;;  %v8741_v37 = vmul.f32 %v4883_v62, %v8711_v14  ;;  %v8744_v59 = vmul.f32 %v4967_v13, %v8711_v14 }
0x1103   : > { %vm9594_vm5 = vcmask 253952   ;;  %vm9595_vm8 = vcmask 261122   ;;  %v5101_v44 = vmul.f32 %v8636_v5, %v8648_v46  ;;  %v5067_v42 = vmul.f32 %v8645_v16, %v8648_v46 }
0x1104   : > { %v5038_v18 = vsel %vm9594_vm5, %v5031_v55, 0.0  ;;  %v5068_v61 = vsel %vm9595_vm8, %v5065_v57, 0.0  ;;  %vm9596_vm2 = vcmask 261123   ;;  %vm9597_vm9 = vcmask 254976  }
0x1105   : > { %v5104_v45 = vsel %vm9596_vm2, %v5101_v44, 0.0  ;;  %v5074_v41 = vsel %vm9597_vm9, %v5067_v42, 0.0  ;;  %v5103_v3 = vmul.f32 %v8639_v35, %v8648_v46  ;;  %v5137_v20 = vmul.f32 %v8669_v23, %v8648_v46 }
0x1106   : > { %4894 = vadd.xlane.f32.xlu1 %v4893_v29  ;;  %4852 = vadd.xlane.f32.xlu0 %v4851_v38  ;;  %vm9598_vm15 = vcmask 256000   ;;  %vm9599_vm1 = vcmask 261124   ;;  %v5173_v62 = vmul.f32 %v8657_v48, %v8648_v46  ;;  %v5139_v58 = vmul.f32 %v8672_v53, %v8648_v46 }
0x1107   : > { %v5110_v8 = vsel %vm9598_vm15, %v5103_v3, 0.0  ;;  %v5140_v7 = vsel %vm9599_vm1, %v5137_v20, 0.0  ;;  %vm9600_vm3 = vcmask 261125   ;;  %vm9601_vm5 = vcmask 257024  }
0x1108   : > { %v5176_v56 = vsel %vm9600_vm3, %v5173_v62, 0.0  ;;  %v5146_v49 = vsel %vm9601_vm5, %v5139_v58, 0.0  ;;  %v5175_v12 = vmul.f32 %v8660_v26, %v8648_v46  ;;  %v5209_v31 = vmul.f32 %v8691_v15, %v8648_v46 }
0x1109   : > { %vm9602_vm8 = vcmask 258048   ;;  %vm9603_vm2 = vcmask 261126   ;;  %v5245_v29 = vmul.f32 %v8679_v36, %v8648_v46  ;;  %v5211_v38 = vmul.f32 %v8694_v11, %v8648_v46 }
0x110a   : > { %4978 = vadd.xlane.f32.xlu1 %v4977_v51  ;;  %4936 = vadd.xlane.f32.xlu0 %v4935_v52  ;;  %v5182_v13 = vsel %vm9602_vm8, %v5175_v12, 0.0  ;;  %v5212_v34 = vsel %vm9603_vm2, %v5209_v31, 0.0  ;;  %vm9604_vm9 = vcmask 261127   ;;  %vm9605_vm15 = vcmask 259072  }
0x110b   : > { %v5248_v63 = vsel %vm9604_vm9, %v5245_v29, 0.0  ;;  %v5218_v43 = vsel %vm9605_vm15, %v5211_v38, 0.0  ;;  %v4719_v51 = vmul.f32 %v8630_v25, %v8711_v14  ;;  %v4721_v52 = vmul.f32 %v8633_v50, %v8711_v14 }
0x110c   : > { %vm9606_vm1 = vcmask 261121   ;;  %vm9607_vm3 = vcmask 253952   ;;  %vm9608_vm5 = vcmask 261122   ;;  %vm9609_vm8 = vcmask 261120  }
0x110d   : > { %v4722_v1 = vsel %vm9606_vm1, %v4719_v51, 0.0  ;;  %v4728_v4 = vsel %vm9607_vm3, %v4721_v52, 0.0  ;;  %v4763_v50 = vmul.f32 %v8645_v16, %v8711_v14  ;;  %v4803_v57 = vmul.f32 %v8636_v5, %v8711_v14 }
0x110e   : > { %5033 = vadd.xlane.f32.xlu1 %v5032_v40  ;;  %5010 = vadd.xlane.f32.xlu0 %v5009_v39  ;;  %v4761_v40 = vmul.f32 %v8642_v2, %v8711_v14  ;;  %v4689_v39 = vmul.f32 %v8627_v9, %v8711_v14  ;;  %vm9610_vm2 = vcmask 254976   ;;  %vm9611_vm9 = vcmask 261123  }
0x110f   : > { %v4806_v2 = vsel %vm9611_vm9, %v4803_v57, 0.0  ;;  %v4805_v44 = vmul.f32 %v8639_v35, %v8711_v14  ;;  %vm9612_vm15 = vcmask 261124   ;;  %vm9613_vm1 = vcmask 256000  }
0x1110   : > { %v4764_v55 = vsel %vm9608_vm5, %v4761_v40, 0.0  ;;  %v4691_v25 = vsel %vm9609_vm8, %v4689_v39, 0.0  ;;  %v4847_v5 = vmul.f32 %v8672_v53, %v8711_v14  ;;  %vm9614_vm3 = vcmask 257024  }
0x1111   : > { %v4812_v16 = vsel %vm9613_vm1, %v4805_v44, 0.0  ;;  %vm9615_vm5 = vcmask 261125   ;;  %v4929_v35 = vmul.f32 %v8691_v15, %v8711_v14  ;;  %v4889_v3 = vmul.f32 %v8660_v26, %v8711_v14 }
0x1112   : > { %5039 = vadd.xlane.f32.xlu1 %v5038_v18  ;;  %5069 = vadd.xlane.f32.xlu0 %v5068_v61  ;;  %v4770_v18 = vsel %vm9610_vm2, %v4763_v50, 0.0  ;;  %v4845_v61 = vmul.f32 %v8669_v23, %v8711_v14  ;;  %vm9616_vm8 = vcmask 261126   ;;  %vm9617_vm2 = vcmask 258048  }
0x1113   : > { %v4932_v20 = vsel %vm9616_vm8, %v4929_v35, 0.0  ;;  %v4896_v53 = vsel %vm9617_vm2, %v4889_v3, 0.0  ;;  %vm9618_vm9 = vcmask 259072   ;;  %v5008_v26 = vmul.f32 %v8625_v0, %v8711_v14 }
0x1114   : > { %v4848_v42 = vsel %vm9612_vm15, %v4845_v61, 0.0  ;;  %vm9619_vm15 = vcmask 261127   ;;  %v4973_v62 = vmul.f32 %v8682_v54, %v8711_v14  ;;  %vm9620_vm1 = vcmask 261120  }
0x1115   : > { %v5012_v58 = vsel %vm9620_vm1, %v5008_v26, 0.0  ;;  %vm9623_vm8 = vmmov %vm9620_vm1  ;;  %v5179_v31 = vsel %vm9620_vm1, %v8741_v37, 0.0 }
0x1116   : > { %5105 = vadd.xlane.f32.xlu1 %v5104_v45  ;;  %5075 = vadd.xlane.f32.xlu0 %v5074_v41  ;;  %v4887_v45 = vmul.f32 %v8657_v48, %v8711_v14  ;;  %v4854_v41 = vsel %vm9614_vm3, %v4847_v5, 0.0  ;;  %v4931_v48 = vmul.f32 %v8694_v11, %v8711_v14  ;;  %vm9621_vm3 = vcmask 260096   ;;  %vm9624_vm2 = vmmov %vm9620_vm1 }
0x1117   : > { %v4980_v11 = vsel %vm9621_vm3, %v4973_v62, 0.0 }
0x1118   : > { %v4890_v23 = vsel %vm9615_vm5, %v4887_v45, 0.0  ;;  %vm9622_vm5 = vmmov %vm9620_vm1 }
0x111a   : > { %5111 = vadd.xlane.f32.xlu1 %v5110_v8  ;;  %5141 = vadd.xlane.f32.xlu0 %v5140_v7  ;;  %v4971_v8 = vmul.f32 %v8679_v36, %v8711_v14  ;;  %v4938_v7 = vsel %vm9618_vm9, %v4931_v48, 0.0  ;;  %v5071_v36 = vsel %vm9622_vm5, %v8720_v21, 0.0  ;;  %vm9625_vm9 = vmmov %vm9620_vm1  ;;  %v5247_v21 = vmul.f32 %v8682_v54, %v8648_v46 }
0x111b   : > { %v5107_v14 = vsel %vm9625_vm9, %v8735_v32, 0.0  ;;  %vm9627_vm5 = vmmov %vm9620_vm1  ;;  %vm9630_vm9 = vcmask 1045504  }
0x111c   : > { %v4974_v15 = vsel %vm9619_vm15, %v4971_v8, 0.0  ;;  %vm9626_vm15 = vmmov %vm9620_vm1  ;;  %vm9632_vm1 = vcmask 1044480  }
0x111d   : > { %v5215_v12 = vsel %vm9626_vm15, %v8738_v6, 0.0  ;;  %vm9631_vm15 = vmmov %vm9630_vm9 }
0x111e   : > { %5177 = vadd.xlane.f32.xlu1 %v5176_v56  ;;  %5147 = vadd.xlane.f32.xlu0 %v5146_v49  ;;  %v5035_v56 = vsel %vm9623_vm8, %v8723_v19, 0.0  ;;  %v5143_v49 = vsel %vm9624_vm2, %v8732_v28, 0.0  ;;  %v5254_v19 = vsel %vm9621_vm3, %v5247_v21, 0.0  ;;  %v5251_v28 = vsel %vm9627_vm5, %v8744_v59, 0.0  ;;  %vm9633_vm3 = vmmov %vm9632_vm1 }
0x111f   : > { %vm9628_vm8 = vcmask 1046528   ;;  %vm9634_vm5 = vcmask 1043456  }
0x1120   : > { %vm9629_vm2 = vmmov %vm9628_vm8 }
0x1122   : > { %5183 = vadd.xlane.f32.xlu1 %v5182_v13  ;;  %5213 = vadd.xlane.f32.xlu0 %v5212_v34 }
0x1126   : > { %5249 = vadd.xlane.f32.xlu1 %v5248_v63  ;;  %5219 = vadd.xlane.f32.xlu0 %v5218_v43 }
0x112a   : > { %4723 = vadd.xlane.f32.xlu1 %v4722_v1  ;;  %4729 = vadd.xlane.f32.xlu0 %v4728_v4 }
0x112e   : > { %4765 = vadd.xlane.f32.xlu1 %v4764_v55  ;;  %4692 = vadd.xlane.f32.xlu0 %v4691_v25 }
0x1132   : > { %4771 = vadd.xlane.f32.xlu1 %v4770_v18  ;;  %4807 = vadd.xlane.f32.xlu0 %v4806_v2 }
0x1136   : > { %4849 = vadd.xlane.f32.xlu1 %v4848_v42  ;;  %4813 = vadd.xlane.f32.xlu0 %v4812_v16 }
0x113a   : > { %4855 = vadd.xlane.f32.xlu1 %v4854_v41  ;;  %4891 = vadd.xlane.f32.xlu0 %v4890_v23 }
0x113e   : > { %4933 = vadd.xlane.f32.xlu1 %v4932_v20  ;;  %4897 = vadd.xlane.f32.xlu0 %v4896_v53 }
0x1142   : > { %4939 = vadd.xlane.f32.xlu1 %v4938_v7  ;;  %4975 = vadd.xlane.f32.xlu0 %v4974_v15 }
0x1146   : > { %5013 = vadd.xlane.f32.xlu1 %v5012_v58  ;;  %4981 = vadd.xlane.f32.xlu0 %v4980_v11 }
0x114a   : > { %5072 = vadd.xlane.f32.xlu1 %v5071_v36  ;;  %5036 = vadd.xlane.f32.xlu0 %v5035_v56 }
0x114e   : > { %5144 = vadd.xlane.f32.xlu1 %v5143_v49  ;;  %5108 = vadd.xlane.f32.xlu0 %v5107_v14 }
0x1152   : > { %5216 = vadd.xlane.f32.xlu1 %v5215_v12  ;;  %5180 = vadd.xlane.f32.xlu0 %v5179_v31 }
0x1156   : > { %5255 = vadd.xlane.f32.xlu1 %v5254_v19  ;;  %5252 = vadd.xlane.f32.xlu0 %v5251_v28 }
0x118b   : > { %v4696_v32 = vpop.xlane.xlu1 %4695  ;;  %v4727_v13 = vpop.xlane.xlu0 %4726 }
0x118c   : > { %v4735_v61 = vrot.slane %v4727_v13, 1 }
0x118f   : > { %v4811_v34 = vpop.xlane.xlu1 %4810  ;;  %v4769_v29 = vpop.xlane.xlu0 %4768 }
0x1190   : > { %v4777_v15 = vrot.slane %v4769_v29, 2  ;;  %v4819_v19 = vrot.slane %v4811_v34, 3 }
0x1193   : > { %v8843_v6 = vpop.xlane.xlu1 %4894  ;;  %v8845_v38 = vpop.xlane.xlu0 %4852 }
0x1197   : > { %v8847_v37 = vpop.xlane.xlu1 %4978  ;;  %v8849_v46 = vpop.xlane.xlu0 %4936 }
0x119b   : > { %v8851_v54 = vpop.xlane.xlu1 %5033  ;;  %v8853_v63 = vpop.xlane.xlu0 %5010 }
0x119f   : > { %v8855_v43 = vpop.xlane.xlu1 %5039  ;;  %v8857_v59 = vpop.xlane.xlu0 %5069 }
0x11a3   : > { %v8859_v51 = vpop.xlane.xlu1 %5105  ;;  %v8861_v52 = vpop.xlane.xlu0 %5075 }
0x11a7   : > { %v8863_v1 = vpop.xlane.xlu1 %5111  ;;  %v8865_v4 = vpop.xlane.xlu0 %5141 }
0x11ab   : > { %v8867_v40 = vpop.xlane.xlu1 %5177  ;;  %v8869_v39 = vpop.xlane.xlu0 %5147 }
0x11af   : > { %v8871_v55 = vpop.xlane.xlu1 %5183  ;;  %v8873_v25 = vpop.xlane.xlu0 %5213 }
0x11b3   : > { %v8875_v50 = vpop.xlane.xlu1 %5249  ;;  %v8877_v57 = vpop.xlane.xlu0 %5219 }
0x11b7   : > { %v4724_v18 = vpop.xlane.xlu1 %4723  ;;  %v4730_v2 = vpop.xlane.xlu0 %4729 }
0x11b8   : > { %v4734_v44 = vrot.slane %v4724_v18, 1  ;;  %v4737_v42 = vrot.slane %v4730_v2, 1 }
0x11ba   : > { %v4736_v16 = vsel %vm9628_vm8, %v4734_v44, %v4735_v61  ;;  %v4738_v5 = vsel %vm9629_vm2, %v4735_v61, %v4737_v42  ;;  %vm9635_vm8 = vmmov %vm9634_vm5  ;;  %vm9636_vm2 = vcmask 1042432  }
0x11bb   : > { %v4741_v45 = vadd.f32 %v4738_v5, %v4736_v16  ;;  %v4766_v41 = vpop.xlane.xlu1 %4765  ;;  %v4693_v23 = vpop.xlane.xlu0 %4692 }
0x11bc   : > { %v4697_v35 = vadd.f32 %v4696_v32, %v4693_v23  ;;  %v4776_v20 = vrot.slane %v4766_v41, 2  ;;  %v4861_v41 = vrot.slane %v8845_v38, 4 }
0x11bd   : > { %v4742_v3 = vrot.slane %v4741_v45, 4 }
0x11be   : > { %v4698_v53 = vrot.slane %v4697_v35, 4  ;;  %v4778_v11 = vsel %vm9630_vm9, %v4776_v20, %v4777_v15  ;;  %vm9637_vm9 = vmmov %vm9636_vm2 }
0x11bf   : > { %v4743_v48 = vadd.f32 %v4742_v3, %v4741_v45  ;;  %v4772_v8 = vpop.xlane.xlu1 %4771  ;;  %v4808_v7 = vpop.xlane.xlu0 %4807 }
0x11c0   : > { %v4699_v26 = vadd.f32 %v4698_v53, %v4697_v35  ;;  %v4779_v62 = vrot.slane %v4772_v8, 2  ;;  %v4818_v49 = vrot.slane %v4808_v7, 3 }
0x11c1   : > { %v4744_v58 = vrot.slane %v4743_v48, 2 }
0x11c2   : > { %v4700_v36 = vrot.slane %v4699_v26, 2  ;;  %v4780_v56 = vsel %vm9631_vm15, %v4777_v15, %v4779_v62  ;;  %v4820_v29 = vsel %vm9632_vm1, %v4818_v49, %v4819_v19  ;;  %vm9638_vm15 = vcmask 1041408  }
0x11c3   : > { %v4745_v14 = vadd.f32 %v4744_v58, %v4743_v48  ;;  %v4783_v12 = vadd.f32 %v4780_v56, %v4778_v11  ;;  %v4850_v31 = vpop.xlane.xlu1 %4849  ;;  %v4814_v21 = vpop.xlane.xlu0 %4813  ;;  %v4903_v11 = vrot.slane %v8843_v6, 5  ;;  %vm9639_vm1 = vmmov %vm9638_vm15 }
0x11c4   : > { %v4701_v28 = vadd.f32 %v4700_v36, %v4699_v26  ;;  %v4821_v32 = vrot.slane %v4814_v21, 3  ;;  %v4860_v42 = vrot.slane %v4850_v31, 4  ;;  %v4945_v31 = vrot.slane %v8849_v46, 6 }
0x11c5   : > { %v4784_v13 = vrot.slane %v4783_v12, 4  ;;  %v4746_v18 = vrot.slane %v4745_v14, 1 }
0x11c6   : > { %v4702_v2 = vrot.slane %v4701_v28, 1  ;;  %v4822_v61 = vsel %vm9633_vm3, %v4819_v19, %v4821_v32  ;;  %v4862_v8 = vsel %vm9635_vm8, %v4860_v42, %v4861_v41  ;;  %vm9640_vm3 = vcmask 1040384  }
0x11c7   : > { %v4785_v44 = vadd.f32 %v4784_v13, %v4783_v12  ;;  %v4825_v16 = vadd.f32 %v4822_v61, %v4820_v29  ;;  %v4856_v5 = vpop.xlane.xlu1 %4855  ;;  %v4892_v45 = vpop.xlane.xlu0 %4891  ;;  %v4747_v34 = vadd.f32 %v4746_v18, %v4745_v14  ;;  %vm9642_vm8 = vmmov %vm9640_vm3 }
0x11c8   : > { %v4863_v23 = vrot.slane %v4856_v5, 4  ;;  %v4703_v20 = vadd.f32 %v4702_v2, %v4701_v28  ;;  %v4902_v58 = vrot.slane %v4892_v45, 5 }
0x11c9   : > { %v4786_v35 = vrot.slane %v4785_v44, 2  ;;  %v4826_v3 = vrot.slane %v4825_v16, 4  ;;  %v8889_v38 = vmul.f32 0.03125, %v4747_v34 }
0x11ca   : > { %v4864_v53 = vsel %vm9634_vm5, %v4861_v41, %v4863_v23  ;;  %v8891_v49 = vmul.f32 0.03125, %v4703_v20  ;;  %v4904_v2 = vsel %vm9636_vm2, %v4902_v58, %v4903_v11  ;;  %vm9641_vm5 = vcmp.eq.s32.totalorder %v7668_v24, 3 }
0x11cb   : > { %v4787_v48 = vadd.f32 %v4786_v35, %v4785_v44  ;;  %v4827_v7 = vadd.f32 %v4826_v3, %v4825_v16  ;;  %v4934_v15 = vpop.xlane.xlu1 %4933  ;;  %v4898_v26 = vpop.xlane.xlu0 %4897  ;;  %v4867_v62 = vadd.f32 %v4864_v53, %v4862_v8  ;;  %v4749_v16 = vsel %vm1953_vm0, %v8889_v38, 0.0 }
0x11cc   : > { %v4905_v12 = vrot.slane %v4898_v26, 5  ;;  %v4944_v28 = vrot.slane %v4934_v15, 6  ;;  %v4705_v46 = vsel %vm1900_vm7, %v8891_v49, 0.0  ;;  %v4987_v53 = vrot.slane %v8847_v37, 7 }
0x11cd   : > { %v4788_v36 = vrot.slane %v4787_v48, 1  ;;  %v4828_v56 = vrot.slane %v4827_v7, 2  ;;  %v4868_v14 = vrot.slane %v4867_v62, 4  ;;  %vm9643_vm2 = vcmask 1045504  }
0x11ce   : > { %v4906_v6 = vsel %vm9637_vm9, %v4903_v11, %v4905_v12  ;;  %v4946_v23 = vsel %vm9639_vm1, %v4944_v28, %v4945_v31  ;;  %v5080_v11 = vrot.slane %v8857_v59, 2  ;;  %v5083_v12 = vrot.slane %v8861_v52, 2  ;;  %vm9644_vm9 = vmmov %vm9643_vm2 }
0x11cf   : > { %v4789_v21 = vadd.f32 %v4788_v36, %v4787_v48  ;;  %v4829_v19 = vadd.f32 %v4828_v56, %v4827_v7  ;;  %v4940_v32 = vpop.xlane.xlu1 %4939  ;;  %v4976_v13 = vpop.xlane.xlu0 %4975  ;;  %v4869_v18 = vadd.f32 %v4868_v14, %v4867_v62  ;;  %v4909_v42 = vadd.f32 %v4906_v6, %v4904_v2 }
0x11d0   : > { %v4947_v29 = vrot.slane %v4940_v32, 6  ;;  %v4986_v3 = vrot.slane %v4976_v13, 7  ;;  %v4750_v36 = vadd.f32 %v4749_v16, %v4705_v46  ;;  %vm9646_vm1 = vcmp.eq.s32.totalorder %v7668_v24, 4 }
0x11d1   : > { %v8896_v61 = vmul.f32 0.03125, %v4789_v21  ;;  %v4830_v44 = vrot.slane %v4829_v19, 1  ;;  %v4870_v5 = vrot.slane %v4869_v18, 2  ;;  %v4910_v35 = vrot.slane %v4909_v42, 4 }
0x11d2   : > { %v4948_v45 = vsel %vm9638_vm15, %v4945_v31, %v4947_v29  ;;  %v4988_v31 = vsel %vm9640_vm3, %v4986_v3, %v4987_v53  ;;  %vm9645_vm15 = vcmask 1046528  }
0x11d3   : > { %v4831_v41 = vadd.f32 %v4830_v44, %v4829_v19  ;;  %v5014_v34 = vpop.xlane.xlu1 %5013  ;;  %v4982_v20 = vpop.xlane.xlu0 %4981  ;;  %v4791_v48 = vsel %vm2007_vm13, %v8896_v61, 0.0  ;;  %v4871_v8 = vadd.f32 %v4870_v5, %v4869_v18  ;;  %v4951_v7 = vadd.f32 %v4948_v45, %v4946_v23  ;;  %vm9647_vm3 = vmmov %vm9645_vm15 }
0x11d4   : > { %v4911_v26 = vadd.f32 %v4910_v35, %v4909_v42  ;;  %v5015_v62 = vadd.f32 %v5014_v34, %v8853_v63  ;;  %v4989_v58 = vrot.slane %v4982_v20, 7  ;;  %v4792_v32 = vadd.f32 %v4791_v48, %v4750_v36 }
0x11d5   : > { %v8910_v15 = vmul.f32 0.03125, %v4831_v41  ;;  %v4872_v56 = vrot.slane %v4871_v8, 1  ;;  %v4952_v14 = vrot.slane %v4951_v7, 4  ;;  %v5044_v23 = vrot.slane %v8851_v54, 1 }
0x11d6   : > { %v4912_v37 = vrot.slane %v4911_v26, 2  ;;  %v5016_v21 = vrot.slane %v5015_v62, 4  ;;  %v4990_v6 = vsel %vm9642_vm8, %v4987_v53, %v4989_v58  ;;  %v5047_v35 = vrot.slane %v8855_v43, 1 }
0x11d7   : > { %v5073_v19 = vpop.xlane.xlu1 %5072  ;;  %v5037_v28 = vpop.xlane.xlu0 %5036  ;;  %v4833_v13 = vsel %vm9641_vm5, %v8910_v15, 0.0  ;;  %v4873_v63 = vadd.f32 %v4872_v56, %v4871_v8  ;;  %v4953_v18 = vadd.f32 %v4952_v14, %v4951_v7  ;;  %v4993_v42 = vadd.f32 %v4990_v6, %v4988_v31 }
0x11d8   : > { %v4913_v2 = vadd.f32 %v4912_v37, %v4911_v26  ;;  %v5017_v59 = vadd.f32 %v5016_v21, %v5015_v62  ;;  %v5081_v29 = vrot.slane %v5073_v19, 2  ;;  %v5045_v16 = vrot.slane %v5037_v28, 1 }
0x11d9   : > { %v8920_v44 = vmul.f32 0.03125, %v4873_v63  ;;  %v4954_v52 = vrot.slane %v4953_v18, 2  ;;  %v4994_v34 = vrot.slane %v4993_v42, 4  ;;  %v5152_v53 = vrot.slane %v8865_v4, 4 }
0x11da   : > { %v4914_v46 = vrot.slane %v4913_v2, 1  ;;  %v5018_v5 = vrot.slane %v5017_v59, 2  ;;  %v5082_v45 = vsel %vm9643_vm2, %v5080_v11, %v5081_v29  ;;  %v5084_v41 = vsel %vm9644_vm9, %v5081_v29, %v5083_v12 }
0x11db   : > { %v4955_v3 = vadd.f32 %v4954_v52, %v4953_v18  ;;  %v5145_v20 = vpop.xlane.xlu1 %5144  ;;  %v4834_v48 = vadd.f32 %v4833_v13, %v4792_v32  ;;  %v4995_v62 = vadd.f32 %v4994_v34, %v4993_v42  ;;  %v5087_v58 = vadd.f32 %v5084_v41, %v5082_v45  ;;  %v5109_v11 = vpop.xlane.xlu0 %5108 }
0x11dc   : > { %v4915_v8 = vadd.f32 %v4914_v46, %v4913_v2  ;;  %v5019_v7 = vadd.f32 %v5018_v5, %v5017_v59  ;;  %v5046_v36 = vsel %vm9645_vm15, %v5044_v23, %v5045_v16  ;;  %v4875_v54 = vsel %vm9646_vm1, %v8920_v44, 0.0 }
0x11dd   : > { %v4956_v26 = vrot.slane %v4955_v3, 1  ;;  %v5048_v43 = vsel %vm9647_vm3, %v5045_v16, %v5047_v35  ;;  %v5153_v14 = vrot.slane %v5145_v20, 4  ;;  %v4996_v4 = vrot.slane %v4995_v62, 2 }
0x11de   : > { %v8931_v56 = vmul.f32 0.03125, %v4915_v8  ;;  %v5088_v37 = vrot.slane %v5087_v58, 4  ;;  %v5051_v31 = vadd.f32 %v5048_v43, %v5046_v36  ;;  %v5116_v21 = vrot.slane %v8859_v51, 3 }
0x11df   : > { %v4957_v12 = vadd.f32 %v4956_v26, %v4955_v3  ;;  %v5155_v19 = vrot.slane %v8869_v39, 4  ;;  %v5020_v28 = vrot.slane %v5019_v7, 1  ;;  %vm9648_vm5 = vcmask 1043456   ;;  %v5217_v46 = vpop.xlane.xlu1 %5216 }
0x11e0   : > { %v5154_v32 = vsel %vm9648_vm5, %v5152_v53, %v5153_v14  ;;  %v5119_v13 = vrot.slane %v8863_v1, 3  ;;  %v4876_v63 = vadd.f32 %v4875_v54, %v4834_v48  ;;  %v4917_v18 = vsel %vm2168_vm6, %v8931_v56, 0.0  ;;  %vm9649_vm8 = vmmov %vm9648_vm5  ;;  %v5181_v1 = vpop.xlane.xlu0 %5180 }
0x11e1   : > { %v4997_v2 = vadd.f32 %v4996_v4, %v4995_v62  ;;  %v8941_v59 = vmul.f32 0.03125, %v4957_v12  ;;  %v5089_v6 = vadd.f32 %v5088_v37, %v5087_v58  ;;  %v5052_v29 = vrot.slane %v5051_v31, 4 }
0x11e2   : > { %v5156_v52 = vsel %vm9649_vm8, %v5153_v14, %v5155_v19  ;;  %v5188_v51 = vrot.slane %v8867_v40, 5  ;;  %v5191_v39 = vrot.slane %v8871_v55, 5  ;;  %v5224_v5 = vrot.slane %v8873_v25, 6 }
0x11e3   : > { %v4998_v42 = vrot.slane %v4997_v2, 1  ;;  %v5159_v16 = vadd.f32 %v5156_v52, %v5154_v32  ;;  %v5227_v45 = vrot.slane %v8877_v57, 6  ;;  %v4918_v41 = vadd.f32 %v4917_v18, %v4876_v63  ;;  %v5256_v19 = vpop.xlane.xlu1 %5255 }
0x11e4   : > { %v5021_v23 = vadd.f32 %v5020_v28, %v5019_v7  ;;  %v5090_v3 = vrot.slane %v5089_v6, 2  ;;  %v5053_v34 = vadd.f32 %v5052_v29, %v5051_v31  ;;  %vm9650_vm2 = vcmp.eq.s32.totalorder %v7668_v24, 6  ;;  %v5253_v28 = vpop.xlane.xlu0 %5252 }
0x11e5   : > { %v4999_v35 = vadd.f32 %v4998_v42, %v4997_v2  ;;  %v5160_v20 = vrot.slane %v5159_v16, 4  ;;  %v4959_v40 = vsel %vm9650_vm2, %v8941_v59, 0.0  ;;  %v5117_v53 = vrot.slane %v5109_v11, 3 }
0x11e6   : > { %v5225_v55 = vrot.slane %v5217_v46, 6  ;;  %v5189_v48 = vrot.slane %v5181_v1, 5  ;;  %v5091_v26 = vadd.f32 %v5090_v3, %v5089_v6  ;;  %v5054_v62 = vrot.slane %v5053_v34, 2 }
0x11e7   : > { %v8951_v8 = vmul.f32 0.03125, %v4999_v35  ;;  %v5161_v25 = vadd.f32 %v5160_v20, %v5159_v16  ;;  %vm9651_vm9 = vcmask 1044480   ;;  %vm9653_vm1 = vcmask 1041408  }
0x11e8   : > { %v5118_v57 = vsel %vm9651_vm9, %v5116_v21, %v5117_v53  ;;  %vm9652_vm15 = vmmov %vm9651_vm9  ;;  %v5226_v58 = vsel %vm9653_vm1, %v5224_v5, %v5225_v55  ;;  %v4960_v54 = vadd.f32 %v4959_v40, %v4918_v41  ;;  %v5022_v43 = vmul.f32 0.03125, %v5021_v23 }
0x11e9   : > { %v5120_v7 = vsel %vm9652_vm15, %v5117_v53, %v5119_v13  ;;  %vm9654_vm3 = vmmov %vm9653_vm1  ;;  %vm9655_vm5 = vcmp.eq.s32.totalorder %v7668_v24, 7  ;;  %v5055_v14 = vadd.f32 %v5054_v62, %v5053_v34  ;;  %v5092_v12 = vrot.slane %v5091_v26, 1 }
0x11ea   : > { %v5228_v36 = vsel %vm9654_vm3, %v5225_v55, %v5227_v45  ;;  %v5001_v11 = vsel %vm9655_vm5, %v8951_v8, 0.0  ;;  %v5162_v4 = vrot.slane %v5161_v25, 2  ;;  %v5123_v37 = vadd.f32 %v5120_v7, %v5118_v57 }
0x11eb   : > { %v5231_v31 = vadd.f32 %v5228_v36, %v5226_v58  ;;  %v5002_v21 = vadd.f32 %v5001_v11, %v4960_v54  ;;  %v5056_v32 = vrot.slane %v5055_v14, 1  ;;  %vm9656_vm8 = vcmask 1042432  }
0x11ec   : > { %v5190_v13 = vsel %vm9656_vm8, %v5188_v51, %v5189_v48  ;;  %vm9657_vm2 = vmmov %vm9656_vm8  ;;  %v5260_v18 = vrot.slane %v8875_v50, 7  ;;  %v5163_v2 = vadd.f32 %v5162_v4, %v5161_v25  ;;  %v5124_v6 = vrot.slane %v5123_v37, 4 }
0x11ed   : > { %v5192_v63 = vsel %vm9657_vm2, %v5189_v48, %v5191_v39  ;;  %v5232_v29 = vrot.slane %v5231_v31, 4  ;;  %v5057_v52 = vadd.f32 %v5056_v32, %v5055_v14  ;;  %v5263_v16 = vrot.slane %v5256_v19, 7 }
0x11ee   : > { %v5195_v42 = vadd.f32 %v5192_v63, %v5190_v13  ;;  %v5261_v46 = vrot.slane %v5253_v28, 7  ;;  %vm9658_vm9 = vcmp.eq.s32.totalorder %v7668_v24, 8  ;;  %v5093_v5 = vadd.f32 %v5092_v12, %v5091_v26 }
0x11ef   : > { %v5023_v1 = vsel %vm9658_vm9, %v5022_v43, 0.0  ;;  %v5125_v45 = vadd.f32 %v5124_v6, %v5123_v37  ;;  %v5233_v41 = vadd.f32 %v5232_v29, %v5231_v31  ;;  %v5058_v35 = vmul.f32 0.03125, %v5057_v52 }
0x11f0   : > { %v5024_v23 = vadd.f32 %v5023_v1, %v5002_v21  ;;  %v5196_v51 = vrot.slane %v5195_v42, 4  ;;  %v5164_v3 = vrot.slane %v5163_v2, 1  ;;  %vm9659_vm15 = vcmask 1040384  }
0x11f1   : > { %v5126_v39 = vrot.slane %v5125_v45, 2  ;;  %v5234_v34 = vrot.slane %v5233_v41, 2  ;;  %v5262_v50 = vsel %vm9659_vm15, %v5260_v18, %v5261_v46  ;;  %v5059_v20 = vsel %vm2338_vm10, %v5058_v35, 0.0  ;;  %vm9661_vm3 = vmmov %vm9659_vm15 }
0x11f2   : > { %vm9660_vm1 = vcmp.eq.s32.totalorder %v7673_v27, 9  ;;  %v5197_v53 = vadd.f32 %v5196_v51, %v5195_v42  ;;  %v5264_v55 = vsel %vm9661_vm3, %v5261_v46, %v5263_v16  ;;  %vm9662_vm5 = vcmp.eq.s32.totalorder %v7666_v22, 1 }
0x11f3   : > { %v5062_v40 = vsel %vm9660_vm1, %v5058_v35, 0.0  ;;  %v4751_v48 = vsel %vm9662_vm5, %v8889_v38, 0.0  ;;  %vm9663_vm8 = vcmp.eq.s32.totalorder %v7666_v22, 0  ;;  %v5094_v62 = vmul.f32 0.03125, %v5093_v5 }
0x11f4   : > { %v4707_v26 = vsel %vm9663_vm8, %v8891_v49, 0.0  ;;  %v5127_v25 = vadd.f32 %v5126_v39, %v5125_v45  ;;  %vm9664_vm2 = vcmp.eq.s32.totalorder %v7673_v27, 8  ;;  %v5235_v7 = vadd.f32 %v5234_v34, %v5233_v41 }
0x11f5   : > { %v5026_v57 = vsel %vm9664_vm2, %v5022_v43, 0.0  ;;  %v5198_v58 = vrot.slane %v5197_v53, 2  ;;  %v5267_v36 = vadd.f32 %v5264_v55, %v5262_v50  ;;  %vm9665_vm9 = vcmp.eq.s32.totalorder %v7666_v22, 2 }
0x11f6   : > { %v4793_v54 = vsel %vm9665_vm9, %v8896_v61, 0.0  ;;  %v5060_v11 = vadd.f32 %v5059_v20, %v5024_v23  ;;  %v5064_v14 = vadd.f32 %v5062_v40, %v5026_v57  ;;  %v5165_v12 = vadd.f32 %v5164_v3, %v5163_v2 }
0x11f7   : > { %v5128_v38 = vrot.slane %v5127_v25, 1  ;;  %v5236_v4 = vrot.slane %v5235_v7, 1  ;;  %v5199_v37 = vadd.f32 %v5198_v58, %v5197_v53  ;;  %v5268_v31 = vrot.slane %v5267_v36, 4 }
0x11f8   : > { %v4753_v49 = vadd.f32 %v4751_v48, %v4707_v26  ;;  %vm9666_vm15 = vcmp.eq.s32.totalorder %v7666_v22, 3  ;;  %v5095_v43 = vsel %vm2377_vm14, %v5094_v62, 0.0  ;;  %vm9667_vm1 = vcmp.eq.s32.totalorder %v7673_v27, 10 }
0x11f9   : > { %v4835_v19 = vsel %vm9666_vm15, %v8910_v15, 0.0  ;;  %v5098_v28 = vsel %vm9667_vm1, %v5094_v62, 0.0  ;;  %v5129_v21 = vadd.f32 %v5128_v38, %v5127_v25  ;;  %v5200_v61 = vrot.slane %v5199_v37, 1 }
0x11fa   : > { %v5269_v32 = vadd.f32 %v5268_v31, %v5267_v36  ;;  %v4795_v13 = vadd.f32 %v4793_v54, %v4753_v49  ;;  %v5166_v63 = vmul.f32 0.03125, %v5165_v12  ;;  %v5096_v18 = vadd.f32 %v5095_v43, %v5060_v11 }
0x11fb   : > { %v5100_v2 = vadd.f32 %v5098_v28, %v5064_v14  ;;  %v5130_v6 = vmul.f32 0.03125, %v5129_v21  ;;  %v5237_v29 = vadd.f32 %v5236_v4, %v5235_v7  ;;  %v5201_v52 = vadd.f32 %v5200_v61, %v5199_v37 }
0x11fc   : > { %v5270_v42 = vrot.slane %v5269_v32, 2  ;;  %v4837_v16 = vadd.f32 %v4835_v19, %v4795_v13  ;;  %vm9668_vm3 = vcmp.eq.s32.totalorder %v7666_v22, 4  ;;  %vm9669_vm5 = vcmp.eq.s32.totalorder %v7673_v27, 11 }
0x11fd   : > { %v4877_v15 = vsel %vm9668_vm3, %v8920_v44, 0.0  ;;  %v5131_v46 = vsel %vm2416_vm11, %v5130_v6, 0.0  ;;  %v5134_v1 = vsel %vm9669_vm5, %v5130_v6, 0.0  ;;  %v5202_v5 = vmul.f32 0.03125, %v5201_v52 }
0x11fe   : > { %v5167_v45 = vsel %vm2455_vm12, %v5166_v63, 0.0  ;;  %v5132_v41 = vadd.f32 %v5131_v46, %v5096_v18  ;;  %v5136_v23 = vadd.f32 %v5134_v1, %v5100_v2  ;;  %v5271_v35 = vadd.f32 %v5270_v42, %v5269_v32 }
0x11ff   : > { %vm9670_vm8 = vcmp.eq.s32.totalorder %v7673_v27, 12  ;;  %v5238_v3 = vmul.f32 0.03125, %v5237_v29  ;;  %v5203_v44 = vsel %vm2494_vm4, %v5202_v5, 0.0  ;;  %vm9671_vm2 = vcmp.eq.s32.totalorder %v7673_v27, 13 }
0x1200   : > { %v5170_v51 = vsel %vm9670_vm8, %v5166_v63, 0.0  ;;  %v5206_v39 = vsel %vm9671_vm2, %v5202_v5, 0.0  ;;  %vm9672_vm9 = vcmp.eq.s32.totalorder %v7666_v22, 5  ;;  %v5272_v20 = vrot.slane %v5271_v35, 1 }
0x1201   : > { %v4919_v34 = vsel %vm9672_vm9, %v8931_v56, 0.0  ;;  %v5172_v50 = vadd.f32 %v5170_v51, %v5136_v23  ;;  %v5168_v40 = vadd.f32 %v5167_v45, %v5132_v41  ;;  %v4879_v53 = vadd.f32 %v4877_v15, %v4837_v16 }
0x1202   : > { %vm9673_vm15 = vcmp.eq.s32.totalorder %v7666_v22, 6  ;;  %v5273_v26 = vadd.f32 %v5272_v20, %v5271_v35  ;;  %vm9674_vm1 = vcmp.eq.s32.totalorder %v7673_v27, 14  ;;  %vm9675_vm3 = vcmp.eq.s32.totalorder %v7668_v24, 14 }
0x1203   : > { %v4961_v55 = vsel %vm9673_vm15, %v8941_v59, 0.0  ;;  %v5208_v48 = vadd.f32 %v5206_v39, %v5172_v50  ;;  %v5204_v62 = vadd.f32 %v5203_v44, %v5168_v40  ;;  %v4921_v25 = vadd.f32 %v4919_v34, %v4879_v53 }
0x1204   : > { %v5242_v57 = vsel %vm9674_vm1, %v5238_v3, 0.0  ;;  %v5239_v7 = vsel %vm9675_vm3, %v5238_v3, 0.0  ;;  %vm9676_vm5 = vcmp.eq.s32.totalorder %v7666_v22, 7  ;;  %v5274_v58 = vmul.f32 0.03125, %v5273_v26 }
0x1205   : > { %v5003_v56 = vsel %vm9676_vm5, %v8951_v8, 0.0  ;;  %v5240_v36 = vadd.f32 %v5239_v7, %v5204_v62  ;;  %v5244_v54 = vadd.f32 %v5242_v57, %v5208_v48  ;;  %v4963_v11 = vadd.f32 %v4961_v55, %v4921_v25 }
0x1206   : > { %vm9677_vm8 = vcmp.eq.s32.totalorder %v7673_v27, 15  ;;  %vm9678_vm2 = vcmp.eq.s32.totalorder %v7668_v24, 15  ;;  %vm9679_vm1 = vcmask 130048  }
0x1207   : > { %v5278_v59 = vsel %vm9677_vm8, %v5274_v58, 0.0  ;;  %v5275_v14 = vsel %vm9678_vm2, %v5274_v58, 0.0  ;;  %v5005_v12 = vadd.f32 %v5003_v56, %v4963_v11  ;;  %vm9680_vm3 = vmmov %vm9679_vm1 }
0x1208   : > { %v5276_v38 = vadd.f32 %v5275_v14, %v5240_v36  ;;  %v5280_v4 = vadd.f32 %v5278_v59, %v5244_v54  ;;  %vm9681_vm8 = vmmov %vm9679_vm1 }
0x1209   : > { %vm9682_vm2 = vmmov %vm9679_vm1 }
0x120a   : > { %vm5281_vm9 = vcmp.gt.f32.partialorder %v5005_v12, %v5276_v38  ;;  %vm5282_vm15 = vcmp.gt.f32.partialorder %v5280_v4, %v5276_v38  ;;  %v1158_v4 = vld [vmem:[%s9700_s1 + $0x8] sm:$0xff] }
0x120b   : > { %v5283_v37 = vsel %vm5281_vm9, 1.0, %v7202_v60  ;;  %v5284_v22 = vsel %vm5282_vm15, 1.0, %v7202_v60  ;;  %vm9683_vm9 = vmmov %vm9679_vm1 }
0x120c   : > { %v5285_v8 = vsel %vm9679_vm1, %v5283_v37, 0.0  ;;  %v5286_v31 = vsel %vm9680_vm3, %v5284_v22, 0.0  ;;  %vm9684_vm15 = vmmov %vm9679_vm1  ;;  %vm9685_vm1 = vcmp.eq.s32.totalorder %v7668_v24, 3  ;;  %v1159_v37 = vld [vmem:[%s9700_s1 + $0x10] sm:$0xff] }
0x120d   : > { %v5287_v49 = vadd.f32 %v5286_v31, %v5285_v8  ;;  %vm9686_vm3 = vmmov %vm9682_vm2  ;;  %v1160_v8 = vld [vmem:[%s9700_s1 + $0x18] sm:$0xff] }
0x120e   : > { %v6999_v31 = vpack.c.bf16 %v1160_v8, %v1159_v37 }
0x120f   : > { %v5288_v19 = vrot.slane %v5287_v49, 4 }
0x1211   : > { %v5289_v27 = vadd.f32 %v5288_v19, %v5287_v49 }
0x1213   : > { %v5290_v43 = vrot.slane %v5289_v27, 2 }
0x1215   : > { %v5291_v28 = vadd.f32 %v5290_v43, %v5289_v27 }
0x1217   : > { %v5292_v21 = vrot.slane %v5291_v28, 1 }
0x1219   : > { %v5293_v61 = vadd.f32 %v5292_v21, %v5291_v28 }
0x121b   : > { %vm5294_vm5 = vcmp.lt.f32.partialorder %v5293_v61, 8.0 }
0x121c   : > { %v5295_v32 = vsel %vm5294_vm5, %v5276_v38, -1e+30 }
0x121d   : > { %v5296_v13 = vsel %vm9681_vm8, %v5295_v32, -inf  ;;  %vm9690_vm8 = vmmov %vm9682_vm2 }
0x121e   : > { %5297 = vmax.xlane.f32.xlu0 %v5296_v13 }
0x12ab   : > { %v5298_v63 = vpop.xlane.xlu0 %5297 }
0x12ac   : > { %v5299_v18 = vsub.f32 %v5276_v38, %v5298_v63  ;;  %v1157_v38 = vld [vmem:[%s9700_s1] sm:$0xff] }
0x12ad   : > { %v6995_v22 = vpack.c.bf16 %v1158_v4, %v1157_v38 }
0x12ae   : > { %v5300_v2 = vmul.f32 1.442695, %v5299_v18 }
0x12af   : > { %6996 = vmatprep.subr.bf16.mxu0 %v6995_v22 }
0x12b0   : > { %7140 = vpow2.f32 %v5300_v2  ;;  %6998 = vmatpush3.bf16.msra.mxu0 %v6995_v22 }
0x12b1   : > { %7000 = vmatprep.subr.bf16.mxu0 %v6999_v31 }
0x12b4   : > { %7002 = vmatpush3.bf16.msra.mxu0 %v6999_v31 }
0x12ba   : > { %v7141_v60 = vpop.eup %7140 }
0x12bb   : > { %v5302_v6 = vsel %vm5294_vm5, %v7141_v60, 0.0  ;;  %vm9687_vm5 = vmmov %vm9682_vm2 }
0x12bc   : > { %v5303_v29 = vsel %vm9682_vm2, %v5302_v6, 0.0 }
0x12bd   : > { %5304 = vadd.xlane.f32.xlu1 %v5303_v29 }
0x134a   : > { %v5305_v52 = vpop.xlane.xlu1 %5304 }
0x134b   : > { %7142 = vrcp.f32 %v5305_v52 }
0x1355   : > { %v7143_v42 = vpop.eup %7142 }
0x1356   : > { %v5307_v16 = vmul.f32 %v7143_v42, %v5302_v6 }
0x1358   : > { %v5332_v15 = vsel %vm2007_vm13, %v5307_v16, 0.0  ;;  %v5316_v46 = vsel %vm1953_vm0, %v5307_v16, 0.0  ;;  %v5348_v45 = vsel %vm9685_vm1, %v5307_v16, 0.0  ;;  %v5308_v41 = vsel %vm1900_vm7, %v5307_v16, 0.0  ;;  %vm9689_vm13 = vmmov %vm9682_vm2 }
0x1359   : > { %v5333_v1 = vsel %vm9683_vm9, %v5332_v15, 0.0  ;;  %v5317_v5 = vsel %vm9684_vm15, %v5316_v46, 0.0  ;;  %v5349_v23 = vsel %vm9686_vm3, %v5348_v45, 0.0  ;;  %v5309_v35 = vsel %vm9687_vm5, %v5308_v41, 0.0  ;;  %vm9693_vm9 = vmmov %vm9686_vm3 }
0x135a   : > { %5334 = vadd.xlane.f32.xlu1 %v5333_v1  ;;  %5318 = vadd.xlane.f32.xlu0 %v5317_v5  ;;  %v5380_v51 = vsel %vm2168_vm6, %v5307_v16, 0.0  ;;  %vm9688_vm0 = vcmp.eq.s32.totalorder %v7668_v24, 4  ;;  %vm9691_vm7 = vcmp.eq.s32.totalorder %v7668_v24, 7  ;;  %vm9692_vm2 = vcmp.eq.s32.totalorder %v7668_v24, 6  ;;  %vm9694_vm15 = vmmov %vm9686_vm3 }
0x135b   : > { %v5364_v3 = vsel %vm9688_vm0, %v5307_v16, 0.0  ;;  %v5381_v44 = vsel %vm9689_vm13, %v5380_v51, 0.0  ;;  %v5412_v34 = vsel %vm9691_vm7, %v5307_v16, 0.0  ;;  %v5396_v50 = vsel %vm9692_vm2, %v5307_v16, 0.0  ;;  %vm9696_vm1 = vmmov %vm9686_vm3 }
0x135c   : > { %v5365_v39 = vsel %vm9690_vm8, %v5364_v3, 0.0  ;;  %v5413_v20 = vsel %vm9693_vm9, %v5412_v34, 0.0  ;;  %v5397_v40 = vsel %vm9694_vm15, %v5396_v50, 0.0  ;;  %vm9695_vm6 = vcmp.eq.s32.totalorder %v7668_v24, 8  ;;  %vm9697_vm3 = vmmov %vm9696_vm1 }
0x135d   : > { %v5428_v53 = vsel %vm9695_vm6, %v5307_v16, 0.0  ;;  %v5436_v55 = vsel %vm2338_vm10, %v5307_v16, 0.0  ;;  %v5468_v62 = vsel %vm2416_vm11, %v5307_v16, 0.0  ;;  %v5452_v25 = vsel %vm2377_vm14, %v5307_v16, 0.0  ;;  %vm9698_vm5 = vmmov %vm9696_vm1 }
0x135e   : > { %5350 = vadd.xlane.f32.xlu1 %v5349_v23  ;;  %5310 = vadd.xlane.f32.xlu0 %v5309_v35  ;;  %v5429_v48 = vsel %vm9696_vm1, %v5428_v53, 0.0  ;;  %v5437_v26 = vsel %vm9697_vm3, %v5436_v55, 0.0  ;;  %v5469_v57 = vsel %vm9698_vm5, %v5468_v62, 0.0  ;;  %vm9699_vm0 = vmmov %vm9696_vm1  ;;  %v5500_v56 = vsel %vm2494_vm4, %v5307_v16, 0.0 }
0x135f   : > { %v5453_v7 = vsel %vm9699_vm0, %v5452_v25, 0.0  ;;  %v5484_v58 = vsel %vm2455_vm12, %v5307_v16, 0.0  ;;  %vm9701_vm10 = vmmov %vm9699_vm0  ;;  %vm9703_vm14 = vcmp.eq.s32.totalorder %v7668_v24, 15  ;;  %vm9704_vm13 = vcmp.eq.s32.totalorder %v7668_v24, 14 }
0x1360   : > { %v5501_v36 = vsel %vm9701_vm10, %v5500_v56, 0.0  ;;  %vm9702_vm11 = vmmov %vm9699_vm0  ;;  %v5532_v11 = vsel %vm9703_vm14, %v5307_v16, 0.0  ;;  %v5516_v59 = vsel %vm9704_vm13, %v5307_v16, 0.0  ;;  %vm9707_vm4 = vcmask 1046528  }
0x1361   : > { %v5485_v54 = vsel %vm9702_vm11, %v5484_v58, 0.0  ;;  %vm9705_vm8 = vmmov %vm9699_vm0  ;;  %vm9709_vm2 = vcmask 1045504   ;;  %vm9711_vm15 = vcmask 1044480   ;;  %vm9713_vm1 = vcmask 1043456  }
0x1362   : > { %5382 = vadd.xlane.f32.xlu1 %v5381_v44  ;;  %5366 = vadd.xlane.f32.xlu0 %v5365_v39  ;;  %v5533_v14 = vsel %vm9705_vm8, %v5532_v11, 0.0  ;;  %vm9706_vm7 = vmmov %vm9699_vm0  ;;  %vm9715_vm5 = vcmask 1042432   ;;  %vm9717_vm10 = vcmask 1041408   ;;  %vm9719_vm14 = vcmask 1040384  }
0x1363   : > { %v5517_v12 = vsel %vm9706_vm7, %v5516_v59, 0.0  ;;  %vm9708_vm12 = vmmov %vm9707_vm4 }
0x1364   : > { %vm9710_vm9 = vmmov %vm9709_vm2 }
0x1365   : > { %vm9712_vm6 = vmmov %vm9711_vm15 }
0x1366   : > { %5414 = vadd.xlane.f32.xlu1 %v5413_v20  ;;  %5398 = vadd.xlane.f32.xlu0 %v5397_v40  ;;  %vm9714_vm3 = vmmov %vm9713_vm1 }
0x1367   : > { %vm9716_vm0 = vmmov %vm9715_vm5 }
0x1368   : > { %vm9718_vm11 = vmmov %vm9717_vm10 }
0x1369   : > { %vm9720_vm13 = vmmov %vm9719_vm14 }
0x136a   : > { %5430 = vadd.xlane.f32.xlu1 %v5429_v48  ;;  %5438 = vadd.xlane.f32.xlu0 %v5437_v26  ;;  %vm9721_vm8 = vmmov %vm9707_vm4 }
0x136b   : > { %vm9722_vm7 = vmmov %vm9707_vm4 }
0x136e   : > { %5470 = vadd.xlane.f32.xlu1 %v5469_v57  ;;  %5454 = vadd.xlane.f32.xlu0 %v5453_v7 }
0x1372   : > { %5502 = vadd.xlane.f32.xlu1 %v5501_v36  ;;  %5486 = vadd.xlane.f32.xlu0 %v5485_v54 }
0x1376   : > { %5534 = vadd.xlane.f32.xlu1 %v5533_v14  ;;  %5518 = vadd.xlane.f32.xlu0 %v5517_v12 }
0x13e7   : > { %v5335_v49 = vpop.xlane.xlu1 %5334  ;;  %v5319_v19 = vpop.xlane.xlu0 %5318 }
0x13e8   : > { %v5336_v24 = vmul.f32 %v5335_v49, %v8627_v9  ;;  %v5337_v27 = vmul.f32 %v5335_v49, %v8625_v0  ;;  %v5320_v43 = vmul.f32 %v5319_v19, %v8627_v9  ;;  %v5321_v28 = vmul.f32 %v5319_v19, %v8625_v0 }
0x13ea   : > { %v5324_v21 = vrot.slane %v5320_v43, 1  ;;  %v5325_v61 = vrot.slane %v5321_v28, 1  ;;  %v5340_v32 = vrot.slane %v5336_v24, 2  ;;  %v5341_v13 = vrot.slane %v5337_v27, 2 }
0x13eb   : > { %v5351_v63 = vpop.xlane.xlu1 %5350  ;;  %v5311_v18 = vpop.xlane.xlu0 %5310 }
0x13ec   : > { %v5352_v2 = vmul.f32 %v5351_v63, %v8627_v9  ;;  %v5353_v60 = vmul.f32 %v5351_v63, %v8625_v0  ;;  %v5326_v6 = vsel %vm9707_vm4, %v5324_v21, %v5325_v61  ;;  %v5327_v29 = vsel %vm9708_vm12, %v5325_v61, %v5324_v21  ;;  %vm9723_vm4 = vmmov %vm9709_vm2 }
0x13ed   : > { %v5312_v52 = vmul.f32 %v5311_v18, %v8627_v9  ;;  %v5313_v42 = vmul.f32 %v5311_v18, %v8625_v0  ;;  %v5342_v46 = vsel %vm9709_vm2, %v5340_v32, %v5341_v13  ;;  %v5343_v1 = vsel %vm9710_vm9, %v5341_v13, %v5340_v32  ;;  %vm9724_vm12 = vmmov %vm9709_vm2 }
0x13ee   : > { %v5356_v16 = vrot.slane %v5352_v2, 3  ;;  %v5357_v15 = vrot.slane %v5353_v60, 3  ;;  %vm9725_vm2 = vmmov %vm9712_vm6 }
0x13ef   : > { %v5330_v5 = vadd.f32 %v5326_v6, %v5312_v52  ;;  %v5331_v45 = vadd.f32 %v5327_v29, %v5313_v42  ;;  %v5383_v41 = vpop.xlane.xlu1 %5382  ;;  %v5367_v23 = vpop.xlane.xlu0 %5366  ;;  %vm9726_vm9 = vmmov %vm9725_vm2 }
0x13f0   : > { %v5358_v35 = vsel %vm9711_vm15, %v5356_v16, %v5357_v15  ;;  %v5359_v51 = vsel %vm9712_vm6, %v5357_v15, %v5356_v16  ;;  %v5384_v3 = vmul.f32 %v5383_v41, %v8627_v9  ;;  %v5385_v44 = vmul.f32 %v5383_v41, %v8625_v0  ;;  %vm9727_vm15 = vmmov %vm9713_vm1 }
0x13f1   : > { %v5346_v39 = vadd.f32 %v5342_v46, %v5330_v5  ;;  %v5347_v34 = vadd.f32 %v5343_v1, %v5331_v45  ;;  %v5368_v50 = vmul.f32 %v5367_v23, %v8627_v9  ;;  %v5369_v20 = vmul.f32 %v5367_v23, %v8625_v0  ;;  %vm9728_vm6 = vmmov %vm9713_vm1 }
0x13f2   : > { %v5388_v40 = vrot.slane %v5384_v3, 5  ;;  %v5389_v53 = vrot.slane %v5385_v44, 5 }
0x13f3   : > { %v5362_v55 = vadd.f32 %v5358_v35, %v5346_v39  ;;  %v5363_v48 = vadd.f32 %v5359_v51, %v5347_v34  ;;  %v5372_v26 = vrot.slane %v5368_v50, 4  ;;  %v5373_v62 = vrot.slane %v5369_v20, 4  ;;  %v5415_v25 = vpop.xlane.xlu1 %5414  ;;  %v5399_v57 = vpop.xlane.xlu0 %5398 }
0x13f4   : > { %v5416_v7 = vmul.f32 %v5415_v25, %v8627_v9  ;;  %v5417_v56 = vmul.f32 %v5415_v25, %v8625_v0  ;;  %v5400_v54 = vmul.f32 %v5399_v57, %v8627_v9  ;;  %v5401_v11 = vmul.f32 %v5399_v57, %v8625_v0 }
0x13f5   : > { %v5374_v58 = vsel %vm9713_vm1, %v5372_v26, %v5373_v62  ;;  %v5375_v36 = vsel %vm9714_vm3, %v5373_v62, %v5372_v26  ;;  %v5390_v59 = vsel %vm9715_vm5, %v5388_v40, %v5389_v53  ;;  %v5391_v14 = vsel %vm9716_vm0, %v5389_v53, %v5388_v40  ;;  %vm9729_vm1 = vmmov %vm9716_vm0 }
0x13f6   : > { %v5378_v12 = vadd.f32 %v5374_v58, %v5362_v55  ;;  %v5379_v38 = vadd.f32 %v5375_v36, %v5363_v48  ;;  %v5420_v4 = vrot.slane %v5416_v7, 7  ;;  %v5421_v37 = vrot.slane %v5417_v56, 7  ;;  %vm9730_vm3 = vmmov %vm9716_vm0 }
0x13f7   : > { %v5404_v22 = vrot.slane %v5400_v54, 6  ;;  %v5405_v8 = vrot.slane %v5401_v11, 6  ;;  %v5431_v31 = vpop.xlane.xlu1 %5430  ;;  %v5439_v49 = vpop.xlane.xlu0 %5438  ;;  %vm9732_vm5 = vmmov %vm9717_vm10 }
0x13f8   : > { %v5394_v19 = vadd.f32 %v5390_v59, %v5378_v12  ;;  %v5395_v24 = vadd.f32 %v5391_v14, %v5379_v38  ;;  %v5440_v61 = vmul.f32 %v5439_v49, %v8625_v0  ;;  %v5441_v32 = vmul.f32 %v5439_v49, %v8627_v9  ;;  %vm9733_vm0 = vmmov %vm9732_vm5 }
0x13f9   : > { %v5406_v27 = vsel %vm9717_vm10, %v5404_v22, %v5405_v8  ;;  %v5407_v43 = vsel %vm9718_vm11, %v5405_v8, %v5404_v22  ;;  %v5422_v13 = vsel %vm9719_vm14, %v5420_v4, %v5421_v37  ;;  %v5423_v63 = vsel %vm9720_vm13, %v5421_v37, %v5420_v4  ;;  %vm9734_vm10 = vmmov %vm9720_vm13 }
0x13fa   : > { %v5410_v28 = vadd.f32 %v5406_v27, %v5394_v19  ;;  %v5411_v21 = vadd.f32 %v5407_v43, %v5395_v24  ;;  %v5432_v18 = vmul.f32 %v5431_v31, %v8625_v0  ;;  %v5433_v2 = vmul.f32 %v5431_v31, %v8627_v9  ;;  %vm9735_vm11 = vmmov %vm9734_vm10 }
0x13fb   : > { %v5471_v60 = vpop.xlane.xlu1 %5470  ;;  %v5455_v6 = vpop.xlane.xlu0 %5454  ;;  %v5444_v42 = vrot.slane %v5440_v61, 1  ;;  %v5445_v16 = vrot.slane %v5441_v32, 1  ;;  %vm9737_vm14 = vcmask 261120  }
0x13fc   : > { %v5426_v29 = vadd.f32 %v5422_v13, %v5410_v28  ;;  %v5427_v52 = vadd.f32 %v5423_v63, %v5411_v21  ;;  %v5472_v15 = vmul.f32 %v5471_v60, %v8625_v0  ;;  %v5473_v46 = vmul.f32 %v5471_v60, %v8627_v9  ;;  %vm9738_vm13 = vmmov %vm9737_vm14 }
0x13fd   : > { %v5456_v1 = vmul.f32 %v5455_v6, %v8625_v0  ;;  %v5457_v5 = vmul.f32 %v5455_v6, %v8627_v9  ;;  %v5446_v23 = vsel %vm9721_vm8, %v5444_v42, %v5445_v16  ;;  %v5447_v35 = vsel %vm9722_vm7, %v5445_v16, %v5444_v42  ;;  %vm9741_vm7 = vmmov %vm9738_vm13 }
0x13fe   : > { %v5434_v45 = vadd.f32 %v5432_v18, %v5426_v29  ;;  %v5435_v41 = vadd.f32 %v5433_v2, %v5427_v52  ;;  %v5476_v51 = vrot.slane %v5472_v15, 3  ;;  %v5477_v3 = vrot.slane %v5473_v46, 3  ;;  %v6410_v46 = vld [vmem:[%s9731_s10] ss:$0 sm:$0xff]  ;;  %s9748_s10 = sld [smem:[#allocation17_spill]] }
0x13ff   : > { %v5460_v44 = vrot.slane %v5456_v1, 2  ;;  %v5461_v39 = vrot.slane %v5457_v5, 2  ;;  %v5503_v34 = vpop.xlane.xlu1 %5502  ;;  %v5487_v50 = vpop.xlane.xlu0 %5486  ;;  %vm9739_vm8 = vcmask 130048  }
0x1400   : > { %v5450_v20 = vadd.f32 %v5446_v23, %v5434_v45  ;;  %v5451_v40 = vadd.f32 %v5447_v35, %v5435_v41  ;;  %v5504_v53 = vmul.f32 %v5503_v34, %v8625_v0  ;;  %v5505_v55 = vmul.f32 %v5503_v34, %v8627_v9  ;;  %v1162_v35 = vld [vmem:[%s9736_s26] sm:$0xff]  ;;  %v7155_v34 = vld [vmem:[%s9562_s18 + $0x8] sm:$0xff] }
0x1401   : > { %v5462_v48 = vsel %vm9723_vm4, %v5460_v44, %v5461_v39  ;;  %v5463_v26 = vsel %vm9724_vm12, %v5461_v39, %v5460_v44  ;;  %v5478_v57 = vsel %vm9725_vm2, %v5476_v51, %v5477_v3  ;;  %v5479_v7 = vsel %vm9726_vm9, %v5477_v3, %v5476_v51  ;;  %v1163_v51 = vld [vmem:[%s9736_s26 + $0x8] sm:$0xff]  ;;  %vm9742_vm4 = vmmov %vm9741_vm7 }
0x1402   : > { %v5466_v62 = vadd.f32 %v5462_v48, %v5450_v20  ;;  %v5467_v25 = vadd.f32 %v5463_v26, %v5451_v40  ;;  %v5488_v56 = vmul.f32 %v5487_v50, %v8625_v0  ;;  %v5489_v58 = vmul.f32 %v5487_v50, %v8627_v9  ;;  %v1164_v50 = vld [vmem:[%s9736_s26 + $0x10] sm:$0xff]  ;;  %v1165_v20 = vld [vmem:[%s9736_s26 + $0x18] sm:$0xff]  ;;  %vm9743_vm12 = vmmov %vm9739_vm8 }
0x1403   : > { %v5535_v36 = vpop.xlane.xlu1 %5534  ;;  %v5519_v54 = vpop.xlane.xlu0 %5518  ;;  %v5508_v11 = vrot.slane %v5504_v53, 5  ;;  %v5509_v59 = vrot.slane %v5505_v55, 5  ;;  %v7007_v39 = vpack.c.bf16 %v1163_v51, %v1162_v35  ;;  %v7011_v40 = vpack.c.bf16 %v1165_v20, %v1164_v50  ;;  %vm9744_vm2 = vmmov %vm9742_vm4 }
0x1404   : > { %v5482_v14 = vadd.f32 %v5478_v57, %v5466_v62  ;;  %v5483_v12 = vadd.f32 %v5479_v7, %v5467_v25  ;;  %v5492_v38 = vrot.slane %v5488_v56, 4  ;;  %v5493_v4 = vrot.slane %v5489_v58, 4  ;;  %v7156_v62 = vld [vmem:[%s9562_s18] sm:$0xff]  ;;  %vm9745_vm9 = vmmov %vm9744_vm2  ;;  %v1171_v35 = vld [vmem:[%s9748_s10 + $0x8] sm:$0xff] }
0x1405   : > { %v5536_v37 = vmul.f32 %v5535_v36, %v8625_v0  ;;  %v5537_v22 = vmul.f32 %v5535_v36, %v8627_v9  ;;  %v5520_v8 = vmul.f32 %v5519_v54, %v8625_v0  ;;  %v5521_v31 = vmul.f32 %v5519_v54, %v8627_v9  ;;  %v1172_v51 = vld [vmem:[%s9748_s10 + $0x10] sm:$0xff] }
0x1406   : > { %v5494_v49 = vsel %vm9727_vm15, %v5492_v38, %v5493_v4  ;;  %v5495_v19 = vsel %vm9728_vm6, %v5493_v4, %v5492_v38  ;;  %v5510_v21 = vsel %vm9729_vm1, %v5508_v11, %v5509_v59  ;;  %v5511_v61 = vsel %vm9730_vm3, %v5509_v59, %v5508_v11  ;;  %vm9746_vm15 = vmmov %vm9739_vm8 }
0x1407   : > { %v5498_v24 = vadd.f32 %v5494_v49, %v5482_v14  ;;  %v5499_v27 = vadd.f32 %v5495_v19, %v5483_v12  ;;  %v5524_v43 = vrot.slane %v5520_v8, 6  ;;  %v5525_v28 = vrot.slane %v5521_v31, 6  ;;  %vm9747_vm6 = vmmov %vm9744_vm2 }
0x1408   : > { %v5540_v32 = vrot.slane %v5536_v37, 7  ;;  %v5541_v13 = vrot.slane %v5537_v22, 7  ;;  %vm9749_vm1 = vmmov %vm9744_vm2  ;;  %vm9750_vm3 = vcmask 1046528  }
0x1409   : > { %v5514_v63 = vadd.f32 %v5510_v21, %v5498_v24  ;;  %v5515_v18 = vadd.f32 %v5511_v61, %v5499_v27  ;;  %v5526_v0 = vsel %vm9732_vm5, %v5524_v43, %v5525_v28  ;;  %v5527_v9 = vsel %vm9733_vm0, %v5525_v28, %v5524_v43 }
0x140a   : > { %v5542_v6 = vsel %vm9734_vm10, %v5540_v32, %v5541_v13  ;;  %v5543_v29 = vsel %vm9735_vm11, %v5541_v13, %v5540_v32  ;;  %vm9751_vm5 = vcmask 1045504   ;;  %vm9753_vm10 = vmmov %vm9749_vm1 }
0x140b   : > { %v5530_v2 = vadd.f32 %v5526_v0, %v5514_v63  ;;  %v5531_v60 = vadd.f32 %v5527_v9, %v5515_v18  ;;  %vm9752_vm0 = vmmov %vm9751_vm5 }
0x140c   : > { %vm9754_vm11 = vmmov %vm9749_vm1 }
0x140d   : > { %v5547_v52 = vadd.f32 %v5543_v29, %v5531_v60  ;;  %v5546_v42 = vadd.f32 %v5542_v6, %v5530_v2 }
0x140f   : > { %5558 = vrot.lane.b32.xlu1 %v5547_v52, %s7201_s28  ;;  %5556 = vrot.lane.b32.xlu0 %v5546_v42, %s7201_s28  ;;  %s9740_s28 = sld [smem:[#allocation16_spill]] }
0x1415   : > { %v1166_v25 = vld [vmem:[%s9740_s28] sm:$0xff]  ;;  %v1167_v57 = vld [vmem:[%s9740_s28 + $0x8] sm:$0xff]  ;;  %v1168_v56 = vld [vmem:[%s9740_s28 + $0x10] sm:$0xff] }
0x1416   : > { %v7015_v7 = vpack.c.bf16 %v1167_v57, %v1166_v25  ;;  %v1169_v58 = vld [vmem:[%s9740_s28 + $0x18] sm:$0xff]  ;;  %v1175_v25 = vld [vmem:[%s9748_s10 + $0x28] sm:$0xff] }
0x1418   : > { %7016 = vmatprep.subr.bf16.mxu0 %v7015_v7 }
0x1481   : > { %v5559_v16 = vpop.permute.xlu1 %5558  ;;  %v5557_v15 = vpop.permute.xlu0 %5556 }
0x1482   : > { %6782 = vmatprep.mubr.msk.f32.mxu0 %vm9737_vm14, %v5557_v15  ;;  %vm9756_vm14 = vmmov %vm9749_vm1 }
0x1483   : > { %6783 = vmatmul.mubr.msk.f32.vlgmr.msra.gmra.mrb[20].mxu0 %vm9738_vm13, %v5559_v16  ;;  %vm9757_vm13 = vmmov %vm9749_vm1 }
0x1484   : > { %7018 = vmatpush3.bf16.msra.mxu0 %v7015_v7  ;;  %v1176_v7 = vld [vmem:[%s9748_s10 + $0x30] sm:$0xff] }
0x1556   : > { %v6784_v1 = vpop.f32.mrb[20].mxu0 }
0x1557   : > { %v5636_v5 = vadd.f32 %v6784_v1, %v6410_v46  ;;  %v5630_v45 = vpop.f32.mrb[21].mxu0 }
0x1558   : > { %v5631_v41 = vadd.f32 %v6410_v46, %v5630_v45 }
0x1559   : > { %v5640_v23 = vadd.f32 %v5636_v5, %v8619_v47 }
0x155a   : > { %v5639_v3 = vadd.f32 %v5631_v41, %v8616_v33 }
0x155c   : > { %v7003_v44 = vpack.c.bf16 %v5640_v23, %v5639_v3 }
0x155e   : > { %7004 = vmatprep.subr.bf16.mxu1 %v7003_v44 }
0x155f   : > { %7006 = vmatpush3.bf16.msra.mxu1 %v7003_v44  ;;  %v1173_v44 = vld [vmem:[%s9748_s10 + $0x18] sm:$0xff] }
0x1560   : > { %7008 = vmatprep.subr.bf16.mxu1 %v7007_v39 }
0x1562   : > { %6790 = vmatmul.mubr.msk.f32.vlgmr.msra.gmra.mrb[10].mxu1 %vm9739_vm8, %v7155_v34  ;;  %vm9758_vm8 = vcmask 523264  }
0x1563   : > { %7010 = vmatpush3.bf16.msra.mxu1 %v7007_v39  ;;  %v7031_v39 = vpack.c.bf16 %v1173_v44, %v1172_v51 }
0x1564   : > { %7012 = vmatprep.subr.bf16.mxu1 %v7011_v40 }
0x1567   : > { %7014 = vmatpush3.bf16.msra.mxu1 %v7011_v40 }
0x1635   : > { %v6791_v33 = vpop.f32.mrb[10].mxu1 }
0x1636   : > { %v5978_v47 = vadd.f32 %v6791_v33, %v8611_v17  ;;  %v5707_v53 = vpop.f32.mrb[11].mxu1  ;;  %v5717_v26 = vsub.f32 %v5640_v23, %v6791_v33  ;;  %v7019_v17 = vpack.c.bf16 %v1169_v58, %v1168_v56  ;;  %v1170_v23 = vld [vmem:[%s9748_s10] sm:$0xff]  ;;  %v1177_v56 = vld [vmem:[%s9748_s10 + $0x38] sm:$0xff] }
0x1637   : > { %v5716_v55 = vsub.f32 %v5639_v3, %v5707_v53  ;;  %v5977_v48 = vadd.f32 %v5707_v53, %v8613_v30  ;;  %v7027_v3 = vpack.c.bf16 %v1171_v35, %v1170_v23  ;;  %v7039_v58 = vpack.c.bf16 %v1177_v56, %v1176_v7 }
0x1638   : > { %7020 = vmatprep.subr.bf16.mxu0 %v7019_v17 }
0x1639   : > { %6800 = vmatprep.mubr.msk.f32.mxu1 %vm9741_vm7, %v5716_v55  ;;  %7022 = vmatpush3.bf16.msra.mxu0 %v7019_v17  ;;  %v1178_v17 = vld [vmem:[%s9748_s10 + $0x40] sm:$0xff]  ;;  %vm9759_vm7 = vmmov %vm9758_vm8 }
0x163a   : > { %6801 = vmatmul.mubr.msk.f32.vlgmr.msra.gmra.mrb[12].mxu1 %vm9742_vm4, %v5717_v26  ;;  %vm9760_vm4 = vmmov %vm9749_vm1 }
0x163b   : > { %6818 = vmatprep.mubr.msk.f32.mxu1 %vm9743_vm12, %v7156_v62  ;;  %v1174_v62 = vld [vmem:[%s9748_s10 + $0x20] sm:$0xff]  ;;  %vm9761_vm12 = vmmov %vm9759_vm7 }
0x163c   : > { %v7035_v57 = vpack.c.bf16 %v1175_v25, %v1174_v62  ;;  %v6425_v25 = vld [vmem:[%s7376_s4] ss:$0 sm:$0xff] }
0x170d   : > { %v6802_v36 = vpop.f32.mrb[12].mxu1 }
0x170e   : > { %v5802_v30 = vmul.f32 0.044715, %v6802_v36  ;;  %v5790_v54 = vpop.f32.mrb[13].mxu1  ;;  %v5800_v43 = vmul.f32 0.5, %v6802_v36 }
0x170f   : > { %v5801_v11 = vmul.f32 0.044715, %v5790_v54  ;;  %v5799_v24 = vmul.f32 0.5, %v5790_v54 }
0x1710   : > { %v5804_v59 = vmul.f32 %v6802_v36, %v5802_v30 }
0x1711   : > { %v5803_v14 = vmul.f32 %v5801_v11, %v5790_v54  ;;  %v1181_v11 = vld [vmem:[%s9748_s10 + $0x58] sm:$0xff] }
0x1712   : > { %v5806_v12 = vmul.f32 %v6802_v36, %v5804_v59 }
0x1713   : > { %v5805_v38 = vmul.f32 %v5803_v14, %v5790_v54  ;;  %v1184_v14 = vld [vmem:[%s7371_s27] sm:$0xff] }
0x1714   : > { %v5808_v4 = vadd.f32 %v6802_v36, %v5806_v12  ;;  %v1179_v36 = vld [vmem:[%s9748_s10 + $0x48] sm:$0xff] }
0x1715   : > { %v5807_v37 = vadd.f32 %v5805_v38, %v5790_v54  ;;  %v7043_v30 = vpack.c.bf16 %v1179_v36, %v1178_v17  ;;  %v1180_v54 = vld [vmem:[%s9748_s10 + $0x50] sm:$0xff]  ;;  %v1185_v12 = vld [vmem:[%s7371_s27 + $0x8] sm:$0xff] }
0x1716   : > { %v5810_v22 = vmul.f32 0.7978846, %v5808_v4  ;;  %v7047_v59 = vpack.c.bf16 %v1181_v11, %v1180_v54  ;;  %v7051_v38 = vpack.c.bf16 %v1185_v12, %v1184_v14 }
0x1717   : > { %v5809_v8 = vmul.f32 0.7978846, %v5807_v37 }
0x1718   : > { %7144 = vtanh.f32 %v5810_v22 }
0x1719   : > { %7146 = vtanh.f32 %v5809_v8 }
0x1722   : > { %v7145_v31 = vpop.eup %7144 }
0x1723   : > { %v7147_v49 = vpop.eup %7146  ;;  %v5814_v19 = vadd.f32 1.0, %v7145_v31 }
0x1724   : > { %v5813_v27 = vadd.f32 1.0, %v7147_v49 }
0x1725   : > { %v5816_v21 = vmul.f32 %v5814_v19, %v5800_v43 }
0x1726   : > { %v5815_v28 = vmul.f32 %v5813_v27, %v5799_v24 }
0x1728   : > { %6811 = vmatprep.mubr.msk.f32.mxu0 %vm9744_vm2, %v5815_v28  ;;  %vm9762_vm2 = vcmask 1040384  }
0x1729   : > { %6812 = vmatmul.mubr.msk.f32.vlgmr.msra.gmra.mrb[22].mxu0 %vm9745_vm9, %v5816_v21  ;;  %vm9763_vm9 = vmmov %vm9762_vm2 }
0x17fc   : > { %v6813_v61 = vpop.f32.mrb[22].mxu0 }
0x17fd   : > { %v5899_v32 = vadd.f32 %v6813_v61, %v5717_v26  ;;  %v5889_v13 = vpop.f32.mrb[23].mxu0 }
0x17fe   : > { %v5898_v63 = vadd.f32 %v5889_v13, %v5716_v55 }
0x1800   : > { %v7023_v18 = vpack.c.bf16 %v5899_v32, %v5898_v63 }
0x1802   : > { %7024 = vmatprep.subr.bf16.mxu1 %v7023_v18 }
0x1803   : > { %7026 = vmatpush3.bf16.msra.mxu1 %v7023_v18 }
0x1804   : > { %7028 = vmatprep.subr.bf16.mxu1 %v7027_v3 }
0x1806   : > { %6819 = vmatmul.mubr.msk.f32.vlgmr.msra.gmra.mrb[14].mxu1 %vm9746_vm15, %v7155_v34  ;;  %vm9764_vm15 = vcmask 785408  }
0x1807   : > { %7030 = vmatpush3.bf16.msra.mxu1 %v7027_v3 }
0x1808   : > { %7032 = vmatprep.subr.bf16.mxu1 %v7031_v39 }
0x180b   : > { %7034 = vmatpush3.bf16.msra.mxu1 %v7031_v39 }
0x180c   : > { %7036 = vmatprep.subr.bf16.mxu1 %v7035_v57 }
0x180f   : > { %7038 = vmatpush3.bf16.msra.mxu1 %v7035_v57 }
0x1810   : > { %7040 = vmatprep.subr.bf16.mxu1 %v7039_v58 }
0x1813   : > { %7042 = vmatpush3.bf16.msra.mxu1 %v7039_v58 }
0x1814   : > { %7044 = vmatprep.subr.bf16.mxu1 %v7043_v30 }
0x1817   : > { %7046 = vmatpush3.bf16.msra.mxu1 %v7043_v30 }
0x1818   : > { %7048 = vmatprep.subr.bf16.mxu1 %v7047_v59 }
0x181b   : > { %7050 = vmatpush3.bf16.msra.mxu1 %v7047_v59 }
0x181c   : > { %7052 = vmatprep.subr.bf16.mxu1 %v7051_v38 }
0x18d9   : > { %v6820_v0 = vpop.f32.mrb[14].mxu1 }
0x18da   : > { %v5976_v9 = vsub.f32 %v5899_v32, %v6820_v0  ;;  %v9165_v2 = vadd.f32 %v6820_v0, %v5978_v47  ;;  %v5966_v60 = vpop.f32.mrb[15].mxu1 }
0x18db   : > { %v5975_v6 = vsub.f32 %v5898_v63, %v5966_v60  ;;  %v9167_v29 = vadd.f32 %v5977_v48, %v5966_v60  ;;  %v1187_v60 = vld [vmem:[%s7371_s27 + $0x18] sm:$0xff] }
0x18dc   : > { %v6104_v52 = vsel %vm9747_vm6, %v5976_v9, 0.0  ;;  %v5984_v42 = vrot.slane %v9165_v2, 1  ;;  %v5996_v16 = vrot.slane %v9165_v2, 2  ;;  %vm9765_vm6 = vmmov %vm9764_vm15 }
0x18dd   : > { %v5983_v15 = vrot.slane %v9167_v29, 1  ;;  %v5995_v46 = vrot.slane %v9167_v29, 2  ;;  %6105 = vadd.xlane.f32.xlu0 %v6104_v52  ;;  %v6101_v1 = vsel %vm9749_vm1, %v5975_v6, 0.0 }
0x18de   : > { %6102 = vadd.xlane.f32.xlu1 %v6101_v1 }
0x18df   : > { %v5985_v5 = vsel %vm9750_vm3, %v5983_v15, %v5984_v42  ;;  %v5997_v45 = vsel %vm9751_vm5, %v5995_v46, %v5996_v16  ;;  %v5998_v41 = vsel %vm9752_vm0, %v5996_v16, %v5995_v46  ;;  %vm9767_vm3 = vmmov %vm9749_vm1 }
0x18e0   : > { %vm9768_vm5 = vmmov %vm9749_vm1 }
0x18e1   : > { %vm9769_vm0 = vmmov %vm9749_vm1 }
0x18f3   : > { %5986 = vrot.lane.b32.xlu0 %v5983_v15, %s7199_s22 }
0x18f7   : > { %5990 = vrot.lane.b32.xlu0 %v5984_v42, %s7199_s22 }
0x18fb   : > { %5999 = vrot.lane.b32.xlu0 %v5995_v46, %s7200_s23 }
0x18ff   : > { %6003 = vrot.lane.b32.xlu0 %v5998_v41, %s7200_s23  ;;  %v6424_v41 = vld [vmem:[%s7366_s9] ss:$0 sm:$0xff] }
0x196a   : > { %v6106_v34 = vpop.xlane.xlu0 %6105 }
0x196b   : > { %v6108_v50 = vmul.f32 0.03125, %v6106_v34  ;;  %v6103_v20 = vpop.xlane.xlu1 %6102 }
0x196c   : > { %v6107_v40 = vmul.f32 0.03125, %v6103_v20 }
0x196d   : > { %v9186_v33 = vsub.f32 %v5976_v9, %v6108_v50  ;;  %v1186_v9 = vld [vmem:[%s7371_s27 + $0x10] sm:$0xff] }
0x196e   : > { %v6109_v47 = vsub.f32 %v5975_v6, %v6107_v40  ;;  %v5987_v4 = vpop.permute.xlu0 %5986 }
0x196f   : > { %v6112_v48 = vmul.f32 %v9186_v33, %v9186_v33  ;;  %v6008_v21 = vsel %vm9756_vm14, %v9165_v2, %v5987_v4 }
0x1970   : > { %v6111_v53 = vmul.f32 %v6109_v47, %v6109_v47 }
0x1971   : > { %v6116_v26 = vsel %vm9754_vm11, %v6112_v48, 0.0 }
0x1972   : > { %v6113_v55 = vsel %vm9753_vm10, %v6111_v53, 0.0  ;;  %v5991_v37 = vpop.permute.xlu0 %5990  ;;  %vm9770_vm10 = vmmov %vm9769_vm0 }
0x1973   : > { %6114 = vadd.xlane.f32.xlu1 %v6113_v55  ;;  %v6010_v61 = vsel %vm9757_vm13, %v9165_v2, %v5991_v37 }
0x1976   : > { %v6000_v31 = vpop.permute.xlu0 %5999 }
0x1977   : > { %6117 = vadd.xlane.f32.xlu1 %v6116_v26  ;;  %v6011_v32 = vsel %vm9758_vm8, %v6008_v21, %v6000_v31 }
0x1978   : > { %v6017_v6 = vrot.slane %v6011_v32, 7 }
0x197a   : > { %v6004_v43 = vpop.permute.xlu0 %6003 }
0x197b   : > { %v6013_v13 = vsel %vm9759_vm7, %v6010_v61, %v6004_v43 }
0x197c   : > { %v6020_v52 = vrot.slane %v6013_v13, 7 }
0x1988   : > { %5988 = vrot.lane.b32.xlu1 %v5985_v5, %s7199_s22  ;;  %s9755_s22 = sld [smem:[#allocation18_spill]]  ;;  %v7055_v5 = vpack.c.bf16 %v1187_v60, %v1186_v9 }
0x198c   : > { %6001 = vrot.lane.b32.xlu1 %v5997_v45, %s7200_s23  ;;  %s9766_s23 = sld [smem:[#allocation3_spill]] }
0x198e   : > { %v6423_v15 = vld [vmem:[%s9755_s22] ss:$0 sm:$0xff]  ;;  %s6365_s22 = sshll.u32 %s9772_s16, 3 }
0x198f   : > { %s1080_s0 = scalar_lea.vmem %s7381_s29, %s6365_s22 }
0x1992   : > { %v6368_v62 = vld [vmem:[%s9766_s23] ss:$0 sm:$0xff] }
0x1993   : > { %v7059_v57 = vadd.f32 %v6425_v25, %v6368_v62 }
0x1995   : > { %v7060_v7 = vadd.f32 %v7059_v57, %v7467_v10 }
0x1a00   : > { %v6115_v22 = vpop.xlane.xlu1 %6114 }
0x1a01   : > { %v6119_v8 = vmul.f32 0.03125, %v6115_v22 }
0x1a03   : > { %v6121_v49 = vadd.f32 1e-05, %v6119_v8 }
0x1a04   : > { %v6118_v19 = vpop.xlane.xlu1 %6117 }
0x1a05   : > { %7148 = vrsqrt.f32 %v6121_v49  ;;  %v6120_v24 = vmul.f32 0.03125, %v6118_v19 }
0x1a07   : > { %v6122_v27 = vadd.f32 1e-05, %v6120_v24 }
0x1a08   : > { %v5989_v28 = vpop.permute.xlu1 %5988 }
0x1a09   : > { %7150 = vrsqrt.f32 %v6122_v27  ;;  %v6009_v63 = vsel %vm9760_vm4, %v9167_v29, %v5989_v28 }
0x1a0c   : > { %v6002_v18 = vpop.permute.xlu1 %6001 }
0x1a0d   : > { %v6012_v0 = vsel %vm9761_vm12, %v6009_v63, %v6002_v18 }
0x1a0e   : > { %v6018_v42 = vrot.slane %v6012_v0, 7 }
0x1a0f   : > { %v7149_v16 = vpop.eup %7148 }
0x1a10   : > { %v6125_v46 = vmul.f32 %v7149_v16, %v6109_v47  ;;  %v6019_v2 = vsel %vm9762_vm2, %v6017_v6, %v6018_v42  ;;  %v6021_v1 = vsel %vm9763_vm9, %v6018_v42, %v6020_v52 }
0x1a11   : > { %6845 = vmatprep.mubr.msk.f32.mxu1 %vm9764_vm15, %v6019_v2 }
0x1a12   : > { %6846 = vmatmul.mubr.msk.f32.vlgmr.msra.gmra.mrb[16].mxu1 %vm9765_vm6, %v6021_v1  ;;  %v6133_v29 = vmul.f32 %v6423_v15, %v6125_v46 }
0x1a13   : > { %v7151_v45 = vpop.eup %7150  ;;  %7054 = vmatpush3.bf16.msra.mxu1 %v7051_v38 }
0x1a14   : > { %v6126_v23 = vmul.f32 %v7151_v45, %v9186_v33  ;;  %7056 = vmatprep.subr.bf16.mxu1 %v7055_v5  ;;  %v6141_v51 = vadd.f32 %v6424_v41, %v6133_v29 }
0x1a16   : > { %v6134_v35 = vmul.f32 %v6423_v15, %v6126_v23  ;;  %v6143_v44 = vsel %vm9749_vm1, %v6141_v51, 0.0 }
0x1a17   : > { %7058 = vmatpush3.bf16.msra.mxu1 %v7055_v5 }
0x1a18   : > { %v6142_v3 = vadd.f32 %v6424_v41, %v6134_v35 }
0x1a1a   : > { %v6144_v39 = vsel %vm9767_vm3, %v6142_v3, 0.0 }
0x1a1b   : > { %v6145_v34 = vadd.f32 %v6144_v39, %v6143_v44 }
0x1a1d   : > { %v6146_v50 = vrot.slane %v6145_v34, 4 }
0x1a1f   : > { %v6147_v20 = vadd.f32 %v6146_v50, %v6145_v34 }
0x1a21   : > { %v6148_v40 = vrot.slane %v6147_v20, 2 }
0x1a23   : > { %v6149_v47 = vadd.f32 %v6148_v40, %v6147_v20 }
0x1a25   : > { %v6150_v53 = vrot.slane %v6149_v47, 1 }
0x1a27   : > { %v6151_v33 = vadd.f32 %v6150_v53, %v6149_v47 }
0x1a29   : > { %v6152_v55 = vmul.f32 0.0625, %v6151_v33 }
0x1a2b   : > { %v6153_v48 = vsub.f32 %v6141_v51, %v6152_v55  ;;  %v6154_v26 = vsub.f32 %v6142_v3, %v6152_v55 }
0x1a2d   : > { %6856 = vmatprep.mubr.msk.f32.mxu1 %vm9768_vm5, %v6153_v48 }
0x1a2e   : > { %6857 = vmatmul.mubr.msk.f32.vlgmr.msra.gmra.mrb[16].mxu1 %vm9769_vm0, %v6154_v26 }
0x1b01   : > { %v6858_v56 = vpop.f32.mrb[16].mxu1 }
0x1b02   : > { %v7061_v58 = vadd.f32 %v7060_v7, %v6858_v56  ;;  %v6233_v17 = vpop.f32.mrb[17].mxu1 }
0x1b04   : > { %6242 = vst.msk [vmem:[%s1080_s0] sm:$0xff] %vm9770_vm10, %v7061_v58 }
0x1b05 PF: > { %s79_s15 = sadd.s32 1, %s7163_s15  }
0x1b06   : > { %p76_p4 = scmp.ge.s32.totalorder %s79_s15, 4  }
0x1b08   :  { %78 = sbr.rel (!%p76_p4) target bundleno = 61 (0x3d), region = 226 }

</bundles_post_ra>
